<compile_context>
chip_gen: v5e
topology: v5e:2x2
jax: 0.10.0
libtpu: 0.0.40
codegen_flags: <defaults>
</compile_context>

<pallas_src>
import functools

import numpy as np

import jax
import jax.numpy as jnp
from jax.experimental import pallas as pl
from jax.experimental.pallas import tpu as pltpu

BN_EPS = 1e-5
COMPUTE_DTYPE = jnp.bfloat16   # MXU input dtype; accumulation & epilogues are f32.


# ----------------------------------------------------------------------------
# One-time capability probe: unaligned minor-dim (lane-axis) concatenation
# ----------------------------------------------------------------------------
_LANE_CONCAT_SUPPORTED = None


def _lane_concat_probe_kernel(a_ref, o_ref):
    o_ref[...] = jnp.concatenate([a_ref[...]] * 9, axis=-1)


def _lane_concat_supported():
    """Compile a tiny dedicated kernel once to check whether this Mosaic build
    lowers unaligned lane-axis concatenation.  Selects the single-dot im2col
    path vs. the 9-accumulated-dots path; the real forward never wraps its own
    compilation/execution in a try/except."""
    global _LANE_CONCAT_SUPPORTED
    if _LANE_CONCAT_SUPPORTED is None:
        def probe(v):
            return pl.pallas_call(
                _lane_concat_probe_kernel,
                out_shape=jax.ShapeDtypeStruct((8, 72), jnp.float32))(v)
        try:
            jax.jit(probe).lower(jnp.zeros((8, 8), jnp.float32)).compile()
            _LANE_CONCAT_SUPPORTED = True
        except Exception:   # Mosaic rejected the concat -> use accumulated dots
            _LANE_CONCAT_SUPPORTED = False
    return _LANE_CONCAT_SUPPORTED


# ----------------------------------------------------------------------------
# In-kernel helpers (traced values; everything stays in VMEM/vregs)
# ----------------------------------------------------------------------------
def _pad_hw1(x):
    """(NB, H, W, C) -> (NB, H+2, W+2, C) with a zero halo of 1 on H and W."""
    nb, h, w, c = x.shape
    zc = jnp.zeros((nb, h, 1, c), x.dtype)
    x = jnp.concatenate([zc, x, zc], axis=2)
    zr = jnp.zeros((nb, 1, w + 2, c), x.dtype)
    return jnp.concatenate([zr, x, zr], axis=1)


def _conv_matmul(x, w, cdt, lane_concat):
    """3x3/stride-1/pad-1 conv of x (NB,H,W,C) against packed weight (9C,Cout).
    Returns the float32 accumulator of shape (NB*H*W, Cout)."""
    nb, h, w_, c = x.shape
    xp = _pad_hw1(x)
    if lane_concat:
        taps = [xp[:, dy:dy + h, dx:dx + w_, :] for dy in range(3) for dx in range(3)]
        p = jnp.concatenate(taps, axis=-1)                 # (NB, H, W, 9C)
        p = p.reshape(nb * h * w_, 9 * c).astype(cdt)      # lane dim unchanged
        return jnp.dot(p, w, preferred_element_type=jnp.float32)
    # Fallback (no unaligned lane-axis concatenation): nine accumulated dots.
    acc = jnp.zeros((nb * h * w_, w.shape[-1]), jnp.float32)
    for k in range(9):
        dy, dx = divmod(k, 3)
        tap = xp[:, dy:dy + h, dx:dx + w_, :].reshape(nb * h * w_, c).astype(cdt)
        acc = acc + jnp.dot(tap, w[k * c:(k + 1) * c, :],
                            preferred_element_type=jnp.float32)
    return acc


def _conv3x3(x, w, b, relu, cdt, lane_concat):
    nb, h, w_, _ = x.shape
    acc = _conv_matmul(x, w, cdt, lane_concat)
    y = acc + b
    if relu:
        y = jnp.maximum(y, 0.0)
    return y.reshape(nb, h, w_, acc.shape[-1])


def _conv3x3_dual(x, w, b1, b2, c1, cdt, lane_concat):
    """ConvBlock conv1 (BN folded, ReLU) and the skip conv fused in one matmul;
    columns [0, c1) -> conv1, columns [c1, :) -> skip conv."""
    nb, h, w_, _ = x.shape
    acc = _conv_matmul(x, w, cdt, lane_concat)
    y1 = jnp.maximum(acc[:, :c1] + b1, 0.0)
    y2 = acc[:, c1:] + b2
    return (y1.reshape(nb, h, w_, c1),
            y2.reshape(nb, h, w_, acc.shape[-1] - c1))


def _pixel_unshuffle2(x, mask_ref, cdt, lane_concat):
    """PixelUnshuffle(2) via one constant 0/1 selection dot per image.

    Returns (NB, H/2, W/2, 4C) with channel order (i*2+j)*C + c when
    lane_concat, otherwise a list of the four (NB, H/2, W/2, C) planes."""
    nb, h, w, c = x.shape
    h2, w2 = h // 2, w // 2
    m = mask_ref[...]                                      # (4*H2*W2, H*W) bf16
    sels = []
    for b in range(nb):
        xb = x[b].reshape(h * w, c).astype(cdt)
        sels.append(jnp.dot(m, xb, preferred_element_type=jnp.float32))
    if lane_concat:
        imgs = []
        for s in sels:
            planes = [s[k * h2 * w2:(k + 1) * h2 * w2, :] for k in range(4)]
            imgs.append(jnp.concatenate(planes, axis=-1))  # (H2*W2, 4C)
        y = jnp.concatenate(imgs, axis=0) if nb > 1 else imgs[0]
        return y.reshape(nb, h2, w2, 4 * c)
    planes = []
    for k in range(4):
        pk = [s[k * h2 * w2:(k + 1) * h2 * w2, :] for s in sels]
        pk = jnp.concatenate(pk, axis=0) if nb > 1 else pk[0]
        planes.append(pk.reshape(nb, h2, w2, c))
    return planes


# ----------------------------------------------------------------------------
# The fused encoder kernel
# ----------------------------------------------------------------------------
def _encoder_kernel(plan, nb, h0, w0, cdt, lane_concat, n_masks,
                    x_ref, w_ref, b_ref, *rest):
    mask_refs = rest[:n_masks]
    out_ref = rest[n_masks]

    def wslice(meta):                      # (row_offset, rows(8-aligned), cols)
        r0, k, c = meta
        return w_ref[r0:r0 + k, 0:c]

    def bslice(meta):                      # (row_index, cols)
        r, c = meta
        return b_ref[r:r + 1, 0:c]

    h, w = h0, w0
    x = None
    for op in plan:
        kind = op[0]
        if kind == "conv0":                                 # init conv (pre-im2col'ed)
            _, wm, bm = op
            p = x_ref[...].reshape(nb * h * w, wm[1])       # (NB*HW, K0) bf16
            acc = jnp.dot(p, wslice(wm), preferred_element_type=jnp.float32)
            x = (acc + bslice(bm)).reshape(nb, h, w, wm[2])
        elif kind == "res_dual":                            # ResidualBlock, skip conv
            _, wdm, b1m, bsm, c1, w2m, b2m = op
            y1, skip = _conv3x3_dual(x, wslice(wdm), bslice(b1m), bslice(bsm),
                                     c1, cdt, lane_concat)
            y2 = _conv3x3(y1, wslice(w2m), bslice(b2m), True, cdt, lane_concat)
            x = y2 + skip
        elif kind == "res_id":                              # ResidualBlock, identity skip
            _, w1m, b1m, w2m, b2m = op
            res = x
            y1 = _conv3x3(x, wslice(w1m), bslice(b1m), True, cdt, lane_concat)
            y2 = _conv3x3(y1, wslice(w2m), bslice(b2m), True, cdt, lane_concat)
            x = y2 + res
        elif kind == "down":                                # PixelUnshuffle(2) + conv
            _, mi, wm, bm = op
            h2, w2 = h // 2, w // 2
            u = _pixel_unshuffle2(x, mask_refs[mi], cdt, lane_concat)
            wd = wslice(wm)
            if lane_concat:
                acc = _conv_matmul(u, wd, cdt, True)
            else:
                cpl = u[0].shape[-1]
                acc = jnp.zeros((nb * h2 * w2, wm[2]), jnp.float32)
                for kpl in range(4):
                    wk = jnp.concatenate(
                        [wd[(t * 4 + kpl) * cpl:(t * 4 + kpl + 1) * cpl, :]
                         for t in range(9)], axis=0)
                    acc = acc + _conv_matmul(u[kpl], wk, cdt, False)
            x = (acc + bslice(bm)).reshape(nb, h2, w2, wm[2])
            h, w = h2, w2
        else:
            raise ValueError(kind)
    out_ref[...] = x.astype(out_ref.dtype)


# ----------------------------------------------------------------------------
# Parameter construction (deterministic, synthetic) + packing for the kernel
# ----------------------------------------------------------------------------
def _conv_init(key, cin, cout, with_bias=True):
    kw, kb = jax.random.split(key)
    bound = float((9 * cin) ** -0.5)
    w = jax.random.uniform(kw, (3, 3, cin, cout), jnp.float32, -bound, bound)
    b = (jax.random.uniform(kb, (cout,), jnp.float32, -bound, bound)
         if with_bias else None)
    return {"w": w, "b": b}


def _convblock_init(key, cin, cout):
    kw, k1, k2, k3, k4 = jax.random.split(key, 5)
    p = _conv_init(kw, cin, cout, with_bias=False)
    p["bn"] = {                       # inference-mode BN params / running stats
        "gamma": jax.random.uniform(k1, (cout,), jnp.float32, 0.5, 1.5),
        "beta": 0.1 * jax.random.normal(k2, (cout,), jnp.float32),
        "mean": 0.1 * jax.random.normal(k3, (cout,), jnp.float32),
        "var": jax.random.uniform(k4, (cout,), jnp.float32, 0.5, 1.5),
    }
    return p


def init_encoder_params(key, channels, num_res_block_per_stage, in_channel=3):
    num_stages = len(channels) - 1
    if isinstance(num_res_block_per_stage, int):
        num_res_block_per_stage = [num_res_block_per_stage] * num_stages
    assert len(channels) == len(num_res_block_per_stage) + 1
    keys = jax.random.split(key, 1 + num_stages)
    params = {"init_conv": _conv_init(keys[0], in_channel, channels[0])}
    stages = []
    for i in range(num_stages):
        n_blk = num_res_block_per_stage[i]
        skeys = jax.random.split(keys[1 + i], 3 * n_blk + 1)
        blocks = []
        for b in range(n_blk):
            bin_ = channels[i] if b == 0 else channels[i + 1]
            cout = channels[i + 1]
            blocks.append({
                "conv1": _convblock_init(skeys[3 * b + 0], bin_, cout),
                "conv2": _convblock_init(skeys[3 * b + 1], cout, cout),
                "skip": (_conv_init(skeys[3 * b + 2], bin_, cout)
                         if bin_ != cout else None),
            })
        down = None
        if i != num_stages - 1:
            down = _conv_init(skeys[-1], channels[i + 1] * 4, channels[i + 1])
        stages.append({"blocks": blocks, "downsample": down})
    params["stages"] = stages
    return params


def _fold_bn(w, bn):
    scale = bn["gamma"] / jnp.sqrt(bn["var"] + BN_EPS)
    return w * scale[None, None, None, :], bn["beta"] - bn["mean"] * scale


def _w2col(w):
    kh, kw, cin, cout = w.shape
    return w.reshape(kh * kw * cin, cout)         # rows ordered (ky, kx, cin)


def pack_encoder_params(params, compute_dtype=COMPUTE_DTYPE):
    """Fold BN into conv weights, fuse conv1+skip, pre-permute the downsample
    weight for the in-kernel unshuffle channel order, and consolidate all
    weights / biases into two slabs.  Returns a dict with slabs + static plan."""
    wblocks, brows, plan = [], [], []
    wrow = [0]

    def add_w(wcol):
        k, cout = int(wcol.shape[0]), int(wcol.shape[1])
        k8 = ((k + 7) // 8) * 8
        meta = (wrow[0], k8, cout)
        wblocks.append(wcol)
        wrow[0] += k8
        return meta

    def add_b(b):
        b = jnp.asarray(b, jnp.float32).reshape(-1)
        brows.append(b)
        return (len(brows) - 1, int(b.shape[0]))

    ic = params["init_conv"]
    plan.append(("conv0", add_w(_w2col(ic["w"])), add_b(ic["b"])))

    mask_idx = 0
    for stage in params["stages"]:
        for blk in stage["blocks"]:
            w1, b1 = _fold_bn(blk["conv1"]["w"], blk["conv1"]["bn"])
            w2, b2 = _fold_bn(blk["conv2"]["w"], blk["conv2"]["bn"])
            cout = int(w1.shape[-1])
            if blk["skip"] is not None:
                wdual = jnp.concatenate([_w2col(w1), _w2col(blk["skip"]["w"])],
                                        axis=-1)
                plan.append(("res_dual", add_w(wdual), add_b(b1),
                             add_b(blk["skip"]["b"]), cout,
                             add_w(_w2col(w2)), add_b(b2)))
            else:
                plan.append(("res_id", add_w(_w2col(w1)), add_b(b1),
                             add_w(_w2col(w2)), add_b(b2)))
        if stage["downsample"] is not None:
            dw, db = stage["downsample"]["w"], stage["downsample"]["b"]
            c = dw.shape[2] // 4
            cout = dw.shape[3]
            # PyTorch unshuffle channel index is c*4 + i*2 + j; the kernel
            # produces (i*2 + j)*C + c -> permute weight rows to (ky,kx,i,j,c).
            dwr = (dw.reshape(3, 3, c, 2, 2, cout)
                     .transpose(0, 1, 3, 4, 2, 5)
                     .reshape(36 * c, cout))
            plan.append(("down", mask_idx, add_w(dwr), add_b(db)))
            mask_idx += 1

    max_cols = max(int(w.shape[1]) for w in wblocks)
    slab_w = ((max_cols + 127) // 128) * 128
    w_slab = jnp.zeros((wrow[0], slab_w), jnp.float32)
    r = 0
    for wcol in wblocks:
        k, cout = int(wcol.shape[0]), int(wcol.shape[1])
        w_slab = w_slab.at[r:r + k, :cout].set(wcol)
        r += ((k + 7) // 8) * 8
    w_slab = w_slab.astype(compute_dtype)

    nrows = ((len(brows) + 7) // 8) * 8
    b_slab = jnp.zeros((nrows, slab_w), jnp.float32)
    for i, b in enumerate(brows):
        b_slab = b_slab.at[i, :b.shape[0]].set(b)

    return {"w_slab": w_slab, "b_slab": b_slab, "plan": tuple(plan),
            "k0": plan[0][1][1], "num_masks": mask_idx}


# ----------------------------------------------------------------------------
# Fused forward pass (matches PyTorch Encoder.forward, eval-mode BN)
# ----------------------------------------------------------------------------
def _plan_out_shape(plan, h, w):
    c = None
    for op in plan:
        if op[0] == "conv0":
            c = op[1][2]
        elif op[0] == "res_dual":
            c = op[5][2]
        elif op[0] == "res_id":
            c = op[3][2]
        elif op[0] == "down":
            h, w, c = h // 2, w // 2, op[2][2]
    return h, w, c


def _downsample_sizes(plan, h, w):
    sizes = []
    for op in plan:
        if op[0] == "down":
            sizes.append((h, w))
            h, w = h // 2, w // 2
    return sizes


def _unshuffle_mask_np(h, w):
    """Constant 0/1 selection matrix: row (i*2+j)*H2*W2 + p*W2 + q picks source
    pixel (2p+i, 2q+j) of the flattened (H*W) image."""
    h2, w2 = h // 2, w // 2
    rows = np.arange(4 * h2 * w2)
    k, rem = rows // (h2 * w2), rows % (h2 * w2)
    p, q = rem // w2, rem % w2
    i, j = k // 2, k % 2
    src = (2 * p + i) * w + (2 * q + j)
    m = np.zeros((4 * h2 * w2, h * w), np.float32)
    m[rows, src] = 1.0
    return m


@functools.partial(jax.jit, static_argnames=("plan", "k0", "nb", "lane_concat"))
def _encoder_forward_jit(w_slab, b_slab, x_nchw, *, plan, k0, nb, lane_concat):
    n, cin, h, w = x_nchw.shape
    assert 9 * cin <= k0 and n % nb == 0

    # Wrapper-side layout plumbing: NCHW -> NHWC -> init-conv im2col patches
    # (bf16, K padded to a multiple of 8), so the lane-sparse Cin=3 layout
    # never enters the kernel.
    x = jnp.transpose(x_nchw, (0, 2, 3, 1)).astype(jnp.float32)
    xp = jnp.pad(x, ((0, 0), (1, 1), (1, 1), (0, 0)))
    taps = [xp[:, dy:dy + h, dx:dx + w, :] for dy in range(3) for dx in range(3)]
    p = jnp.concatenate(taps, axis=-1).reshape(n, h * w, 9 * cin)
    if k0 > 9 * cin:
        p = jnp.pad(p, ((0, 0), (0, 0), (0, k0 - 9 * cin)))
    p = p.astype(COMPUTE_DTYPE)

    # Constant unshuffle selection masks (one per Downsample), built at trace
    # time with numpy — no iota / div / mod / where inside the kernel.
    masks = tuple(jnp.asarray(_unshuffle_mask_np(hh, ww), COMPUTE_DTYPE)
                  for hh, ww in _downsample_sizes(plan, h, w))

    ho, wo, co = _plan_out_shape(plan, h, w)
    kernel = functools.partial(_encoder_kernel, plan, nb, h, w, COMPUTE_DTYPE,
                               lane_concat, len(masks))
    # NOTE: constant inputs (slabs, masks) reuse the same block every step; a
    # pipeline_mode=pl.Buffered(1) hint would also drop their double buffer.
    const2d = lambda t: pl.BlockSpec(t.shape, lambda s: (0, 0))
    out = pl.pallas_call(
        kernel,
        out_shape=jax.ShapeDtypeStruct((n, ho, wo, co), jnp.float32),
        grid=(n // nb,),
        in_specs=[pl.BlockSpec((nb, h * w, k0), lambda s: (s, 0, 0)),
                  const2d(w_slab), const2d(b_slab)] + [const2d(m) for m in masks],
        out_specs=pl.BlockSpec((nb, ho, wo, co), lambda s: (s, 0, 0, 0)),
        compiler_params=pltpu.CompilerParams(
            dimension_semantics=("parallel",)),   # megacore-shards grid steps
    )(p, w_slab, b_slab, *masks)
    return jnp.transpose(out, (0, 3, 1, 2))                 # NHWC -> NCHW


def encoder_forward(packed, x_nchw, batch_per_step=None):
    """Run the fused encoder.  `batch_per_step` folds that many images into the
    matmul M dimension per grid step; the default keeps >= 2 grid steps so both
    TensorCores are used on v7x (use batch_per_step=N on single-core chips)."""
    n = x_nchw.shape[0]
    nb = batch_per_step if batch_per_step is not None else max(1, n // 2)
    return _encoder_forward_jit(packed["w_slab"], packed["b_slab"], x_nchw,
                                plan=packed["plan"], k0=packed["k0"],
                                nb=nb, lane_concat=_lane_concat_supported())


# ----------------------------------------------------------------------------
# Plain-XLA reference (for an in-script sanity check of the fused kernel)
# ----------------------------------------------------------------------------
def _conv_ref(x, w, b=None):
    y = jax.lax.conv_general_dilated(
        x, w, window_strides=(1, 1), padding=((1, 1), (1, 1)),
        dimension_numbers=("NHWC", "HWIO", "NHWC"))
    return y if b is None else y + b


def _bn_ref(x, bn):
    scale = bn["gamma"] / jnp.sqrt(bn["var"] + BN_EPS)
    return (x - bn["mean"]) * scale + bn["beta"]


def encoder_reference(params, x_nchw):
    x = jnp.transpose(x_nchw, (0, 2, 3, 1)).astype(jnp.float32)
    ic = params["init_conv"]
    x = _conv_ref(x, ic["w"], ic["b"])
    for stage in params["stages"]:
        for blk in stage["blocks"]:
            res = x
            x = jax.nn.relu(_bn_ref(_conv_ref(x, blk["conv1"]["w"]),
                                    blk["conv1"]["bn"]))
            x = jax.nn.relu(_bn_ref(_conv_ref(x, blk["conv2"]["w"]),
                                    blk["conv2"]["bn"]))
            if blk["skip"] is not None:
                res = _conv_ref(res, blk["skip"]["w"], blk["skip"]["b"])
            x = x + res
        if stage["downsample"] is not None:
            n, h, w, c = x.shape
            x = (x.reshape(n, h // 2, 2, w // 2, 2, c)
                  .transpose(0, 1, 3, 5, 2, 4)
                  .reshape(n, h // 2, w // 2, 4 * c))      # channel = c*4 + i*2 + j
            d = stage["downsample"]
            x = _conv_ref(x, d["w"], d["b"])
    return jnp.transpose(x, (0, 3, 1, 2))


# ----------------------------------------------------------------------------
if __name__ == "__main__":
    key = jax.random.PRNGKey(0)
    k_param, k_input = jax.random.split(key)

    channels = [8, 16, 32]              # 2 stages -> one Downsample between them
    num_res_block_per_stage = 1
    in_channel = 3

    params = init_encoder_params(k_param, channels, num_res_block_per_stage,
                                 in_channel=in_channel)
    packed = pack_encoder_params(params)

    # PyTorch-convention NCHW input.
    x = jax.random.normal(k_input, (2, in_channel, 16, 16), jnp.float32)

    # Default: 2 grid steps (one image each) -> both v7x TensorCores engaged.
    out = jax.block_until_ready(encoder_forward(packed, x))
    assert out.shape == (2, channels[-1], 8, 8), out.shape
    assert bool(jnp.all(jnp.isfinite(out)))

    # Sanity check against a plain-XLA f32 reference (bf16 MXU inputs -> loose tol).
    ref = jax.block_until_ready(encoder_reference(params, x))
    max_err = float(jnp.max(jnp.abs(out - ref)))
    scale = float(jnp.max(jnp.abs(ref)))
    assert max_err <= 1e-2 + 2e-2 * scale, (max_err, scale)

    # Batch folded into the matmul M dimension (single grid step; best on
    # single-TensorCore v5e/v6e).  Must match the per-image result.
    out_stacked = jax.block_until_ready(encoder_forward(packed, x, batch_per_step=2))
    assert float(jnp.max(jnp.abs(out_stacked - out))) <= 1e-4

    print("KERNEL_OK")
</pallas_src>

<mosaic_0001>
module attributes {stable_mosaic.version = 11 : i64} {
  func.func @_encoder_kernel(%arg0: i32, %arg1: memref<1x256x32xbf16, #tpu.memory_space<vmem>>, %arg2: memref<1256x128xbf16, #tpu.memory_space<vmem>>, %arg3: memref<8x128xf32, #tpu.memory_space<vmem>>, %arg4: memref<256x256xbf16, #tpu.memory_space<vmem>>, %arg5: memref<1x8x8x32xf32, #tpu.memory_space<vmem>>) attributes {dimension_semantics = [#tpu.dimension_semantics<parallel>], iteration_bounds = array<i64: 2>, scalar_prefetch = 0 : i64, scratch_operands = 0 : i64, tpu.core_type = #tpu.core_type<tc>, window_params = [{transform_indices = @transform_0, window_bounds = array<i64: 1, 256, 32>}, {pipeline_mode = #tpu.pipeline_mode<synchronous>, transform_indices = @transform_1, window_bounds = array<i64: 1256, 128>}, {pipeline_mode = #tpu.pipeline_mode<synchronous>, transform_indices = @transform_2, window_bounds = array<i64: 8, 128>}, {pipeline_mode = #tpu.pipeline_mode<synchronous>, transform_indices = @transform_3, window_bounds = array<i64: 256, 256>}, {transform_indices = @transform_4, window_bounds = array<i64: 1, 8, 8, 32>}]} {
    %c0 = arith.constant 0 : index
    %c0_0 = arith.constant 0 : index
    %c0_1 = arith.constant 0 : index
    %0 = vector.load %arg1[%c0, %c0_0, %c0_1] : memref<1x256x32xbf16, #tpu.memory_space<vmem>>, vector<1x256x32xbf16>
    %1 = vector.shape_cast %0 : vector<1x256x32xbf16> to vector<256x32xbf16>
    %c0_2 = arith.constant 0 : index
    %c0_3 = arith.constant 0 : index
    %2 = vector.load %arg2[%c0_2, %c0_3] : memref<1256x128xbf16, #tpu.memory_space<vmem>>, vector<32x8xbf16>
    %cst = arith.constant dense<0.000000e+00> : vector<256x8xf32>
    %3 = tpu.matmul %1, %2, %cst {dimension_numbers = #tpu.dot_dimension_numbers<[1], [0], [0], [1], [0, 0, 1, 1], [], []>} : vector<256x32xbf16>, vector<32x8xbf16>, vector<256x8xf32> -> vector<256x8xf32>
    %c0_4 = arith.constant 0 : index
    %c0_5 = arith.constant 0 : index
    %4 = vector.load %arg3[%c0_4, %c0_5] : memref<8x128xf32, #tpu.memory_space<vmem>>, vector<1x8xf32>
    %5 = vector.broadcast %4 : vector<1x8xf32> to vector<256x8xf32>
    %6 = arith.addf %3, %5 : vector<256x8xf32>
    %7 = vector.shape_cast %6 : vector<256x8xf32> to vector<1x16x16x8xf32>
    %c32 = arith.constant 32 : index
    %c0_6 = arith.constant 0 : index
    %8 = vector.load %arg2[%c32, %c0_6] : memref<1256x128xbf16, #tpu.memory_space<vmem>>, vector<72x32xbf16>
    %c1 = arith.constant 1 : index
    %c0_7 = arith.constant 0 : index
    %9 = vector.load %arg3[%c1, %c0_7] : memref<8x128xf32, #tpu.memory_space<vmem>>, vector<1x16xf32>
    %c2 = arith.constant 2 : index
    %c0_8 = arith.constant 0 : index
    %10 = vector.load %arg3[%c2, %c0_8] : memref<8x128xf32, #tpu.memory_space<vmem>>, vector<1x16xf32>
    %cst_9 = arith.constant 0.000000e+00 : f32
    %11 = vector.broadcast %cst_9 : f32 to vector<1x16x1x8xf32>
    %12 = tpu.concatenate %11, %7, %11 in 2 : vector<1x16x1x8xf32>, vector<1x16x16x8xf32>, vector<1x16x1x8xf32> -> vector<1x16x18x8xf32>
    %cst_10 = arith.constant 0.000000e+00 : f32
    %13 = vector.broadcast %cst_10 : f32 to vector<1x1x18x8xf32>
    %14 = tpu.concatenate %13, %12, %13 in 1 : vector<1x1x18x8xf32>, vector<1x16x18x8xf32>, vector<1x1x18x8xf32> -> vector<1x18x18x8xf32>
    %cst_11 = arith.constant 0.000000e+00 : f32
    %15 = vector.broadcast %cst_11 : f32 to vector<256x32xf32>
    %16 = vector.extract_strided_slice %14 {offsets = [0, 0, 0, 0], sizes = [1, 16, 16, 8], strides = [1, 1, 1, 1]} : vector<1x18x18x8xf32> to vector<1x16x16x8xf32>
    %17 = vector.shape_cast %16 : vector<1x16x16x8xf32> to vector<256x8xf32>
    %18 = arith.truncf %17 : vector<256x8xf32> to vector<256x8xbf16>
    %19 = vector.extract_strided_slice %8 {offsets = [0, 0], sizes = [8, 32], strides = [1, 1]} : vector<72x32xbf16> to vector<8x32xbf16>
    %cst_12 = arith.constant dense<0.000000e+00> : vector<256x32xf32>
    %20 = tpu.matmul %18, %19, %cst_12 {dimension_numbers = #tpu.dot_dimension_numbers<[1], [0], [0], [1], [0, 0, 1, 1], [], []>} : vector<256x8xbf16>, vector<8x32xbf16>, vector<256x32xf32> -> vector<256x32xf32>
    %21 = arith.addf %15, %20 : vector<256x32xf32>
    %22 = vector.extract_strided_slice %14 {offsets = [0, 0, 1, 0], sizes = [1, 16, 16, 8], strides = [1, 1, 1, 1]} : vector<1x18x18x8xf32> to vector<1x16x16x8xf32>
    %23 = vector.shape_cast %22 : vector<1x16x16x8xf32> to vector<256x8xf32>
    %24 = arith.truncf %23 : vector<256x8xf32> to vector<256x8xbf16>
    %25 = vector.extract_strided_slice %8 {offsets = [8, 0], sizes = [8, 32], strides = [1, 1]} : vector<72x32xbf16> to vector<8x32xbf16>
    %cst_13 = arith.constant dense<0.000000e+00> : vector<256x32xf32>
    %26 = tpu.matmul %24, %25, %cst_13 {dimension_numbers = #tpu.dot_dimension_numbers<[1], [0], [0], [1], [0, 0, 1, 1], [], []>} : vector<256x8xbf16>, vector<8x32xbf16>, vector<256x32xf32> -> vector<256x32xf32>
    %27 = arith.addf %21, %26 : vector<256x32xf32>
    %28 = vector.extract_strided_slice %14 {offsets = [0, 0, 2, 0], sizes = [1, 16, 16, 8], strides = [1, 1, 1, 1]} : vector<1x18x18x8xf32> to vector<1x16x16x8xf32>
    %29 = vector.shape_cast %28 : vector<1x16x16x8xf32> to vector<256x8xf32>
    %30 = arith.truncf %29 : vector<256x8xf32> to vector<256x8xbf16>
    %31 = vector.extract_strided_slice %8 {offsets = [16, 0], sizes = [8, 32], strides = [1, 1]} : vector<72x32xbf16> to vector<8x32xbf16>
    %cst_14 = arith.constant dense<0.000000e+00> : vector<256x32xf32>
    %32 = tpu.matmul %30, %31, %cst_14 {dimension_numbers = #tpu.dot_dimension_numbers<[1], [0], [0], [1], [0, 0, 1, 1], [], []>} : vector<256x8xbf16>, vector<8x32xbf16>, vector<256x32xf32> -> vector<256x32xf32>
    %33 = arith.addf %27, %32 : vector<256x32xf32>
    %34 = vector.extract_strided_slice %14 {offsets = [0, 1, 0, 0], sizes = [1, 16, 16, 8], strides = [1, 1, 1, 1]} : vector<1x18x18x8xf32> to vector<1x16x16x8xf32>
    %35 = vector.shape_cast %34 : vector<1x16x16x8xf32> to vector<256x8xf32>
    %36 = arith.truncf %35 : vector<256x8xf32> to vector<256x8xbf16>
    %37 = vector.extract_strided_slice %8 {offsets = [24, 0], sizes = [8, 32], strides = [1, 1]} : vector<72x32xbf16> to vector<8x32xbf16>
    %cst_15 = arith.constant dense<0.000000e+00> : vector<256x32xf32>
    %38 = tpu.matmul %36, %37, %cst_15 {dimension_numbers = #tpu.dot_dimension_numbers<[1], [0], [0], [1], [0, 0, 1, 1], [], []>} : vector<256x8xbf16>, vector<8x32xbf16>, vector<256x32xf32> -> vector<256x32xf32>
    %39 = arith.addf %33, %38 : vector<256x32xf32>
    %40 = vector.extract_strided_slice %14 {offsets = [0, 1, 1, 0], sizes = [1, 16, 16, 8], strides = [1, 1, 1, 1]} : vector<1x18x18x8xf32> to vector<1x16x16x8xf32>
    %41 = vector.shape_cast %40 : vector<1x16x16x8xf32> to vector<256x8xf32>
    %42 = arith.truncf %41 : vector<256x8xf32> to vector<256x8xbf16>
    %43 = vector.extract_strided_slice %8 {offsets = [32, 0], sizes = [8, 32], strides = [1, 1]} : vector<72x32xbf16> to vector<8x32xbf16>
    %cst_16 = arith.constant dense<0.000000e+00> : vector<256x32xf32>
    %44 = tpu.matmul %42, %43, %cst_16 {dimension_numbers = #tpu.dot_dimension_numbers<[1], [0], [0], [1], [0, 0, 1, 1], [], []>} : vector<256x8xbf16>, vector<8x32xbf16>, vector<256x32xf32> -> vector<256x32xf32>
    %45 = arith.addf %39, %44 : vector<256x32xf32>
    %46 = vector.extract_strided_slice %14 {offsets = [0, 1, 2, 0], sizes = [1, 16, 16, 8], strides = [1, 1, 1, 1]} : vector<1x18x18x8xf32> to vector<1x16x16x8xf32>
    %47 = vector.shape_cast %46 : vector<1x16x16x8xf32> to vector<256x8xf32>
    %48 = arith.truncf %47 : vector<256x8xf32> to vector<256x8xbf16>
    %49 = vector.extract_strided_slice %8 {offsets = [40, 0], sizes = [8, 32], strides = [1, 1]} : vector<72x32xbf16> to vector<8x32xbf16>
    %cst_17 = arith.constant dense<0.000000e+00> : vector<256x32xf32>
    %50 = tpu.matmul %48, %49, %cst_17 {dimension_numbers = #tpu.dot_dimension_numbers<[1], [0], [0], [1], [0, 0, 1, 1], [], []>} : vector<256x8xbf16>, vector<8x32xbf16>, vector<256x32xf32> -> vector<256x32xf32>
    %51 = arith.addf %45, %50 : vector<256x32xf32>
    %52 = vector.extract_strided_slice %14 {offsets = [0, 2, 0, 0], sizes = [1, 16, 16, 8], strides = [1, 1, 1, 1]} : vector<1x18x18x8xf32> to vector<1x16x16x8xf32>
    %53 = vector.shape_cast %52 : vector<1x16x16x8xf32> to vector<256x8xf32>
    %54 = arith.truncf %53 : vector<256x8xf32> to vector<256x8xbf16>
    %55 = vector.extract_strided_slice %8 {offsets = [48, 0], sizes = [8, 32], strides = [1, 1]} : vector<72x32xbf16> to vector<8x32xbf16>
    %cst_18 = arith.constant dense<0.000000e+00> : vector<256x32xf32>
    %56 = tpu.matmul %54, %55, %cst_18 {dimension_numbers = #tpu.dot_dimension_numbers<[1], [0], [0], [1], [0, 0, 1, 1], [], []>} : vector<256x8xbf16>, vector<8x32xbf16>, vector<256x32xf32> -> vector<256x32xf32>
    %57 = arith.addf %51, %56 : vector<256x32xf32>
    %58 = vector.extract_strided_slice %14 {offsets = [0, 2, 1, 0], sizes = [1, 16, 16, 8], strides = [1, 1, 1, 1]} : vector<1x18x18x8xf32> to vector<1x16x16x8xf32>
    %59 = vector.shape_cast %58 : vector<1x16x16x8xf32> to vector<256x8xf32>
    %60 = arith.truncf %59 : vector<256x8xf32> to vector<256x8xbf16>
    %61 = vector.extract_strided_slice %8 {offsets = [56, 0], sizes = [8, 32], strides = [1, 1]} : vector<72x32xbf16> to vector<8x32xbf16>
    %cst_19 = arith.constant dense<0.000000e+00> : vector<256x32xf32>
    %62 = tpu.matmul %60, %61, %cst_19 {dimension_numbers = #tpu.dot_dimension_numbers<[1], [0], [0], [1], [0, 0, 1, 1], [], []>} : vector<256x8xbf16>, vector<8x32xbf16>, vector<256x32xf32> -> vector<256x32xf32>
    %63 = arith.addf %57, %62 : vector<256x32xf32>
    %64 = vector.extract_strided_slice %14 {offsets = [0, 2, 2, 0], sizes = [1, 16, 16, 8], strides = [1, 1, 1, 1]} : vector<1x18x18x8xf32> to vector<1x16x16x8xf32>
    %65 = vector.shape_cast %64 : vector<1x16x16x8xf32> to vector<256x8xf32>
    %66 = arith.truncf %65 : vector<256x8xf32> to vector<256x8xbf16>
    %67 = vector.extract_strided_slice %8 {offsets = [64, 0], sizes = [8, 32], strides = [1, 1]} : vector<72x32xbf16> to vector<8x32xbf16>
    %cst_20 = arith.constant dense<0.000000e+00> : vector<256x32xf32>
    %68 = tpu.matmul %66, %67, %cst_20 {dimension_numbers = #tpu.dot_dimension_numbers<[1], [0], [0], [1], [0, 0, 1, 1], [], []>} : vector<256x8xbf16>, vector<8x32xbf16>, vector<256x32xf32> -> vector<256x32xf32>
    %69 = arith.addf %63, %68 : vector<256x32xf32>
    %70 = vector.extract_strided_slice %69 {offsets = [0, 0], sizes = [256, 16], strides = [1, 1]} : vector<256x32xf32> to vector<256x16xf32>
    %71 = vector.broadcast %9 : vector<1x16xf32> to vector<256x16xf32>
    %72 = arith.addf %70, %71 : vector<256x16xf32>
    %cst_21 = arith.constant 0.000000e+00 : f32
    %73 = vector.broadcast %cst_21 : f32 to vector<256x16xf32>
    %74 = arith.maximumf %72, %73 : vector<256x16xf32>
    %75 = vector.extract_strided_slice %69 {offsets = [0, 16], sizes = [256, 16], strides = [1, 1]} : vector<256x32xf32> to vector<256x16xf32>
    %76 = vector.broadcast %10 : vector<1x16xf32> to vector<256x16xf32>
    %77 = arith.addf %75, %76 : vector<256x16xf32>
    %78 = vector.shape_cast %74 : vector<256x16xf32> to vector<1x16x16x16xf32>
    %79 = vector.shape_cast %77 : vector<256x16xf32> to vector<1x16x16x16xf32>
    %c104 = arith.constant 104 : index
    %c0_22 = arith.constant 0 : index
    %80 = vector.load %arg2[%c104, %c0_22] : memref<1256x128xbf16, #tpu.memory_space<vmem>>, vector<144x16xbf16>
    %c3 = arith.constant 3 : index
    %c0_23 = arith.constant 0 : index
    %81 = vector.load %arg3[%c3, %c0_23] : memref<8x128xf32, #tpu.memory_space<vmem>>, vector<1x16xf32>
    %cst_24 = arith.constant 0.000000e+00 : f32
    %82 = vector.broadcast %cst_24 : f32 to vector<1x16x1x16xf32>
    %83 = tpu.concatenate %82, %78, %82 in 2 : vector<1x16x1x16xf32>, vector<1x16x16x16xf32>, vector<1x16x1x16xf32> -> vector<1x16x18x16xf32>
    %cst_25 = arith.constant 0.000000e+00 : f32
    %84 = vector.broadcast %cst_25 : f32 to vector<1x1x18x16xf32>
    %85 = tpu.concatenate %84, %83, %84 in 1 : vector<1x1x18x16xf32>, vector<1x16x18x16xf32>, vector<1x1x18x16xf32> -> vector<1x18x18x16xf32>
    %cst_26 = arith.constant 0.000000e+00 : f32
    %86 = vector.broadcast %cst_26 : f32 to vector<256x16xf32>
    %87 = vector.extract_strided_slice %85 {offsets = [0, 0, 0, 0], sizes = [1, 16, 16, 16], strides = [1, 1, 1, 1]} : vector<1x18x18x16xf32> to vector<1x16x16x16xf32>
    %88 = vector.shape_cast %87 : vector<1x16x16x16xf32> to vector<256x16xf32>
    %89 = arith.truncf %88 : vector<256x16xf32> to vector<256x16xbf16>
    %90 = vector.extract_strided_slice %80 {offsets = [0, 0], sizes = [16, 16], strides = [1, 1]} : vector<144x16xbf16> to vector<16x16xbf16>
    %cst_27 = arith.constant dense<0.000000e+00> : vector<256x16xf32>
    %91 = tpu.matmul %89, %90, %cst_27 {dimension_numbers = #tpu.dot_dimension_numbers<[1], [0], [0], [1], [0, 0, 1, 1], [], []>} : vector<256x16xbf16>, vector<16x16xbf16>, vector<256x16xf32> -> vector<256x16xf32>
    %92 = arith.addf %86, %91 : vector<256x16xf32>
    %93 = vector.extract_strided_slice %85 {offsets = [0, 0, 1, 0], sizes = [1, 16, 16, 16], strides = [1, 1, 1, 1]} : vector<1x18x18x16xf32> to vector<1x16x16x16xf32>
    %94 = vector.shape_cast %93 : vector<1x16x16x16xf32> to vector<256x16xf32>
    %95 = arith.truncf %94 : vector<256x16xf32> to vector<256x16xbf16>
    %96 = vector.extract_strided_slice %80 {offsets = [16, 0], sizes = [16, 16], strides = [1, 1]} : vector<144x16xbf16> to vector<16x16xbf16>
    %cst_28 = arith.constant dense<0.000000e+00> : vector<256x16xf32>
    %97 = tpu.matmul %95, %96, %cst_28 {dimension_numbers = #tpu.dot_dimension_numbers<[1], [0], [0], [1], [0, 0, 1, 1], [], []>} : vector<256x16xbf16>, vector<16x16xbf16>, vector<256x16xf32> -> vector<256x16xf32>
    %98 = arith.addf %92, %97 : vector<256x16xf32>
    %99 = vector.extract_strided_slice %85 {offsets = [0, 0, 2, 0], sizes = [1, 16, 16, 16], strides = [1, 1, 1, 1]} : vector<1x18x18x16xf32> to vector<1x16x16x16xf32>
    %100 = vector.shape_cast %99 : vector<1x16x16x16xf32> to vector<256x16xf32>
    %101 = arith.truncf %100 : vector<256x16xf32> to vector<256x16xbf16>
    %102 = vector.extract_strided_slice %80 {offsets = [32, 0], sizes = [16, 16], strides = [1, 1]} : vector<144x16xbf16> to vector<16x16xbf16>
    %cst_29 = arith.constant dense<0.000000e+00> : vector<256x16xf32>
    %103 = tpu.matmul %101, %102, %cst_29 {dimension_numbers = #tpu.dot_dimension_numbers<[1], [0], [0], [1], [0, 0, 1, 1], [], []>} : vector<256x16xbf16>, vector<16x16xbf16>, vector<256x16xf32> -> vector<256x16xf32>
    %104 = arith.addf %98, %103 : vector<256x16xf32>
    %105 = vector.extract_strided_slice %85 {offsets = [0, 1, 0, 0], sizes = [1, 16, 16, 16], strides = [1, 1, 1, 1]} : vector<1x18x18x16xf32> to vector<1x16x16x16xf32>
    %106 = vector.shape_cast %105 : vector<1x16x16x16xf32> to vector<256x16xf32>
    %107 = arith.truncf %106 : vector<256x16xf32> to vector<256x16xbf16>
    %108 = vector.extract_strided_slice %80 {offsets = [48, 0], sizes = [16, 16], strides = [1, 1]} : vector<144x16xbf16> to vector<16x16xbf16>
    %cst_30 = arith.constant dense<0.000000e+00> : vector<256x16xf32>
    %109 = tpu.matmul %107, %108, %cst_30 {dimension_numbers = #tpu.dot_dimension_numbers<[1], [0], [0], [1], [0, 0, 1, 1], [], []>} : vector<256x16xbf16>, vector<16x16xbf16>, vector<256x16xf32> -> vector<256x16xf32>
    %110 = arith.addf %104, %109 : vector<256x16xf32>
    %111 = vector.extract_strided_slice %85 {offsets = [0, 1, 1, 0], sizes = [1, 16, 16, 16], strides = [1, 1, 1, 1]} : vector<1x18x18x16xf32> to vector<1x16x16x16xf32>
    %112 = vector.shape_cast %111 : vector<1x16x16x16xf32> to vector<256x16xf32>
    %113 = arith.truncf %112 : vector<256x16xf32> to vector<256x16xbf16>
    %114 = vector.extract_strided_slice %80 {offsets = [64, 0], sizes = [16, 16], strides = [1, 1]} : vector<144x16xbf16> to vector<16x16xbf16>
    %cst_31 = arith.constant dense<0.000000e+00> : vector<256x16xf32>
    %115 = tpu.matmul %113, %114, %cst_31 {dimension_numbers = #tpu.dot_dimension_numbers<[1], [0], [0], [1], [0, 0, 1, 1], [], []>} : vector<256x16xbf16>, vector<16x16xbf16>, vector<256x16xf32> -> vector<256x16xf32>
    %116 = arith.addf %110, %115 : vector<256x16xf32>
    %117 = vector.extract_strided_slice %85 {offsets = [0, 1, 2, 0], sizes = [1, 16, 16, 16], strides = [1, 1, 1, 1]} : vector<1x18x18x16xf32> to vector<1x16x16x16xf32>
    %118 = vector.shape_cast %117 : vector<1x16x16x16xf32> to vector<256x16xf32>
    %119 = arith.truncf %118 : vector<256x16xf32> to vector<256x16xbf16>
    %120 = vector.extract_strided_slice %80 {offsets = [80, 0], sizes = [16, 16], strides = [1, 1]} : vector<144x16xbf16> to vector<16x16xbf16>
    %cst_32 = arith.constant dense<0.000000e+00> : vector<256x16xf32>
    %121 = tpu.matmul %119, %120, %cst_32 {dimension_numbers = #tpu.dot_dimension_numbers<[1], [0], [0], [1], [0, 0, 1, 1], [], []>} : vector<256x16xbf16>, vector<16x16xbf16>, vector<256x16xf32> -> vector<256x16xf32>
    %122 = arith.addf %116, %121 : vector<256x16xf32>
    %123 = vector.extract_strided_slice %85 {offsets = [0, 2, 0, 0], sizes = [1, 16, 16, 16], strides = [1, 1, 1, 1]} : vector<1x18x18x16xf32> to vector<1x16x16x16xf32>
    %124 = vector.shape_cast %123 : vector<1x16x16x16xf32> to vector<256x16xf32>
    %125 = arith.truncf %124 : vector<256x16xf32> to vector<256x16xbf16>
    %126 = vector.extract_strided_slice %80 {offsets = [96, 0], sizes = [16, 16], strides = [1, 1]} : vector<144x16xbf16> to vector<16x16xbf16>
    %cst_33 = arith.constant dense<0.000000e+00> : vector<256x16xf32>
    %127 = tpu.matmul %125, %126, %cst_33 {dimension_numbers = #tpu.dot_dimension_numbers<[1], [0], [0], [1], [0, 0, 1, 1], [], []>} : vector<256x16xbf16>, vector<16x16xbf16>, vector<256x16xf32> -> vector<256x16xf32>
    %128 = arith.addf %122, %127 : vector<256x16xf32>
    %129 = vector.extract_strided_slice %85 {offsets = [0, 2, 1, 0], sizes = [1, 16, 16, 16], strides = [1, 1, 1, 1]} : vector<1x18x18x16xf32> to vector<1x16x16x16xf32>
    %130 = vector.shape_cast %129 : vector<1x16x16x16xf32> to vector<256x16xf32>
    %131 = arith.truncf %130 : vector<256x16xf32> to vector<256x16xbf16>
    %132 = vector.extract_strided_slice %80 {offsets = [112, 0], sizes = [16, 16], strides = [1, 1]} : vector<144x16xbf16> to vector<16x16xbf16>
    %cst_34 = arith.constant dense<0.000000e+00> : vector<256x16xf32>
    %133 = tpu.matmul %131, %132, %cst_34 {dimension_numbers = #tpu.dot_dimension_numbers<[1], [0], [0], [1], [0, 0, 1, 1], [], []>} : vector<256x16xbf16>, vector<16x16xbf16>, vector<256x16xf32> -> vector<256x16xf32>
    %134 = arith.addf %128, %133 : vector<256x16xf32>
    %135 = vector.extract_strided_slice %85 {offsets = [0, 2, 2, 0], sizes = [1, 16, 16, 16], strides = [1, 1, 1, 1]} : vector<1x18x18x16xf32> to vector<1x16x16x16xf32>
    %136 = vector.shape_cast %135 : vector<1x16x16x16xf32> to vector<256x16xf32>
    %137 = arith.truncf %136 : vector<256x16xf32> to vector<256x16xbf16>
    %138 = vector.extract_strided_slice %80 {offsets = [128, 0], sizes = [16, 16], strides = [1, 1]} : vector<144x16xbf16> to vector<16x16xbf16>
    %cst_35 = arith.constant dense<0.000000e+00> : vector<256x16xf32>
    %139 = tpu.matmul %137, %138, %cst_35 {dimension_numbers = #tpu.dot_dimension_numbers<[1], [0], [0], [1], [0, 0, 1, 1], [], []>} : vector<256x16xbf16>, vector<16x16xbf16>, vector<256x16xf32> -> vector<256x16xf32>
    %140 = arith.addf %134, %139 : vector<256x16xf32>
    %141 = vector.broadcast %81 : vector<1x16xf32> to vector<256x16xf32>
    %142 = arith.addf %140, %141 : vector<256x16xf32>
    %cst_36 = arith.constant 0.000000e+00 : f32
    %143 = vector.broadcast %cst_36 : f32 to vector<256x16xf32>
    %144 = arith.maximumf %142, %143 : vector<256x16xf32>
    %145 = vector.shape_cast %144 : vector<256x16xf32> to vector<1x16x16x16xf32>
    %146 = arith.addf %145, %79 : vector<1x16x16x16xf32>
    %c0_37 = arith.constant 0 : index
    %c0_38 = arith.constant 0 : index
    %147 = vector.load %arg4[%c0_37, %c0_38] : memref<256x256xbf16, #tpu.memory_space<vmem>>, vector<256x256xbf16>
    %148 = vector.shape_cast %146 : vector<1x16x16x16xf32> to vector<16x16x16xf32>
    %149 = vector.shape_cast %148 : vector<16x16x16xf32> to vector<256x16xf32>
    %150 = arith.truncf %149 : vector<256x16xf32> to vector<256x16xbf16>
    %cst_39 = arith.constant dense<0.000000e+00> : vector<256x16xf32>
    %151 = tpu.matmul %147, %150, %cst_39 {dimension_numbers = #tpu.dot_dimension_numbers<[1], [0], [0], [1], [0, 0, 1, 1], [], []>} : vector<256x256xbf16>, vector<256x16xbf16>, vector<256x16xf32> -> vector<256x16xf32>
    %152 = vector.extract_strided_slice %151 {offsets = [0, 0], sizes = [64, 16], strides = [1, 1]} : vector<256x16xf32> to vector<64x16xf32>
    %153 = vector.shape_cast %152 : vector<64x16xf32> to vector<1x8x8x16xf32>
    %154 = vector.extract_strided_slice %151 {offsets = [64, 0], sizes = [64, 16], strides = [1, 1]} : vector<256x16xf32> to vector<64x16xf32>
    %155 = vector.shape_cast %154 : vector<64x16xf32> to vector<1x8x8x16xf32>
    %156 = vector.extract_strided_slice %151 {offsets = [128, 0], sizes = [64, 16], strides = [1, 1]} : vector<256x16xf32> to vector<64x16xf32>
    %157 = vector.shape_cast %156 : vector<64x16xf32> to vector<1x8x8x16xf32>
    %158 = vector.extract_strided_slice %151 {offsets = [192, 0], sizes = [64, 16], strides = [1, 1]} : vector<256x16xf32> to vector<64x16xf32>
    %159 = vector.shape_cast %158 : vector<64x16xf32> to vector<1x8x8x16xf32>
    %c248 = arith.constant 248 : index
    %c0_40 = arith.constant 0 : index
    %160 = vector.load %arg2[%c248, %c0_40] : memref<1256x128xbf16, #tpu.memory_space<vmem>>, vector<576x16xbf16>
    %cst_41 = arith.constant 0.000000e+00 : f32
    %161 = vector.broadcast %cst_41 : f32 to vector<64x16xf32>
    %162 = vector.extract_strided_slice %160 {offsets = [0, 0], sizes = [16, 16], strides = [1, 1]} : vector<576x16xbf16> to vector<16x16xbf16>
    %163 = vector.extract_strided_slice %160 {offsets = [64, 0], sizes = [16, 16], strides = [1, 1]} : vector<576x16xbf16> to vector<16x16xbf16>
    %164 = vector.extract_strided_slice %160 {offsets = [128, 0], sizes = [16, 16], strides = [1, 1]} : vector<576x16xbf16> to vector<16x16xbf16>
    %165 = vector.extract_strided_slice %160 {offsets = [192, 0], sizes = [16, 16], strides = [1, 1]} : vector<576x16xbf16> to vector<16x16xbf16>
    %166 = vector.extract_strided_slice %160 {offsets = [256, 0], sizes = [16, 16], strides = [1, 1]} : vector<576x16xbf16> to vector<16x16xbf16>
    %167 = vector.extract_strided_slice %160 {offsets = [320, 0], sizes = [16, 16], strides = [1, 1]} : vector<576x16xbf16> to vector<16x16xbf16>
    %168 = vector.extract_strided_slice %160 {offsets = [384, 0], sizes = [16, 16], strides = [1, 1]} : vector<576x16xbf16> to vector<16x16xbf16>
    %169 = vector.extract_strided_slice %160 {offsets = [448, 0], sizes = [16, 16], strides = [1, 1]} : vector<576x16xbf16> to vector<16x16xbf16>
    %170 = vector.extract_strided_slice %160 {offsets = [512, 0], sizes = [16, 16], strides = [1, 1]} : vector<576x16xbf16> to vector<16x16xbf16>
    %171 = tpu.concatenate %162, %163, %164, %165, %166, %167, %168, %169, %170 in 0 : vector<16x16xbf16>, vector<16x16xbf16>, vector<16x16xbf16>, vector<16x16xbf16>, vector<16x16xbf16>, vector<16x16xbf16>, vector<16x16xbf16>, vector<16x16xbf16>, vector<16x16xbf16> -> vector<144x16xbf16>
    %cst_42 = arith.constant 0.000000e+00 : f32
    %172 = vector.broadcast %cst_42 : f32 to vector<1x8x1x16xf32>
    %173 = tpu.concatenate %172, %153, %172 in 2 : vector<1x8x1x16xf32>, vector<1x8x8x16xf32>, vector<1x8x1x16xf32> -> vector<1x8x10x16xf32>
    %cst_43 = arith.constant 0.000000e+00 : f32
    %174 = vector.broadcast %cst_43 : f32 to vector<1x1x10x16xf32>
    %175 = tpu.concatenate %174, %173, %174 in 1 : vector<1x1x10x16xf32>, vector<1x8x10x16xf32>, vector<1x1x10x16xf32> -> vector<1x10x10x16xf32>
    %cst_44 = arith.constant 0.000000e+00 : f32
    %176 = vector.broadcast %cst_44 : f32 to vector<64x16xf32>
    %177 = vector.extract_strided_slice %175 {offsets = [0, 0, 0, 0], sizes = [1, 8, 8, 16], strides = [1, 1, 1, 1]} : vector<1x10x10x16xf32> to vector<1x8x8x16xf32>
    %178 = vector.shape_cast %177 : vector<1x8x8x16xf32> to vector<64x16xf32>
    %179 = arith.truncf %178 : vector<64x16xf32> to vector<64x16xbf16>
    %180 = vector.extract_strided_slice %171 {offsets = [0, 0], sizes = [16, 16], strides = [1, 1]} : vector<144x16xbf16> to vector<16x16xbf16>
    %cst_45 = arith.constant dense<0.000000e+00> : vector<64x16xf32>
    %181 = tpu.matmul %179, %180, %cst_45 {dimension_numbers = #tpu.dot_dimension_numbers<[1], [0], [0], [1], [0, 0, 1, 1], [], []>} : vector<64x16xbf16>, vector<16x16xbf16>, vector<64x16xf32> -> vector<64x16xf32>
    %182 = arith.addf %176, %181 : vector<64x16xf32>
    %183 = vector.extract_strided_slice %175 {offsets = [0, 0, 1, 0], sizes = [1, 8, 8, 16], strides = [1, 1, 1, 1]} : vector<1x10x10x16xf32> to vector<1x8x8x16xf32>
    %184 = vector.shape_cast %183 : vector<1x8x8x16xf32> to vector<64x16xf32>
    %185 = arith.truncf %184 : vector<64x16xf32> to vector<64x16xbf16>
    %186 = vector.extract_strided_slice %171 {offsets = [16, 0], sizes = [16, 16], strides = [1, 1]} : vector<144x16xbf16> to vector<16x16xbf16>
    %cst_46 = arith.constant dense<0.000000e+00> : vector<64x16xf32>
    %187 = tpu.matmul %185, %186, %cst_46 {dimension_numbers = #tpu.dot_dimension_numbers<[1], [0], [0], [1], [0, 0, 1, 1], [], []>} : vector<64x16xbf16>, vector<16x16xbf16>, vector<64x16xf32> -> vector<64x16xf32>
    %188 = arith.addf %182, %187 : vector<64x16xf32>
    %189 = vector.extract_strided_slice %175 {offsets = [0, 0, 2, 0], sizes = [1, 8, 8, 16], strides = [1, 1, 1, 1]} : vector<1x10x10x16xf32> to vector<1x8x8x16xf32>
    %190 = vector.shape_cast %189 : vector<1x8x8x16xf32> to vector<64x16xf32>
    %191 = arith.truncf %190 : vector<64x16xf32> to vector<64x16xbf16>
    %192 = vector.extract_strided_slice %171 {offsets = [32, 0], sizes = [16, 16], strides = [1, 1]} : vector<144x16xbf16> to vector<16x16xbf16>
    %cst_47 = arith.constant dense<0.000000e+00> : vector<64x16xf32>
    %193 = tpu.matmul %191, %192, %cst_47 {dimension_numbers = #tpu.dot_dimension_numbers<[1], [0], [0], [1], [0, 0, 1, 1], [], []>} : vector<64x16xbf16>, vector<16x16xbf16>, vector<64x16xf32> -> vector<64x16xf32>
    %194 = arith.addf %188, %193 : vector<64x16xf32>
    %195 = vector.extract_strided_slice %175 {offsets = [0, 1, 0, 0], sizes = [1, 8, 8, 16], strides = [1, 1, 1, 1]} : vector<1x10x10x16xf32> to vector<1x8x8x16xf32>
    %196 = vector.shape_cast %195 : vector<1x8x8x16xf32> to vector<64x16xf32>
    %197 = arith.truncf %196 : vector<64x16xf32> to vector<64x16xbf16>
    %198 = vector.extract_strided_slice %171 {offsets = [48, 0], sizes = [16, 16], strides = [1, 1]} : vector<144x16xbf16> to vector<16x16xbf16>
    %cst_48 = arith.constant dense<0.000000e+00> : vector<64x16xf32>
    %199 = tpu.matmul %197, %198, %cst_48 {dimension_numbers = #tpu.dot_dimension_numbers<[1], [0], [0], [1], [0, 0, 1, 1], [], []>} : vector<64x16xbf16>, vector<16x16xbf16>, vector<64x16xf32> -> vector<64x16xf32>
    %200 = arith.addf %194, %199 : vector<64x16xf32>
    %201 = vector.extract_strided_slice %175 {offsets = [0, 1, 1, 0], sizes = [1, 8, 8, 16], strides = [1, 1, 1, 1]} : vector<1x10x10x16xf32> to vector<1x8x8x16xf32>
    %202 = vector.shape_cast %201 : vector<1x8x8x16xf32> to vector<64x16xf32>
    %203 = arith.truncf %202 : vector<64x16xf32> to vector<64x16xbf16>
    %204 = vector.extract_strided_slice %171 {offsets = [64, 0], sizes = [16, 16], strides = [1, 1]} : vector<144x16xbf16> to vector<16x16xbf16>
    %cst_49 = arith.constant dense<0.000000e+00> : vector<64x16xf32>
    %205 = tpu.matmul %203, %204, %cst_49 {dimension_numbers = #tpu.dot_dimension_numbers<[1], [0], [0], [1], [0, 0, 1, 1], [], []>} : vector<64x16xbf16>, vector<16x16xbf16>, vector<64x16xf32> -> vector<64x16xf32>
    %206 = arith.addf %200, %205 : vector<64x16xf32>
    %207 = vector.extract_strided_slice %175 {offsets = [0, 1, 2, 0], sizes = [1, 8, 8, 16], strides = [1, 1, 1, 1]} : vector<1x10x10x16xf32> to vector<1x8x8x16xf32>
    %208 = vector.shape_cast %207 : vector<1x8x8x16xf32> to vector<64x16xf32>
    %209 = arith.truncf %208 : vector<64x16xf32> to vector<64x16xbf16>
    %210 = vector.extract_strided_slice %171 {offsets = [80, 0], sizes = [16, 16], strides = [1, 1]} : vector<144x16xbf16> to vector<16x16xbf16>
    %cst_50 = arith.constant dense<0.000000e+00> : vector<64x16xf32>
    %211 = tpu.matmul %209, %210, %cst_50 {dimension_numbers = #tpu.dot_dimension_numbers<[1], [0], [0], [1], [0, 0, 1, 1], [], []>} : vector<64x16xbf16>, vector<16x16xbf16>, vector<64x16xf32> -> vector<64x16xf32>
    %212 = arith.addf %206, %211 : vector<64x16xf32>
    %213 = vector.extract_strided_slice %175 {offsets = [0, 2, 0, 0], sizes = [1, 8, 8, 16], strides = [1, 1, 1, 1]} : vector<1x10x10x16xf32> to vector<1x8x8x16xf32>
    %214 = vector.shape_cast %213 : vector<1x8x8x16xf32> to vector<64x16xf32>
    %215 = arith.truncf %214 : vector<64x16xf32> to vector<64x16xbf16>
    %216 = vector.extract_strided_slice %171 {offsets = [96, 0], sizes = [16, 16], strides = [1, 1]} : vector<144x16xbf16> to vector<16x16xbf16>
    %cst_51 = arith.constant dense<0.000000e+00> : vector<64x16xf32>
    %217 = tpu.matmul %215, %216, %cst_51 {dimension_numbers = #tpu.dot_dimension_numbers<[1], [0], [0], [1], [0, 0, 1, 1], [], []>} : vector<64x16xbf16>, vector<16x16xbf16>, vector<64x16xf32> -> vector<64x16xf32>
    %218 = arith.addf %212, %217 : vector<64x16xf32>
    %219 = vector.extract_strided_slice %175 {offsets = [0, 2, 1, 0], sizes = [1, 8, 8, 16], strides = [1, 1, 1, 1]} : vector<1x10x10x16xf32> to vector<1x8x8x16xf32>
    %220 = vector.shape_cast %219 : vector<1x8x8x16xf32> to vector<64x16xf32>
    %221 = arith.truncf %220 : vector<64x16xf32> to vector<64x16xbf16>
    %222 = vector.extract_strided_slice %171 {offsets = [112, 0], sizes = [16, 16], strides = [1, 1]} : vector<144x16xbf16> to vector<16x16xbf16>
    %cst_52 = arith.constant dense<0.000000e+00> : vector<64x16xf32>
    %223 = tpu.matmul %221, %222, %cst_52 {dimension_numbers = #tpu.dot_dimension_numbers<[1], [0], [0], [1], [0, 0, 1, 1], [], []>} : vector<64x16xbf16>, vector<16x16xbf16>, vector<64x16xf32> -> vector<64x16xf32>
    %224 = arith.addf %218, %223 : vector<64x16xf32>
    %225 = vector.extract_strided_slice %175 {offsets = [0, 2, 2, 0], sizes = [1, 8, 8, 16], strides = [1, 1, 1, 1]} : vector<1x10x10x16xf32> to vector<1x8x8x16xf32>
    %226 = vector.shape_cast %225 : vector<1x8x8x16xf32> to vector<64x16xf32>
    %227 = arith.truncf %226 : vector<64x16xf32> to vector<64x16xbf16>
    %228 = vector.extract_strided_slice %171 {offsets = [128, 0], sizes = [16, 16], strides = [1, 1]} : vector<144x16xbf16> to vector<16x16xbf16>
    %cst_53 = arith.constant dense<0.000000e+00> : vector<64x16xf32>
    %229 = tpu.matmul %227, %228, %cst_53 {dimension_numbers = #tpu.dot_dimension_numbers<[1], [0], [0], [1], [0, 0, 1, 1], [], []>} : vector<64x16xbf16>, vector<16x16xbf16>, vector<64x16xf32> -> vector<64x16xf32>
    %230 = arith.addf %224, %229 : vector<64x16xf32>
    %231 = arith.addf %161, %230 : vector<64x16xf32>
    %232 = vector.extract_strided_slice %160 {offsets = [16, 0], sizes = [16, 16], strides = [1, 1]} : vector<576x16xbf16> to vector<16x16xbf16>
    %233 = vector.extract_strided_slice %160 {offsets = [80, 0], sizes = [16, 16], strides = [1, 1]} : vector<576x16xbf16> to vector<16x16xbf16>
    %234 = vector.extract_strided_slice %160 {offsets = [144, 0], sizes = [16, 16], strides = [1, 1]} : vector<576x16xbf16> to vector<16x16xbf16>
    %235 = vector.extract_strided_slice %160 {offsets = [208, 0], sizes = [16, 16], strides = [1, 1]} : vector<576x16xbf16> to vector<16x16xbf16>
    %236 = vector.extract_strided_slice %160 {offsets = [272, 0], sizes = [16, 16], strides = [1, 1]} : vector<576x16xbf16> to vector<16x16xbf16>
    %237 = vector.extract_strided_slice %160 {offsets = [336, 0], sizes = [16, 16], strides = [1, 1]} : vector<576x16xbf16> to vector<16x16xbf16>
    %238 = vector.extract_strided_slice %160 {offsets = [400, 0], sizes = [16, 16], strides = [1, 1]} : vector<576x16xbf16> to vector<16x16xbf16>
    %239 = vector.extract_strided_slice %160 {offsets = [464, 0], sizes = [16, 16], strides = [1, 1]} : vector<576x16xbf16> to vector<16x16xbf16>
    %240 = vector.extract_strided_slice %160 {offsets = [528, 0], sizes = [16, 16], strides = [1, 1]} : vector<576x16xbf16> to vector<16x16xbf16>
    %241 = tpu.concatenate %232, %233, %234, %235, %236, %237, %238, %239, %240 in 0 : vector<16x16xbf16>, vector<16x16xbf16>, vector<16x16xbf16>, vector<16x16xbf16>, vector<16x16xbf16>, vector<16x16xbf16>, vector<16x16xbf16>, vector<16x16xbf16>, vector<16x16xbf16> -> vector<144x16xbf16>
    %cst_54 = arith.constant 0.000000e+00 : f32
    %242 = vector.broadcast %cst_54 : f32 to vector<1x8x1x16xf32>
    %243 = tpu.concatenate %242, %155, %242 in 2 : vector<1x8x1x16xf32>, vector<1x8x8x16xf32>, vector<1x8x1x16xf32> -> vector<1x8x10x16xf32>
    %cst_55 = arith.constant 0.000000e+00 : f32
    %244 = vector.broadcast %cst_55 : f32 to vector<1x1x10x16xf32>
    %245 = tpu.concatenate %244, %243, %244 in 1 : vector<1x1x10x16xf32>, vector<1x8x10x16xf32>, vector<1x1x10x16xf32> -> vector<1x10x10x16xf32>
    %cst_56 = arith.constant 0.000000e+00 : f32
    %246 = vector.broadcast %cst_56 : f32 to vector<64x16xf32>
    %247 = vector.extract_strided_slice %245 {offsets = [0, 0, 0, 0], sizes = [1, 8, 8, 16], strides = [1, 1, 1, 1]} : vector<1x10x10x16xf32> to vector<1x8x8x16xf32>
    %248 = vector.shape_cast %247 : vector<1x8x8x16xf32> to vector<64x16xf32>
    %249 = arith.truncf %248 : vector<64x16xf32> to vector<64x16xbf16>
    %250 = vector.extract_strided_slice %241 {offsets = [0, 0], sizes = [16, 16], strides = [1, 1]} : vector<144x16xbf16> to vector<16x16xbf16>
    %cst_57 = arith.constant dense<0.000000e+00> : vector<64x16xf32>
    %251 = tpu.matmul %249, %250, %cst_57 {dimension_numbers = #tpu.dot_dimension_numbers<[1], [0], [0], [1], [0, 0, 1, 1], [], []>} : vector<64x16xbf16>, vector<16x16xbf16>, vector<64x16xf32> -> vector<64x16xf32>
    %252 = arith.addf %246, %251 : vector<64x16xf32>
    %253 = vector.extract_strided_slice %245 {offsets = [0, 0, 1, 0], sizes = [1, 8, 8, 16], strides = [1, 1, 1, 1]} : vector<1x10x10x16xf32> to vector<1x8x8x16xf32>
    %254 = vector.shape_cast %253 : vector<1x8x8x16xf32> to vector<64x16xf32>
    %255 = arith.truncf %254 : vector<64x16xf32> to vector<64x16xbf16>
    %256 = vector.extract_strided_slice %241 {offsets = [16, 0], sizes = [16, 16], strides = [1, 1]} : vector<144x16xbf16> to vector<16x16xbf16>
    %cst_58 = arith.constant dense<0.000000e+00> : vector<64x16xf32>
    %257 = tpu.matmul %255, %256, %cst_58 {dimension_numbers = #tpu.dot_dimension_numbers<[1], [0], [0], [1], [0, 0, 1, 1], [], []>} : vector<64x16xbf16>, vector<16x16xbf16>, vector<64x16xf32> -> vector<64x16xf32>
    %258 = arith.addf %252, %257 : vector<64x16xf32>
    %259 = vector.extract_strided_slice %245 {offsets = [0, 0, 2, 0], sizes = [1, 8, 8, 16], strides = [1, 1, 1, 1]} : vector<1x10x10x16xf32> to vector<1x8x8x16xf32>
    %260 = vector.shape_cast %259 : vector<1x8x8x16xf32> to vector<64x16xf32>
    %261 = arith.truncf %260 : vector<64x16xf32> to vector<64x16xbf16>
    %262 = vector.extract_strided_slice %241 {offsets = [32, 0], sizes = [16, 16], strides = [1, 1]} : vector<144x16xbf16> to vector<16x16xbf16>
    %cst_59 = arith.constant dense<0.000000e+00> : vector<64x16xf32>
    %263 = tpu.matmul %261, %262, %cst_59 {dimension_numbers = #tpu.dot_dimension_numbers<[1], [0], [0], [1], [0, 0, 1, 1], [], []>} : vector<64x16xbf16>, vector<16x16xbf16>, vector<64x16xf32> -> vector<64x16xf32>
    %264 = arith.addf %258, %263 : vector<64x16xf32>
    %265 = vector.extract_strided_slice %245 {offsets = [0, 1, 0, 0], sizes = [1, 8, 8, 16], strides = [1, 1, 1, 1]} : vector<1x10x10x16xf32> to vector<1x8x8x16xf32>
    %266 = vector.shape_cast %265 : vector<1x8x8x16xf32> to vector<64x16xf32>
    %267 = arith.truncf %266 : vector<64x16xf32> to vector<64x16xbf16>
    %268 = vector.extract_strided_slice %241 {offsets = [48, 0], sizes = [16, 16], strides = [1, 1]} : vector<144x16xbf16> to vector<16x16xbf16>
    %cst_60 = arith.constant dense<0.000000e+00> : vector<64x16xf32>
    %269 = tpu.matmul %267, %268, %cst_60 {dimension_numbers = #tpu.dot_dimension_numbers<[1], [0], [0], [1], [0, 0, 1, 1], [], []>} : vector<64x16xbf16>, vector<16x16xbf16>, vector<64x16xf32> -> vector<64x16xf32>
    %270 = arith.addf %264, %269 : vector<64x16xf32>
    %271 = vector.extract_strided_slice %245 {offsets = [0, 1, 1, 0], sizes = [1, 8, 8, 16], strides = [1, 1, 1, 1]} : vector<1x10x10x16xf32> to vector<1x8x8x16xf32>
    %272 = vector.shape_cast %271 : vector<1x8x8x16xf32> to vector<64x16xf32>
    %273 = arith.truncf %272 : vector<64x16xf32> to vector<64x16xbf16>
    %274 = vector.extract_strided_slice %241 {offsets = [64, 0], sizes = [16, 16], strides = [1, 1]} : vector<144x16xbf16> to vector<16x16xbf16>
    %cst_61 = arith.constant dense<0.000000e+00> : vector<64x16xf32>
    %275 = tpu.matmul %273, %274, %cst_61 {dimension_numbers = #tpu.dot_dimension_numbers<[1], [0], [0], [1], [0, 0, 1, 1], [], []>} : vector<64x16xbf16>, vector<16x16xbf16>, vector<64x16xf32> -> vector<64x16xf32>
    %276 = arith.addf %270, %275 : vector<64x16xf32>
    %277 = vector.extract_strided_slice %245 {offsets = [0, 1, 2, 0], sizes = [1, 8, 8, 16], strides = [1, 1, 1, 1]} : vector<1x10x10x16xf32> to vector<1x8x8x16xf32>
    %278 = vector.shape_cast %277 : vector<1x8x8x16xf32> to vector<64x16xf32>
    %279 = arith.truncf %278 : vector<64x16xf32> to vector<64x16xbf16>
    %280 = vector.extract_strided_slice %241 {offsets = [80, 0], sizes = [16, 16], strides = [1, 1]} : vector<144x16xbf16> to vector<16x16xbf16>
    %cst_62 = arith.constant dense<0.000000e+00> : vector<64x16xf32>
    %281 = tpu.matmul %279, %280, %cst_62 {dimension_numbers = #tpu.dot_dimension_numbers<[1], [0], [0], [1], [0, 0, 1, 1], [], []>} : vector<64x16xbf16>, vector<16x16xbf16>, vector<64x16xf32> -> vector<64x16xf32>
    %282 = arith.addf %276, %281 : vector<64x16xf32>
    %283 = vector.extract_strided_slice %245 {offsets = [0, 2, 0, 0], sizes = [1, 8, 8, 16], strides = [1, 1, 1, 1]} : vector<1x10x10x16xf32> to vector<1x8x8x16xf32>
    %284 = vector.shape_cast %283 : vector<1x8x8x16xf32> to vector<64x16xf32>
    %285 = arith.truncf %284 : vector<64x16xf32> to vector<64x16xbf16>
    %286 = vector.extract_strided_slice %241 {offsets = [96, 0], sizes = [16, 16], strides = [1, 1]} : vector<144x16xbf16> to vector<16x16xbf16>
    %cst_63 = arith.constant dense<0.000000e+00> : vector<64x16xf32>
    %287 = tpu.matmul %285, %286, %cst_63 {dimension_numbers = #tpu.dot_dimension_numbers<[1], [0], [0], [1], [0, 0, 1, 1], [], []>} : vector<64x16xbf16>, vector<16x16xbf16>, vector<64x16xf32> -> vector<64x16xf32>
    %288 = arith.addf %282, %287 : vector<64x16xf32>
    %289 = vector.extract_strided_slice %245 {offsets = [0, 2, 1, 0], sizes = [1, 8, 8, 16], strides = [1, 1, 1, 1]} : vector<1x10x10x16xf32> to vector<1x8x8x16xf32>
    %290 = vector.shape_cast %289 : vector<1x8x8x16xf32> to vector<64x16xf32>
    %291 = arith.truncf %290 : vector<64x16xf32> to vector<64x16xbf16>
    %292 = vector.extract_strided_slice %241 {offsets = [112, 0], sizes = [16, 16], strides = [1, 1]} : vector<144x16xbf16> to vector<16x16xbf16>
    %cst_64 = arith.constant dense<0.000000e+00> : vector<64x16xf32>
    %293 = tpu.matmul %291, %292, %cst_64 {dimension_numbers = #tpu.dot_dimension_numbers<[1], [0], [0], [1], [0, 0, 1, 1], [], []>} : vector<64x16xbf16>, vector<16x16xbf16>, vector<64x16xf32> -> vector<64x16xf32>
    %294 = arith.addf %288, %293 : vector<64x16xf32>
    %295 = vector.extract_strided_slice %245 {offsets = [0, 2, 2, 0], sizes = [1, 8, 8, 16], strides = [1, 1, 1, 1]} : vector<1x10x10x16xf32> to vector<1x8x8x16xf32>
    %296 = vector.shape_cast %295 : vector<1x8x8x16xf32> to vector<64x16xf32>
    %297 = arith.truncf %296 : vector<64x16xf32> to vector<64x16xbf16>
    %298 = vector.extract_strided_slice %241 {offsets = [128, 0], sizes = [16, 16], strides = [1, 1]} : vector<144x16xbf16> to vector<16x16xbf16>
    %cst_65 = arith.constant dense<0.000000e+00> : vector<64x16xf32>
    %299 = tpu.matmul %297, %298, %cst_65 {dimension_numbers = #tpu.dot_dimension_numbers<[1], [0], [0], [1], [0, 0, 1, 1], [], []>} : vector<64x16xbf16>, vector<16x16xbf16>, vector<64x16xf32> -> vector<64x16xf32>
    %300 = arith.addf %294, %299 : vector<64x16xf32>
    %301 = arith.addf %231, %300 : vector<64x16xf32>
    %302 = vector.extract_strided_slice %160 {offsets = [32, 0], sizes = [16, 16], strides = [1, 1]} : vector<576x16xbf16> to vector<16x16xbf16>
    %303 = vector.extract_strided_slice %160 {offsets = [96, 0], sizes = [16, 16], strides = [1, 1]} : vector<576x16xbf16> to vector<16x16xbf16>
    %304 = vector.extract_strided_slice %160 {offsets = [160, 0], sizes = [16, 16], strides = [1, 1]} : vector<576x16xbf16> to vector<16x16xbf16>
    %305 = vector.extract_strided_slice %160 {offsets = [224, 0], sizes = [16, 16], strides = [1, 1]} : vector<576x16xbf16> to vector<16x16xbf16>
    %306 = vector.extract_strided_slice %160 {offsets = [288, 0], sizes = [16, 16], strides = [1, 1]} : vector<576x16xbf16> to vector<16x16xbf16>
    %307 = vector.extract_strided_slice %160 {offsets = [352, 0], sizes = [16, 16], strides = [1, 1]} : vector<576x16xbf16> to vector<16x16xbf16>
    %308 = vector.extract_strided_slice %160 {offsets = [416, 0], sizes = [16, 16], strides = [1, 1]} : vector<576x16xbf16> to vector<16x16xbf16>
    %309 = vector.extract_strided_slice %160 {offsets = [480, 0], sizes = [16, 16], strides = [1, 1]} : vector<576x16xbf16> to vector<16x16xbf16>
    %310 = vector.extract_strided_slice %160 {offsets = [544, 0], sizes = [16, 16], strides = [1, 1]} : vector<576x16xbf16> to vector<16x16xbf16>
    %311 = tpu.concatenate %302, %303, %304, %305, %306, %307, %308, %309, %310 in 0 : vector<16x16xbf16>, vector<16x16xbf16>, vector<16x16xbf16>, vector<16x16xbf16>, vector<16x16xbf16>, vector<16x16xbf16>, vector<16x16xbf16>, vector<16x16xbf16>, vector<16x16xbf16> -> vector<144x16xbf16>
    %cst_66 = arith.constant 0.000000e+00 : f32
    %312 = vector.broadcast %cst_66 : f32 to vector<1x8x1x16xf32>
    %313 = tpu.concatenate %312, %157, %312 in 2 : vector<1x8x1x16xf32>, vector<1x8x8x16xf32>, vector<1x8x1x16xf32> -> vector<1x8x10x16xf32>
    %cst_67 = arith.constant 0.000000e+00 : f32
    %314 = vector.broadcast %cst_67 : f32 to vector<1x1x10x16xf32>
    %315 = tpu.concatenate %314, %313, %314 in 1 : vector<1x1x10x16xf32>, vector<1x8x10x16xf32>, vector<1x1x10x16xf32> -> vector<1x10x10x16xf32>
    %cst_68 = arith.constant 0.000000e+00 : f32
    %316 = vector.broadcast %cst_68 : f32 to vector<64x16xf32>
    %317 = vector.extract_strided_slice %315 {offsets = [0, 0, 0, 0], sizes = [1, 8, 8, 16], strides = [1, 1, 1, 1]} : vector<1x10x10x16xf32> to vector<1x8x8x16xf32>
    %318 = vector.shape_cast %317 : vector<1x8x8x16xf32> to vector<64x16xf32>
    %319 = arith.truncf %318 : vector<64x16xf32> to vector<64x16xbf16>
    %320 = vector.extract_strided_slice %311 {offsets = [0, 0], sizes = [16, 16], strides = [1, 1]} : vector<144x16xbf16> to vector<16x16xbf16>
    %cst_69 = arith.constant dense<0.000000e+00> : vector<64x16xf32>
    %321 = tpu.matmul %319, %320, %cst_69 {dimension_numbers = #tpu.dot_dimension_numbers<[1], [0], [0], [1], [0, 0, 1, 1], [], []>} : vector<64x16xbf16>, vector<16x16xbf16>, vector<64x16xf32> -> vector<64x16xf32>
    %322 = arith.addf %316, %321 : vector<64x16xf32>
    %323 = vector.extract_strided_slice %315 {offsets = [0, 0, 1, 0], sizes = [1, 8, 8, 16], strides = [1, 1, 1, 1]} : vector<1x10x10x16xf32> to vector<1x8x8x16xf32>
    %324 = vector.shape_cast %323 : vector<1x8x8x16xf32> to vector<64x16xf32>
    %325 = arith.truncf %324 : vector<64x16xf32> to vector<64x16xbf16>
    %326 = vector.extract_strided_slice %311 {offsets = [16, 0], sizes = [16, 16], strides = [1, 1]} : vector<144x16xbf16> to vector<16x16xbf16>
    %cst_70 = arith.constant dense<0.000000e+00> : vector<64x16xf32>
    %327 = tpu.matmul %325, %326, %cst_70 {dimension_numbers = #tpu.dot_dimension_numbers<[1], [0], [0], [1], [0, 0, 1, 1], [], []>} : vector<64x16xbf16>, vector<16x16xbf16>, vector<64x16xf32> -> vector<64x16xf32>
    %328 = arith.addf %322, %327 : vector<64x16xf32>
    %329 = vector.extract_strided_slice %315 {offsets = [0, 0, 2, 0], sizes = [1, 8, 8, 16], strides = [1, 1, 1, 1]} : vector<1x10x10x16xf32> to vector<1x8x8x16xf32>
    %330 = vector.shape_cast %329 : vector<1x8x8x16xf32> to vector<64x16xf32>
    %331 = arith.truncf %330 : vector<64x16xf32> to vector<64x16xbf16>
    %332 = vector.extract_strided_slice %311 {offsets = [32, 0], sizes = [16, 16], strides = [1, 1]} : vector<144x16xbf16> to vector<16x16xbf16>
    %cst_71 = arith.constant dense<0.000000e+00> : vector<64x16xf32>
    %333 = tpu.matmul %331, %332, %cst_71 {dimension_numbers = #tpu.dot_dimension_numbers<[1], [0], [0], [1], [0, 0, 1, 1], [], []>} : vector<64x16xbf16>, vector<16x16xbf16>, vector<64x16xf32> -> vector<64x16xf32>
    %334 = arith.addf %328, %333 : vector<64x16xf32>
    %335 = vector.extract_strided_slice %315 {offsets = [0, 1, 0, 0], sizes = [1, 8, 8, 16], strides = [1, 1, 1, 1]} : vector<1x10x10x16xf32> to vector<1x8x8x16xf32>
    %336 = vector.shape_cast %335 : vector<1x8x8x16xf32> to vector<64x16xf32>
    %337 = arith.truncf %336 : vector<64x16xf32> to vector<64x16xbf16>
    %338 = vector.extract_strided_slice %311 {offsets = [48, 0], sizes = [16, 16], strides = [1, 1]} : vector<144x16xbf16> to vector<16x16xbf16>
    %cst_72 = arith.constant dense<0.000000e+00> : vector<64x16xf32>
    %339 = tpu.matmul %337, %338, %cst_72 {dimension_numbers = #tpu.dot_dimension_numbers<[1], [0], [0], [1], [0, 0, 1, 1], [], []>} : vector<64x16xbf16>, vector<16x16xbf16>, vector<64x16xf32> -> vector<64x16xf32>
    %340 = arith.addf %334, %339 : vector<64x16xf32>
    %341 = vector.extract_strided_slice %315 {offsets = [0, 1, 1, 0], sizes = [1, 8, 8, 16], strides = [1, 1, 1, 1]} : vector<1x10x10x16xf32> to vector<1x8x8x16xf32>
    %342 = vector.shape_cast %341 : vector<1x8x8x16xf32> to vector<64x16xf32>
    %343 = arith.truncf %342 : vector<64x16xf32> to vector<64x16xbf16>
    %344 = vector.extract_strided_slice %311 {offsets = [64, 0], sizes = [16, 16], strides = [1, 1]} : vector<144x16xbf16> to vector<16x16xbf16>
    %cst_73 = arith.constant dense<0.000000e+00> : vector<64x16xf32>
    %345 = tpu.matmul %343, %344, %cst_73 {dimension_numbers = #tpu.dot_dimension_numbers<[1], [0], [0], [1], [0, 0, 1, 1], [], []>} : vector<64x16xbf16>, vector<16x16xbf16>, vector<64x16xf32> -> vector<64x16xf32>
    %346 = arith.addf %340, %345 : vector<64x16xf32>
    %347 = vector.extract_strided_slice %315 {offsets = [0, 1, 2, 0], sizes = [1, 8, 8, 16], strides = [1, 1, 1, 1]} : vector<1x10x10x16xf32> to vector<1x8x8x16xf32>
    %348 = vector.shape_cast %347 : vector<1x8x8x16xf32> to vector<64x16xf32>
    %349 = arith.truncf %348 : vector<64x16xf32> to vector<64x16xbf16>
    %350 = vector.extract_strided_slice %311 {offsets = [80, 0], sizes = [16, 16], strides = [1, 1]} : vector<144x16xbf16> to vector<16x16xbf16>
    %cst_74 = arith.constant dense<0.000000e+00> : vector<64x16xf32>
    %351 = tpu.matmul %349, %350, %cst_74 {dimension_numbers = #tpu.dot_dimension_numbers<[1], [0], [0], [1], [0, 0, 1, 1], [], []>} : vector<64x16xbf16>, vector<16x16xbf16>, vector<64x16xf32> -> vector<64x16xf32>
    %352 = arith.addf %346, %351 : vector<64x16xf32>
    %353 = vector.extract_strided_slice %315 {offsets = [0, 2, 0, 0], sizes = [1, 8, 8, 16], strides = [1, 1, 1, 1]} : vector<1x10x10x16xf32> to vector<1x8x8x16xf32>
    %354 = vector.shape_cast %353 : vector<1x8x8x16xf32> to vector<64x16xf32>
    %355 = arith.truncf %354 : vector<64x16xf32> to vector<64x16xbf16>
    %356 = vector.extract_strided_slice %311 {offsets = [96, 0], sizes = [16, 16], strides = [1, 1]} : vector<144x16xbf16> to vector<16x16xbf16>
    %cst_75 = arith.constant dense<0.000000e+00> : vector<64x16xf32>
    %357 = tpu.matmul %355, %356, %cst_75 {dimension_numbers = #tpu.dot_dimension_numbers<[1], [0], [0], [1], [0, 0, 1, 1], [], []>} : vector<64x16xbf16>, vector<16x16xbf16>, vector<64x16xf32> -> vector<64x16xf32>
    %358 = arith.addf %352, %357 : vector<64x16xf32>
    %359 = vector.extract_strided_slice %315 {offsets = [0, 2, 1, 0], sizes = [1, 8, 8, 16], strides = [1, 1, 1, 1]} : vector<1x10x10x16xf32> to vector<1x8x8x16xf32>
    %360 = vector.shape_cast %359 : vector<1x8x8x16xf32> to vector<64x16xf32>
    %361 = arith.truncf %360 : vector<64x16xf32> to vector<64x16xbf16>
    %362 = vector.extract_strided_slice %311 {offsets = [112, 0], sizes = [16, 16], strides = [1, 1]} : vector<144x16xbf16> to vector<16x16xbf16>
    %cst_76 = arith.constant dense<0.000000e+00> : vector<64x16xf32>
    %363 = tpu.matmul %361, %362, %cst_76 {dimension_numbers = #tpu.dot_dimension_numbers<[1], [0], [0], [1], [0, 0, 1, 1], [], []>} : vector<64x16xbf16>, vector<16x16xbf16>, vector<64x16xf32> -> vector<64x16xf32>
    %364 = arith.addf %358, %363 : vector<64x16xf32>
    %365 = vector.extract_strided_slice %315 {offsets = [0, 2, 2, 0], sizes = [1, 8, 8, 16], strides = [1, 1, 1, 1]} : vector<1x10x10x16xf32> to vector<1x8x8x16xf32>
    %366 = vector.shape_cast %365 : vector<1x8x8x16xf32> to vector<64x16xf32>
    %367 = arith.truncf %366 : vector<64x16xf32> to vector<64x16xbf16>
    %368 = vector.extract_strided_slice %311 {offsets = [128, 0], sizes = [16, 16], strides = [1, 1]} : vector<144x16xbf16> to vector<16x16xbf16>
    %cst_77 = arith.constant dense<0.000000e+00> : vector<64x16xf32>
    %369 = tpu.matmul %367, %368, %cst_77 {dimension_numbers = #tpu.dot_dimension_numbers<[1], [0], [0], [1], [0, 0, 1, 1], [], []>} : vector<64x16xbf16>, vector<16x16xbf16>, vector<64x16xf32> -> vector<64x16xf32>
    %370 = arith.addf %364, %369 : vector<64x16xf32>
    %371 = arith.addf %301, %370 : vector<64x16xf32>
    %372 = vector.extract_strided_slice %160 {offsets = [48, 0], sizes = [16, 16], strides = [1, 1]} : vector<576x16xbf16> to vector<16x16xbf16>
    %373 = vector.extract_strided_slice %160 {offsets = [112, 0], sizes = [16, 16], strides = [1, 1]} : vector<576x16xbf16> to vector<16x16xbf16>
    %374 = vector.extract_strided_slice %160 {offsets = [176, 0], sizes = [16, 16], strides = [1, 1]} : vector<576x16xbf16> to vector<16x16xbf16>
    %375 = vector.extract_strided_slice %160 {offsets = [240, 0], sizes = [16, 16], strides = [1, 1]} : vector<576x16xbf16> to vector<16x16xbf16>
    %376 = vector.extract_strided_slice %160 {offsets = [304, 0], sizes = [16, 16], strides = [1, 1]} : vector<576x16xbf16> to vector<16x16xbf16>
    %377 = vector.extract_strided_slice %160 {offsets = [368, 0], sizes = [16, 16], strides = [1, 1]} : vector<576x16xbf16> to vector<16x16xbf16>
    %378 = vector.extract_strided_slice %160 {offsets = [432, 0], sizes = [16, 16], strides = [1, 1]} : vector<576x16xbf16> to vector<16x16xbf16>
    %379 = vector.extract_strided_slice %160 {offsets = [496, 0], sizes = [16, 16], strides = [1, 1]} : vector<576x16xbf16> to vector<16x16xbf16>
    %380 = vector.extract_strided_slice %160 {offsets = [560, 0], sizes = [16, 16], strides = [1, 1]} : vector<576x16xbf16> to vector<16x16xbf16>
    %381 = tpu.concatenate %372, %373, %374, %375, %376, %377, %378, %379, %380 in 0 : vector<16x16xbf16>, vector<16x16xbf16>, vector<16x16xbf16>, vector<16x16xbf16>, vector<16x16xbf16>, vector<16x16xbf16>, vector<16x16xbf16>, vector<16x16xbf16>, vector<16x16xbf16> -> vector<144x16xbf16>
    %cst_78 = arith.constant 0.000000e+00 : f32
    %382 = vector.broadcast %cst_78 : f32 to vector<1x8x1x16xf32>
    %383 = tpu.concatenate %382, %159, %382 in 2 : vector<1x8x1x16xf32>, vector<1x8x8x16xf32>, vector<1x8x1x16xf32> -> vector<1x8x10x16xf32>
    %cst_79 = arith.constant 0.000000e+00 : f32
    %384 = vector.broadcast %cst_79 : f32 to vector<1x1x10x16xf32>
    %385 = tpu.concatenate %384, %383, %384 in 1 : vector<1x1x10x16xf32>, vector<1x8x10x16xf32>, vector<1x1x10x16xf32> -> vector<1x10x10x16xf32>
    %cst_80 = arith.constant 0.000000e+00 : f32
    %386 = vector.broadcast %cst_80 : f32 to vector<64x16xf32>
    %387 = vector.extract_strided_slice %385 {offsets = [0, 0, 0, 0], sizes = [1, 8, 8, 16], strides = [1, 1, 1, 1]} : vector<1x10x10x16xf32> to vector<1x8x8x16xf32>
    %388 = vector.shape_cast %387 : vector<1x8x8x16xf32> to vector<64x16xf32>
    %389 = arith.truncf %388 : vector<64x16xf32> to vector<64x16xbf16>
    %390 = vector.extract_strided_slice %381 {offsets = [0, 0], sizes = [16, 16], strides = [1, 1]} : vector<144x16xbf16> to vector<16x16xbf16>
    %cst_81 = arith.constant dense<0.000000e+00> : vector<64x16xf32>
    %391 = tpu.matmul %389, %390, %cst_81 {dimension_numbers = #tpu.dot_dimension_numbers<[1], [0], [0], [1], [0, 0, 1, 1], [], []>} : vector<64x16xbf16>, vector<16x16xbf16>, vector<64x16xf32> -> vector<64x16xf32>
    %392 = arith.addf %386, %391 : vector<64x16xf32>
    %393 = vector.extract_strided_slice %385 {offsets = [0, 0, 1, 0], sizes = [1, 8, 8, 16], strides = [1, 1, 1, 1]} : vector<1x10x10x16xf32> to vector<1x8x8x16xf32>
    %394 = vector.shape_cast %393 : vector<1x8x8x16xf32> to vector<64x16xf32>
    %395 = arith.truncf %394 : vector<64x16xf32> to vector<64x16xbf16>
    %396 = vector.extract_strided_slice %381 {offsets = [16, 0], sizes = [16, 16], strides = [1, 1]} : vector<144x16xbf16> to vector<16x16xbf16>
    %cst_82 = arith.constant dense<0.000000e+00> : vector<64x16xf32>
    %397 = tpu.matmul %395, %396, %cst_82 {dimension_numbers = #tpu.dot_dimension_numbers<[1], [0], [0], [1], [0, 0, 1, 1], [], []>} : vector<64x16xbf16>, vector<16x16xbf16>, vector<64x16xf32> -> vector<64x16xf32>
    %398 = arith.addf %392, %397 : vector<64x16xf32>
    %399 = vector.extract_strided_slice %385 {offsets = [0, 0, 2, 0], sizes = [1, 8, 8, 16], strides = [1, 1, 1, 1]} : vector<1x10x10x16xf32> to vector<1x8x8x16xf32>
    %400 = vector.shape_cast %399 : vector<1x8x8x16xf32> to vector<64x16xf32>
    %401 = arith.truncf %400 : vector<64x16xf32> to vector<64x16xbf16>
    %402 = vector.extract_strided_slice %381 {offsets = [32, 0], sizes = [16, 16], strides = [1, 1]} : vector<144x16xbf16> to vector<16x16xbf16>
    %cst_83 = arith.constant dense<0.000000e+00> : vector<64x16xf32>
    %403 = tpu.matmul %401, %402, %cst_83 {dimension_numbers = #tpu.dot_dimension_numbers<[1], [0], [0], [1], [0, 0, 1, 1], [], []>} : vector<64x16xbf16>, vector<16x16xbf16>, vector<64x16xf32> -> vector<64x16xf32>
    %404 = arith.addf %398, %403 : vector<64x16xf32>
    %405 = vector.extract_strided_slice %385 {offsets = [0, 1, 0, 0], sizes = [1, 8, 8, 16], strides = [1, 1, 1, 1]} : vector<1x10x10x16xf32> to vector<1x8x8x16xf32>
    %406 = vector.shape_cast %405 : vector<1x8x8x16xf32> to vector<64x16xf32>
    %407 = arith.truncf %406 : vector<64x16xf32> to vector<64x16xbf16>
    %408 = vector.extract_strided_slice %381 {offsets = [48, 0], sizes = [16, 16], strides = [1, 1]} : vector<144x16xbf16> to vector<16x16xbf16>
    %cst_84 = arith.constant dense<0.000000e+00> : vector<64x16xf32>
    %409 = tpu.matmul %407, %408, %cst_84 {dimension_numbers = #tpu.dot_dimension_numbers<[1], [0], [0], [1], [0, 0, 1, 1], [], []>} : vector<64x16xbf16>, vector<16x16xbf16>, vector<64x16xf32> -> vector<64x16xf32>
    %410 = arith.addf %404, %409 : vector<64x16xf32>
    %411 = vector.extract_strided_slice %385 {offsets = [0, 1, 1, 0], sizes = [1, 8, 8, 16], strides = [1, 1, 1, 1]} : vector<1x10x10x16xf32> to vector<1x8x8x16xf32>
    %412 = vector.shape_cast %411 : vector<1x8x8x16xf32> to vector<64x16xf32>
    %413 = arith.truncf %412 : vector<64x16xf32> to vector<64x16xbf16>
    %414 = vector.extract_strided_slice %381 {offsets = [64, 0], sizes = [16, 16], strides = [1, 1]} : vector<144x16xbf16> to vector<16x16xbf16>
    %cst_85 = arith.constant dense<0.000000e+00> : vector<64x16xf32>
    %415 = tpu.matmul %413, %414, %cst_85 {dimension_numbers = #tpu.dot_dimension_numbers<[1], [0], [0], [1], [0, 0, 1, 1], [], []>} : vector<64x16xbf16>, vector<16x16xbf16>, vector<64x16xf32> -> vector<64x16xf32>
    %416 = arith.addf %410, %415 : vector<64x16xf32>
    %417 = vector.extract_strided_slice %385 {offsets = [0, 1, 2, 0], sizes = [1, 8, 8, 16], strides = [1, 1, 1, 1]} : vector<1x10x10x16xf32> to vector<1x8x8x16xf32>
    %418 = vector.shape_cast %417 : vector<1x8x8x16xf32> to vector<64x16xf32>
    %419 = arith.truncf %418 : vector<64x16xf32> to vector<64x16xbf16>
    %420 = vector.extract_strided_slice %381 {offsets = [80, 0], sizes = [16, 16], strides = [1, 1]} : vector<144x16xbf16> to vector<16x16xbf16>
    %cst_86 = arith.constant dense<0.000000e+00> : vector<64x16xf32>
    %421 = tpu.matmul %419, %420, %cst_86 {dimension_numbers = #tpu.dot_dimension_numbers<[1], [0], [0], [1], [0, 0, 1, 1], [], []>} : vector<64x16xbf16>, vector<16x16xbf16>, vector<64x16xf32> -> vector<64x16xf32>
    %422 = arith.addf %416, %421 : vector<64x16xf32>
    %423 = vector.extract_strided_slice %385 {offsets = [0, 2, 0, 0], sizes = [1, 8, 8, 16], strides = [1, 1, 1, 1]} : vector<1x10x10x16xf32> to vector<1x8x8x16xf32>
    %424 = vector.shape_cast %423 : vector<1x8x8x16xf32> to vector<64x16xf32>
    %425 = arith.truncf %424 : vector<64x16xf32> to vector<64x16xbf16>
    %426 = vector.extract_strided_slice %381 {offsets = [96, 0], sizes = [16, 16], strides = [1, 1]} : vector<144x16xbf16> to vector<16x16xbf16>
    %cst_87 = arith.constant dense<0.000000e+00> : vector<64x16xf32>
    %427 = tpu.matmul %425, %426, %cst_87 {dimension_numbers = #tpu.dot_dimension_numbers<[1], [0], [0], [1], [0, 0, 1, 1], [], []>} : vector<64x16xbf16>, vector<16x16xbf16>, vector<64x16xf32> -> vector<64x16xf32>
    %428 = arith.addf %422, %427 : vector<64x16xf32>
    %429 = vector.extract_strided_slice %385 {offsets = [0, 2, 1, 0], sizes = [1, 8, 8, 16], strides = [1, 1, 1, 1]} : vector<1x10x10x16xf32> to vector<1x8x8x16xf32>
    %430 = vector.shape_cast %429 : vector<1x8x8x16xf32> to vector<64x16xf32>
    %431 = arith.truncf %430 : vector<64x16xf32> to vector<64x16xbf16>
    %432 = vector.extract_strided_slice %381 {offsets = [112, 0], sizes = [16, 16], strides = [1, 1]} : vector<144x16xbf16> to vector<16x16xbf16>
    %cst_88 = arith.constant dense<0.000000e+00> : vector<64x16xf32>
    %433 = tpu.matmul %431, %432, %cst_88 {dimension_numbers = #tpu.dot_dimension_numbers<[1], [0], [0], [1], [0, 0, 1, 1], [], []>} : vector<64x16xbf16>, vector<16x16xbf16>, vector<64x16xf32> -> vector<64x16xf32>
    %434 = arith.addf %428, %433 : vector<64x16xf32>
    %435 = vector.extract_strided_slice %385 {offsets = [0, 2, 2, 0], sizes = [1, 8, 8, 16], strides = [1, 1, 1, 1]} : vector<1x10x10x16xf32> to vector<1x8x8x16xf32>
    %436 = vector.shape_cast %435 : vector<1x8x8x16xf32> to vector<64x16xf32>
    %437 = arith.truncf %436 : vector<64x16xf32> to vector<64x16xbf16>
    %438 = vector.extract_strided_slice %381 {offsets = [128, 0], sizes = [16, 16], strides = [1, 1]} : vector<144x16xbf16> to vector<16x16xbf16>
    %cst_89 = arith.constant dense<0.000000e+00> : vector<64x16xf32>
    %439 = tpu.matmul %437, %438, %cst_89 {dimension_numbers = #tpu.dot_dimension_numbers<[1], [0], [0], [1], [0, 0, 1, 1], [], []>} : vector<64x16xbf16>, vector<16x16xbf16>, vector<64x16xf32> -> vector<64x16xf32>
    %440 = arith.addf %434, %439 : vector<64x16xf32>
    %441 = arith.addf %371, %440 : vector<64x16xf32>
    %c4 = arith.constant 4 : index
    %c0_90 = arith.constant 0 : index
    %442 = vector.load %arg3[%c4, %c0_90] : memref<8x128xf32, #tpu.memory_space<vmem>>, vector<1x16xf32>
    %443 = vector.broadcast %442 : vector<1x16xf32> to vector<64x16xf32>
    %444 = arith.addf %441, %443 : vector<64x16xf32>
    %445 = vector.shape_cast %444 : vector<64x16xf32> to vector<1x8x8x16xf32>
    %c824 = arith.constant 824 : index
    %c0_91 = arith.constant 0 : index
    %446 = vector.load %arg2[%c824, %c0_91] : memref<1256x128xbf16, #tpu.memory_space<vmem>>, vector<144x64xbf16>
    %c5 = arith.constant 5 : index
    %c0_92 = arith.constant 0 : index
    %447 = vector.load %arg3[%c5, %c0_92] : memref<8x128xf32, #tpu.memory_space<vmem>>, vector<1x32xf32>
    %c6 = arith.constant 6 : index
    %c0_93 = arith.constant 0 : index
    %448 = vector.load %arg3[%c6, %c0_93] : memref<8x128xf32, #tpu.memory_space<vmem>>, vector<1x32xf32>
    %cst_94 = arith.constant 0.000000e+00 : f32
    %449 = vector.broadcast %cst_94 : f32 to vector<1x8x1x16xf32>
    %450 = tpu.concatenate %449, %445, %449 in 2 : vector<1x8x1x16xf32>, vector<1x8x8x16xf32>, vector<1x8x1x16xf32> -> vector<1x8x10x16xf32>
    %cst_95 = arith.constant 0.000000e+00 : f32
    %451 = vector.broadcast %cst_95 : f32 to vector<1x1x10x16xf32>
    %452 = tpu.concatenate %451, %450, %451 in 1 : vector<1x1x10x16xf32>, vector<1x8x10x16xf32>, vector<1x1x10x16xf32> -> vector<1x10x10x16xf32>
    %cst_96 = arith.constant 0.000000e+00 : f32
    %453 = vector.broadcast %cst_96 : f32 to vector<64x64xf32>
    %454 = vector.extract_strided_slice %452 {offsets = [0, 0, 0, 0], sizes = [1, 8, 8, 16], strides = [1, 1, 1, 1]} : vector<1x10x10x16xf32> to vector<1x8x8x16xf32>
    %455 = vector.shape_cast %454 : vector<1x8x8x16xf32> to vector<64x16xf32>
    %456 = arith.truncf %455 : vector<64x16xf32> to vector<64x16xbf16>
    %457 = vector.extract_strided_slice %446 {offsets = [0, 0], sizes = [16, 64], strides = [1, 1]} : vector<144x64xbf16> to vector<16x64xbf16>
    %cst_97 = arith.constant dense<0.000000e+00> : vector<64x64xf32>
    %458 = tpu.matmul %456, %457, %cst_97 {dimension_numbers = #tpu.dot_dimension_numbers<[1], [0], [0], [1], [0, 0, 1, 1], [], []>} : vector<64x16xbf16>, vector<16x64xbf16>, vector<64x64xf32> -> vector<64x64xf32>
    %459 = arith.addf %453, %458 : vector<64x64xf32>
    %460 = vector.extract_strided_slice %452 {offsets = [0, 0, 1, 0], sizes = [1, 8, 8, 16], strides = [1, 1, 1, 1]} : vector<1x10x10x16xf32> to vector<1x8x8x16xf32>
    %461 = vector.shape_cast %460 : vector<1x8x8x16xf32> to vector<64x16xf32>
    %462 = arith.truncf %461 : vector<64x16xf32> to vector<64x16xbf16>
    %463 = vector.extract_strided_slice %446 {offsets = [16, 0], sizes = [16, 64], strides = [1, 1]} : vector<144x64xbf16> to vector<16x64xbf16>
    %cst_98 = arith.constant dense<0.000000e+00> : vector<64x64xf32>
    %464 = tpu.matmul %462, %463, %cst_98 {dimension_numbers = #tpu.dot_dimension_numbers<[1], [0], [0], [1], [0, 0, 1, 1], [], []>} : vector<64x16xbf16>, vector<16x64xbf16>, vector<64x64xf32> -> vector<64x64xf32>
    %465 = arith.addf %459, %464 : vector<64x64xf32>
    %466 = vector.extract_strided_slice %452 {offsets = [0, 0, 2, 0], sizes = [1, 8, 8, 16], strides = [1, 1, 1, 1]} : vector<1x10x10x16xf32> to vector<1x8x8x16xf32>
    %467 = vector.shape_cast %466 : vector<1x8x8x16xf32> to vector<64x16xf32>
    %468 = arith.truncf %467 : vector<64x16xf32> to vector<64x16xbf16>
    %469 = vector.extract_strided_slice %446 {offsets = [32, 0], sizes = [16, 64], strides = [1, 1]} : vector<144x64xbf16> to vector<16x64xbf16>
    %cst_99 = arith.constant dense<0.000000e+00> : vector<64x64xf32>
    %470 = tpu.matmul %468, %469, %cst_99 {dimension_numbers = #tpu.dot_dimension_numbers<[1], [0], [0], [1], [0, 0, 1, 1], [], []>} : vector<64x16xbf16>, vector<16x64xbf16>, vector<64x64xf32> -> vector<64x64xf32>
    %471 = arith.addf %465, %470 : vector<64x64xf32>
    %472 = vector.extract_strided_slice %452 {offsets = [0, 1, 0, 0], sizes = [1, 8, 8, 16], strides = [1, 1, 1, 1]} : vector<1x10x10x16xf32> to vector<1x8x8x16xf32>
    %473 = vector.shape_cast %472 : vector<1x8x8x16xf32> to vector<64x16xf32>
    %474 = arith.truncf %473 : vector<64x16xf32> to vector<64x16xbf16>
    %475 = vector.extract_strided_slice %446 {offsets = [48, 0], sizes = [16, 64], strides = [1, 1]} : vector<144x64xbf16> to vector<16x64xbf16>
    %cst_100 = arith.constant dense<0.000000e+00> : vector<64x64xf32>
    %476 = tpu.matmul %474, %475, %cst_100 {dimension_numbers = #tpu.dot_dimension_numbers<[1], [0], [0], [1], [0, 0, 1, 1], [], []>} : vector<64x16xbf16>, vector<16x64xbf16>, vector<64x64xf32> -> vector<64x64xf32>
    %477 = arith.addf %471, %476 : vector<64x64xf32>
    %478 = vector.extract_strided_slice %452 {offsets = [0, 1, 1, 0], sizes = [1, 8, 8, 16], strides = [1, 1, 1, 1]} : vector<1x10x10x16xf32> to vector<1x8x8x16xf32>
    %479 = vector.shape_cast %478 : vector<1x8x8x16xf32> to vector<64x16xf32>
    %480 = arith.truncf %479 : vector<64x16xf32> to vector<64x16xbf16>
    %481 = vector.extract_strided_slice %446 {offsets = [64, 0], sizes = [16, 64], strides = [1, 1]} : vector<144x64xbf16> to vector<16x64xbf16>
    %cst_101 = arith.constant dense<0.000000e+00> : vector<64x64xf32>
    %482 = tpu.matmul %480, %481, %cst_101 {dimension_numbers = #tpu.dot_dimension_numbers<[1], [0], [0], [1], [0, 0, 1, 1], [], []>} : vector<64x16xbf16>, vector<16x64xbf16>, vector<64x64xf32> -> vector<64x64xf32>
    %483 = arith.addf %477, %482 : vector<64x64xf32>
    %484 = vector.extract_strided_slice %452 {offsets = [0, 1, 2, 0], sizes = [1, 8, 8, 16], strides = [1, 1, 1, 1]} : vector<1x10x10x16xf32> to vector<1x8x8x16xf32>
    %485 = vector.shape_cast %484 : vector<1x8x8x16xf32> to vector<64x16xf32>
    %486 = arith.truncf %485 : vector<64x16xf32> to vector<64x16xbf16>
    %487 = vector.extract_strided_slice %446 {offsets = [80, 0], sizes = [16, 64], strides = [1, 1]} : vector<144x64xbf16> to vector<16x64xbf16>
    %cst_102 = arith.constant dense<0.000000e+00> : vector<64x64xf32>
    %488 = tpu.matmul %486, %487, %cst_102 {dimension_numbers = #tpu.dot_dimension_numbers<[1], [0], [0], [1], [0, 0, 1, 1], [], []>} : vector<64x16xbf16>, vector<16x64xbf16>, vector<64x64xf32> -> vector<64x64xf32>
    %489 = arith.addf %483, %488 : vector<64x64xf32>
    %490 = vector.extract_strided_slice %452 {offsets = [0, 2, 0, 0], sizes = [1, 8, 8, 16], strides = [1, 1, 1, 1]} : vector<1x10x10x16xf32> to vector<1x8x8x16xf32>
    %491 = vector.shape_cast %490 : vector<1x8x8x16xf32> to vector<64x16xf32>
    %492 = arith.truncf %491 : vector<64x16xf32> to vector<64x16xbf16>
    %493 = vector.extract_strided_slice %446 {offsets = [96, 0], sizes = [16, 64], strides = [1, 1]} : vector<144x64xbf16> to vector<16x64xbf16>
    %cst_103 = arith.constant dense<0.000000e+00> : vector<64x64xf32>
    %494 = tpu.matmul %492, %493, %cst_103 {dimension_numbers = #tpu.dot_dimension_numbers<[1], [0], [0], [1], [0, 0, 1, 1], [], []>} : vector<64x16xbf16>, vector<16x64xbf16>, vector<64x64xf32> -> vector<64x64xf32>
    %495 = arith.addf %489, %494 : vector<64x64xf32>
    %496 = vector.extract_strided_slice %452 {offsets = [0, 2, 1, 0], sizes = [1, 8, 8, 16], strides = [1, 1, 1, 1]} : vector<1x10x10x16xf32> to vector<1x8x8x16xf32>
    %497 = vector.shape_cast %496 : vector<1x8x8x16xf32> to vector<64x16xf32>
    %498 = arith.truncf %497 : vector<64x16xf32> to vector<64x16xbf16>
    %499 = vector.extract_strided_slice %446 {offsets = [112, 0], sizes = [16, 64], strides = [1, 1]} : vector<144x64xbf16> to vector<16x64xbf16>
    %cst_104 = arith.constant dense<0.000000e+00> : vector<64x64xf32>
    %500 = tpu.matmul %498, %499, %cst_104 {dimension_numbers = #tpu.dot_dimension_numbers<[1], [0], [0], [1], [0, 0, 1, 1], [], []>} : vector<64x16xbf16>, vector<16x64xbf16>, vector<64x64xf32> -> vector<64x64xf32>
    %501 = arith.addf %495, %500 : vector<64x64xf32>
    %502 = vector.extract_strided_slice %452 {offsets = [0, 2, 2, 0], sizes = [1, 8, 8, 16], strides = [1, 1, 1, 1]} : vector<1x10x10x16xf32> to vector<1x8x8x16xf32>
    %503 = vector.shape_cast %502 : vector<1x8x8x16xf32> to vector<64x16xf32>
    %504 = arith.truncf %503 : vector<64x16xf32> to vector<64x16xbf16>
    %505 = vector.extract_strided_slice %446 {offsets = [128, 0], sizes = [16, 64], strides = [1, 1]} : vector<144x64xbf16> to vector<16x64xbf16>
    %cst_105 = arith.constant dense<0.000000e+00> : vector<64x64xf32>
    %506 = tpu.matmul %504, %505, %cst_105 {dimension_numbers = #tpu.dot_dimension_numbers<[1], [0], [0], [1], [0, 0, 1, 1], [], []>} : vector<64x16xbf16>, vector<16x64xbf16>, vector<64x64xf32> -> vector<64x64xf32>
    %507 = arith.addf %501, %506 : vector<64x64xf32>
    %508 = vector.extract_strided_slice %507 {offsets = [0, 0], sizes = [64, 32], strides = [1, 1]} : vector<64x64xf32> to vector<64x32xf32>
    %509 = vector.broadcast %447 : vector<1x32xf32> to vector<64x32xf32>
    %510 = arith.addf %508, %509 : vector<64x32xf32>
    %cst_106 = arith.constant 0.000000e+00 : f32
    %511 = vector.broadcast %cst_106 : f32 to vector<64x32xf32>
    %512 = arith.maximumf %510, %511 : vector<64x32xf32>
    %513 = vector.extract_strided_slice %507 {offsets = [0, 32], sizes = [64, 32], strides = [1, 1]} : vector<64x64xf32> to vector<64x32xf32>
    %514 = vector.broadcast %448 : vector<1x32xf32> to vector<64x32xf32>
    %515 = arith.addf %513, %514 : vector<64x32xf32>
    %516 = vector.shape_cast %512 : vector<64x32xf32> to vector<1x8x8x32xf32>
    %517 = vector.shape_cast %515 : vector<64x32xf32> to vector<1x8x8x32xf32>
    %c968 = arith.constant 968 : index
    %c0_107 = arith.constant 0 : index
    %518 = vector.load %arg2[%c968, %c0_107] : memref<1256x128xbf16, #tpu.memory_space<vmem>>, vector<288x32xbf16>
    %c7 = arith.constant 7 : index
    %c0_108 = arith.constant 0 : index
    %519 = vector.load %arg3[%c7, %c0_108] : memref<8x128xf32, #tpu.memory_space<vmem>>, vector<1x32xf32>
    %cst_109 = arith.constant 0.000000e+00 : f32
    %520 = vector.broadcast %cst_109 : f32 to vector<1x8x1x32xf32>
    %521 = tpu.concatenate %520, %516, %520 in 2 : vector<1x8x1x32xf32>, vector<1x8x8x32xf32>, vector<1x8x1x32xf32> -> vector<1x8x10x32xf32>
    %cst_110 = arith.constant 0.000000e+00 : f32
    %522 = vector.broadcast %cst_110 : f32 to vector<1x1x10x32xf32>
    %523 = tpu.concatenate %522, %521, %522 in 1 : vector<1x1x10x32xf32>, vector<1x8x10x32xf32>, vector<1x1x10x32xf32> -> vector<1x10x10x32xf32>
    %cst_111 = arith.constant 0.000000e+00 : f32
    %524 = vector.broadcast %cst_111 : f32 to vector<64x32xf32>
    %525 = vector.extract_strided_slice %523 {offsets = [0, 0, 0, 0], sizes = [1, 8, 8, 32], strides = [1, 1, 1, 1]} : vector<1x10x10x32xf32> to vector<1x8x8x32xf32>
    %526 = vector.shape_cast %525 : vector<1x8x8x32xf32> to vector<64x32xf32>
    %527 = arith.truncf %526 : vector<64x32xf32> to vector<64x32xbf16>
    %528 = vector.extract_strided_slice %518 {offsets = [0, 0], sizes = [32, 32], strides = [1, 1]} : vector<288x32xbf16> to vector<32x32xbf16>
    %cst_112 = arith.constant dense<0.000000e+00> : vector<64x32xf32>
    %529 = tpu.matmul %527, %528, %cst_112 {dimension_numbers = #tpu.dot_dimension_numbers<[1], [0], [0], [1], [0, 0, 1, 1], [], []>} : vector<64x32xbf16>, vector<32x32xbf16>, vector<64x32xf32> -> vector<64x32xf32>
    %530 = arith.addf %524, %529 : vector<64x32xf32>
    %531 = vector.extract_strided_slice %523 {offsets = [0, 0, 1, 0], sizes = [1, 8, 8, 32], strides = [1, 1, 1, 1]} : vector<1x10x10x32xf32> to vector<1x8x8x32xf32>
    %532 = vector.shape_cast %531 : vector<1x8x8x32xf32> to vector<64x32xf32>
    %533 = arith.truncf %532 : vector<64x32xf32> to vector<64x32xbf16>
    %534 = vector.extract_strided_slice %518 {offsets = [32, 0], sizes = [32, 32], strides = [1, 1]} : vector<288x32xbf16> to vector<32x32xbf16>
    %cst_113 = arith.constant dense<0.000000e+00> : vector<64x32xf32>
    %535 = tpu.matmul %533, %534, %cst_113 {dimension_numbers = #tpu.dot_dimension_numbers<[1], [0], [0], [1], [0, 0, 1, 1], [], []>} : vector<64x32xbf16>, vector<32x32xbf16>, vector<64x32xf32> -> vector<64x32xf32>
    %536 = arith.addf %530, %535 : vector<64x32xf32>
    %537 = vector.extract_strided_slice %523 {offsets = [0, 0, 2, 0], sizes = [1, 8, 8, 32], strides = [1, 1, 1, 1]} : vector<1x10x10x32xf32> to vector<1x8x8x32xf32>
    %538 = vector.shape_cast %537 : vector<1x8x8x32xf32> to vector<64x32xf32>
    %539 = arith.truncf %538 : vector<64x32xf32> to vector<64x32xbf16>
    %540 = vector.extract_strided_slice %518 {offsets = [64, 0], sizes = [32, 32], strides = [1, 1]} : vector<288x32xbf16> to vector<32x32xbf16>
    %cst_114 = arith.constant dense<0.000000e+00> : vector<64x32xf32>
    %541 = tpu.matmul %539, %540, %cst_114 {dimension_numbers = #tpu.dot_dimension_numbers<[1], [0], [0], [1], [0, 0, 1, 1], [], []>} : vector<64x32xbf16>, vector<32x32xbf16>, vector<64x32xf32> -> vector<64x32xf32>
    %542 = arith.addf %536, %541 : vector<64x32xf32>
    %543 = vector.extract_strided_slice %523 {offsets = [0, 1, 0, 0], sizes = [1, 8, 8, 32], strides = [1, 1, 1, 1]} : vector<1x10x10x32xf32> to vector<1x8x8x32xf32>
    %544 = vector.shape_cast %543 : vector<1x8x8x32xf32> to vector<64x32xf32>
    %545 = arith.truncf %544 : vector<64x32xf32> to vector<64x32xbf16>
    %546 = vector.extract_strided_slice %518 {offsets = [96, 0], sizes = [32, 32], strides = [1, 1]} : vector<288x32xbf16> to vector<32x32xbf16>
    %cst_115 = arith.constant dense<0.000000e+00> : vector<64x32xf32>
    %547 = tpu.matmul %545, %546, %cst_115 {dimension_numbers = #tpu.dot_dimension_numbers<[1], [0], [0], [1], [0, 0, 1, 1], [], []>} : vector<64x32xbf16>, vector<32x32xbf16>, vector<64x32xf32> -> vector<64x32xf32>
    %548 = arith.addf %542, %547 : vector<64x32xf32>
    %549 = vector.extract_strided_slice %523 {offsets = [0, 1, 1, 0], sizes = [1, 8, 8, 32], strides = [1, 1, 1, 1]} : vector<1x10x10x32xf32> to vector<1x8x8x32xf32>
    %550 = vector.shape_cast %549 : vector<1x8x8x32xf32> to vector<64x32xf32>
    %551 = arith.truncf %550 : vector<64x32xf32> to vector<64x32xbf16>
    %552 = vector.extract_strided_slice %518 {offsets = [128, 0], sizes = [32, 32], strides = [1, 1]} : vector<288x32xbf16> to vector<32x32xbf16>
    %cst_116 = arith.constant dense<0.000000e+00> : vector<64x32xf32>
    %553 = tpu.matmul %551, %552, %cst_116 {dimension_numbers = #tpu.dot_dimension_numbers<[1], [0], [0], [1], [0, 0, 1, 1], [], []>} : vector<64x32xbf16>, vector<32x32xbf16>, vector<64x32xf32> -> vector<64x32xf32>
    %554 = arith.addf %548, %553 : vector<64x32xf32>
    %555 = vector.extract_strided_slice %523 {offsets = [0, 1, 2, 0], sizes = [1, 8, 8, 32], strides = [1, 1, 1, 1]} : vector<1x10x10x32xf32> to vector<1x8x8x32xf32>
    %556 = vector.shape_cast %555 : vector<1x8x8x32xf32> to vector<64x32xf32>
    %557 = arith.truncf %556 : vector<64x32xf32> to vector<64x32xbf16>
    %558 = vector.extract_strided_slice %518 {offsets = [160, 0], sizes = [32, 32], strides = [1, 1]} : vector<288x32xbf16> to vector<32x32xbf16>
    %cst_117 = arith.constant dense<0.000000e+00> : vector<64x32xf32>
    %559 = tpu.matmul %557, %558, %cst_117 {dimension_numbers = #tpu.dot_dimension_numbers<[1], [0], [0], [1], [0, 0, 1, 1], [], []>} : vector<64x32xbf16>, vector<32x32xbf16>, vector<64x32xf32> -> vector<64x32xf32>
    %560 = arith.addf %554, %559 : vector<64x32xf32>
    %561 = vector.extract_strided_slice %523 {offsets = [0, 2, 0, 0], sizes = [1, 8, 8, 32], strides = [1, 1, 1, 1]} : vector<1x10x10x32xf32> to vector<1x8x8x32xf32>
    %562 = vector.shape_cast %561 : vector<1x8x8x32xf32> to vector<64x32xf32>
    %563 = arith.truncf %562 : vector<64x32xf32> to vector<64x32xbf16>
    %564 = vector.extract_strided_slice %518 {offsets = [192, 0], sizes = [32, 32], strides = [1, 1]} : vector<288x32xbf16> to vector<32x32xbf16>
    %cst_118 = arith.constant dense<0.000000e+00> : vector<64x32xf32>
    %565 = tpu.matmul %563, %564, %cst_118 {dimension_numbers = #tpu.dot_dimension_numbers<[1], [0], [0], [1], [0, 0, 1, 1], [], []>} : vector<64x32xbf16>, vector<32x32xbf16>, vector<64x32xf32> -> vector<64x32xf32>
    %566 = arith.addf %560, %565 : vector<64x32xf32>
    %567 = vector.extract_strided_slice %523 {offsets = [0, 2, 1, 0], sizes = [1, 8, 8, 32], strides = [1, 1, 1, 1]} : vector<1x10x10x32xf32> to vector<1x8x8x32xf32>
    %568 = vector.shape_cast %567 : vector<1x8x8x32xf32> to vector<64x32xf32>
    %569 = arith.truncf %568 : vector<64x32xf32> to vector<64x32xbf16>
    %570 = vector.extract_strided_slice %518 {offsets = [224, 0], sizes = [32, 32], strides = [1, 1]} : vector<288x32xbf16> to vector<32x32xbf16>
    %cst_119 = arith.constant dense<0.000000e+00> : vector<64x32xf32>
    %571 = tpu.matmul %569, %570, %cst_119 {dimension_numbers = #tpu.dot_dimension_numbers<[1], [0], [0], [1], [0, 0, 1, 1], [], []>} : vector<64x32xbf16>, vector<32x32xbf16>, vector<64x32xf32> -> vector<64x32xf32>
    %572 = arith.addf %566, %571 : vector<64x32xf32>
    %573 = vector.extract_strided_slice %523 {offsets = [0, 2, 2, 0], sizes = [1, 8, 8, 32], strides = [1, 1, 1, 1]} : vector<1x10x10x32xf32> to vector<1x8x8x32xf32>
    %574 = vector.shape_cast %573 : vector<1x8x8x32xf32> to vector<64x32xf32>
    %575 = arith.truncf %574 : vector<64x32xf32> to vector<64x32xbf16>
    %576 = vector.extract_strided_slice %518 {offsets = [256, 0], sizes = [32, 32], strides = [1, 1]} : vector<288x32xbf16> to vector<32x32xbf16>
    %cst_120 = arith.constant dense<0.000000e+00> : vector<64x32xf32>
    %577 = tpu.matmul %575, %576, %cst_120 {dimension_numbers = #tpu.dot_dimension_numbers<[1], [0], [0], [1], [0, 0, 1, 1], [], []>} : vector<64x32xbf16>, vector<32x32xbf16>, vector<64x32xf32> -> vector<64x32xf32>
    %578 = arith.addf %572, %577 : vector<64x32xf32>
    %579 = vector.broadcast %519 : vector<1x32xf32> to vector<64x32xf32>
    %580 = arith.addf %578, %579 : vector<64x32xf32>
    %cst_121 = arith.constant 0.000000e+00 : f32
    %581 = vector.broadcast %cst_121 : f32 to vector<64x32xf32>
    %582 = arith.maximumf %580, %581 : vector<64x32xf32>
    %583 = vector.shape_cast %582 : vector<64x32xf32> to vector<1x8x8x32xf32>
    %584 = arith.addf %583, %517 : vector<1x8x8x32xf32>
    %c0_122 = arith.constant 0 : index
    %c0_123 = arith.constant 0 : index
    %c0_124 = arith.constant 0 : index
    %c0_125 = arith.constant 0 : index
    %585 = vector.load %arg5[%c0_122, %c0_123, %c0_124, %c0_125] : memref<1x8x8x32xf32, #tpu.memory_space<vmem>>, vector<1x8x8x32xf32>
    tpu.vector_store %arg5[%c0_122, %c0_123, %c0_124, %c0_125], %584 {strides = array<i32>} : memref<1x8x8x32xf32, #tpu.memory_space<vmem>>, vector<1x8x8x32xf32>,
    return
  }
  func.func @transform_0(%arg0: i32) -> (i32, i32, i32) {
    %c0_i32 = arith.constant 0 : i32
    %c0_i32_0 = arith.constant 0 : i32
    %c0_i32_1 = arith.constant 0 : i32
    return %arg0, %c0_i32, %c0_i32_0 : i32, i32, i32
  }
  func.func @transform_1(%arg0: i32) -> (i32, i32) {
    %c0_i32 = arith.constant 0 : i32
    %c0_i32_0 = arith.constant 0 : i32
    %c0_i32_1 = arith.constant 0 : i32
    return %c0_i32, %c0_i32_0 : i32, i32
  }
  func.func @transform_2(%arg0: i32) -> (i32, i32) {
    %c0_i32 = arith.constant 0 : i32
    %c0_i32_0 = arith.constant 0 : i32
    %c0_i32_1 = arith.constant 0 : i32
    return %c0_i32, %c0_i32_0 : i32, i32
  }
  func.func @transform_3(%arg0: i32) -> (i32, i32) {
    %c0_i32 = arith.constant 0 : i32
    %c0_i32_0 = arith.constant 0 : i32
    %c0_i32_1 = arith.constant 0 : i32
    return %c0_i32, %c0_i32_0 : i32, i32
  }
  func.func @transform_4(%arg0: i32) -> (i32, i32, i32, i32) {
    %c0_i32 = arith.constant 0 : i32
    %c0_i32_0 = arith.constant 0 : i32
    %c0_i32_1 = arith.constant 0 : i32
    %c0_i32_2 = arith.constant 0 : i32
    return %arg0, %c0_i32, %c0_i32_0, %c0_i32_1 : i32, i32, i32, i32
  }
}

</mosaic_0001>

<bundles_post_ra>
// kernel: _encoder_forward_jit.1
= control target key start
LH: loop header
LB: loop body
LE: loop exit
PB: predicated region body
PF: predicated region fallthrough
CT: control target
= control target key end

     0   :  { %9 = vsyncpa [#allocation3], 0  ;;  %s14625_s0 = inlined_call_operand.vmem [shape: bf16[2,256,32], index: 0, kind: input, shape index: {}]   ;;  %s14626_s1 = inlined_call_operand.vmem [shape: bf16[1256,128], index: 1, kind: input, shape index: {}]   ;;  %s14627_s2 = inlined_call_operand.vmem [shape: f32[8,128], index: 2, kind: input, shape index: {}]   ;;  %s14628_s3 = inlined_call_operand.vmem [shape: bf16[256,256], index: 3, kind: input, shape index: {}]   ;;  %s14629_s4 = inlined_call_operand.hbm [shape: f32[2,8,8,32], index: 4, kind: output, shape index: {}]  }
   0x1   :  { %11 = vsyncpa [#allocation3 + $0x1], 0  ;;  %s9873_s15 = smov 0   ;;  %s9875_s16 = smov 0  }
   0x2   :  { %s9877_s17 = smov 0   ;;  %s9879_s18 = smov 0  }
   0x3 LB: > { %s9894_s19 = sadd.s32 4294967295, %s9838_s18   ;;  %s8578_s20 = sadd.s32 4294967294, %s9838_s18   ;;  %s9838_s18 = sphi %s9879_s18, %s15224_s18   ;;  %s9834_s17 = sphi %s9877_s17, %s15223_s17   ;;  %s9830_s16 = sphi %s9875_s16, %s15222_s16   ;;  %s9826_s15 = sphi %s9873_s15, %s15221_s15  }
   0x4   : > { %s9898_s21 = sadd.s32 1, %s9838_s18   ;;  %s113_s22 = sadd.s32 1, %s9834_s17 }
   0x5   : > { %s110_s23 = ssub.s32 %s9838_s18, %s9898_s21  ;;  %p123_p0 = scmp.ne.s32.totalorder %s9834_s17, %s9830_s16 }
   0x6   : > { %p111_p1 = scmp.eq.s32.totalorder %s110_s23, 0  ;;  %p124_p2 = scmp.eq.s32.totalorder %s9894_s19, 1 }
   0x7   : > { %p129_p3 = scmp.ne.s32.totalorder %s9830_s16, %s9826_s15  ;;  %p130_p4 = scmp.eq.s32.totalorder %s8578_s20, 1 }
   0x8   : > { %s9909_s24 = scalar_select %p111_p1, %s9834_s17, %s113_s22  }
   0x9   : > { %p9911_p5 = por %p124_p2, %p123_p0  ;;  %p9915_p6 = por %p130_p4, %p129_p3 }
   0xa   : > { %p8581_p7 = scmp.ge.s32.totalorder %s9838_s18, 1  ;;  %p165_p8 = scmp.lt.s32.totalorder %s9838_s18, 3 }
   0xc   : > { %p166_p9 = pnand %p8581_p7, %p165_p8 }
   0xe   : > { %169 = sbr.rel (%p166_p9) target bundleno = 3314 (0xcf2), region = 36 }
  0x13   : > { %v9612_v0 = vld [vmem:[%s14626_s1 + $0x8] sm:$0xff]  ;;  %p191_p10 = scmp.lt.s32.totalorder %s9894_s19, 1  ;;  %v9611_v1 = vld [vmem:[%s14626_s1] sm:$0xff]  ;;  %vm327_vm0 = vcmask 261120   ;;  %v466_v8 = vld [vmem:[%s14626_s1 + $0x14] sm:$0xf] }
  0x14   : > { %382 = vmatpush.bf16.msra.mxu0 %v9612_v0  ;;  %vm858_vm1 = vcmask 1043456   ;;  %v14632_v11 = vmov 0.0   ;;  %vm809_vm2 = vcmask 64512   ;;  %v465_v14 = vld [vmem:[%s14626_s1 + $0x10] sm:$0xf]  ;;  %vm508_vm3 = vcmask 1040384  }
  0x15   : > { %s192_s5 = scalar_select %p191_p10, %s9894_s19, 1  ;;  %v860_v10 = vsel %vm858_vm1, %v466_v8, 0  ;;  %v9952_v12 = vrot.slane %v14632_v11, 1  ;;  %v1000_v15 = vsel %vm858_vm1, %v465_v14, 0  ;;  %v9970_v17 = vld [vmem:[%s14627_s2] ss:$0 sm:$0xff] }
  0x16   : > { %869 = vmatpush.bf16.msra.mxu1 %v860_v10  ;;  %9718 = vmatpush.bf16.msra.mxu3 %v860_v10  ;;  %vm684_vm4 = vcmask 1046528   ;;  %vm1091_vm5 = vcmask 1045504   ;;  %s9842_s20 = smov 16   ;;  %vm2612_vm6 = vcmask 130048   ;;  %s9844_s8 = smov 32  }
  0x17   : > { %s9594_s6 = sshll.u32 %s192_s5, 7  ;;  %14768 = vst [vmem:[#allocation5_spill] sm:$0xff] %v9952_v12  ;;  %v9956_v13 = vpack.c.bf16 %v9952_v12, %v9952_v12  ;;  %9719 = vmatpush.bf16.msra.mxu2 %v1000_v15  ;;  %s9845_s10 = smov 96  }
  0x18   : > { %s9932_s9 = scalar_lea.vmem %s14625_s0, %s9594_s6  ;;  %383 = vmatpush.bf16.msra.mxu0 %v9611_v1  ;;  %s188_s22 = sand.u32 1, %s9830_s16  }
  0x19   : > { %v9595_v2 = vld [vmem:[%s9932_s9] sm:$0xff]  ;;  %v9596_v3 = vld [vmem:[%s9932_s9 + $0x8] sm:$0xff]  ;;  %v9597_v4 = vld [vmem:[%s9932_s9 + $0x10] sm:$0xff]  ;;  %14769 = vst [vmem:[#allocation6_spill] sm:$0xff] %v9956_v13  ;;  %8673 = vmatmul.msk.bf16.vlgmr.msra.gmra.mxu1 %vm809_vm2, %v9956_v13  ;;  %s8582_s23 = sshll.u32 %s188_s22, 6  ;;  %s9717_s28 = sshll.u32 %s9894_s19, 6 }
  0x1a   : > { %v9598_v5 = vld [vmem:[%s9932_s9 + $0x18] sm:$0xff]  ;;  %v9599_v6 = vld [vmem:[%s9932_s9 + $0x20] sm:$0xff]  ;;  %v9600_v7 = vld [vmem:[%s9932_s9 + $0x28] sm:$0xff]  ;;  %s14548_s27 = scalar_lea.vmem [#allocation2], %s8582_s23  ;;  %s8512_s5 = scalar_lea.hbm %s14629_s4, %s9717_s28 }
  0x1b   : > { %8657 = vmatmul.msk.bf16.vlgmr.msra.gmra.mxu0 %vm327_vm0, %v9595_v2  ;;  %v9601_v9 = vld [vmem:[%s9932_s9 + $0x30] sm:$0xff]  ;;  %v9602_v16 = vld [vmem:[%s9932_s9 + $0x38] sm:$0xff]  ;;  %v9603_v18 = vld [vmem:[%s9932_s9 + $0x40] sm:$0xff]  ;;  %s8513_s6 = sshll.u32 %s14548_s27, 4  ;;  %s8515_s7 = sshll.u32 %s8512_s5, 4  ;;  %s8514_s6 = int_to_ptr.vmem [resolvable:$true] %s8513_s6  ;;  %s8516_s7 = int_to_ptr.hbm [resolvable:$true] %s8515_s7 }
  0x1c   : > { %1009 = vmatpush.bf16.msrb.mxu0 %v1000_v15  ;;  %v9604_v35 = vld [vmem:[%s9932_s9 + $0x48] sm:$0xff]  ;;  %v9605_v58 = vld [vmem:[%s9932_s9 + $0x50] sm:$0xff]  ;;  %s8501_s19 = scalar_lea.sflag [#allocation3], %s188_s22  ;;  %s9796_s12 = scalar_lea.hbm %s14629_s4, 128 }
  0x2b   : > { %8658 = vmatmul.msk.bf16.gmra.mxu0 %vm327_vm0, %v9596_v3 }
  0x3b   : > { %8659 = vmatmul.msk.bf16.gmra.mxu0 %vm327_vm0, %v9597_v4 }
  0x4b   : > { %8660 = vmatmul.msk.bf16.gmra.mxu0 %vm327_vm0, %v9598_v5 }
  0x5b   : > { %8661 = vmatmul.msk.bf16.gmra.mxu0 %vm327_vm0, %v9599_v6 }
  0x6b   : > { %8662 = vmatmul.msk.bf16.gmra.mxu0 %vm327_vm0, %v9600_v7 }
  0x7b   : > { %8663 = vmatmul.msk.bf16.gmra.mxu0 %vm327_vm0, %v9601_v9 }
  0x8b   : > { %8664 = vmatmul.msk.bf16.gmra.mxu0 %vm327_vm0, %v9602_v16 }
  0x98   : > { %v385_v19 = vpop.f32.mrf.mxu0 }
  0x99   : > { %v386_v20 = vadd.f32 %v9970_v17, %v385_v19 }
  0x9b   : > { %8665 = vmatmul.msk.bf16.gmra.mxu0 %vm327_vm0, %v9603_v18  ;;  %v509_v21 = vrot.slane %v386_v20, 7 }
  0x9d   : > { %v605_v24 = vsel %vm508_vm3, 0.0, %v509_v21 }
  0x9e   : > { %v687_v26 = vrot.slane %v605_v24, 1  ;;  %v1094_v33 = vrot.slane %v605_v24, 2 }
  0xa0   : > { %v387_v22 = vpop.f32.mrf.mxu0 }
  0xa1   : > { %v388_v23 = vadd.f32 %v9970_v17, %v387_v22 }
  0xa3   : > { %v510_v25 = vrot.slane %v388_v23, 7 }
  0xa5   : > { %v621_v27 = vsel %vm508_vm3, %v510_v25, 0.0  ;;  %v511_v28 = vsel %vm508_vm3, %v509_v21, %v510_v25  ;;  %v9606_v21 = vld [vmem:[%s9932_s9 + $0x58] sm:$0xff] }
  0xa6   : > { %v690_v29 = vrot.slane %v621_v27, 1  ;;  %v1097_v30 = vrot.slane %v621_v27, 2  ;;  %v9979_v31 = vpack.c.bf16 %v511_v28, %v605_v24  ;;  %v688_v32 = vrot.slane %v511_v28, 1 }
  0xa7   : > { %v1095_v34 = vrot.slane %v511_v28, 2 }
  0xa8   : > { %v390_v36 = vpop.f32.mrf.mxu0  ;;  %8689 = vmatmul.msk.bf16.vlgmr.msra.gmra.mxu2 %vm809_vm2, %v9979_v31  ;;  %v689_v37 = vsel %vm684_vm4, %v687_v26, %v688_v32  ;;  %v691_v38 = vsel %vm684_vm4, %v688_v32, %v690_v29 }
  0xa9   : > { %v9986_v39 = vpack.c.bf16 %v691_v38, %v689_v37  ;;  %v1096_v40 = vsel %vm1091_vm5, %v1094_v33, %v1095_v34  ;;  %v1098_v41 = vsel %vm1091_vm5, %v1095_v34, %v1097_v30  ;;  %v391_v42 = vadd.f32 %v9970_v17, %v390_v36 }
  0xaa   : > { %v9991_v43 = vpack.c.bf16 %v1098_v41, %v1096_v40 }
  0xab   : > { %8666 = vmatmul.msk.bf16.gmra.mxu0 %vm327_vm0, %v9604_v35  ;;  %8674 = vmatmul.msk.bf16.gmra.mxu1 %vm809_vm2, %v9986_v39  ;;  %v512_v44 = vrot.slane %v391_v42, 7 }
  0xad   : > { %v606_v47 = vsel %vm508_vm3, 0.0, %v512_v44 }
  0xae   : > { %v692_v49 = vrot.slane %v606_v47, 1  ;;  %v1099_v56 = vrot.slane %v606_v47, 2 }
  0xb0   : > { %v392_v45 = vpop.f32.mrf.mxu0 }
  0xb1   : > { %v393_v46 = vadd.f32 %v9970_v17, %v392_v45 }
  0xb3   : > { %v513_v48 = vrot.slane %v393_v46, 7 }
  0xb5   : > { %v622_v50 = vsel %vm508_vm3, %v513_v48, 0.0  ;;  %v514_v51 = vsel %vm508_vm3, %v512_v44, %v513_v48 }
  0xb6   : > { %v695_v52 = vrot.slane %v622_v50, 1  ;;  %v1102_v53 = vrot.slane %v622_v50, 2  ;;  %v10000_v54 = vpack.c.bf16 %v514_v51, %v606_v47  ;;  %v693_v55 = vrot.slane %v514_v51, 1  ;;  %v9607_v47 = vld [vmem:[%s9932_s9 + $0x60] sm:$0xff] }
  0xb7   : > { %v1100_v57 = vrot.slane %v514_v51, 2 }
  0xb8   : > { %v395_v59 = vpop.f32.mrf.mxu0  ;;  %8690 = vmatmul.msk.bf16.gmra.mxu2 %vm809_vm2, %v10000_v54  ;;  %v694_v60 = vsel %vm684_vm4, %v692_v49, %v693_v55  ;;  %v696_v61 = vsel %vm684_vm4, %v693_v55, %v695_v52 }
  0xb9   : > { %v10007_v62 = vpack.c.bf16 %v696_v61, %v694_v60  ;;  %v1101_v63 = vsel %vm1091_vm5, %v1099_v56, %v1100_v57  ;;  %v1103_v0 = vsel %vm1091_vm5, %v1100_v57, %v1102_v53  ;;  %v396_v1 = vadd.f32 %v9970_v17, %v395_v59 }
  0xba   : > { %v10012_v2 = vpack.c.bf16 %v1103_v0, %v1101_v63 }
  0xbb   : > { %8667 = vmatmul.msk.bf16.gmra.mxu0 %vm327_vm0, %v9605_v58  ;;  %8675 = vmatmul.msk.bf16.gmra.mxu1 %vm809_vm2, %v10007_v62  ;;  %v515_v3 = vrot.slane %v396_v1, 7 }
  0xbd   : > { %v607_v6 = vsel %vm508_vm3, 0.0, %v515_v3 }
  0xbe   : > { %v697_v8 = vrot.slane %v607_v6, 1  ;;  %v1104_v19 = vrot.slane %v607_v6, 2 }
  0xc0   : > { %v397_v4 = vpop.f32.mrf.mxu0 }
  0xc1   : > { %v398_v5 = vadd.f32 %v9970_v17, %v397_v4 }
  0xc3   : > { %v516_v7 = vrot.slane %v398_v5, 7 }
  0xc5   : > { %v623_v9 = vsel %vm508_vm3, %v516_v7, 0.0  ;;  %v517_v10 = vsel %vm508_vm3, %v515_v3, %v516_v7 }
  0xc6   : > { %v700_v14 = vrot.slane %v623_v9, 1  ;;  %v1107_v15 = vrot.slane %v623_v9, 2  ;;  %v10021_v16 = vpack.c.bf16 %v517_v10, %v607_v6  ;;  %v698_v18 = vrot.slane %v517_v10, 1  ;;  %v9608_v9 = vld [vmem:[%s9932_s9 + $0x68] sm:$0xff] }
  0xc7   : > { %v1105_v20 = vrot.slane %v517_v10, 2 }
  0xc8   : > { %v400_v22 = vpop.f32.mrf.mxu0  ;;  %8691 = vmatmul.msk.bf16.gmra.mxu2 %vm809_vm2, %v10021_v16  ;;  %v699_v23 = vsel %vm684_vm4, %v697_v8, %v698_v18  ;;  %v701_v24 = vsel %vm684_vm4, %v698_v18, %v700_v14 }
  0xc9   : > { %v10028_v25 = vpack.c.bf16 %v701_v24, %v699_v23  ;;  %v1106_v26 = vsel %vm1091_vm5, %v1104_v19, %v1105_v20  ;;  %v1108_v27 = vsel %vm1091_vm5, %v1105_v20, %v1107_v15  ;;  %v401_v28 = vadd.f32 %v9970_v17, %v400_v22 }
  0xca   : > { %v10033_v29 = vpack.c.bf16 %v1108_v27, %v1106_v26 }
  0xcb   : > { %8668 = vmatmul.msk.bf16.gmra.mxu0 %vm327_vm0, %v9606_v21  ;;  %8676 = vmatmul.msk.bf16.gmra.mxu1 %vm809_vm2, %v10028_v25  ;;  %v518_v30 = vrot.slane %v401_v28, 7 }
  0xcd   : > { %v608_v34 = vsel %vm508_vm3, 0.0, %v518_v30 }
  0xce   : > { %v702_v36 = vrot.slane %v608_v34, 1  ;;  %v1109_v45 = vrot.slane %v608_v34, 2 }
  0xd0   : > { %v402_v32 = vpop.f32.mrf.mxu0 }
  0xd1   : > { %v403_v33 = vadd.f32 %v9970_v17, %v402_v32 }
  0xd3   : > { %v519_v35 = vrot.slane %v403_v33, 7 }
  0xd5   : > { %v624_v37 = vsel %vm508_vm3, %v519_v35, 0.0  ;;  %v520_v38 = vsel %vm508_vm3, %v518_v30, %v519_v35 }
  0xd6   : > { %v705_v40 = vrot.slane %v624_v37, 1  ;;  %v1112_v41 = vrot.slane %v624_v37, 2  ;;  %v10042_v42 = vpack.c.bf16 %v520_v38, %v608_v34  ;;  %v703_v44 = vrot.slane %v520_v38, 1 }
  0xd7   : > { %v1110_v46 = vrot.slane %v520_v38, 2 }
  0xd8   : > { %v405_v48 = vpop.f32.mrf.mxu0  ;;  %8692 = vmatmul.msk.bf16.gmra.mxu2 %vm809_vm2, %v10042_v42  ;;  %v704_v49 = vsel %vm684_vm4, %v702_v36, %v703_v44  ;;  %v706_v50 = vsel %vm684_vm4, %v703_v44, %v705_v40 }
  0xd9   : > { %v10049_v51 = vpack.c.bf16 %v706_v50, %v704_v49  ;;  %v1111_v52 = vsel %vm1091_vm5, %v1109_v45, %v1110_v46  ;;  %v1113_v53 = vsel %vm1091_vm5, %v1110_v46, %v1112_v41  ;;  %v406_v55 = vadd.f32 %v9970_v17, %v405_v48  ;;  %v9609_v41 = vld [vmem:[%s9932_s9 + $0x70] sm:$0xff] }
  0xda   : > { %v10054_v56 = vpack.c.bf16 %v1113_v53, %v1111_v52 }
  0xdb   : > { %8669 = vmatmul.msk.bf16.gmra.mxu0 %vm327_vm0, %v9607_v47  ;;  %8677 = vmatmul.msk.bf16.gmra.mxu1 %vm809_vm2, %v10049_v51  ;;  %v521_v57 = vrot.slane %v406_v55, 7 }
  0xdd   : > { %v609_v60 = vsel %vm508_vm3, 0.0, %v521_v57 }
  0xde   : > { %v707_v63 = vrot.slane %v609_v60, 1  ;;  %v1114_v7 = vrot.slane %v609_v60, 2 }
  0xe0   : > { %v407_v58 = vpop.f32.mrf.mxu0 }
  0xe1   : > { %v408_v59 = vadd.f32 %v9970_v17, %v407_v58 }
  0xe3   : > { %v522_v61 = vrot.slane %v408_v59, 7 }
  0xe5   : > { %v625_v0 = vsel %vm508_vm3, %v522_v61, 0.0  ;;  %v523_v1 = vsel %vm508_vm3, %v521_v57, %v522_v61 }
  0xe6   : > { %v710_v3 = vrot.slane %v625_v0, 1  ;;  %v1117_v4 = vrot.slane %v625_v0, 2  ;;  %v10063_v5 = vpack.c.bf16 %v523_v1, %v609_v60  ;;  %v708_v6 = vrot.slane %v523_v1, 1 }
  0xe7   : > { %v1115_v8 = vrot.slane %v523_v1, 2 }
  0xe8   : > { %v410_v10 = vpop.f32.mrf.mxu0  ;;  %8693 = vmatmul.msk.bf16.gmra.mxu2 %vm809_vm2, %v10063_v5  ;;  %v709_v14 = vsel %vm684_vm4, %v707_v63, %v708_v6  ;;  %v711_v15 = vsel %vm684_vm4, %v708_v6, %v710_v3 }
  0xe9   : > { %v10070_v18 = vpack.c.bf16 %v711_v15, %v709_v14  ;;  %v1116_v19 = vsel %vm1091_vm5, %v1114_v7, %v1115_v8  ;;  %v1118_v20 = vsel %vm1091_vm5, %v1115_v8, %v1117_v4  ;;  %v411_v21 = vadd.f32 %v9970_v17, %v410_v10  ;;  %v9610_v8 = vld [vmem:[%s9932_s9 + $0x78] sm:$0xff]  ;;  %s9843_s9 = smov 112  }
  0xea   : > { %v10075_v22 = vpack.c.bf16 %v1118_v20, %v1116_v19 }
  0xeb   : > { %8670 = vmatmul.msk.bf16.gmra.mxu0 %vm327_vm0, %v9608_v9  ;;  %8678 = vmatmul.msk.bf16.gmra.mxu1 %vm809_vm2, %v10070_v18  ;;  %v524_v23 = vrot.slane %v411_v21, 7  ;;  %v471_v9 = vld [vmem:[%s14626_s1 + $0x28] sm:$0xf] }
  0xec   : > { %v1789_v19 = vsel %vm858_vm1, %v471_v9, 0 }
  0xed   : > { %v610_v27 = vsel %vm508_vm3, 0.0, %v524_v23  ;;  %1798 = vmatpush.bf16.msra.mxu0 %v1789_v19 }
  0xee   : > { %v712_v30 = vrot.slane %v610_v27, 1  ;;  %v1119_v38 = vrot.slane %v610_v27, 2 }
  0xf0   : > { %v412_v24 = vpop.f32.mrf.mxu0 }
  0xf1   : > { %v413_v26 = vadd.f32 %v9970_v17, %v412_v24 }
  0xf3   : > { %v525_v28 = vrot.slane %v413_v26, 7 }
  0xf5   : > { %v626_v32 = vsel %vm508_vm3, %v525_v28, 0.0  ;;  %v526_v33 = vsel %vm508_vm3, %v524_v23, %v525_v28 }
  0xf6   : > { %v715_v34 = vrot.slane %v626_v32, 1  ;;  %v1122_v35 = vrot.slane %v626_v32, 2  ;;  %v10084_v36 = vpack.c.bf16 %v526_v33, %v610_v27  ;;  %v713_v37 = vrot.slane %v526_v33, 1 }
  0xf7   : > { %v1120_v40 = vrot.slane %v526_v33, 2 }
  0xf8   : > { %v415_v44 = vpop.f32.mrf.mxu0  ;;  %8694 = vmatmul.msk.bf16.gmra.mxu2 %vm809_vm2, %v10084_v36  ;;  %v714_v45 = vsel %vm684_vm4, %v712_v30, %v713_v37  ;;  %v716_v46 = vsel %vm684_vm4, %v713_v37, %v715_v34  ;;  %v10128_v34 = vpop.f32.mrf.mxu1 }
  0xf9   : > { %v10091_v47 = vpack.c.bf16 %v716_v46, %v714_v45  ;;  %v1121_v48 = vsel %vm1091_vm5, %v1119_v38, %v1120_v40  ;;  %v1123_v49 = vsel %vm1091_vm5, %v1120_v40, %v1122_v35  ;;  %v416_v50 = vadd.f32 %v9970_v17, %v415_v44 }
  0xfa   : > { %v10096_v52 = vpack.c.bf16 %v1123_v49, %v1121_v48 }
  0xfb   : > { %8671 = vmatmul.msk.bf16.gmra.mxu0 %vm327_vm0, %v9609_v41  ;;  %8679 = vmatmul.msk.bf16.gmra.mxu1 %vm809_vm2, %v10091_v47  ;;  %v527_v53 = vrot.slane %v416_v50, 7 }
  0xfd   : > { %v611_v58 = vsel %vm508_vm3, 0.0, %v527_v53 }
  0xfe   : > { %v717_v60 = vrot.slane %v611_v58, 1  ;;  %v1124_v6 = vrot.slane %v611_v58, 2 }
 0x100   : > { %v417_v55 = vpop.f32.mrf.mxu0 }
 0x101   : > { %v418_v57 = vadd.f32 %v9970_v17, %v417_v55 }
 0x103   : > { %v528_v59 = vrot.slane %v418_v57, 7 }
 0x105   : > { %v627_v61 = vsel %vm508_vm3, %v528_v59, 0.0  ;;  %v529_v63 = vsel %vm508_vm3, %v527_v53, %v528_v59 }
 0x106   : > { %v720_v0 = vrot.slane %v627_v61, 1  ;;  %v1127_v1 = vrot.slane %v627_v61, 2  ;;  %v10105_v3 = vpack.c.bf16 %v529_v63, %v611_v58  ;;  %v718_v4 = vrot.slane %v529_v63, 1 }
 0x107   : > { %v1125_v7 = vrot.slane %v529_v63, 2  ;;  %v14630_v61 = vmov 0.0|0.0  }
 0x108   : > { %v420_v10 = vpop.f32.mrf.mxu0  ;;  %8695 = vmatmul.msk.bf16.gmra.mxu2 %vm809_vm2, %v10105_v3  ;;  %v719_v14 = vsel %vm684_vm4, %v717_v60, %v718_v4  ;;  %v721_v15 = vsel %vm684_vm4, %v718_v4, %v720_v0  ;;  %v10148_v0 = vpop.f32.mrf.mxu1 }
 0x109   : > { %v10116_v20 = vpack.c.bf16 %v721_v15, %v719_v14  ;;  %v1126_v21 = vsel %vm1091_vm5, %v1124_v6, %v1125_v7  ;;  %v1128_v23 = vsel %vm1091_vm5, %v1125_v7, %v1127_v1  ;;  %v421_v24 = vadd.f32 %v9970_v17, %v420_v10 }
 0x10a   : > { %v10121_v26 = vpack.c.bf16 %v1128_v23, %v1126_v21 }
 0x10b   : > { %8672 = vmatmul.msk.bf16.gmra.mxu0 %vm327_vm0, %v9610_v8  ;;  %8680 = vmatmul.msk.bf16.gmra.mxu1 %vm809_vm2, %v10116_v20  ;;  %v530_v27 = vrot.slane %v421_v24, 7 }
 0x10c   : > { %14770 = vst [vmem:[#allocation7_spill] sm:$0xff] %v10121_v26 }
 0x10d   : > { %v612_v32 = vsel %vm508_vm3, 0.0, %v530_v27 }
 0x10e   : > { %v722_v35 = vrot.slane %v612_v32, 1  ;;  %v1129_v46 = vrot.slane %v612_v32, 2 }
 0x110   : > { %v422_v28 = vpop.f32.mrf.mxu0 }
 0x111   : > { %v423_v30 = vadd.f32 %v9970_v17, %v422_v28 }
 0x113   : > { %v531_v33 = vrot.slane %v423_v30, 7 }
 0x115   : > { %v628_v37 = vsel %vm508_vm3, %v531_v33, 0.0  ;;  %v532_v38 = vsel %vm508_vm3, %v530_v27, %v531_v33 }
 0x116   : > { %v725_v40 = vrot.slane %v628_v37, 1  ;;  %v1132_v41 = vrot.slane %v628_v37, 2  ;;  %v10132_v44 = vpack.c.bf16 %v532_v38, %v612_v32  ;;  %v723_v45 = vrot.slane %v532_v38, 1 }
 0x117   : > { %v1130_v48 = vrot.slane %v532_v38, 2 }
 0x118   : > { %v425_v49 = vpop.f32.mrf.mxu0  ;;  %8696 = vmatmul.msk.bf16.gmra.mxu2 %vm809_vm2, %v10132_v44  ;;  %v724_v50 = vsel %vm684_vm4, %v722_v35, %v723_v45  ;;  %v726_v53 = vsel %vm684_vm4, %v723_v45, %v725_v40 }
 0x119   : > { %v10138_v55 = vpack.c.bf16 %v726_v53, %v724_v50  ;;  %v1131_v57 = vsel %vm1091_vm5, %v1129_v46, %v1130_v48  ;;  %v1133_v58 = vsel %vm1091_vm5, %v1130_v48, %v1132_v41  ;;  %v426_v59 = vadd.f32 %v9970_v17, %v425_v49 }
 0x11a   : > { %v10143_v60 = vpack.c.bf16 %v1133_v58, %v1131_v57 }
 0x11b   : > { %14771 = vst [vmem:[#allocation8_spill] sm:$0xff] %v10138_v55  ;;  %8681 = vmatmul.msk.bf16.gmra.mxu1 %vm809_vm2, %v10138_v55  ;;  %1010 = vmatmul.bf16.vlgmr.msrb.gmra.mxu0 %v14630_v61  ;;  %v533_v63 = vrot.slane %v426_v59, 7 }
 0x11d   : > { %v613_v6 = vsel %vm508_vm3, 0.0, %v533_v63 }
 0x11e   : > { %v727_v8 = vrot.slane %v613_v6, 1  ;;  %v1134_v23 = vrot.slane %v613_v6, 2 }
 0x120   : > { %v427_v1 = vpop.f32.mrf.mxu0 }
 0x121   : > { %v428_v4 = vadd.f32 %v9970_v17, %v427_v1 }
 0x123   : > { %v534_v7 = vrot.slane %v428_v4, 7 }
 0x125   : > { %v629_v9 = vsel %vm508_vm3, %v534_v7, 0.0  ;;  %v535_v10 = vsel %vm508_vm3, %v533_v63, %v534_v7 }
 0x126   : > { %v730_v14 = vrot.slane %v629_v9, 1  ;;  %v1137_v15 = vrot.slane %v629_v9, 2  ;;  %v10154_v19 = vpack.c.bf16 %v535_v10, %v613_v6  ;;  %v728_v21 = vrot.slane %v535_v10, 1 }
 0x127   : > { %v1135_v24 = vrot.slane %v535_v10, 2 }
 0x128   : > { %v430_v27 = vpop.f32.mrf.mxu0  ;;  %v876_v28 = vpop.f32.mrf.mxu1  ;;  %8697 = vmatmul.msk.bf16.gmra.mxu2 %vm809_vm2, %v10154_v19  ;;  %v729_v30 = vsel %vm684_vm4, %v727_v8, %v728_v21  ;;  %v731_v32 = vsel %vm684_vm4, %v728_v21, %v730_v14 }
 0x129   : > { %v10160_v33 = vpack.c.bf16 %v731_v32, %v729_v30  ;;  %v1136_v35 = vsel %vm1091_vm5, %v1134_v23, %v1135_v24  ;;  %v1138_v37 = vsel %vm1091_vm5, %v1135_v24, %v1137_v15  ;;  %v431_v38 = vadd.f32 %v9970_v17, %v430_v27 }
 0x12a   : > { %v10165_v40 = vpack.c.bf16 %v1138_v37, %v1136_v35 }
 0x12b   : > { %14772 = vst [vmem:[#allocation9_spill] sm:$0xff] %v10160_v33  ;;  %8682 = vmatmul.msk.bf16.gmra.mxu1 %vm809_vm2, %v10160_v33  ;;  %v1016_v41 = vpop.f32.mrf.mxu2  ;;  %8768 = vmatmul.msk.bf16.vlgmr.msra.gmra.mxu0 %vm809_vm2, %v10000_v54  ;;  %v536_v46 = vrot.slane %v431_v38, 7 }
 0x12c   : > { %v10171_v45 = vadd.f32 %v1016_v41, %v876_v28 }
 0x12d   : > { %v614_v53 = vsel %vm508_vm3, 0.0, %v536_v46 }
 0x12e   : > { %v732_v63 = vrot.slane %v614_v53, 1  ;;  %v1139_v10 = vrot.slane %v614_v53, 2 }
 0x130   : > { %v432_v48 = vpop.f32.mrf.mxu0  ;;  %v878_v49 = vpop.f32.mrf.mxu1 }
 0x131   : > { %v433_v50 = vadd.f32 %v9970_v17, %v432_v48 }
 0x133   : > { %v537_v57 = vrot.slane %v433_v50, 7  ;;  %v1018_v58 = vpop.f32.mrf.mxu2 }
 0x134   : > { %v10175_v59 = vadd.f32 %v1018_v58, %v878_v49 }
 0x135   : > { %v630_v1 = vsel %vm508_vm3, %v537_v57, 0.0  ;;  %v538_v4 = vsel %vm508_vm3, %v536_v46, %v537_v57 }
 0x136   : > { %v735_v6 = vrot.slane %v630_v1, 1  ;;  %v1142_v7 = vrot.slane %v630_v1, 2  ;;  %v10179_v8 = vpack.c.bf16 %v538_v4, %v614_v53  ;;  %v733_v9 = vrot.slane %v538_v4, 1 }
 0x137   : > { %v1140_v14 = vrot.slane %v538_v4, 2 }
 0x138   : > { %v435_v15 = vpop.f32.mrf.mxu0  ;;  %v881_v21 = vpop.f32.mrf.mxu1  ;;  %8698 = vmatmul.msk.bf16.gmra.mxu2 %vm809_vm2, %v10179_v8  ;;  %v734_v23 = vsel %vm684_vm4, %v732_v63, %v733_v9  ;;  %v736_v24 = vsel %vm684_vm4, %v733_v9, %v735_v6 }
 0x139   : > { %v10185_v27 = vpack.c.bf16 %v736_v24, %v734_v23  ;;  %v1141_v28 = vsel %vm1091_vm5, %v1139_v10, %v1140_v14  ;;  %v1143_v30 = vsel %vm1091_vm5, %v1140_v14, %v1142_v7  ;;  %v436_v32 = vadd.f32 %v9970_v17, %v435_v15 }
 0x13a   : > { %v10190_v35 = vpack.c.bf16 %v1143_v30, %v1141_v28 }
 0x13b   : > { %8683 = vmatmul.msk.bf16.gmra.mxu1 %vm809_vm2, %v10185_v27  ;;  %v1021_v37 = vpop.f32.mrf.mxu2  ;;  %8769 = vmatmul.msk.bf16.gmra.mxu0 %vm809_vm2, %v10021_v16  ;;  %v539_v41 = vrot.slane %v436_v32, 7 }
 0x13c   : > { %v10196_v38 = vadd.f32 %v1021_v37, %v881_v21 }
 0x13d   : > { %v615_v50 = vsel %vm508_vm3, 0.0, %v539_v41 }
 0x13e   : > { %v737_v63 = vrot.slane %v615_v50, 1  ;;  %v1144_v14 = vrot.slane %v615_v50, 2 }
 0x140   : > { %v437_v46 = vpop.f32.mrf.mxu0  ;;  %v883_v48 = vpop.f32.mrf.mxu1 }
 0x141   : > { %v438_v49 = vadd.f32 %v9970_v17, %v437_v46 }
 0x143   : > { %v540_v53 = vrot.slane %v438_v49, 7  ;;  %v1023_v57 = vpop.f32.mrf.mxu2 }
 0x144   : > { %v10200_v58 = vadd.f32 %v1023_v57, %v883_v48 }
 0x145   : > { %v631_v1 = vsel %vm508_vm3, %v540_v53, 0.0  ;;  %v541_v4 = vsel %vm508_vm3, %v539_v41, %v540_v53 }
 0x146   : > { %v740_v6 = vrot.slane %v631_v1, 1  ;;  %v1147_v7 = vrot.slane %v631_v1, 2  ;;  %v10204_v9 = vpack.c.bf16 %v541_v4, %v615_v50  ;;  %v738_v10 = vrot.slane %v541_v4, 1 }
 0x147   : > { %v1145_v15 = vrot.slane %v541_v4, 2 }
 0x148   : > { %v440_v21 = vpop.f32.mrf.mxu0  ;;  %v886_v23 = vpop.f32.mrf.mxu1  ;;  %8699 = vmatmul.msk.bf16.gmra.mxu2 %vm809_vm2, %v10204_v9  ;;  %v739_v24 = vsel %vm684_vm4, %v737_v63, %v738_v10  ;;  %v741_v28 = vsel %vm684_vm4, %v738_v10, %v740_v6 }
 0x149   : > { %v10210_v30 = vpack.c.bf16 %v741_v28, %v739_v24  ;;  %v1146_v32 = vsel %vm1091_vm5, %v1144_v14, %v1145_v15  ;;  %v1148_v37 = vsel %vm1091_vm5, %v1145_v15, %v1147_v7  ;;  %v441_v41 = vadd.f32 %v9970_v17, %v440_v21 }
 0x14a   : > { %v10215_v46 = vpack.c.bf16 %v1148_v37, %v1146_v32 }
 0x14b   : > { %8684 = vmatmul.msk.bf16.gmra.mxu1 %vm809_vm2, %v10210_v30  ;;  %v1026_v48 = vpop.f32.mrf.mxu2  ;;  %8770 = vmatmul.msk.bf16.gmra.mxu0 %vm809_vm2, %v10042_v42  ;;  %v542_v50 = vrot.slane %v441_v41, 7 }
 0x14c   : > { %v10221_v49 = vadd.f32 %v1026_v48, %v886_v23 }
 0x14d   : > { %v616_v1 = vsel %vm508_vm3, 0.0, %v542_v50 }
 0x14e   : > { %v742_v10 = vrot.slane %v616_v1, 1  ;;  %v1149_v32 = vrot.slane %v616_v1, 2 }
 0x150   : > { %v442_v53 = vpop.f32.mrf.mxu0  ;;  %v888_v57 = vpop.f32.mrf.mxu1 }
 0x151   : > { %v443_v63 = vadd.f32 %v9970_v17, %v442_v53 }
 0x153   : > { %v543_v4 = vrot.slane %v443_v63, 7  ;;  %v1028_v6 = vpop.f32.mrf.mxu2 }
 0x154   : > { %v10225_v7 = vadd.f32 %v1028_v6, %v888_v57 }
 0x155   : > { %v632_v14 = vsel %vm508_vm3, %v543_v4, 0.0  ;;  %v544_v15 = vsel %vm508_vm3, %v542_v50, %v543_v4 }
 0x156   : > { %14773 = vst [vmem:[#allocation10_spill] sm:$0xff] %v10225_v7  ;;  %v745_v21 = vrot.slane %v632_v14, 1  ;;  %v1152_v24 = vrot.slane %v632_v14, 2  ;;  %v10229_v23 = vpack.c.bf16 %v544_v15, %v616_v1  ;;  %v743_v28 = vrot.slane %v544_v15, 1 }
 0x157   : > { %v1150_v37 = vrot.slane %v544_v15, 2 }
 0x158   : > { %v445_v41 = vpop.f32.mrf.mxu0  ;;  %v891_v48 = vpop.f32.mrf.mxu1  ;;  %8700 = vmatmul.msk.bf16.gmra.mxu2 %vm809_vm2, %v10229_v23  ;;  %v744_v53 = vsel %vm684_vm4, %v742_v10, %v743_v28  ;;  %v746_v57 = vsel %vm684_vm4, %v743_v28, %v745_v21 }
 0x159   : > { %v10235_v63 = vpack.c.bf16 %v746_v57, %v744_v53  ;;  %v1151_v50 = vsel %vm1091_vm5, %v1149_v32, %v1150_v37  ;;  %v1153_v4 = vsel %vm1091_vm5, %v1150_v37, %v1152_v24  ;;  %v446_v6 = vadd.f32 %v9970_v17, %v445_v41 }
 0x15a   : > { %v10240_v14 = vpack.c.bf16 %v1153_v4, %v1151_v50 }
 0x15b   : > { %8685 = vmatmul.msk.bf16.gmra.mxu1 %vm809_vm2, %v10235_v63  ;;  %v1031_v1 = vpop.f32.mrf.mxu2  ;;  %8771 = vmatmul.msk.bf16.gmra.mxu0 %vm809_vm2, %v10063_v5  ;;  %v545_v15 = vrot.slane %v446_v6, 7 }
 0x15c   : > { %14774 = vst [vmem:[#allocation11_spill] sm:$0xff] %v10240_v14  ;;  %v10246_v10 = vadd.f32 %v1031_v1, %v891_v48 }
 0x15d   : > { %v617_v24 = vsel %vm508_vm3, 0.0, %v545_v15 }
 0x15e   : > { %14775 = vst [vmem:[#allocation12_spill] sm:$0xff] %v10246_v10  ;;  %v747_v57 = vrot.slane %v617_v24, 1  ;;  %v1154_v50 = vrot.slane %v617_v24, 2 }
 0x160   : > { %v447_v21 = vpop.f32.mrf.mxu0  ;;  %v893_v28 = vpop.f32.mrf.mxu1 }
 0x161   : > { %v448_v32 = vadd.f32 %v9970_v17, %v447_v21  ;;  %v468_v21 = vld [vmem:[%s14626_s1 + $0x1c] sm:$0xf] }
 0x163   : > { %v546_v37 = vrot.slane %v448_v32, 7  ;;  %v1033_v41 = vpop.f32.mrf.mxu2 }
 0x164   : > { %v10250_v53 = vadd.f32 %v1033_v41, %v893_v28 }
 0x165   : > { %v547_v4 = vsel %vm508_vm3, %v545_v15, %v546_v37  ;;  %v633_v61 = vsel %vm508_vm3, %v546_v37, 0.0  ;;  %v1393_v15 = vsel %vm858_vm1, %v468_v21, 0 }
 0x166   : > { %14776 = vst [vmem:[#allocation13_spill] sm:$0xff] %v10250_v53  ;;  %v748_v11 = vrot.slane %v547_v4, 1  ;;  %v750_v48 = vrot.slane %v633_v61, 1  ;;  %v1155_v1 = vrot.slane %v547_v4, 2  ;;  %v1157_v6 = vrot.slane %v633_v61, 2  ;;  %1402 = vmatpush.bf16.msrb.mxu1 %v1393_v15 }
 0x167   : > { %v10254_v12 = vpack.c.bf16 %v547_v4, %v617_v24  ;;  %v469_v15 = vld [vmem:[%s14626_s1 + $0x20] sm:$0xf] }
 0x168   : > { %v450_v32 = vpop.f32.mrf.mxu0  ;;  %v896_v13 = vpop.f32.mrf.mxu1  ;;  %v749_v28 = vsel %vm684_vm4, %v747_v57, %v748_v11  ;;  %v751_v41 = vsel %vm684_vm4, %v748_v11, %v750_v48  ;;  %v1156_v37 = vsel %vm1091_vm5, %v1154_v50, %v1155_v1  ;;  %v1158_v24 = vsel %vm1091_vm5, %v1155_v1, %v1157_v6 }
 0x169   : > { %8701 = vmatmul.msk.bf16.gmra.mxu2 %vm809_vm2, %v10254_v12  ;;  %v10265_v61 = vpack.c.bf16 %v751_v41, %v749_v28  ;;  %v451_v4 = vadd.f32 %v9970_v17, %v450_v32  ;;  %v10269_v53 = vpack.c.bf16 %v1158_v24, %v1156_v37 }
 0x16b   : > { %14777 = vst [vmem:[#allocation14_spill] sm:$0xff] %v10265_v61  ;;  %8686 = vmatmul.msk.bf16.gmra.mxu1 %vm809_vm2, %v10265_v61  ;;  %v1036_v11 = vpop.f32.mrf.mxu2  ;;  %8772 = vmatmul.msk.bf16.gmra.mxu0 %vm809_vm2, %v10084_v36  ;;  %v548_v50 = vrot.slane %v451_v4, 7  ;;  %v1530_v4 = vsel %vm858_vm1, %v469_v15, 0 }
 0x16c   : > { %14778 = vst [vmem:[#allocation15_spill] sm:$0xff] %v10269_v53  ;;  %v10275_v57 = vadd.f32 %v1036_v11, %v896_v13  ;;  %1539 = vmatpush.bf16.msrb.mxu2 %v1530_v4 }
 0x16d   : > { %v618_v1 = vsel %vm508_vm3, 0.0, %v548_v50 }
 0x16e   : > { %14779 = vst [vmem:[#allocation16_spill] sm:$0xff] %v10275_v57  ;;  %v752_v37 = vrot.slane %v618_v1, 1 }
 0x170   : > { %v452_v48 = vpop.f32.mrf.mxu0  ;;  %v898_v21 = vpop.f32.mrf.mxu1 }
 0x171   : > { %v453_v28 = vadd.f32 %v9970_v17, %v452_v48 }
 0x173   : > { %v549_v6 = vrot.slane %v453_v28, 7  ;;  %v1038_v32 = vpop.f32.mrf.mxu2  ;;  %v1159_v28 = vrot.slane %v618_v1, 2 }
 0x174   : > { %v10279_v41 = vadd.f32 %v1038_v32, %v898_v21  ;;  %v467_v21 = vld [vmem:[%s14626_s1 + $0x18] sm:$0xf] }
 0x175   : > { %v550_v24 = vsel %vm508_vm3, %v548_v50, %v549_v6  ;;  %v634_v13 = vsel %vm508_vm3, %v549_v6, 0.0  ;;  %v1265_v15 = vsel %vm858_vm1, %v467_v21, 0 }
 0x176   : > { %14780 = vst [vmem:[#allocation17_spill] sm:$0xff] %v10279_v41  ;;  %v753_v11 = vrot.slane %v550_v24, 1  ;;  %v755_v57 = vrot.slane %v634_v13, 1  ;;  %v1160_v48 = vrot.slane %v550_v24, 2  ;;  %v1162_v53 = vrot.slane %v634_v13, 2  ;;  %1274 = vmatpush.bf16.msrb.mxu3 %v1265_v15 }
 0x177   : > { %v10287_v10 = vpack.c.bf16 %v550_v24, %v618_v1 }
 0x178   : > { %v455_v32 = vpop.f32.mrf.mxu0  ;;  %v901_v41 = vpop.f32.mrf.mxu1  ;;  %v754_v50 = vsel %vm684_vm4, %v752_v37, %v753_v11  ;;  %v756_v6 = vsel %vm684_vm4, %v753_v11, %v755_v57  ;;  %v1161_v1 = vsel %vm1091_vm5, %v1159_v28, %v1160_v48  ;;  %v1163_v4 = vsel %vm1091_vm5, %v1160_v48, %v1162_v53 }
 0x179   : > { %8702 = vmatmul.msk.bf16.gmra.mxu2 %vm809_vm2, %v10287_v10  ;;  %v10297_v13 = vpack.c.bf16 %v756_v6, %v754_v50  ;;  %v456_v24 = vadd.f32 %v9970_v17, %v455_v32  ;;  %v10306_v57 = vpack.c.bf16 %v1163_v4, %v1161_v1 }
 0x17b   : > { %14781 = vst [vmem:[#allocation18_spill] sm:$0xff] %v10297_v13  ;;  %8687 = vmatmul.msk.bf16.gmra.mxu1 %vm809_vm2, %v10297_v13  ;;  %v1041_v37 = vpop.f32.mrf.mxu2  ;;  %8773 = vmatmul.msk.bf16.gmra.mxu0 %vm809_vm2, %v10105_v3  ;;  %v551_v21 = vrot.slane %v456_v24, 7 }
 0x17c   : > { %14782 = vst [vmem:[#allocation19_spill] sm:$0xff] %v10306_v57  ;;  %v10308_v11 = vadd.f32 %v1041_v37, %v901_v41 }
 0x17d   : > { %v619_v32 = vsel %vm508_vm3, 0.0, %v551_v21 }
 0x17e   : > { %14783 = vst [vmem:[#allocation20_spill] sm:$0xff] %v10308_v11  ;;  %v757_v13 = vrot.slane %v619_v32, 1  ;;  %v1164_v14 = vrot.slane %v619_v32, 2 }
 0x180   : > { %v457_v50 = vpop.f32.mrf.mxu0  ;;  %v903_v6 = vpop.f32.mrf.mxu1 }
 0x181   : > { %v458_v28 = vadd.f32 %v9970_v17, %v457_v50 }
 0x183   : > { %v552_v15 = vrot.slane %v458_v28, 7  ;;  %v1043_v53 = vpop.f32.mrf.mxu2 }
 0x184   : > { %v10312_v48 = vadd.f32 %v1043_v53, %v903_v6 }
 0x185   : > { %v553_v61 = vsel %vm508_vm3, %v551_v21, %v552_v15  ;;  %v635_v1 = vsel %vm508_vm3, %v552_v15, 0.0 }
 0x186   : > { %v758_v4 = vrot.slane %v553_v61, 1  ;;  %v760_v41 = vrot.slane %v635_v1, 1  ;;  %v1165_v37 = vrot.slane %v553_v61, 2  ;;  %v1167_v24 = vrot.slane %v635_v1, 2 }
 0x187   : > { %v10316_v11 = vpack.c.bf16 %v553_v61, %v619_v32 }
 0x188   : > { %v460_v57 = vpop.f32.mrf.mxu0  ;;  %v906_v50 = vpop.f32.mrf.mxu1  ;;  %v759_v7 = vsel %vm684_vm4, %v757_v13, %v758_v4  ;;  %v761_v28 = vsel %vm684_vm4, %v758_v4, %v760_v41  ;;  %v1166_v6 = vsel %vm1091_vm5, %v1164_v14, %v1165_v37  ;;  %v1168_v53 = vsel %vm1091_vm5, %v1165_v37, %v1167_v24 }
 0x189   : > { %8703 = vmatmul.msk.bf16.gmra.mxu2 %vm809_vm2, %v10316_v11  ;;  %v10324_v21 = vpack.c.bf16 %v761_v28, %v759_v7  ;;  %v10326_v15 = vpack.c.bf16 %v1168_v53, %v1166_v6  ;;  %v10337_v14 = vadd.f32 %v9970_v17, %v460_v57  ;;  %v14785_v24 = vmov 0.0  }
 0x18b   : > { %14784 = vst [vmem:[#allocation21_spill] sm:$0xff] %v10324_v21  ;;  %8688 = vmatmul.msk.bf16.vlgmr.msra.gmra.mxu3 %vm809_vm2, %v10324_v21  ;;  %v1046_v61 = vpop.f32.mrf.mxu2  ;;  %8720 = vmatmul.msk.bf16.vlgmr.msrb.gmra.mxu1 %vm809_vm2, %v9979_v31  ;;  %v14646_v1 = vrot.slane %v10337_v14, 7  ;;  %v10345_v31 = vrot.slane %v14785_v24, 2 }
 0x18c   : > { %v10332_v13 = vadd.f32 %v1046_v61, %v906_v50  ;;  %8774 = vmatmul.msk.bf16.gmra.mxu0 %vm809_vm2, %v10132_v44 }
 0x18d   : > { %14786 = vst [vmem:[#allocation22_spill] sm:$0xff] %v10345_v31  ;;  %v10358_v28 = vpack.c.bf16 %v10345_v31, %v10345_v31 }
 0x18f   : > { %14788 = vst [vmem:[#allocation24_spill] sm:$0xff] %v10358_v28 }
 0x190   : > { %v462_v32 = vpop.f32.mrf.mxu0  ;;  %v908_v7 = vpop.f32.mrf.mxu1 }
 0x191   : > { %v10341_v4 = vadd.f32 %v9970_v17, %v462_v32 }
 0x193   : > { %v14645_v41 = vrot.slane %v10341_v4, 7  ;;  %v1048_v37 = vpop.f32.mrf.mxu2 }
 0x194   : > { %v10347_v50 = vadd.f32 %v1048_v37, %v908_v7 }
 0x195   : > { %v10354_v57 = vsel %vm508_vm3, %v14646_v1, %v14645_v41 }
 0x196   : > { %14787 = vst [vmem:[#allocation23_spill] sm:$0xff] %v10354_v57 }
 0x198   : > { %v911_v17 = vpop.f32.mrf.mxu1  ;;  %v1011_v1 = vpop.f32.mrf.mxu0 }
 0x199   : > { %8736 = vmatmul.msk.bf16.vlgmr.msrb.gmra.mxu2 %vm809_vm2, %v9986_v39 }
 0x19b   : > { %v1051_v6 = vpop.f32.mrf.mxu2  ;;  %8704 = vmatmul.msk.bf16.vlgmr.msrb.gmra.mxu3 %vm809_vm2, %v10358_v28  ;;  %8721 = vmatmul.msk.bf16.gmra.mxu1 %vm809_vm2, %v10000_v54 }
 0x19c   : > { %v10366_v53 = vadd.f32 %v1051_v6, %v911_v17  ;;  %8775 = vmatmul.msk.bf16.gmra.mxu0 %vm809_vm2, %v10154_v19 }
 0x1a0   : > { %v913_v61 = vpop.f32.mrf.mxu1 }
 0x1a3   : > { %v1053_v32 = vpop.f32.mrf.mxu2 }
 0x1a4   : > { %v10370_v7 = vadd.f32 %v1053_v32, %v913_v61 }
 0x1a8   : > { %v916_v37 = vpop.f32.mrf.mxu1 }
 0x1a9   : > { %8737 = vmatmul.msk.bf16.gmra.mxu2 %vm809_vm2, %v10007_v62 }
 0x1ab   : > { %v1056_v39 = vpop.f32.mrf.mxu2  ;;  %8705 = vmatmul.msk.bf16.gmra.mxu3 %vm809_vm2, %v9991_v43  ;;  %8722 = vmatmul.msk.bf16.gmra.mxu1 %vm809_vm2, %v10021_v16 }
 0x1ac   : > { %v10378_v54 = vadd.f32 %v1056_v39, %v916_v37  ;;  %8776 = vmatmul.msk.bf16.gmra.mxu0 %vm809_vm2, %v10179_v8 }
 0x1b0   : > { %v918_v17 = vpop.f32.mrf.mxu1 }
 0x1b3   : > { %v1058_v6 = vpop.f32.mrf.mxu2 }
 0x1b4   : > { %v10382_v61 = vadd.f32 %v1058_v6, %v918_v17 }
 0x1b8   : > { %v921_v32 = vpop.f32.mrf.mxu1 }
 0x1b9   : > { %8738 = vmatmul.msk.bf16.gmra.mxu2 %vm809_vm2, %v10028_v25 }
 0x1bb   : > { %v1061_v41 = vpop.f32.mrf.mxu2  ;;  %8706 = vmatmul.msk.bf16.gmra.mxu3 %vm809_vm2, %v10012_v2  ;;  %8723 = vmatmul.msk.bf16.gmra.mxu1 %vm809_vm2, %v10042_v42 }
 0x1bc   : > { %v10390_v16 = vadd.f32 %v1061_v41, %v921_v32  ;;  %8777 = vmatmul.msk.bf16.gmra.mxu0 %vm809_vm2, %v10204_v9 }
 0x1c0   : > { %v923_v37 = vpop.f32.mrf.mxu1 }
 0x1c3   : > { %v1063_v39 = vpop.f32.mrf.mxu2 }
 0x1c4   : > { %v10394_v17 = vadd.f32 %v1063_v39, %v923_v37  ;;  %v1013_v37 = vpop.f32.mrf.mxu0 }
 0x1c8   : > { %v926_v6 = vpop.f32.mrf.mxu1 }
 0x1c9   : > { %8739 = vmatmul.msk.bf16.gmra.mxu2 %vm809_vm2, %v10049_v51 }
 0x1cb   : > { %v1066_v31 = vpop.f32.mrf.mxu2  ;;  %8707 = vmatmul.msk.bf16.gmra.mxu3 %vm809_vm2, %v10033_v29  ;;  %8724 = vmatmul.msk.bf16.gmra.mxu1 %vm809_vm2, %v10063_v5 }
 0x1cc   : > { %v10402_v42 = vadd.f32 %v1066_v31, %v926_v6  ;;  %8778 = vmatmul.msk.bf16.gmra.mxu0 %vm809_vm2, %v10229_v23  ;;  %v10418_v31 = vpop.f32.mrf.mxu0 }
 0x1cd   : > { %14792 = vst [vmem:[#allocation28_spill] sm:$0xff] %v10418_v31 }
 0x1ce   : > { %14789 = vst [vmem:[#allocation25_spill] sm:$0xff] %v10402_v42 }
 0x1d0   : > { %v928_v41 = vpop.f32.mrf.mxu1 }
 0x1d3   : > { %v1068_v32 = vpop.f32.mrf.mxu2 }
 0x1d4   : > { %v10406_v39 = vadd.f32 %v1068_v32, %v928_v41 }
 0x1d6   : > { %14790 = vst [vmem:[#allocation26_spill] sm:$0xff] %v10406_v39  ;;  %v10422_v39 = vpop.f32.mrf.mxu0 }
 0x1d7   : > { %14794 = vst [vmem:[#allocation30_spill] sm:$0xff] %v10422_v39 }
 0x1d8   : > { %v931_v24 = vpop.f32.mrf.mxu1 }
 0x1d9   : > { %8740 = vmatmul.msk.bf16.gmra.mxu2 %vm809_vm2, %v10070_v18 }
 0x1db   : > { %v1071_v28 = vpop.f32.mrf.mxu2  ;;  %8708 = vmatmul.msk.bf16.gmra.mxu3 %vm809_vm2, %v10054_v56  ;;  %8725 = vmatmul.msk.bf16.gmra.mxu1 %vm809_vm2, %v10084_v36 }
 0x1dc   : > { %v10414_v5 = vadd.f32 %v1071_v28, %v931_v24  ;;  %8779 = vmatmul.msk.bf16.gmra.mxu0 %vm809_vm2, %v10254_v12 }
 0x1de   : > { %14791 = vst [vmem:[#allocation27_spill] sm:$0xff] %v10414_v5 }
 0x1e0   : > { %v933_v6 = vpop.f32.mrf.mxu1 }
 0x1e3   : > { %v1073_v41 = vpop.f32.mrf.mxu2 }
 0x1e4   : > { %v10420_v32 = vadd.f32 %v1073_v41, %v933_v6  ;;  %v10434_v6 = vpop.f32.mrf.mxu0 }
 0x1e5   : > { %14796 = vst [vmem:[#allocation32_spill] sm:$0xff] %v10434_v6 }
 0x1e6   : > { %14793 = vst [vmem:[#allocation29_spill] sm:$0xff] %v10420_v32 }
 0x1e8   : > { %v936_v42 = vpop.f32.mrf.mxu1 }
 0x1e9   : > { %8741 = vmatmul.msk.bf16.gmra.mxu2 %vm809_vm2, %v10091_v47 }
 0x1eb   : > { %8709 = vmatmul.msk.bf16.gmra.mxu3 %vm809_vm2, %v10075_v22  ;;  %8726 = vmatmul.msk.bf16.gmra.mxu1 %vm809_vm2, %v10105_v3 }
 0x1ec   : > { %v1076_v36 = vpop.f32.mrf.mxu2  ;;  %8780 = vmatmul.msk.bf16.gmra.mxu0 %vm809_vm2, %v10287_v10  ;;  %v10444_v3 = vpop.f32.mrf.mxu0 }
 0x1ed   : > { %v10432_v24 = vadd.f32 %v1076_v36, %v936_v42  ;;  %14798 = vst [vmem:[#allocation34_spill] sm:$0xff] %v10444_v3 }
 0x1ef   : > { %14795 = vst [vmem:[#allocation31_spill] sm:$0xff] %v10432_v24 }
 0x1f0   : > { %v938_v28 = vpop.f32.mrf.mxu1 }
 0x1f4   : > { %v1078_v41 = vpop.f32.mrf.mxu2 }
 0x1f5   : > { %v10436_v39 = vadd.f32 %v1078_v41, %v938_v28 }
 0x1f7   : > { %14797 = vst [vmem:[#allocation33_spill] sm:$0xff] %v10436_v39 }
 0x1f8   : > { %v941_v31 = vpop.f32.mrf.mxu1 }
 0x1f9   : > { %8742 = vmatmul.msk.bf16.gmra.mxu2 %vm809_vm2, %v10116_v20 }
 0x1fb   : > { %8710 = vmatmul.msk.bf16.gmra.mxu3 %vm809_vm2, %v10096_v52  ;;  %8727 = vmatmul.msk.bf16.gmra.mxu1 %vm809_vm2, %v10132_v44 }
 0x1fc   : > { %v1081_v42 = vpop.f32.mrf.mxu2  ;;  %8781 = vmatmul.msk.bf16.gmra.mxu0 %vm809_vm2, %v10316_v11 }
 0x1fd   : > { %v10448_v36 = vadd.f32 %v1081_v42, %v941_v31 }
 0x1ff   : > { %14799 = vst [vmem:[#allocation35_spill] sm:$0xff] %v10448_v36 }
 0x200   : > { %v943_v28 = vpop.f32.mrf.mxu1 }
 0x204   : > { %v1083_v41 = vpop.f32.mrf.mxu2 }
 0x205   : > { %v10450_v6 = vadd.f32 %v1083_v41, %v943_v28  ;;  %v1012_v41 = vadd.f32 %v1011_v1, %v10128_v34 }
 0x207   : > { %14800 = vst [vmem:[#allocation36_spill] sm:$0xff] %v10450_v6 }
 0x208   : > { %v1404_v39 = vpop.f32.mrf.mxu1 }
 0x209   : > { %8743 = vmatmul.msk.bf16.gmra.mxu2 %vm809_vm2, %v10138_v55 }
 0x20b   : > { %8711 = vmatmul.msk.bf16.gmra.mxu3 %vm809_vm2, %v10121_v26  ;;  %8728 = vmatmul.msk.bf16.gmra.mxu1 %vm809_vm2, %v10154_v19 }
 0x20c   : > { %v1086_v44 = vpop.f32.mrf.mxu2 }
 0x20e   : > { %v946_v3 = vpop.f32.mrf.mxu3 }
 0x20f   : > { %v10458_v24 = vadd.f32 %v1086_v44, %v946_v3 }
 0x210   : > { %v1406_v31 = vpop.f32.mrf.mxu1 }
 0x211   : > { %14801 = vst [vmem:[#allocation37_spill] sm:$0xff] %v10458_v24 }
 0x214   : > { %v1088_v42 = vpop.f32.mrf.mxu2 }
 0x216   : > { %v948_v36 = vpop.f32.mrf.mxu3 }
 0x217   : > { %v10460_v32 = vadd.f32 %v1088_v42, %v948_v36  ;;  %v1014_v42 = vadd.f32 %v1013_v37, %v10148_v0 }
 0x218   : > { %v1409_v28 = vpop.f32.mrf.mxu1 }
 0x219   : > { %14802 = vst [vmem:[#allocation38_spill] sm:$0xff] %v10460_v32  ;;  %8744 = vmatmul.msk.bf16.gmra.mxu2 %vm809_vm2, %v10160_v33 }
 0x21b   : > { %8712 = vmatmul.msk.bf16.gmra.mxu3 %vm809_vm2, %v10143_v60  ;;  %8729 = vmatmul.msk.bf16.gmra.mxu1 %vm809_vm2, %v10179_v8 }
 0x21c   : > { %v1541_v19 = vpop.f32.mrf.mxu2 }
 0x21e   : > { %v1276_v3 = vpop.f32.mrf.mxu3 }
 0x21f   : > { %v1356_v44 = vadd.f32 %v1276_v3, %v1012_v41 }
 0x220   : > { %v1411_v24 = vpop.f32.mrf.mxu1 }
 0x221   : > { %v1484_v6 = vadd.f32 %v1404_v39, %v1356_v44 }
 0x223   : > { %v10469_v55 = vadd.f32 %v1541_v19, %v1484_v6 }
 0x224   : > { %v1543_v36 = vpop.f32.mrf.mxu2 }
 0x226   : > { %v1278_v32 = vpop.f32.mrf.mxu3 }
 0x227   : > { %v1357_v33 = vadd.f32 %v1278_v32, %v1014_v42 }
 0x228   : > { %v1414_v26 = vpop.f32.mrf.mxu1 }
 0x229   : > { %v1485_v5 = vadd.f32 %v1406_v31, %v1357_v33  ;;  %8745 = vmatmul.msk.bf16.gmra.mxu2 %vm809_vm2, %v10185_v27 }
 0x22b   : > { %8713 = vmatmul.msk.bf16.gmra.mxu3 %vm809_vm2, %v10165_v40  ;;  %8730 = vmatmul.msk.bf16.gmra.mxu1 %vm809_vm2, %v10204_v9  ;;  %v10478_v34 = vadd.f32 %v1543_v36, %v1485_v5 }
 0x22c   : > { %v1546_v8 = vpop.f32.mrf.mxu2 }
 0x22e   : > { %v1281_v1 = vpop.f32.mrf.mxu3 }
 0x22f   : > { %v1358_v39 = vadd.f32 %v1281_v1, %v10171_v45 }
 0x230   : > { %v1416_v0 = vpop.f32.mrf.mxu1 }
 0x231   : > { %v1486_v37 = vadd.f32 %v1409_v28, %v1358_v39  ;;  %v10504_v39 = vpop.f32.mrf.mxu0 }
 0x233   : > { %v10481_v32 = vadd.f32 %v1546_v8, %v1486_v37 }
 0x234   : > { %v1548_v33 = vpop.f32.mrf.mxu2 }
 0x236   : > { %v1283_v6 = vpop.f32.mrf.mxu3 }
 0x237   : > { %v1359_v31 = vadd.f32 %v1283_v6, %v10175_v59 }
 0x238   : > { %v1419_v19 = vpop.f32.mrf.mxu1 }
 0x239   : > { %v1487_v41 = vadd.f32 %v1411_v24, %v1359_v31  ;;  %8746 = vmatmul.msk.bf16.gmra.mxu2 %vm809_vm2, %v10210_v30 }
 0x23b   : > { %8714 = vmatmul.msk.bf16.gmra.mxu3 %vm809_vm2, %v10190_v35  ;;  %8731 = vmatmul.msk.bf16.gmra.mxu1 %vm809_vm2, %v10229_v23  ;;  %v10490_v45 = vadd.f32 %v1548_v33, %v1487_v41  ;;  %v14804_v41 = vld [vmem:[#allocation10_spill] sm:$0xff] }
 0x23c   : > { %v1551_v9 = vpop.f32.mrf.mxu2 }
 0x23e   : > { %v1286_v5 = vpop.f32.mrf.mxu3 }
 0x23f   : > { %v1360_v28 = vadd.f32 %v1286_v5, %v10196_v38  ;;  %v14805_v5 = vrot.slane %v10337_v14, 7 }
 0x240   : > { %v1421_v3 = vpop.f32.mrf.mxu1 }
 0x241   : > { %v1488_v44 = vadd.f32 %v1414_v26, %v1360_v28 }
 0x243   : > { %v10493_v59 = vadd.f32 %v1551_v9, %v1488_v44  ;;  %v10515_v44 = vpop.f32.mrf.mxu0 }
 0x244   : > { %v1553_v24 = vpop.f32.mrf.mxu2  ;;  %14807 = vst [vmem:[#allocation40_spill] sm:$0xff] %v10515_v44  ;;  %v14815_v44 = vld [vmem:[#allocation18_spill] sm:$0xff] }
 0x246   : > { %v1288_v36 = vpop.f32.mrf.mxu3 }
 0x247   : > { %v1361_v42 = vadd.f32 %v1288_v36, %v10200_v58  ;;  %v14808_v36 = vld [vmem:[#allocation14_spill] sm:$0xff] }
 0x248   : > { %v1424_v8 = vpop.f32.mrf.mxu1 }
 0x249   : > { %v1489_v1 = vadd.f32 %v1416_v0, %v1361_v42  ;;  %8747 = vmatmul.msk.bf16.gmra.mxu2 %vm809_vm2, %v10235_v63 }
 0x24b   : > { %8715 = vmatmul.msk.bf16.gmra.mxu3 %vm809_vm2, %v10215_v46  ;;  %8732 = vmatmul.msk.bf16.gmra.mxu1 %vm809_vm2, %v10254_v12  ;;  %v10502_v38 = vadd.f32 %v1553_v24, %v1489_v1  ;;  %v10513_v12 = vsel %vm508_vm3, 0.0, %v14805_v5  ;;  %v470_v1 = vld [vmem:[%s14626_s1 + $0x24] sm:$0xf] }
 0x24c   : > { %v1556_v26 = vpop.f32.mrf.mxu2  ;;  %14806 = vst [vmem:[#allocation10_spill] sm:$0xff] %v10513_v12  ;;  %v14814_v5 = vld [vmem:[#allocation13_spill] sm:$0xff] }
 0x24e   : > { %v1291_v23 = vpop.f32.mrf.mxu3 }
 0x24f   : > { %v1362_v37 = vadd.f32 %v1291_v23, %v10221_v49  ;;  %v14809_v49 = vld [vmem:[#allocation11_spill] sm:$0xff]  ;;  %v14811_v23 = vld [vmem:[#allocation12_spill] sm:$0xff] }
 0x250   : > { %v1426_v58 = vpop.f32.mrf.mxu1 }
 0x251   : > { %v1490_v33 = vadd.f32 %v1419_v19, %v1362_v37  ;;  %v1388_v19 = vpack.c.bf16 %v10354_v57, %v10513_v12 }
 0x253   : > { %v10507_v0 = vadd.f32 %v1556_v26, %v1490_v33  ;;  %8782 = vmatmul.msk.bf16.gmra.mxu0 %vm809_vm2, %v1388_v19 }
 0x254   : > { %v1558_v6 = vpop.f32.mrf.mxu2 }
 0x255   : > { %14803 = vst [vmem:[#allocation39_spill] sm:$0xff] %v10507_v0 }
 0x256   : > { %v1293_v31 = vpop.f32.mrf.mxu3 }
 0x257   : > { %v1363_v9 = vadd.f32 %v1293_v31, %v14804_v41  ;;  %v10533_v31 = vpop.f32.mrf.mxu0 }
 0x258   : > { %v1429_v28 = vpop.f32.mrf.mxu1  ;;  %14812 = vst [vmem:[#allocation11_spill] sm:$0xff] %v10533_v31 }
 0x259   : > { %v1491_v24 = vadd.f32 %v1421_v3, %v1363_v9  ;;  %8748 = vmatmul.msk.bf16.gmra.mxu2 %vm809_vm2, %v14808_v36  ;;  %v1665_v3 = vsel %vm858_vm1, %v470_v1, 0  ;;  %v472_v1 = vld [vmem:[%s14626_s1 + $0x2c] sm:$0xf] }
 0x25a   : > { %1674 = vmatpush.bf16.msra.mxu3 %v1665_v3  ;;  %v1913_v3 = vsel %vm858_vm1, %v472_v1, 0 }
 0x25b   : > { %8716 = vmatmul.msk.bf16.gmra.mxu3 %vm809_vm2, %v14809_v49  ;;  %8733 = vmatmul.msk.bf16.gmra.mxu1 %vm809_vm2, %v10287_v10  ;;  %v10525_v14 = vadd.f32 %v1558_v6, %v1491_v24 }
 0x25c   : > { %v1561_v42 = vpop.f32.mrf.mxu2  ;;  %1922 = vmatpush.bf16.msra.mxu1 %v1913_v3 }
 0x25d   : > { %14810 = vst [vmem:[#allocation14_spill] sm:$0xff] %v10525_v14 }
 0x25e   : > { %v1296_v26 = vpop.f32.mrf.mxu3 }
 0x25f   : > { %v1364_v37 = vadd.f32 %v1296_v26, %v14811_v23  ;;  %v10550_v23 = vpop.f32.mrf.mxu0 }
 0x260   : > { %v1431_v33 = vpop.f32.mrf.mxu1  ;;  %14818 = vst [vmem:[#allocation18_spill] sm:$0xff] %v10550_v23 }
 0x261   : > { %v1492_v10 = vadd.f32 %v1424_v8, %v1364_v37  ;;  %v14816_v8 = vld [vmem:[#allocation15_spill] sm:$0xff]  ;;  %v14819_v37 = vmov 0.0|0.0  }
 0x263   : > { %v10535_v41 = vadd.f32 %v1561_v42, %v1492_v10  ;;  %1874 = vmatmul.bf16.gmra.mxu0 %v14819_v37  ;;  %v14820_v10 = vld [vmem:[#allocation16_spill] sm:$0xff] }
 0x264   : > { %v1563_v6 = vpop.f32.mrf.mxu2 }
 0x265   : > { %14813 = vst [vmem:[#allocation12_spill] sm:$0xff] %v10535_v41  ;;  %v473_v41 = vld [vmem:[%s14626_s1 + $0x30] sm:$0xf] }
 0x266   : > { %v1298_v9 = vpop.f32.mrf.mxu3 }
 0x267   : > { %v1365_v24 = vadd.f32 %v1298_v9, %v14814_v5 }
 0x268   : > { %v1434_v14 = vpop.f32.mrf.mxu1 }
 0x269   : > { %v1493_v0 = vadd.f32 %v1426_v58, %v1365_v24  ;;  %8749 = vmatmul.msk.bf16.gmra.mxu2 %vm809_vm2, %v14815_v44 }
 0x26b   : > { %8717 = vmatmul.msk.bf16.gmra.mxu3 %vm809_vm2, %v14816_v8  ;;  %8734 = vmatmul.msk.bf16.gmra.mxu1 %vm809_vm2, %v10316_v11  ;;  %v10548_v42 = vadd.f32 %v1563_v6, %v1493_v0  ;;  %v2037_v11 = vsel %vm858_vm1, %v473_v41, 0  ;;  %v14822_v6 = vld [vmem:[#allocation17_spill] sm:$0xff] }
 0x26c   : > { %v1566_v26 = vpop.f32.mrf.mxu2  ;;  %2046 = vmatpush.bf16.msra.mxu2 %v2037_v11  ;;  %v14826_v11 = vld [vmem:[#allocation20_spill] sm:$0xff] }
 0x26d   : > { %14817 = vst [vmem:[#allocation13_spill] sm:$0xff] %v10548_v42 }
 0x26e   : > { %v1301_v58 = vpop.f32.mrf.mxu3 }
 0x26f   : > { %v1366_v9 = vadd.f32 %v1301_v58, %v14820_v10  ;;  %v14824_v58 = vld [vmem:[#allocation19_spill] sm:$0xff] }
 0x270   : > { %v1436_v5 = vpop.f32.mrf.mxu1 }
 0x271   : > { %v1494_v24 = vadd.f32 %v1429_v28, %v1366_v9  ;;  %v14823_v28 = vrot.slane %v10341_v4, 7  ;;  %v1518_v9 = vrot.slane %v10513_v12, 1 }
 0x273   : > { %v10554_v1 = vadd.f32 %v1566_v26, %v1494_v24  ;;  %v10566_v26 = vsel %vm508_vm3, %v14823_v28, 0.0 }
 0x274   : > { %v1568_v3 = vpop.f32.mrf.mxu2 }
 0x275   : > { %14821 = vst [vmem:[#allocation15_spill] sm:$0xff] %v10554_v1 }
 0x276   : > { %v1303_v0 = vpop.f32.mrf.mxu3 }
 0x277   : > { %v1367_v42 = vadd.f32 %v1303_v0, %v14822_v6 }
 0x278   : > { %v1439_v23 = vpop.f32.mrf.mxu1 }
 0x279   : > { %v1495_v31 = vadd.f32 %v1431_v33, %v1367_v42  ;;  %8750 = vmatmul.msk.bf16.gmra.mxu2 %vm809_vm2, %v10324_v21  ;;  %v1519_v33 = vrot.slane %v10354_v57, 1  ;;  %v1521_v42 = vrot.slane %v10566_v26, 1 }
 0x27b   : > { %8718 = vmatmul.msk.bf16.gmra.mxu3 %vm809_vm2, %v14824_v58  ;;  %8735 = vmatmul.msk.bf16.gmra.mxu1 %vm809_vm2, %v1388_v19  ;;  %v10571_v41 = vadd.f32 %v1568_v3, %v1495_v31  ;;  %v1520_v28 = vsel %vm684_vm4, %v1518_v9, %v1519_v33  ;;  %v1522_v1 = vsel %vm684_vm4, %v1519_v33, %v1521_v42 }
 0x27c   : > { %v1571_v10 = vpop.f32.mrf.mxu2  ;;  %v10581_v31 = vpack.c.bf16 %v1522_v1, %v1520_v28 }
 0x27d   : > { %14825 = vst [vmem:[#allocation16_spill] sm:$0xff] %v10571_v41 }
 0x27e   : > { %v1306_v24 = vpop.f32.mrf.mxu3 }
 0x27f   : > { %v1368_v4 = vadd.f32 %v1306_v24, %v14826_v11 }
 0x280   : > { %v1441_v0 = vpop.f32.mrf.mxu1 }
 0x281   : > { %v1496_v6 = vadd.f32 %v1434_v14, %v1368_v4 }
 0x283   : > { %v10579_v21 = vadd.f32 %v1571_v10, %v1496_v6 }
 0x284   : > { %v1573_v19 = vpop.f32.mrf.mxu2 }
 0x286   : > { %v1308_v3 = vpop.f32.mrf.mxu3 }
 0x287   : > { %v1369_v41 = vadd.f32 %v1308_v3, %v10312_v48 }
 0x288   : > { %v1444_v57 = vpop.f32.mrf.mxu1 }
 0x289   : > { %v1497_v12 = vadd.f32 %v1436_v5, %v1369_v41  ;;  %8751 = vmatmul.msk.bf16.gmra.mxu2 %vm809_vm2, %v10581_v31  ;;  %v9768_v41 = vld [vmem:[%s14627_s2 + $0x2] ss:$0 sm:$0xff] }
 0x28a   : > { %2227 = vrot.lane.b32.xlu0 %v9768_v41, %s9842_s20  ;;  %v10622_v41 = vpop.f32.mrf.mxu0 }
 0x28b   : > { %8719 = vmatmul.msk.bf16.gmra.mxu3 %vm809_vm2, %v10326_v15  ;;  %8783 = vmatmul.msk.bf16.vlgmr.msra.gmra.mxu1 %vm809_vm2, %v10007_v62  ;;  %v10590_v14 = vadd.f32 %v1573_v19, %v1497_v12 }
 0x28c   : > { %v1576_v10 = vpop.f32.mrf.mxu2 }
 0x28e   : > { %v1311_v9 = vpop.f32.mrf.mxu3 }
 0x28f   : > { %v1370_v1 = vadd.f32 %v1311_v9, %v10332_v13 }
 0x290   : > { %v1446_v33 = vpop.f32.mrf.mxu1 }
 0x291   : > { %v1498_v42 = vadd.f32 %v1439_v23, %v1370_v1 }
 0x293   : > { %v10593_v48 = vadd.f32 %v1576_v10, %v1498_v42 }
 0x294   : > { %v1578_v5 = vpop.f32.mrf.mxu2 }
 0x296   : > { %v1313_v24 = vpop.f32.mrf.mxu3 }
 0x297   : > { %v1371_v62 = vadd.f32 %v1313_v24, %v10347_v50 }
 0x298   : > { %v1449_v12 = vpop.f32.mrf.mxu1 }
 0x299   : > { %v1499_v11 = vadd.f32 %v1441_v0, %v1371_v62  ;;  %8799 = vmatmul.msk.bf16.vlgmr.msra.gmra.mxu2 %vm809_vm2, %v10012_v2 }
 0x29b   : > { %8752 = vmatmul.msk.bf16.vlgmr.msra.gmra.mxu3 %vm809_vm2, %v9991_v43  ;;  %8784 = vmatmul.msk.bf16.gmra.mxu1 %vm809_vm2, %v10028_v25  ;;  %v10605_v13 = vadd.f32 %v1578_v5, %v1499_v11 }
 0x29c   : > { %v1581_v23 = vpop.f32.mrf.mxu2 }
 0x29e   : > { %v1316_v4 = vpop.f32.mrf.mxu3 }
 0x29f   : > { %v1372_v6 = vadd.f32 %v1316_v4, %v10366_v53 }
 0x2a0   : > { %v1451_v28 = vpop.f32.mrf.mxu1 }
 0x2a1   : > { %v1500_v19 = vadd.f32 %v1444_v57, %v1372_v6 }
 0x2a3   : > { %v10608_v50 = vadd.f32 %v1581_v23, %v1500_v19  ;;  %v10633_v23 = vpop.f32.mrf.mxu0 }
 0x2a4   : > { %v1583_v0 = vpop.f32.mrf.mxu2 }
 0x2a6   : > { %v1318_v3 = vpop.f32.mrf.mxu3 }
 0x2a7   : > { %v1373_v10 = vadd.f32 %v1318_v3, %v10370_v7 }
 0x2a8   : > { %v1454_v9 = vpop.f32.mrf.mxu1 }
 0x2a9   : > { %v1501_v1 = vadd.f32 %v1446_v33, %v1373_v10  ;;  %8800 = vmatmul.msk.bf16.gmra.mxu2 %vm809_vm2, %v10033_v29 }
 0x2ab   : > { %8753 = vmatmul.msk.bf16.gmra.mxu3 %vm809_vm2, %v10012_v2  ;;  %8785 = vmatmul.msk.bf16.gmra.mxu1 %vm809_vm2, %v10049_v51  ;;  %v10617_v43 = vadd.f32 %v1583_v0, %v1501_v1  ;;  %v10639_v10 = vpop.f32.mrf.mxu0 }
 0x2ac   : > { %v1586_v25 = vpop.f32.mrf.mxu2 }
 0x2ae   : > { %v1321_v57 = vpop.f32.mrf.mxu3 }
 0x2af   : > { %v1374_v53 = vadd.f32 %v1321_v57, %v10378_v54 }
 0x2b0   : > { %v1456_v42 = vpop.f32.mrf.mxu1 }
 0x2b1   : > { %v1502_v5 = vadd.f32 %v1449_v12, %v1374_v53 }
 0x2b3   : > { %v10620_v7 = vadd.f32 %v1586_v25, %v1502_v5  ;;  %v14828_v25 = vld [vmem:[#allocation25_spill] sm:$0xff]  ;;  %v10650_v5 = vpop.f32.mrf.mxu0 }
 0x2b4   : > { %v1588_v33 = vpop.f32.mrf.mxu2 }
 0x2b6   : > { %v1323_v24 = vpop.f32.mrf.mxu3 }
 0x2b7   : > { %v1375_v62 = vadd.f32 %v1323_v24, %v10382_v61 }
 0x2b8   : > { %v1459_v2 = vpop.f32.mrf.mxu1 }
 0x2b9   : > { %v1503_v11 = vadd.f32 %v1451_v28, %v1375_v62  ;;  %8801 = vmatmul.msk.bf16.gmra.mxu2 %vm809_vm2, %v10054_v56  ;;  %v14830_v62 = vld [vmem:[#allocation26_spill] sm:$0xff] }
 0x2bb   : > { %8754 = vmatmul.msk.bf16.gmra.mxu3 %vm809_vm2, %v10033_v29  ;;  %8786 = vmatmul.msk.bf16.gmra.mxu1 %vm809_vm2, %v10070_v18  ;;  %v10631_v51 = vadd.f32 %v1588_v33, %v1503_v11 }
 0x2bc   : > { %v1591_v54 = vpop.f32.mrf.mxu2 }
 0x2be   : > { %v1326_v12 = vpop.f32.mrf.mxu3 }
 0x2bf   : > { %v1376_v4 = vadd.f32 %v1326_v12, %v10390_v16  ;;  %v10663_v12 = vpop.f32.mrf.mxu0 }
 0x2c0   : > { %v1461_v61 = vpop.f32.mrf.mxu1 }
 0x2c1   : > { %v1504_v6 = vadd.f32 %v1454_v9, %v1376_v4 }
 0x2c3   : > { %v10636_v28 = vadd.f32 %v1591_v54, %v1504_v6  ;;  %v14832_v6 = vld [vmem:[#allocation27_spill] sm:$0xff] }
 0x2c4   : > { %v1593_v19 = vpop.f32.mrf.mxu2 }
 0x2c6   : > { %v1328_v0 = vpop.f32.mrf.mxu3 }
 0x2c7   : > { %v1377_v3 = vadd.f32 %v1328_v0, %v10394_v17 }
 0x2c8   : > { %v1464_v29 = vpop.f32.mrf.mxu1 }
 0x2c9   : > { %v1505_v18 = vadd.f32 %v1456_v42, %v1377_v3  ;;  %8802 = vmatmul.msk.bf16.gmra.mxu2 %vm809_vm2, %v10075_v22 }
 0x2cb   : > { %8755 = vmatmul.msk.bf16.gmra.mxu3 %vm809_vm2, %v10054_v56  ;;  %8787 = vmatmul.msk.bf16.gmra.mxu1 %vm809_vm2, %v10091_v47  ;;  %v10647_v16 = vadd.f32 %v1593_v19, %v1505_v18 }
 0x2cc   : > { %v1596_v9 = vpop.f32.mrf.mxu2 }
 0x2cd   : > { %14827 = vst [vmem:[#allocation17_spill] sm:$0xff] %v10647_v16 }
 0x2ce   : > { %v1331_v1 = vpop.f32.mrf.mxu3 }
 0x2cf   : > { %v1378_v57 = vadd.f32 %v1331_v1, %v14828_v25  ;;  %v10668_v1 = vpop.f32.mrf.mxu0 }
 0x2d0   : > { %v1466_v17 = vpop.f32.mrf.mxu1 }
 0x2d1   : > { %v1506_v53 = vadd.f32 %v1459_v2, %v1378_v57 }
 0x2d3   : > { %v10652_v42 = vadd.f32 %v1596_v9, %v1506_v53  ;;  %v14835_v53 = vld [vmem:[#allocation7_spill] sm:$0xff] }
 0x2d4   : > { %v1598_v33 = vpop.f32.mrf.mxu2 }
 0x2d5   : > { %14829 = vst [vmem:[#allocation19_spill] sm:$0xff] %v10652_v42 }
 0x2d6   : > { %v1333_v24 = vpop.f32.mrf.mxu3 }
 0x2d7   : > { %v1379_v11 = vadd.f32 %v1333_v24, %v14830_v62 }
 0x2d8   : > { %v1469_v56 = vpop.f32.mrf.mxu1 }
 0x2d9   : > { %v1507_v54 = vadd.f32 %v1461_v61, %v1379_v11  ;;  %8803 = vmatmul.msk.bf16.gmra.mxu2 %vm809_vm2, %v10096_v52  ;;  %v14838_v11 = vld [vmem:[#allocation31_spill] sm:$0xff] }
 0x2db   : > { %8756 = vmatmul.msk.bf16.gmra.mxu3 %vm809_vm2, %v10075_v22  ;;  %8788 = vmatmul.msk.bf16.gmra.mxu1 %vm809_vm2, %v10116_v20  ;;  %v10661_v47 = vadd.f32 %v1598_v33, %v1507_v54  ;;  %v14834_v22 = vld [vmem:[#allocation29_spill] sm:$0xff]  ;;  %v14836_v33 = vld [vmem:[#allocation8_spill] sm:$0xff] }
 0x2dc   : > { %v1601_v2 = vpop.f32.mrf.mxu2 }
 0x2dd   : > { %14831 = vst [vmem:[#allocation20_spill] sm:$0xff] %v10661_v47 }
 0x2de   : > { %v1336_v4 = vpop.f32.mrf.mxu3 }
 0x2df   : > { %v1380_v19 = vadd.f32 %v1336_v4, %v14832_v6  ;;  %v10680_v4 = vpop.f32.mrf.mxu0 }
 0x2e0   : > { %v1471_v0 = vpop.f32.mrf.mxu1 }
 0x2e1   : > { %v1508_v3 = vadd.f32 %v1464_v29, %v1380_v19 }
 0x2e3   : > { %v10666_v61 = vadd.f32 %v1601_v2, %v1508_v3 }
 0x2e4   : > { %v1603_v18 = vpop.f32.mrf.mxu2 }
 0x2e5   : > { %14833 = vst [vmem:[#allocation25_spill] sm:$0xff] %v10666_v61 }
 0x2e6   : > { %v1338_v9 = vpop.f32.mrf.mxu3 }
 0x2e7   : > { %v1381_v25 = vadd.f32 %v1338_v9, %v14834_v22  ;;  %v14840_v9 = vld [vmem:[#allocation33_spill] sm:$0xff] }
 0x2e8   : > { %v1474_v57 = vpop.f32.mrf.mxu1 }
 0x2e9   : > { %v1509_v20 = vadd.f32 %v1466_v17, %v1381_v25  ;;  %8804 = vmatmul.msk.bf16.gmra.mxu2 %vm809_vm2, %v14835_v53 }
 0x2eb   : > { %8757 = vmatmul.msk.bf16.gmra.mxu3 %vm809_vm2, %v10096_v52  ;;  %8789 = vmatmul.msk.bf16.gmra.mxu1 %vm809_vm2, %v14836_v33  ;;  %v10677_v29 = vadd.f32 %v1603_v18, %v1509_v20  ;;  %v10687_v18 = vpop.f32.mrf.mxu0  ;;  %v14841_v20 = vld [vmem:[#allocation9_spill] sm:$0xff] }
 0x2ec   : > { %v1606_v24 = vpop.f32.mrf.mxu2 }
 0x2ed   : > { %14837 = vst [vmem:[#allocation26_spill] sm:$0xff] %v10677_v29 }
 0x2ee   : > { %v1341_v62 = vpop.f32.mrf.mxu3 }
 0x2ef   : > { %v1382_v54 = vadd.f32 %v1341_v62, %v14838_v11  ;;  %v14843_v62 = vld [vmem:[#allocation35_spill] sm:$0xff] }
 0x2f0   : > { %v1476_v2 = vpop.f32.mrf.mxu1 }
 0x2f1   : > { %v1510_v6 = vadd.f32 %v1469_v56, %v1382_v54 }
 0x2f3   : > { %v10682_v17 = vadd.f32 %v1606_v24, %v1510_v6 }
 0x2f4   : > { %v1608_v19 = vpop.f32.mrf.mxu2 }
 0x2f5   : > { %14839 = vst [vmem:[#allocation27_spill] sm:$0xff] %v10682_v17  ;;  %v14845_v17 = vld [vmem:[#allocation36_spill] sm:$0xff] }
 0x2f6   : > { %v1343_v3 = vpop.f32.mrf.mxu3 }
 0x2f7   : > { %v1383_v22 = vadd.f32 %v1343_v3, %v14840_v9  ;;  %v10698_v9 = vpop.f32.mrf.mxu0 }
 0x2f8   : > { %v1479_v52 = vpop.f32.mrf.mxu1 }
 0x2f9   : > { %v1511_v25 = vadd.f32 %v1471_v0, %v1383_v22  ;;  %8805 = vmatmul.msk.bf16.gmra.mxu2 %vm809_vm2, %v10143_v60 }
 0x2fb   : > { %8758 = vmatmul.msk.bf16.gmra.mxu3 %vm809_vm2, %v14835_v53  ;;  %8790 = vmatmul.msk.bf16.gmra.mxu1 %vm809_vm2, %v14841_v20  ;;  %v10693_v56 = vadd.f32 %v1608_v19, %v1511_v25  ;;  %v9613_v53 = vld [vmem:[%s14626_s1 + $0x34] sm:$0xff] }
 0x2fc   : > { %v1611_v33 = vpop.f32.mrf.mxu2  ;;  %2809 = vmatpush.bf16.msrb.mxu0 %v9613_v53 }
 0x2fd   : > { %14842 = vst [vmem:[#allocation29_spill] sm:$0xff] %v10693_v56 }
 0x2fe   : > { %v1346_v24 = vpop.f32.mrf.mxu3 }
 0x2ff   : > { %v1384_v11 = vadd.f32 %v1346_v24, %v14843_v62  ;;  %2810 = vmatmul.bf16.vlgmr.msrb.gmra.mxu0 %v14819_v37  ;;  %v10713_v62 = vpop.f32.mrf.mxu0  ;;  %v14849_v37 = vld [vmem:[#allocation38_spill] sm:$0xff] }
 0x300   : > { %v1481_v54 = vpop.f32.mrf.mxu1 }
 0x301   : > { %v1512_v6 = vadd.f32 %v1474_v57, %v1384_v11 }
 0x303   : > { %v10696_v0 = vadd.f32 %v1611_v33, %v1512_v6 }
 0x304   : > { %v1613_v3 = vpop.f32.mrf.mxu2 }
 0x305   : > { %14844 = vst [vmem:[#allocation7_spill] sm:$0xff] %v10696_v0 }
 0x306   : > { %v1348_v22 = vpop.f32.mrf.mxu3 }
 0x307   : > { %v1385_v20 = vadd.f32 %v1348_v22, %v14845_v17  ;;  %v14847_v17 = vld [vmem:[#allocation37_spill] sm:$0xff]  ;;  %v10719_v56 = vpop.f32.mrf.mxu0 }
 0x308   : > { %v1924_v19 = vpop.f32.mrf.mxu1 }
 0x309   : > { %v1513_v25 = vadd.f32 %v1476_v2, %v1385_v20  ;;  %8806 = vmatmul.msk.bf16.gmra.mxu2 %vm809_vm2, %v10165_v40 }
 0x30b   : > { %8759 = vmatmul.msk.bf16.gmra.mxu3 %vm809_vm2, %v10143_v60  ;;  %8791 = vmatmul.msk.bf16.gmra.mxu1 %vm809_vm2, %v10185_v27  ;;  %v10711_v57 = vadd.f32 %v1613_v3, %v1513_v25 }
 0x30c   : > { %v1616_v33 = vpop.f32.mrf.mxu2 }
 0x30d   : > { %14846 = vst [vmem:[#allocation8_spill] sm:$0xff] %v10711_v57 }
 0x30e   : > { %v1351_v24 = vpop.f32.mrf.mxu3 }
 0x30f   : > { %v1386_v11 = vadd.f32 %v1351_v24, %v14847_v17  ;;  %v14851_v24 = vld [vmem:[#allocation28_spill] sm:$0xff] }
 0x310   : > { %v1926_v2 = vpop.f32.mrf.mxu1 }
 0x311   : > { %v1514_v6 = vadd.f32 %v1479_v52, %v1386_v11  ;;  %v10731_v11 = vpop.f32.mrf.mxu0 }
 0x313   : > { %v10716_v53 = vadd.f32 %v1616_v33, %v1514_v6 }
 0x314   : > { %v1618_v22 = vpop.f32.mrf.mxu2 }
 0x315   : > { %14848 = vst [vmem:[#allocation31_spill] sm:$0xff] %v10716_v53 }
 0x316   : > { %v1353_v20 = vpop.f32.mrf.mxu3 }
 0x317   : > { %v1387_v0 = vadd.f32 %v1353_v20, %v14849_v37 }
 0x318   : > { %v1929_v60 = vpop.f32.mrf.mxu1 }
 0x319   : > { %v1515_v27 = vadd.f32 %v1481_v54, %v1387_v0  ;;  %8807 = vmatmul.msk.bf16.gmra.mxu2 %vm809_vm2, %v10190_v35  ;;  %v10736_v0 = vld [vmem:[%s14627_s2 + $0x1] ss:$0 sm:$0xff] }
 0x31b   : > { %8760 = vmatmul.msk.bf16.gmra.mxu3 %vm809_vm2, %v10165_v40  ;;  %8792 = vmatmul.msk.bf16.gmra.mxu1 %vm809_vm2, %v10210_v30  ;;  %v10727_v52 = vadd.f32 %v1618_v22, %v1515_v27 }
 0x31c   : > { %v2048_v3 = vpop.f32.mrf.mxu2 }
 0x31d   : > { %14850 = vst [vmem:[#allocation33_spill] sm:$0xff] %v10727_v52 }
 0x31e   : > { %v1676_v25 = vpop.f32.mrf.mxu3 }
 0x31f   : > { %v1756_v33 = vadd.f32 %v1676_v25, %v10469_v55  ;;  %v14852_v25 = vld [vmem:[#allocation30_spill] sm:$0xff] }
 0x320   : > { %v1931_v37 = vpop.f32.mrf.mxu1 }
 0x321   : > { %v1880_v17 = vadd.f32 %v14851_v24, %v1756_v33  ;;  %v10750_v24 = vpop.f32.mrf.mxu0 }
 0x322   : > { %14853 = vst [vmem:[#allocation9_spill] sm:$0xff] %v10750_v24 }
 0x323   : > { %v2004_v54 = vadd.f32 %v1924_v19, %v1880_v17 }
 0x324   : > { %v2050_v40 = vpop.f32.mrf.mxu2 }
 0x325   : > { %v10738_v6 = vadd.f32 %v2048_v3, %v2004_v54 }
 0x326   : > { %v1678_v30 = vpop.f32.mrf.mxu3 }
 0x327   : > { %v2161_v22 = vadd.f32 %v10736_v0, %v10738_v6  ;;  %v1757_v55 = vadd.f32 %v1678_v30, %v10478_v34 }
 0x328   : > { %v1934_v20 = vpop.f32.mrf.mxu1 }
 0x329   : > { %v2193_v27 = vmax.f32 %v2161_v22, 0.0  ;;  %v1881_v33 = vadd.f32 %v14852_v25, %v1757_v55  ;;  %8808 = vmatmul.msk.bf16.gmra.mxu2 %vm809_vm2, %v10215_v46  ;;  %v14855_v25 = vld [vmem:[#allocation32_spill] sm:$0xff] }
 0x32b   : > { %v2005_v19 = vadd.f32 %v1926_v2, %v1881_v33  ;;  %8761 = vmatmul.msk.bf16.gmra.mxu3 %vm809_vm2, %v10190_v35  ;;  %8793 = vmatmul.msk.bf16.gmra.mxu1 %vm809_vm2, %v10235_v63  ;;  %v2313_v17 = vrot.slane %v2193_v27, 7 }
 0x32c   : > { %v2053_v3 = vpop.f32.mrf.mxu2 }
 0x32d   : > { %v10752_v54 = vadd.f32 %v2050_v40, %v2005_v19  ;;  %v2409_v33 = vsel %vm508_vm3, 0.0, %v2313_v17 }
 0x32e   : > { %v1681_v34 = vpop.f32.mrf.mxu3  ;;  %v2486_v57 = vrot.slane %v2409_v33, 1  ;;  %v2891_v29 = vrot.slane %v2409_v33, 2 }
 0x32f   : > { %14854 = vst [vmem:[#allocation35_spill] sm:$0xff] %v10752_v54  ;;  %v2162_v30 = vadd.f32 %v10736_v0, %v10752_v54  ;;  %v1758_v22 = vadd.f32 %v1681_v34, %v10481_v32 }
 0x330   : > { %v10757_v55 = vpop.f32.mrf.mxu1 }
 0x331   : > { %v2194_v2 = vmax.f32 %v2162_v30, 0.0  ;;  %v1882_v35 = vadd.f32 %v14855_v25, %v1758_v22  ;;  %v10767_v25 = vpop.f32.mrf.mxu0 }
 0x332   : > { %14856 = vst [vmem:[#allocation36_spill] sm:$0xff] %v10767_v25 }
 0x333   : > { %v2314_v63 = vrot.slane %v2194_v2, 7  ;;  %v2006_v52 = vadd.f32 %v1929_v60, %v1882_v35 }
 0x334   : > { %v2055_v53 = vpop.f32.mrf.mxu2 }
 0x335   : > { %v2425_v40 = vsel %vm508_vm3, %v2314_v63, 0.0  ;;  %v10762_v27 = vadd.f32 %v2053_v3, %v2006_v52  ;;  %v2315_v19 = vsel %vm508_vm3, %v2313_v17, %v2314_v63  ;;  %v14857_v63 = vld [vmem:[#allocation34_spill] sm:$0xff] }
 0x336   : > { %v1683_v32 = vpop.f32.mrf.mxu3  ;;  %v10765_v34 = vpack.c.bf16 %v2315_v19, %v2409_v33  ;;  %v2487_v30 = vrot.slane %v2315_v19, 1  ;;  %v2892_v61 = vrot.slane %v2315_v19, 2  ;;  %v2894_v22 = vrot.slane %v2425_v40, 2 }
 0x337   : > { %v2163_v60 = vadd.f32 %v10736_v0, %v10762_v27  ;;  %v1759_v2 = vadd.f32 %v1683_v32, %v10490_v45  ;;  %v2489_v35 = vrot.slane %v2425_v40, 1 }
 0x338   : > { %v10772_v47 = vpop.f32.mrf.mxu1  ;;  %8839 = vmatmul.msk.bf16.gmra.mxu0 %vm2612_vm6, %v10765_v34  ;;  %v2893_v52 = vsel %vm1091_vm5, %v2891_v29, %v2892_v61  ;;  %v2895_v3 = vsel %vm1091_vm5, %v2892_v61, %v2894_v22  ;;  %v2488_v17 = vsel %vm684_vm4, %v2486_v57, %v2487_v30 }
 0x339   : > { %v2195_v33 = vmax.f32 %v2163_v60, 0.0  ;;  %v1883_v19 = vadd.f32 %v14857_v63, %v1759_v2  ;;  %8809 = vmatmul.msk.bf16.gmra.mxu2 %vm809_vm2, %v14809_v49  ;;  %v10782_v42 = vpack.c.bf16 %v2895_v3, %v2893_v52  ;;  %v2490_v45 = vsel %vm684_vm4, %v2487_v30, %v2489_v35  ;;  %v10798_v35 = vpop.f32.mrf.mxu0 }
 0x33a   : > { %v10785_v40 = vpack.c.bf16 %v2490_v45, %v2488_v17  ;;  %14859 = vst [vmem:[#allocation38_spill] sm:$0xff] %v10798_v35 }
 0x33b   : > { %v2007_v32 = vadd.f32 %v1931_v37, %v1883_v19  ;;  %8762 = vmatmul.msk.bf16.gmra.mxu3 %vm809_vm2, %v10215_v46  ;;  %8794 = vmatmul.msk.bf16.gmra.mxu1 %vm809_vm2, %v14808_v36  ;;  %v2316_v29 = vrot.slane %v2195_v33, 7 }
 0x33c   : > { %14858 = vst [vmem:[#allocation37_spill] sm:$0xff] %v10785_v40  ;;  %v2058_v61 = vpop.f32.mrf.mxu2 }
 0x33d   : > { %v10791_v57 = vadd.f32 %v2055_v53, %v2007_v32  ;;  %v2410_v52 = vsel %vm508_vm3, 0.0, %v2316_v29 }
 0x33e   : > { %v1686_v22 = vpop.f32.mrf.mxu3  ;;  %v2491_v53 = vrot.slane %v2410_v52, 1 }
 0x33f   : > { %v2164_v60 = vadd.f32 %v10736_v0, %v10791_v57  ;;  %v1760_v2 = vadd.f32 %v1686_v22, %v10493_v59  ;;  %v2896_v59 = vrot.slane %v2410_v52, 2 }
 0x340   : > { %v10796_v30 = vpop.f32.mrf.mxu1 }
 0x341   : > { %v2196_v37 = vmax.f32 %v2164_v60, 0.0  ;;  %v1884_v46 = vadd.f32 %v10504_v39, %v1760_v2 }
 0x343   : > { %v2317_v36 = vrot.slane %v2196_v37, 7  ;;  %v2008_v3 = vadd.f32 %v1934_v20, %v1884_v46 }
 0x344   : > { %v2060_v17 = vpop.f32.mrf.mxu2 }
 0x345   : > { %v2426_v33 = vsel %vm508_vm3, %v2317_v36, 0.0  ;;  %v10803_v63 = vadd.f32 %v2058_v61, %v2008_v3  ;;  %v2318_v19 = vsel %vm508_vm3, %v2316_v29, %v2317_v36  ;;  %v14861_v36 = vld [vmem:[#allocation40_spill] sm:$0xff] }
 0x346   : > { %v1688_v45 = vpop.f32.mrf.mxu3  ;;  %v10806_v32 = vpack.c.bf16 %v2318_v19, %v2410_v52  ;;  %v2492_v22 = vrot.slane %v2318_v19, 1  ;;  %v2897_v60 = vrot.slane %v2318_v19, 2  ;;  %v2899_v35 = vrot.slane %v2426_v33, 2 }
 0x347   : > { %v2165_v39 = vadd.f32 %v10736_v0, %v10803_v63  ;;  %v1761_v20 = vadd.f32 %v1688_v45, %v10502_v38  ;;  %v2494_v2 = vrot.slane %v2426_v33, 1  ;;  %v10826_v45 = vpop.f32.mrf.mxu0 }
 0x348   : > { %14860 = vst [vmem:[#allocation28_spill] sm:$0xff] %v10806_v32  ;;  %v10811_v37 = vpop.f32.mrf.mxu1  ;;  %8840 = vmatmul.msk.bf16.gmra.mxu0 %vm2612_vm6, %v10806_v32  ;;  %v2898_v61 = vsel %vm1091_vm5, %v2896_v59, %v2897_v60  ;;  %v2900_v29 = vsel %vm1091_vm5, %v2897_v60, %v2899_v35  ;;  %v2493_v46 = vsel %vm684_vm4, %v2491_v53, %v2492_v22 }
 0x349   : > { %v2197_v52 = vmax.f32 %v2165_v39, 0.0  ;;  %v1885_v3 = vadd.f32 %v14861_v36, %v1761_v20  ;;  %8810 = vmatmul.msk.bf16.gmra.mxu2 %vm809_vm2, %v14816_v8  ;;  %v10821_v19 = vpack.c.bf16 %v2900_v29, %v2898_v61  ;;  %v2495_v38 = vsel %vm684_vm4, %v2492_v22, %v2494_v2  ;;  %14864 = vst [vmem:[#allocation34_spill] sm:$0xff] %v10826_v45  ;;  %v14865_v20 = vld [vmem:[#allocation39_spill] sm:$0xff] }
 0x34a   : > { %v10824_v33 = vpack.c.bf16 %v2495_v38, %v2493_v46 }
 0x34b   : > { %14862 = vst [vmem:[#allocation30_spill] sm:$0xff] %v10821_v19  ;;  %v2009_v59 = vadd.f32 %v10757_v55, %v1885_v3  ;;  %8763 = vmatmul.msk.bf16.gmra.mxu3 %vm809_vm2, %v14809_v49  ;;  %8795 = vmatmul.msk.bf16.gmra.mxu1 %vm809_vm2, %v14815_v44  ;;  %v2319_v53 = vrot.slane %v2197_v52, 7  ;;  %v14866_v55 = vld [vmem:[#allocation11_spill] sm:$0xff] }
 0x34c   : > { %14863 = vst [vmem:[#allocation32_spill] sm:$0xff] %v10824_v33  ;;  %v2063_v35 = vpop.f32.mrf.mxu2 }
 0x34d   : > { %v10833_v60 = vadd.f32 %v2060_v17, %v2009_v59  ;;  %v2411_v49 = vsel %vm508_vm3, 0.0, %v2319_v53 }
 0x34e   : > { %v1691_v39 = vpop.f32.mrf.mxu3  ;;  %v2496_v52 = vrot.slane %v2411_v49, 1 }
 0x34f   : > { %v2166_v22 = vadd.f32 %v10736_v0, %v10833_v60  ;;  %v1762_v2 = vadd.f32 %v1691_v39, %v14865_v20  ;;  %v10843_v17 = vpop.f32.mrf.mxu0  ;;  %v2901_v20 = vrot.slane %v2411_v49, 2 }
 0x350   : > { %v10838_v61 = vpop.f32.mrf.mxu1  ;;  %14867 = vst [vmem:[#allocation40_spill] sm:$0xff] %v10843_v17 }
 0x351   : > { %v2198_v29 = vmax.f32 %v2166_v22, 0.0  ;;  %v1886_v46 = vadd.f32 %v14866_v55, %v1762_v2 }
 0x353   : > { %v2320_v36 = vrot.slane %v2198_v29, 7  ;;  %v2010_v44 = vadd.f32 %v10772_v47, %v1886_v46  ;;  %v14869_v29 = vld [vmem:[#allocation14_spill] sm:$0xff] }
 0x354   : > { %v2065_v3 = vpop.f32.mrf.mxu2 }
 0x355   : > { %v2427_v38 = vsel %vm508_vm3, %v2320_v36, 0.0  ;;  %v10846_v59 = vadd.f32 %v2063_v35, %v2010_v44  ;;  %v2321_v39 = vsel %vm508_vm3, %v2319_v53, %v2320_v36  ;;  %v14870_v44 = vld [vmem:[#allocation18_spill] sm:$0xff] }
 0x356   : > { %v1693_v45 = vpop.f32.mrf.mxu3  ;;  %v10849_v22 = vpack.c.bf16 %v2321_v39, %v2411_v49  ;;  %v2497_v2 = vrot.slane %v2321_v39, 1  ;;  %v2902_v55 = vrot.slane %v2321_v39, 2  ;;  %v2904_v25 = vrot.slane %v2427_v38, 2 }
 0x357   : > { %v2167_v47 = vadd.f32 %v10736_v0, %v10846_v59  ;;  %v1763_v46 = vadd.f32 %v1693_v45, %v14869_v29  ;;  %v2499_v16 = vrot.slane %v2427_v38, 1 }
 0x358   : > { %14868 = vst [vmem:[#allocation39_spill] sm:$0xff] %v10849_v22  ;;  %v10854_v17 = vpop.f32.mrf.mxu1  ;;  %8841 = vmatmul.msk.bf16.gmra.mxu0 %vm2612_vm6, %v10849_v22  ;;  %v2903_v35 = vsel %vm1091_vm5, %v2901_v20, %v2902_v55  ;;  %v2905_v53 = vsel %vm1091_vm5, %v2902_v55, %v2904_v25  ;;  %v2498_v49 = vsel %vm684_vm4, %v2496_v52, %v2497_v2  ;;  %v14873_v25 = vld [vmem:[#allocation21_spill] sm:$0xff] }
 0x359   : > { %v2199_v36 = vmax.f32 %v2167_v47, 0.0  ;;  %v1887_v39 = vadd.f32 %v14870_v44, %v1763_v46  ;;  %8811 = vmatmul.msk.bf16.gmra.mxu2 %vm809_vm2, %v14824_v58  ;;  %v10864_v24 = vpack.c.bf16 %v2905_v53, %v2903_v35  ;;  %v2500_v45 = vsel %vm684_vm4, %v2497_v2, %v2499_v16  ;;  %v10876_v46 = vpop.f32.mrf.mxu0  ;;  %v14875_v2 = vld [vmem:[#allocation12_spill] sm:$0xff] }
 0x35a   : > { %v10867_v38 = vpack.c.bf16 %v2500_v45, %v2498_v49  ;;  %14874 = vst [vmem:[#allocation18_spill] sm:$0xff] %v10876_v46 }
 0x35b   : > { %14871 = vst [vmem:[#allocation11_spill] sm:$0xff] %v10864_v24  ;;  %v2011_v29 = vadd.f32 %v10796_v30, %v1887_v39  ;;  %8764 = vmatmul.msk.bf16.gmra.mxu3 %vm809_vm2, %v14816_v8  ;;  %8796 = vmatmul.msk.bf16.gmra.mxu1 %vm809_vm2, %v14873_v25  ;;  %v2322_v20 = vrot.slane %v2199_v36, 7 }
 0x35c   : > { %14872 = vst [vmem:[#allocation14_spill] sm:$0xff] %v10867_v38  ;;  %v2068_v52 = vpop.f32.mrf.mxu2 }
 0x35d   : > { %v10874_v55 = vadd.f32 %v2065_v3, %v2011_v29  ;;  %v2412_v49 = vsel %vm508_vm3, 0.0, %v2322_v20 }
 0x35e   : > { %v1696_v47 = vpop.f32.mrf.mxu3  ;;  %v2501_v39 = vrot.slane %v2412_v49, 1  ;;  %v2906_v46 = vrot.slane %v2412_v49, 2 }
 0x35f   : > { %v2168_v16 = vadd.f32 %v10736_v0, %v10874_v55  ;;  %v1764_v35 = vadd.f32 %v1696_v47, %v14875_v2  ;;  %v9614_v47 = vld [vmem:[%s14626_s1 + $0x3c] sm:$0xff] }
 0x360   : > { %v10881_v53 = vpop.f32.mrf.mxu1  ;;  %2667 = vmatpush.bf16.msrb.mxu3 %v9614_v47 }
 0x361   : > { %v2200_v30 = vmax.f32 %v2168_v16, 0.0  ;;  %v1888_v8 = vadd.f32 %v10622_v41, %v1764_v35  ;;  %v10908_v54 = vpop.f32.mrf.mxu0 }
 0x362   : > { %14878 = vst [vmem:[#allocation12_spill] sm:$0xff] %v10908_v54 }
 0x363   : > { %v2323_v44 = vrot.slane %v2200_v30, 7  ;;  %v2012_v36 = vadd.f32 %v10811_v37, %v1888_v8  ;;  %v14877_v8 = vld [vmem:[#allocation13_spill] sm:$0xff] }
 0x364   : > { %v2070_v3 = vpop.f32.mrf.mxu2 }
 0x365   : > { %v2428_v45 = vsel %vm508_vm3, %v2323_v44, 0.0  ;;  %v10887_v29 = vadd.f32 %v2068_v52, %v2012_v36  ;;  %v2324_v25 = vsel %vm508_vm3, %v2322_v20, %v2323_v44  ;;  %v9615_v20 = vld [vmem:[%s14626_s1 + $0x44] sm:$0xff] }
 0x366   : > { %v1698_v16 = vpop.f32.mrf.mxu3  ;;  %v10893_v41 = vpack.c.bf16 %v2324_v25, %v2412_v49  ;;  %v2502_v2 = vrot.slane %v2324_v25, 1  ;;  %v2907_v35 = vrot.slane %v2324_v25, 2  ;;  %v2909_v30 = vrot.slane %v2428_v45, 2  ;;  %3071 = vmatpush.bf16.msrb.mxu1 %v9615_v20  ;;  %v14883_v20 = vld [vmem:[#allocation15_spill] sm:$0xff] }
 0x367   : > { %v2169_v37 = vadd.f32 %v10736_v0, %v10887_v29  ;;  %v1765_v38 = vadd.f32 %v1698_v16, %v14877_v8  ;;  %v2504_v52 = vrot.slane %v2428_v45, 1 }
 0x368   : > { %14876 = vst [vmem:[#allocation21_spill] sm:$0xff] %v10893_v41  ;;  %v10898_v36 = vpop.f32.mrf.mxu1  ;;  %8842 = vmatmul.msk.bf16.gmra.mxu0 %vm2612_vm6, %v10893_v41  ;;  %v2908_v49 = vsel %vm1091_vm5, %v2906_v46, %v2907_v35  ;;  %v2910_v44 = vsel %vm1091_vm5, %v2907_v35, %v2909_v30  ;;  %v2503_v25 = vsel %vm684_vm4, %v2501_v39, %v2502_v2  ;;  %v14881_v39 = vld [vmem:[#allocation10_spill] sm:$0xff] }
 0x369   : > { %v2201_v16 = vmax.f32 %v2169_v37, 0.0  ;;  %v1889_v45 = vadd.f32 %v10633_v23, %v1765_v38  ;;  %8812 = vmatmul.msk.bf16.gmra.mxu2 %vm809_vm2, %v10326_v15  ;;  %v10913_v47 = vpack.c.bf16 %v2910_v44, %v2908_v49  ;;  %v2505_v8 = vsel %vm684_vm4, %v2502_v2, %v2504_v52  ;;  %v14882_v38 = vld [vmem:[#allocation23_spill] sm:$0xff] }
 0x36a   : > { %v10916_v41 = vpack.c.bf16 %v2505_v8, %v2503_v25  ;;  %v1653_v23 = vrot.slane %v14881_v39, 2  ;;  %v1654_v35 = vrot.slane %v14882_v38, 2  ;;  %v1656_v37 = vrot.slane %v10566_v26, 2 }
 0x36b   : > { %14879 = vst [vmem:[#allocation13_spill] sm:$0xff] %v10913_v47  ;;  %v2013_v46 = vadd.f32 %v10838_v61, %v1889_v45  ;;  %8765 = vmatmul.msk.bf16.gmra.mxu3 %vm809_vm2, %v14824_v58  ;;  %8797 = vmatmul.msk.bf16.gmra.mxu1 %vm809_vm2, %v10581_v31  ;;  %v2325_v49 = vrot.slane %v2201_v16, 7  ;;  %v10937_v16 = vpop.f32.mrf.mxu0 }
 0x36c   : > { %14880 = vst [vmem:[#allocation41_spill] sm:$0xff] %v10916_v41  ;;  %v2073_v30 = vpop.f32.mrf.mxu2  ;;  %v1655_v31 = vsel %vm1091_vm5, %v1653_v23, %v1654_v35  ;;  %v1657_v8 = vsel %vm1091_vm5, %v1654_v35, %v1656_v37  ;;  %v10947_v35 = vpop.permute.xlu0 %2227 }
 0x36d   : > { %v10926_v2 = vadd.f32 %v2070_v3, %v2013_v46  ;;  %v2413_v26 = vsel %vm508_vm3, 0.0, %v2325_v49  ;;  %14884 = vst [vmem:[#allocation10_spill] sm:$0xff] %v10937_v16  ;;  %v10940_v38 = vpack.c.bf16 %v1657_v8, %v1655_v31 }
 0x36e   : > { %v1701_v52 = vpop.f32.mrf.mxu3 }
 0x36f   : > { %v2170_v61 = vadd.f32 %v10736_v0, %v10926_v2  ;;  %v1766_v44 = vadd.f32 %v1701_v52, %v14883_v20  ;;  %v2506_v52 = vrot.slane %v2413_v26, 1 }
 0x370   : > { %v10931_v58 = vpop.f32.mrf.mxu1 }
 0x371   : > { %v2202_v25 = vmax.f32 %v2170_v61, 0.0  ;;  %v1890_v45 = vadd.f32 %v10639_v10, %v1766_v44  ;;  %v2911_v61 = vrot.slane %v2413_v26, 2  ;;  %v9616_v10 = vld [vmem:[%s14626_s1 + $0x4c] sm:$0xff] }
 0x372   : > { %3202 = vmatpush.bf16.msrb.mxu2 %v9616_v10 }
 0x373   : > { %v2326_v3 = vrot.slane %v2202_v25, 7  ;;  %v2014_v46 = vadd.f32 %v10854_v17, %v1890_v45  ;;  %v14886_v45 = vld [vmem:[#allocation16_spill] sm:$0xff] }
 0x374   : > { %v2075_v39 = vpop.f32.mrf.mxu2 }
 0x375   : > { %v2429_v20 = vsel %vm508_vm3, %v2326_v3, 0.0  ;;  %v2327_v23 = vsel %vm508_vm3, %v2325_v49, %v2326_v3  ;;  %v2138_v54 = vadd.f32 %v2073_v30, %v2014_v46 }
 0x376   : > { %v1703_v37 = vpop.f32.mrf.mxu3  ;;  %v10949_v44 = vpack.c.bf16 %v2327_v23, %v2413_v26  ;;  %v2507_v17 = vrot.slane %v2327_v23, 1  ;;  %v2912_v25 = vrot.slane %v2327_v23, 2  ;;  %v2914_v31 = vrot.slane %v2429_v20, 2 }
 0x377   : > { %v1767_v8 = vadd.f32 %v1703_v37, %v14886_v45  ;;  %v2240_v16 = vadd.f32 %v10947_v35, %v2138_v54  ;;  %v2171_v49 = vadd.f32 %v10736_v0, %v2138_v54  ;;  %v2509_v30 = vrot.slane %v2429_v20, 1 }
 0x378   : > { %14885 = vst [vmem:[#allocation23_spill] sm:$0xff] %v10949_v44  ;;  %v10954_v3 = vpop.f32.mrf.mxu1  ;;  %8843 = vmatmul.msk.bf16.gmra.mxu0 %vm2612_vm6, %v10949_v44  ;;  %v2913_v46 = vsel %vm1091_vm5, %v2911_v61, %v2912_v25  ;;  %v2915_v26 = vsel %vm1091_vm5, %v2912_v25, %v2914_v31  ;;  %v2508_v23 = vsel %vm684_vm4, %v2506_v52, %v2507_v17  ;;  %v10970_v61 = vpop.f32.mrf.mxu0 }
 0x379   : > { %v1891_v41 = vadd.f32 %v10650_v5, %v1767_v8  ;;  %8813 = vmatmul.msk.bf16.gmra.mxu2 %vm809_vm2, %v10940_v38  ;;  %4092 = vrot.lane.b32.xlu2 %v2240_v16, %s9843_s9  ;;  %v2203_v54 = vmax.f32 %v2171_v49, 0.0  ;;  %v10965_v20 = vpack.c.bf16 %v2915_v26, %v2913_v46  ;;  %v2510_v10 = vsel %vm684_vm4, %v2507_v17, %v2509_v30  ;;  %v14890_v5 = vld [vmem:[#allocation6_spill] sm:$0xff] }
 0x37a   : > { %v10968_v37 = vpack.c.bf16 %v2510_v10, %v2508_v23  ;;  %14889 = vst [vmem:[#allocation42_spill] sm:$0xff] %v10970_v61 }
 0x37b   : > { %14887 = vst [vmem:[#allocation15_spill] sm:$0xff] %v10965_v20  ;;  %v2015_v25 = vadd.f32 %v10881_v53, %v1891_v41  ;;  %8766 = vmatmul.msk.bf16.gmra.mxu3 %vm809_vm2, %v10326_v15  ;;  %8798 = vmatmul.msk.bf16.gmra.mxu1 %vm809_vm2, %v14890_v5  ;;  %v2328_v16 = vrot.slane %v2203_v54, 7 }
 0x37c   : > { %14888 = vst [vmem:[#allocation16_spill] sm:$0xff] %v10968_v37  ;;  %v2078_v52 = vpop.f32.mrf.mxu2 }
 0x37d   : > { %v10977_v31 = vadd.f32 %v2075_v39, %v2015_v25  ;;  %v2414_v53 = vsel %vm508_vm3, 0.0, %v2328_v16 }
 0x37e   : > { %v1706_v45 = vpop.f32.mrf.mxu3  ;;  %v2511_v26 = vrot.slane %v2414_v53, 1  ;;  %v2916_v10 = vrot.slane %v2414_v53, 2 }
 0x37f   : > { %v2172_v17 = vadd.f32 %v10736_v0, %v10977_v31  ;;  %v1768_v8 = vadd.f32 %v1706_v45, %v10579_v21 }
 0x380   : > { %v10982_v49 = vpop.f32.mrf.mxu1  ;;  %v10987_v23 = vpop.f32.mrf.mxu0 }
 0x381   : > { %v2204_v30 = vmax.f32 %v2172_v17, 0.0  ;;  %v1892_v15 = vadd.f32 %v10663_v12, %v1768_v8 }
 0x383   : > { %v2329_v41 = vrot.slane %v2204_v30, 7  ;;  %v2016_v46 = vadd.f32 %v10898_v36, %v1892_v15 }
 0x384   : > { %v2080_v39 = vpop.f32.mrf.mxu2 }
 0x385   : > { %v2430_v54 = vsel %vm508_vm3, %v2329_v41, 0.0  ;;  %v2330_v25 = vsel %vm508_vm3, %v2328_v16, %v2329_v41  ;;  %v2140_v21 = vadd.f32 %v2078_v52, %v2016_v46  ;;  %v14892_v46 = vld [vmem:[#allocation24_spill] sm:$0xff] }
 0x386   : > { %v1708_v45 = vpop.f32.mrf.mxu3  ;;  %v10991_v61 = vpack.c.bf16 %v2330_v25, %v2414_v53  ;;  %v2512_v17 = vrot.slane %v2330_v25, 1  ;;  %v2917_v37 = vrot.slane %v2330_v25, 2  ;;  %v2919_v20 = vrot.slane %v2430_v54, 2 }
 0x387   : > { %v1769_v12 = vadd.f32 %v1708_v45, %v10590_v14  ;;  %v2242_v36 = vadd.f32 %v10947_v35, %v2140_v21  ;;  %v2173_v8 = vadd.f32 %v10736_v0, %v2140_v21  ;;  %v2514_v30 = vrot.slane %v2430_v54, 1 }
 0x388   : > { %14891 = vst [vmem:[#allocation43_spill] sm:$0xff] %v10991_v61  ;;  %v10996_v15 = vpop.f32.mrf.mxu1  ;;  %8844 = vmatmul.msk.bf16.gmra.mxu0 %vm2612_vm6, %v10991_v61  ;;  %v2918_v52 = vsel %vm1091_vm5, %v2916_v10, %v2917_v37  ;;  %v2920_v16 = vsel %vm1091_vm5, %v2917_v37, %v2919_v20  ;;  %v2513_v53 = vsel %vm684_vm4, %v2511_v26, %v2512_v17  ;;  %v11017_v26 = vpop.f32.mrf.mxu0 }
 0x389   : > { %v1893_v41 = vadd.f32 %v10668_v1, %v1769_v12  ;;  %8814 = vmatmul.msk.bf16.gmra.mxu2 %vm809_vm2, %v14892_v46  ;;  %4096 = vrot.lane.b32.xlu1 %v2242_v36, %s9843_s9  ;;  %v2205_v14 = vmax.f32 %v2173_v8, 0.0  ;;  %v11007_v54 = vpack.c.bf16 %v2920_v16, %v2918_v52  ;;  %v2515_v25 = vsel %vm684_vm4, %v2512_v17, %v2514_v30 }
 0x38a   : > { %v11010_v21 = vpack.c.bf16 %v2515_v25, %v2513_v53 }
 0x38b   : > { %14893 = vst [vmem:[#allocation44_spill] sm:$0xff] %v11007_v54  ;;  %v2017_v10 = vadd.f32 %v10931_v58, %v1893_v41  ;;  %8767 = vmatmul.msk.bf16.gmra.mxu3 %vm809_vm2, %v10940_v38  ;;  %8858 = vmatmul.msk.bf16.vlgmr.msrb.gmra.mxu1 %vm2612_vm6, %v14892_v46  ;;  %v2331_v20 = vrot.slane %v2205_v14, 7 }
 0x38c   : > { %14894 = vst [vmem:[#allocation45_spill] sm:$0xff] %v11010_v21  ;;  %v2083_v1 = vpop.f32.mrf.mxu2 }
 0x38d   : > { %v2141_v37 = vadd.f32 %v2080_v39, %v2017_v10  ;;  %v2415_v58 = vsel %vm508_vm3, 0.0, %v2331_v20 }
 0x38e   : > { %v1711_v45 = vpop.f32.mrf.mxu3  ;;  %v2516_v16 = vrot.slane %v2415_v58, 1  ;;  %v2921_v41 = vrot.slane %v2415_v58, 2 }
 0x38f   : > { %v1770_v12 = vadd.f32 %v1711_v45, %v10593_v48  ;;  %v2174_v17 = vadd.f32 %v10736_v0, %v2141_v37  ;;  %v2243_v36 = vadd.f32 %v10947_v35, %v2141_v37 }
 0x390   : > { %v11022_v8 = vpop.f32.mrf.mxu1 }
 0x391   : > { %v1894_v38 = vadd.f32 %v10680_v4, %v1770_v12  ;;  %v2206_v30 = vmax.f32 %v2174_v17, 0.0  ;;  %4098 = vrot.lane.b32.xlu2 %v2243_v36, %s9843_s9 }
 0x393   : > { %v2018_v39 = vadd.f32 %v10954_v3, %v1894_v38  ;;  %v2332_v52 = vrot.slane %v2206_v30, 7  ;;  %v11035_v38 = vpop.f32.mrf.mxu0 }
 0x394   : > { %v2085_v53 = vpop.f32.mrf.mxu2 }
 0x395   : > { %v2431_v48 = vsel %vm508_vm3, %v2332_v52, 0.0  ;;  %v2333_v14 = vsel %vm508_vm3, %v2331_v20, %v2332_v52  ;;  %v2142_v25 = vadd.f32 %v2083_v1, %v2018_v39  ;;  %v2239_v1 = vadd.f32 %v10947_v35, %v10926_v2 }
 0x396   : > { %v2519_v10 = vrot.slane %v2431_v48, 1  ;;  %v2924_v37 = vrot.slane %v2431_v48, 2  ;;  %v1713_v45 = vpop.f32.mrf.mxu3  ;;  %v11030_v46 = vpack.c.bf16 %v2333_v14, %v2415_v58  ;;  %v2517_v4 = vrot.slane %v2333_v14, 1 }
 0x397   : > { %v1771_v12 = vadd.f32 %v1713_v45, %v10605_v13  ;;  %v2922_v17 = vrot.slane %v2333_v14, 2  ;;  %v2244_v3 = vadd.f32 %v10947_v35, %v2142_v25  ;;  %v2175_v36 = vadd.f32 %v10736_v0, %v2142_v25 }
 0x398   : > { %14895 = vst [vmem:[#allocation46_spill] sm:$0xff] %v11030_v46  ;;  %v11037_v30 = vpop.f32.mrf.mxu1  ;;  %8845 = vmatmul.msk.bf16.gmra.mxu0 %vm2612_vm6, %v11030_v46  ;;  %v2518_v20 = vsel %vm684_vm4, %v2516_v16, %v2517_v4  ;;  %v2520_v58 = vsel %vm684_vm4, %v2517_v4, %v2519_v10  ;;  %v2241_v4 = vadd.f32 %v10947_v35, %v10977_v31 }
 0x399   : > { %v1895_v13 = vadd.f32 %v10687_v18, %v1771_v12  ;;  %8878 = vmatmul.msk.bf16.vlgmr.msrb.gmra.mxu2 %vm2612_vm6, %v10765_v34  ;;  %4100 = vrot.lane.b32.xlu0 %v2244_v3, %s9843_s9  ;;  %v2923_v39 = vsel %vm1091_vm5, %v2921_v41, %v2922_v17  ;;  %v2925_v52 = vsel %vm1091_vm5, %v2922_v17, %v2924_v37  ;;  %v2207_v48 = vmax.f32 %v2175_v36, 0.0 }
 0x39a   : > { %4090 = vrot.lane.b32.xlu2 %v2239_v1, %s9843_s9  ;;  %v11052_v14 = vpack.c.bf16 %v2925_v52, %v2923_v39  ;;  %v11054_v2 = vpack.c.bf16 %v2520_v58, %v2518_v20  ;;  %v2234_v12 = vadd.f32 %v10947_v35, %v10803_v63  ;;  %v2238_v63 = vadd.f32 %v10947_v35, %v10887_v29 }
 0x39b   : > { %v2019_v16 = vadd.f32 %v10982_v49, %v1895_v13  ;;  %8819 = vmatmul.msk.bf16.vlgmr.msrb.gmra.mxu3 %vm2612_vm6, %v14890_v5  ;;  %8859 = vmatmul.msk.bf16.gmra.mxu1 %vm2612_vm6, %v10782_v42  ;;  %v2334_v41 = vrot.slane %v2207_v48, 7 }
 0x39c   : > { %14896 = vst [vmem:[#allocation47_spill] sm:$0xff] %v11052_v14  ;;  %v2088_v18 = vpop.f32.mrf.mxu2 }
 0x39d   : > { %14897 = vst [vmem:[#allocation48_spill] sm:$0xff] %v11054_v2  ;;  %v2143_v34 = vadd.f32 %v2085_v53, %v2019_v16  ;;  %v2416_v53 = vsel %vm508_vm3, 0.0, %v2334_v41 }
 0x39e   : > { %v1716_v25 = vpop.f32.mrf.mxu3  ;;  %v2521_v13 = vrot.slane %v2416_v53, 1 }
 0x39f   : > { %v1772_v10 = vadd.f32 %v1716_v25, %v10608_v50  ;;  %v2176_v37 = vadd.f32 %v10736_v0, %v2143_v34  ;;  %v2245_v45 = vadd.f32 %v10947_v35, %v2143_v34  ;;  %v11073_v50 = vpop.f32.mrf.mxu0 }
 0x3a0   : > { %v11066_v49 = vpop.f32.mrf.mxu1 }
 0x3a1   : > { %v1896_v17 = vadd.f32 %v10698_v9, %v1772_v10  ;;  %v2208_v3 = vmax.f32 %v2176_v37, 0.0  ;;  %4102 = vrot.lane.b32.xlu1 %v2245_v45, %s9843_s9  ;;  %4094 = vrot.lane.b32.xlu0 %v2241_v4, %s9843_s9  ;;  %v2926_v10 = vrot.slane %v2416_v53, 2  ;;  %v2233_v37 = vadd.f32 %v10947_v35, %v10791_v57 }
 0x3a2   : > { %4080 = vrot.lane.b32.xlu2 %v2234_v12, %s9843_s9 }
 0x3a3   : > { %v2020_v31 = vadd.f32 %v10996_v15, %v1896_v17  ;;  %v2335_v36 = vrot.slane %v2208_v3, 7 }
 0x3a4   : > { %v2090_v1 = vpop.f32.mrf.mxu2 }
 0x3a5   : > { %v11080_v20 = vadd.f32 %v2088_v18, %v2020_v31  ;;  %v2432_v9 = vsel %vm508_vm3, %v2335_v36, 0.0  ;;  %v2336_v58 = vsel %vm508_vm3, %v2334_v41, %v2335_v36  ;;  %v2236_v41 = vadd.f32 %v10947_v35, %v10846_v59 }
 0x3a6   : > { %v2524_v39 = vrot.slane %v2432_v9, 1  ;;  %v2929_v52 = vrot.slane %v2432_v9, 2  ;;  %v1718_v48 = vpop.f32.mrf.mxu3  ;;  %v11084_v16 = vpack.c.bf16 %v2336_v58, %v2416_v53  ;;  %v2522_v34 = vrot.slane %v2336_v58, 1 }
 0x3a7   : > { %v2177_v15 = vadd.f32 %v10736_v0, %v11080_v20  ;;  %v1773_v25 = vadd.f32 %v1718_v48, %v10617_v43  ;;  %v2927_v29 = vrot.slane %v2336_v58, 2 }
 0x3a8   : > { %14898 = vst [vmem:[#allocation49_spill] sm:$0xff] %v11084_v16  ;;  %v11089_v18 = vpop.f32.mrf.mxu1  ;;  %8846 = vmatmul.msk.bf16.gmra.mxu0 %vm2612_vm6, %v11084_v16  ;;  %v2523_v45 = vsel %vm684_vm4, %v2521_v13, %v2522_v34  ;;  %v2525_v4 = vsel %vm684_vm4, %v2522_v34, %v2524_v39 }
 0x3a9   : > { %v2209_v12 = vmax.f32 %v2177_v15, 0.0  ;;  %v1897_v43 = vadd.f32 %v10713_v62, %v1773_v25  ;;  %8879 = vmatmul.msk.bf16.gmra.mxu2 %vm2612_vm6, %v10806_v32  ;;  %4088 = vrot.lane.b32.xlu1 %v2238_v63, %s9843_s9  ;;  %v2928_v17 = vsel %vm1091_vm5, %v2926_v10, %v2927_v29  ;;  %v2930_v3 = vsel %vm1091_vm5, %v2927_v29, %v2929_v52  ;;  %v11116_v62 = vpop.f32.mrf.mxu0 }
 0x3aa   : > { %4084 = vrot.lane.b32.xlu0 %v2236_v41, %s9843_s9  ;;  %4078 = vrot.lane.b32.xlu2 %v2233_v37, %s9843_s9  ;;  %v11107_v57 = vpack.c.bf16 %v2930_v3, %v2928_v17  ;;  %v11109_v59 = vpack.c.bf16 %v2525_v4, %v2523_v45  ;;  %v2235_v52 = vadd.f32 %v10947_v35, %v10833_v60 }
 0x3ab   : > { %v2021_v53 = vadd.f32 %v11022_v8, %v1897_v43  ;;  %8820 = vmatmul.msk.bf16.gmra.mxu3 %vm2612_vm6, %v10785_v40  ;;  %8860 = vmatmul.msk.bf16.gmra.mxu1 %vm2612_vm6, %v10821_v19  ;;  %v2337_v36 = vrot.slane %v2209_v12, 7  ;;  %v2237_v8 = vadd.f32 %v10947_v35, %v10874_v55  ;;  %v2232_v3 = vadd.f32 %v10947_v35, %v10762_v27 }
 0x3ac   : > { %14899 = vst [vmem:[#allocation50_spill] sm:$0xff] %v11107_v57  ;;  %v2093_v31 = vpop.f32.mrf.mxu2 }
 0x3ad   : > { %v11118_v63 = vadd.f32 %v2090_v1, %v2021_v53  ;;  %v2417_v1 = vsel %vm508_vm3, 0.0, %v2337_v36 }
 0x3ae   : > { %v1721_v9 = vpop.f32.mrf.mxu3  ;;  %v2526_v10 = vrot.slane %v2417_v1, 1 }
 0x3af   : > { %v2178_v58 = vadd.f32 %v10736_v0, %v11118_v63  ;;  %v1774_v13 = vadd.f32 %v1721_v9, %v10620_v7 }
 0x3b0   : > { %v11125_v39 = vpop.f32.mrf.mxu1 }
 0x3b1   : > { %v2210_v48 = vmax.f32 %v2178_v58, 0.0  ;;  %v1898_v34 = vadd.f32 %v10719_v56, %v1774_v13  ;;  %4086 = vrot.lane.b32.xlu1 %v2237_v8, %s9843_s9  ;;  %v2931_v56 = vrot.slane %v2417_v1, 2 }
 0x3b2   : > { %4082 = vrot.lane.b32.xlu0 %v2235_v52, %s9843_s9 }
 0x3b3   : > { %v2338_v15 = vrot.slane %v2210_v48, 7  ;;  %v2022_v7 = vadd.f32 %v11037_v30, %v1898_v34 }
 0x3b4   : > { %v2095_v25 = vpop.f32.mrf.mxu2 }
 0x3b5   : > { %v2433_v55 = vsel %vm508_vm3, %v2338_v15, 0.0  ;;  %v11135_v29 = vadd.f32 %v2093_v31, %v2022_v7  ;;  %v11137_v41 = vpop.f32.mrf.mxu0  ;;  %v2339_v60 = vsel %vm508_vm3, %v2337_v36, %v2338_v15  ;;  %v2230_v36 = vadd.f32 %v10947_v35, %v10738_v6 }
 0x3b6   : > { %v1723_v37 = vpop.f32.mrf.mxu3  ;;  %v11140_v45 = vpack.c.bf16 %v2339_v60, %v2417_v1  ;;  %v2527_v4 = vrot.slane %v2339_v60, 1  ;;  %v2932_v12 = vrot.slane %v2339_v60, 2  ;;  %v2934_v43 = vrot.slane %v2433_v55, 2  ;;  %v14901_v60 = vld [vmem:[#allocation35_spill] sm:$0xff] }
 0x3b7   : > { %v2179_v30 = vadd.f32 %v10736_v0, %v11135_v29  ;;  %v1775_v17 = vadd.f32 %v1723_v37, %v10631_v51  ;;  %v2529_v53 = vrot.slane %v2433_v55, 1 }
 0x3b8   : > { %v11147_v31 = vpop.f32.mrf.mxu1  ;;  %8847 = vmatmul.msk.bf16.gmra.mxu0 %vm2612_vm6, %v11140_v45  ;;  %v2933_v9 = vsel %vm1091_vm5, %v2931_v56, %v2932_v12  ;;  %v2935_v58 = vsel %vm1091_vm5, %v2932_v12, %v2934_v43  ;;  %v2528_v13 = vsel %vm684_vm4, %v2526_v10, %v2527_v4 }
 0x3b9   : > { %v2211_v8 = vmax.f32 %v2179_v30, 0.0  ;;  %v1899_v51 = vadd.f32 %v10731_v11, %v1775_v17  ;;  %8880 = vmatmul.msk.bf16.gmra.mxu2 %vm2612_vm6, %v10849_v22  ;;  %4076 = vrot.lane.b32.xlu1 %v2232_v3, %s9843_s9  ;;  %v11160_v27 = vpack.c.bf16 %v2935_v58, %v2933_v9  ;;  %v2530_v52 = vsel %vm684_vm4, %v2527_v4, %v2529_v53  ;;  %v14902_v4 = vld [vmem:[#allocation9_spill] sm:$0xff] }
 0x3ba   : > { %4072 = vrot.lane.b32.xlu0 %v2230_v36, %s9843_s9  ;;  %v11164_v6 = vpack.c.bf16 %v2530_v52, %v2528_v13 }
 0x3bb   : > { %14900 = vst [vmem:[#allocation51_spill] sm:$0xff] %v11160_v27  ;;  %v2023_v48 = vadd.f32 %v11066_v49, %v1899_v51  ;;  %8821 = vmatmul.msk.bf16.gmra.mxu3 %vm2612_vm6, %v10824_v33  ;;  %8861 = vmatmul.msk.bf16.gmra.mxu1 %vm2612_vm6, %v10864_v24  ;;  %v2340_v34 = vrot.slane %v2211_v8, 7  ;;  %v2231_v49 = vadd.f32 %v10947_v35, %v14901_v60  ;;  %v14915_v33 = vld [vmem:[#allocation41_spill] sm:$0xff] }
 0x3bc   : > { %v2098_v11 = vpop.f32.mrf.mxu2 }
 0x3bd   : > { %v11171_v1 = vadd.f32 %v2095_v25, %v2023_v48  ;;  %v11173_v15 = vpop.f32.mrf.mxu0  ;;  %v2418_v25 = vsel %vm508_vm3, 0.0, %v2340_v34 }
 0x3be   : > { %v1726_v7 = vpop.f32.mrf.mxu3  ;;  %v2531_v3 = vrot.slane %v2418_v25, 1  ;;  %v2936_v58 = vrot.slane %v2418_v25, 2 }
 0x3bf   : > { %v2180_v10 = vadd.f32 %v10736_v0, %v11171_v1  ;;  %v1776_v55 = vadd.f32 %v1726_v7, %v10636_v28  ;;  %v14903_v7 = vld [vmem:[#allocation17_spill] sm:$0xff] }
 0x3c0   : > { %v11180_v56 = vpop.f32.mrf.mxu1 }
 0x3c1   : > { %v2212_v37 = vmax.f32 %v2180_v10, 0.0  ;;  %v1900_v12 = vadd.f32 %v14902_v4, %v1776_v55  ;;  %4074 = vrot.lane.b32.xlu1 %v2231_v49, %s9843_s9  ;;  %v14904_v4 = vld [vmem:[#allocation36_spill] sm:$0xff] }
 0x3c3   : > { %v2341_v43 = vrot.slane %v2212_v37, 7  ;;  %v2024_v30 = vadd.f32 %v11089_v18, %v1900_v12 }
 0x3c4   : > { %v2100_v17 = vpop.f32.mrf.mxu2 }
 0x3c5   : > { %v2434_v53 = vsel %vm508_vm3, %v2341_v43, 0.0  ;;  %v11187_v28 = vadd.f32 %v2098_v11, %v2024_v30  ;;  %v11189_v36 = vpop.f32.mrf.mxu0  ;;  %v2342_v9 = vsel %vm508_vm3, %v2340_v34, %v2341_v43 }
 0x3c6   : > { %v1728_v13 = vpop.f32.mrf.mxu3  ;;  %v11192_v8 = vpack.c.bf16 %v2342_v9, %v2418_v25  ;;  %v2532_v51 = vrot.slane %v2342_v9, 1  ;;  %v2937_v52 = vrot.slane %v2342_v9, 2  ;;  %v2939_v48 = vrot.slane %v2434_v53, 2  ;;  %v14905_v25 = vld [vmem:[#allocation21_spill] sm:$0xff] }
 0x3c7   : > { %v2181_v18 = vadd.f32 %v10736_v0, %v11187_v28  ;;  %v1777_v10 = vadd.f32 %v1728_v13, %v14903_v7  ;;  %v2534_v55 = vrot.slane %v2434_v53, 1  ;;  %v14907_v13 = vld [vmem:[#allocation14_spill] sm:$0xff]  ;;  %v14908_v7 = vld [vmem:[#allocation19_spill] sm:$0xff] }
 0x3c8   : > { %v11197_v60 = vpop.f32.mrf.mxu1  ;;  %8848 = vmatmul.msk.bf16.gmra.mxu0 %vm2612_vm6, %v11192_v8  ;;  %v2938_v11 = vsel %vm1091_vm5, %v2936_v58, %v2937_v52  ;;  %v2940_v34 = vsel %vm1091_vm5, %v2937_v52, %v2939_v48  ;;  %v2533_v49 = vsel %vm684_vm4, %v2531_v3, %v2532_v51 }
 0x3c9   : > { %v2213_v37 = vmax.f32 %v2181_v18, 0.0  ;;  %v1901_v12 = vadd.f32 %v14904_v4, %v1777_v10  ;;  %8881 = vmatmul.msk.bf16.gmra.mxu2 %vm2612_vm6, %v14905_v25  ;;  %v11207_v43 = vpack.c.bf16 %v2940_v34, %v2938_v11  ;;  %v2535_v30 = vsel %vm684_vm4, %v2532_v51, %v2534_v55  ;;  %v14909_v11 = vld [vmem:[#allocation38_spill] sm:$0xff] }
 0x3ca   : > { %v11210_v53 = vpack.c.bf16 %v2535_v30, %v2533_v49 }
 0x3cb   : > { %14906 = vst [vmem:[#allocation35_spill] sm:$0xff] %v11207_v43  ;;  %v2025_v9 = vadd.f32 %v11125_v39, %v1901_v12  ;;  %8822 = vmatmul.msk.bf16.gmra.mxu3 %vm2612_vm6, %v14907_v13  ;;  %8862 = vmatmul.msk.bf16.gmra.mxu1 %vm2612_vm6, %v10913_v47  ;;  %v2343_v58 = vrot.slane %v2213_v37, 7 }
 0x3cc   : > { %v2103_v3 = vpop.f32.mrf.mxu2 }
 0x3cd   : > { %v11217_v52 = vadd.f32 %v2100_v17, %v2025_v9  ;;  %v11219_v48 = vpop.f32.mrf.mxu0  ;;  %v2419_v49 = vsel %vm508_vm3, 0.0, %v2343_v58 }
 0x3ce   : > { %v1731_v18 = vpop.f32.mrf.mxu3  ;;  %v2536_v12 = vrot.slane %v2419_v49, 1 }
 0x3cf   : > { %v2182_v51 = vadd.f32 %v10736_v0, %v11217_v52  ;;  %v1778_v10 = vadd.f32 %v1731_v18, %v14908_v7  ;;  %v2941_v7 = vrot.slane %v2419_v49, 2 }
 0x3d0   : > { %v11224_v55 = vpop.f32.mrf.mxu1 }
 0x3d1   : > { %v2214_v39 = vmax.f32 %v2182_v51, 0.0  ;;  %v1902_v34 = vadd.f32 %v14909_v11, %v1778_v10 }
 0x3d3   : > { %v2344_v4 = vrot.slane %v2214_v39, 7  ;;  %v2026_v37 = vadd.f32 %v11147_v31, %v1902_v34  ;;  %v14911_v39 = vld [vmem:[#allocation20_spill] sm:$0xff] }
 0x3d4   : > { %v2105_v17 = vpop.f32.mrf.mxu2 }
 0x3d5   : > { %v2435_v30 = vsel %vm508_vm3, %v2344_v4, 0.0  ;;  %v11230_v9 = vadd.f32 %v2103_v3, %v2026_v37  ;;  %v11232_v5 = vpop.f32.mrf.mxu0  ;;  %v2345_v18 = vsel %vm508_vm3, %v2343_v58, %v2344_v4  ;;  %v14912_v37 = vld [vmem:[#allocation34_spill] sm:$0xff] }
 0x3d6   : > { %14910 = vst [vmem:[#allocation9_spill] sm:$0xff] %v11232_v5  ;;  %v1733_v25 = vpop.f32.mrf.mxu3  ;;  %v11235_v51 = vpack.c.bf16 %v2345_v18, %v2419_v49  ;;  %v2537_v10 = vrot.slane %v2345_v18, 1  ;;  %v2942_v11 = vrot.slane %v2345_v18, 2  ;;  %v2944_v13 = vrot.slane %v2435_v30, 2 }
 0x3d7   : > { %v2183_v31 = vadd.f32 %v10736_v0, %v11230_v9  ;;  %v1779_v34 = vadd.f32 %v1733_v25, %v14911_v39  ;;  %v2539_v22 = vrot.slane %v2435_v30, 1 }
 0x3d8   : > { %v11240_v40 = vpop.f32.mrf.mxu1  ;;  %8849 = vmatmul.msk.bf16.gmra.mxu0 %vm2612_vm6, %v11235_v51  ;;  %v2943_v3 = vsel %vm1091_vm5, %v2941_v7, %v2942_v11  ;;  %v2945_v58 = vsel %vm1091_vm5, %v2942_v11, %v2944_v13  ;;  %v2538_v49 = vsel %vm684_vm4, %v2536_v12, %v2537_v10  ;;  %v14916_v13 = vld [vmem:[#allocation15_spill] sm:$0xff] }
 0x3d9   : > { %v2215_v4 = vmax.f32 %v2183_v31, 0.0  ;;  %v1903_v18 = vadd.f32 %v14912_v37, %v1779_v34  ;;  %8882 = vmatmul.msk.bf16.gmra.mxu2 %vm2612_vm6, %v10949_v44  ;;  %v11250_v0 = vpack.c.bf16 %v2945_v58, %v2943_v3  ;;  %v2540_v25 = vsel %vm684_vm4, %v2537_v10, %v2539_v22  ;;  %v11267_v22 = vld [vmem:[%s14627_s2 + $0x1] ss:$0 sm:$0xff]  ;;  %v14919_v37 = vld [vmem:[#allocation40_spill] sm:$0xff] }
 0x3da   : > { %v11253_v30 = vpack.c.bf16 %v2540_v25, %v2538_v49  ;;  %v14918_v10 = vld [vmem:[#allocation25_spill] sm:$0xff] }
 0x3db   : > { %14913 = vst [vmem:[#allocation17_spill] sm:$0xff] %v11250_v0  ;;  %v2027_v39 = vadd.f32 %v11180_v56, %v1903_v18  ;;  %8823 = vmatmul.msk.bf16.gmra.mxu3 %vm2612_vm6, %v14915_v33  ;;  %8863 = vmatmul.msk.bf16.gmra.mxu1 %vm2612_vm6, %v14916_v13  ;;  %v2346_v7 = vrot.slane %v2215_v4, 7 }
 0x3dc   : > { %14914 = vst [vmem:[#allocation36_spill] sm:$0xff] %v11253_v30  ;;  %v2108_v12 = vpop.f32.mrf.mxu2 }
 0x3dd   : > { %v11260_v11 = vadd.f32 %v2105_v17, %v2027_v39  ;;  %v11262_v31 = vpop.f32.mrf.mxu0  ;;  %v2420_v17 = vsel %vm508_vm3, 0.0, %v2346_v7 }
 0x3de   : > { %14917 = vst [vmem:[#allocation19_spill] sm:$0xff] %v11262_v31  ;;  %v1736_v34 = vpop.f32.mrf.mxu3  ;;  %v2541_v44 = vrot.slane %v2420_v17, 1 }
 0x3df   : > { %v2184_v56 = vadd.f32 %v11267_v22, %v11260_v11  ;;  %v1780_v3 = vadd.f32 %v1736_v34, %v14918_v10  ;;  %v2946_v10 = vrot.slane %v2420_v17, 2 }
 0x3e0   : > { %v11272_v58 = vpop.f32.mrf.mxu1 }
 0x3e1   : > { %v2216_v49 = vmax.f32 %v2184_v56, 0.0  ;;  %v1904_v4 = vadd.f32 %v14919_v37, %v1780_v3 }
 0x3e3   : > { %v2347_v18 = vrot.slane %v2216_v49, 7  ;;  %v2028_v25 = vadd.f32 %v11197_v60, %v1904_v4  ;;  %v14922_v49 = vld [vmem:[#allocation26_spill] sm:$0xff] }
 0x3e4   : > { %v2110_v39 = vpop.f32.mrf.mxu2 }
 0x3e5   : > { %v2436_v33 = vsel %vm508_vm3, %v2347_v18, 0.0  ;;  %v11278_v32 = vadd.f32 %v2108_v12, %v2028_v25  ;;  %v11280_v13 = vpop.f32.mrf.mxu0  ;;  %v2348_v34 = vsel %vm508_vm3, %v2346_v7, %v2347_v18  ;;  %v14923_v25 = vld [vmem:[#allocation18_spill] sm:$0xff] }
 0x3e6   : > { %14920 = vst [vmem:[#allocation38_spill] sm:$0xff] %v11280_v13  ;;  %v1738_v47 = vpop.f32.mrf.mxu3  ;;  %v11283_v56 = vpack.c.bf16 %v2348_v34, %v2420_v17  ;;  %v2542_v3 = vrot.slane %v2348_v34, 1  ;;  %v2947_v37 = vrot.slane %v2348_v34, 2  ;;  %v2949_v31 = vrot.slane %v2436_v33, 2 }
 0x3e7   : > { %v2185_v60 = vadd.f32 %v11267_v22, %v11278_v32  ;;  %v1781_v4 = vadd.f32 %v1738_v47, %v14922_v49  ;;  %v2544_v5 = vrot.slane %v2436_v33, 1 }
 0x3e8   : > { %14921 = vst [vmem:[#allocation20_spill] sm:$0xff] %v11283_v56  ;;  %v11288_v30 = vpop.f32.mrf.mxu1  ;;  %8850 = vmatmul.msk.bf16.gmra.mxu0 %vm2612_vm6, %v11283_v56  ;;  %v2948_v12 = vsel %vm1091_vm5, %v2946_v10, %v2947_v37  ;;  %v2950_v7 = vsel %vm1091_vm5, %v2947_v37, %v2949_v31  ;;  %v2543_v17 = vsel %vm684_vm4, %v2541_v44, %v2542_v3  ;;  %v14926_v56 = vld [vmem:[#allocation16_spill] sm:$0xff] }
 0x3e9   : > { %v2217_v18 = vmax.f32 %v2185_v60, 0.0  ;;  %v1905_v34 = vadd.f32 %v14923_v25, %v1781_v4  ;;  %8883 = vmatmul.msk.bf16.gmra.mxu2 %vm2612_vm6, %v10991_v61  ;;  %v11298_v13 = vpack.c.bf16 %v2950_v7, %v2948_v12  ;;  %v2545_v33 = vsel %vm684_vm4, %v2542_v3, %v2544_v5  ;;  %v14928_v3 = vld [vmem:[#allocation27_spill] sm:$0xff]  ;;  %v14929_v7 = vld [vmem:[#allocation12_spill] sm:$0xff] }
 0x3ea   : > { %v11301_v47 = vpack.c.bf16 %v2545_v33, %v2543_v17 }
 0x3eb   : > { %14924 = vst [vmem:[#allocation34_spill] sm:$0xff] %v11298_v13  ;;  %v2029_v49 = vadd.f32 %v11224_v55, %v1905_v34  ;;  %8824 = vmatmul.msk.bf16.gmra.mxu3 %vm2612_vm6, %v14926_v56  ;;  %8864 = vmatmul.msk.bf16.gmra.mxu1 %vm2612_vm6, %v11007_v54  ;;  %v2349_v31 = vrot.slane %v2217_v18, 7 }
 0x3ec   : > { %14925 = vst [vmem:[#allocation25_spill] sm:$0xff] %v11301_v47  ;;  %v2113_v44 = vpop.f32.mrf.mxu2  ;;  %v14930_v47 = vld [vmem:[#allocation29_spill] sm:$0xff] }
 0x3ed   : > { %v11308_v10 = vadd.f32 %v2110_v39, %v2029_v49  ;;  %v11310_v37 = vpop.f32.mrf.mxu0  ;;  %v2421_v25 = vsel %vm508_vm3, 0.0, %v2349_v31 }
 0x3ee   : > { %14927 = vst [vmem:[#allocation40_spill] sm:$0xff] %v11310_v37  ;;  %v1741_v60 = vpop.f32.mrf.mxu3  ;;  %v2546_v33 = vrot.slane %v2421_v25, 1  ;;  %v2951_v56 = vrot.slane %v2421_v25, 2 }
 0x3ef   : > { %v2186_v5 = vadd.f32 %v11267_v22, %v11308_v10  ;;  %v1782_v4 = vadd.f32 %v1741_v60, %v14928_v3 }
 0x3f0   : > { %v11315_v12 = vpop.f32.mrf.mxu1 }
 0x3f1   : > { %v2218_v55 = vmax.f32 %v2186_v5, 0.0  ;;  %v1906_v17 = vadd.f32 %v14929_v7, %v1782_v4 }
 0x3f3   : > { %v2350_v34 = vrot.slane %v2218_v55, 7  ;;  %v2030_v18 = vadd.f32 %v11240_v40, %v1906_v17 }
 0x3f4   : > { %v2115_v39 = vpop.f32.mrf.mxu2 }
 0x3f5   : > { %v2437_v49 = vsel %vm508_vm3, %v2350_v34, 0.0  ;;  %v2351_v61 = vsel %vm508_vm3, %v2349_v31, %v2350_v34  ;;  %v2154_v54 = vadd.f32 %v2113_v44, %v2030_v18  ;;  %v11322_v37 = vpop.f32.mrf.mxu0 }
 0x3f6   : > { %v1743_v60 = vpop.f32.mrf.mxu3  ;;  %v11324_v3 = vpack.c.bf16 %v2351_v61, %v2421_v25  ;;  %v2547_v5 = vrot.slane %v2351_v61, 1  ;;  %v2952_v4 = vrot.slane %v2351_v61, 2  ;;  %v2954_v7 = vrot.slane %v2437_v49, 2  ;;  %v14931_v61 = vld [vmem:[#allocation10_spill] sm:$0xff] }
 0x3f7   : > { %v1783_v55 = vadd.f32 %v1743_v60, %v14930_v47  ;;  %v2187_v40 = vadd.f32 %v11267_v22, %v2154_v54  ;;  %v2256_v17 = vadd.f32 %v10947_v35, %v2154_v54  ;;  %v2549_v13 = vrot.slane %v2437_v49, 1 }
 0x3f8   : > { %v11329_v24 = vpop.f32.mrf.mxu1  ;;  %8851 = vmatmul.msk.bf16.gmra.mxu0 %vm2612_vm6, %v11324_v3  ;;  %v2953_v44 = vsel %vm1091_vm5, %v2951_v56, %v2952_v4  ;;  %v2955_v31 = vsel %vm1091_vm5, %v2952_v4, %v2954_v7  ;;  %v2548_v25 = vsel %vm684_vm4, %v2546_v33, %v2547_v5 }
 0x3f9   : > { %v1907_v34 = vadd.f32 %v14931_v61, %v1783_v55  ;;  %8884 = vmatmul.msk.bf16.gmra.mxu2 %vm2612_vm6, %v11030_v46  ;;  %v2219_v47 = vmax.f32 %v2187_v40, 0.0  ;;  %4124 = vrot.lane.b32.xlu0 %v2256_v17, %s9843_s9  ;;  %v11340_v54 = vpack.c.bf16 %v2955_v31, %v2953_v44  ;;  %v2550_v18 = vsel %vm684_vm4, %v2547_v5, %v2549_v13  ;;  %v14933_v55 = vld [vmem:[#allocation7_spill] sm:$0xff] }
 0x3fa   : > { %v11343_v49 = vpack.c.bf16 %v2550_v18, %v2548_v25 }
 0x3fb   : > { %14932 = vst [vmem:[#allocation26_spill] sm:$0xff] %v11340_v54  ;;  %v2031_v56 = vadd.f32 %v11272_v58, %v1907_v34  ;;  %8825 = vmatmul.msk.bf16.gmra.mxu3 %vm2612_vm6, %v11010_v21  ;;  %8865 = vmatmul.msk.bf16.gmra.mxu1 %vm2612_vm6, %v11052_v14  ;;  %v2352_v60 = vrot.slane %v2219_v47, 7  ;;  %v14935_v58 = vld [vmem:[#allocation42_spill] sm:$0xff] }
 0x3fc   : > { %v2118_v33 = vpop.f32.mrf.mxu2 }
 0x3fd   : > { %v2155_v4 = vadd.f32 %v2115_v39, %v2031_v56  ;;  %v11353_v5 = vpop.f32.mrf.mxu0  ;;  %v2422_v61 = vsel %vm508_vm3, 0.0, %v2352_v60 }
 0x3fe   : > { %v1746_v7 = vpop.f32.mrf.mxu3  ;;  %14934 = vst [vmem:[#allocation18_spill] sm:$0xff] %v11353_v5  ;;  %v2551_v18 = vrot.slane %v2422_v61, 1 }
 0x3ff   : > { %v1784_v40 = vadd.f32 %v1746_v7, %v14933_v55  ;;  %v2188_v17 = vadd.f32 %v11267_v22, %v2155_v4  ;;  %v2257_v13 = vadd.f32 %v10947_v35, %v2155_v4  ;;  %v2956_v7 = vrot.slane %v2422_v61, 2 }
 0x400   : > { %v11355_v44 = vpop.f32.mrf.mxu1 }
 0x401   : > { %v1908_v31 = vadd.f32 %v14935_v58, %v1784_v40  ;;  %v2220_v25 = vmax.f32 %v2188_v17, 0.0  ;;  %4126 = vrot.lane.b32.xlu1 %v2257_v13, %s9843_s9  ;;  %v9618_v40 = vld [vmem:[%s14626_s1 + $0x5c] sm:$0xff] }
 0x402   : > { %3480 = vmatpush.bf16.msra.mxu0 %v9618_v40 }
 0x403   : > { %v2032_v39 = vadd.f32 %v11288_v30, %v1908_v31  ;;  %v2353_v34 = vrot.slane %v2220_v25, 7  ;;  %v14936_v30 = vld [vmem:[#allocation8_spill] sm:$0xff] }
 0x404   : > { %v2120_v47 = vpop.f32.mrf.mxu2 }
 0x405   : > { %v2438_v56 = vsel %vm508_vm3, %v2353_v34, 0.0  ;;  %v2354_v4 = vsel %vm508_vm3, %v2352_v60, %v2353_v34  ;;  %v2156_v55 = vadd.f32 %v2118_v33, %v2032_v39 }
 0x406   : > { %v2554_v17 = vrot.slane %v2438_v56, 1  ;;  %v2959_v58 = vrot.slane %v2438_v56, 2  ;;  %v1748_v13 = vpop.f32.mrf.mxu3  ;;  %v11366_v46 = vpack.c.bf16 %v2354_v4, %v2422_v61  ;;  %v2552_v21 = vrot.slane %v2354_v4, 1 }
 0x407   : > { %v1785_v31 = vadd.f32 %v1748_v13, %v14936_v30  ;;  %v2957_v25 = vrot.slane %v2354_v4, 2  ;;  %v2189_v14 = vadd.f32 %v11267_v22, %v2156_v55  ;;  %v2258_v5 = vadd.f32 %v10947_v35, %v2156_v55  ;;  %v11383_v55 = vpop.f32.mrf.mxu0 }
 0x408   : > { %8852 = vmatmul.msk.bf16.gmra.mxu0 %vm2612_vm6, %v11366_v46  ;;  %v11373_v33 = vpop.f32.mrf.mxu1  ;;  %v2553_v60 = vsel %vm684_vm4, %v2551_v18, %v2552_v21  ;;  %v2555_v39 = vsel %vm684_vm4, %v2552_v21, %v2554_v17 }
 0x409   : > { %v1909_v61 = vadd.f32 %v10987_v23, %v1785_v31  ;;  %8885 = vmatmul.msk.bf16.gmra.mxu2 %vm2612_vm6, %v11084_v16  ;;  %v2221_v34 = vmax.f32 %v2189_v14, 0.0  ;;  %4128 = vrot.lane.b32.xlu1 %v2258_v5, %s9843_s9  ;;  %v2958_v56 = vsel %vm1091_vm5, %v2956_v7, %v2957_v25  ;;  %v2960_v4 = vsel %vm1091_vm5, %v2957_v25, %v2959_v58  ;;  %v14937_v7 = vld [vmem:[#allocation31_spill] sm:$0xff] }
 0x40a   : > { %v11385_v40 = vpack.c.bf16 %v2960_v4, %v2958_v56  ;;  %v11387_v13 = vpack.c.bf16 %v2555_v39, %v2553_v60  ;;  %v2252_v31 = vadd.f32 %v10947_v35, %v11230_v9 }
 0x40b   : > { %v2033_v21 = vadd.f32 %v11315_v12, %v1909_v61  ;;  %8826 = vmatmul.msk.bf16.gmra.mxu3 %vm2612_vm6, %v11054_v2  ;;  %8866 = vmatmul.msk.bf16.gmra.mxu1 %vm2612_vm6, %v11107_v57  ;;  %v2355_v14 = vrot.slane %v2221_v34, 7 }
 0x40c   : > { %v2123_v23 = vpop.f32.mrf.mxu2 }
 0x40d   : > { %v2157_v5 = vadd.f32 %v2120_v47, %v2033_v21  ;;  %v2423_v47 = vsel %vm508_vm3, 0.0, %v2355_v14 }
 0x40e   : > { %v1751_v18 = vpop.f32.mrf.mxu3  ;;  %v2556_v4 = vrot.slane %v2423_v47, 1 }
 0x40f   : > { %v1786_v17 = vadd.f32 %v1751_v18, %v14937_v7  ;;  %v2190_v58 = vadd.f32 %v11267_v22, %v2157_v5  ;;  %v2259_v30 = vadd.f32 %v10947_v35, %v2157_v5  ;;  %v11406_v34 = vpop.f32.mrf.mxu0  ;;  %v2961_v5 = vrot.slane %v2423_v47, 2 }
 0x410   : > { %v11399_v12 = vpop.f32.mrf.mxu1 }
 0x411   : > { %v1910_v25 = vadd.f32 %v11017_v26, %v1786_v17  ;;  %v2222_v60 = vmax.f32 %v2190_v58, 0.0  ;;  %4130 = vrot.lane.b32.xlu2 %v2259_v30, %s9843_s9  ;;  %4116 = vrot.lane.b32.xlu1 %v2252_v31, %s9843_s9  ;;  %v14938_v31 = vld [vmem:[#allocation33_spill] sm:$0xff] }
 0x413   : > { %v2034_v39 = vadd.f32 %v11329_v24, %v1910_v25  ;;  %v2356_v61 = vrot.slane %v2222_v60, 7 }
 0x414   : > { %v2125_v56 = vpop.f32.mrf.mxu2 }
 0x415   : > { %v2439_v9 = vsel %vm508_vm3, %v2356_v61, 0.0  ;;  %v2357_v21 = vsel %vm508_vm3, %v2355_v14, %v2356_v61  ;;  %v2158_v26 = vadd.f32 %v2123_v23, %v2034_v39  ;;  %v2251_v23 = vadd.f32 %v10947_v35, %v11217_v52 }
 0x416   : > { %v2559_v18 = vrot.slane %v2439_v9, 1  ;;  %v2964_v7 = vrot.slane %v2439_v9, 2  ;;  %v1753_v17 = vpop.f32.mrf.mxu3  ;;  %v11410_v58 = vpack.c.bf16 %v2357_v21, %v2423_v47  ;;  %v2557_v30 = vrot.slane %v2357_v21, 1 }
 0x417   : > { %v1787_v16 = vadd.f32 %v1753_v17, %v14938_v31  ;;  %v2962_v24 = vrot.slane %v2357_v21, 2  ;;  %v2191_v25 = vadd.f32 %v11267_v22, %v2158_v26  ;;  %v2260_v60 = vadd.f32 %v10947_v35, %v2158_v26 }
 0x418   : > { %8853 = vmatmul.msk.bf16.gmra.mxu0 %vm2612_vm6, %v11410_v58  ;;  %v11417_v2 = vpop.f32.mrf.mxu1  ;;  %v2558_v14 = vsel %vm684_vm4, %v2556_v4, %v2557_v30  ;;  %v2560_v47 = vsel %vm684_vm4, %v2557_v30, %v2559_v18 }
 0x419   : > { %v1911_v39 = vadd.f32 %v11035_v38, %v1787_v16  ;;  %8886 = vmatmul.msk.bf16.gmra.mxu2 %vm2612_vm6, %v11140_v45  ;;  %4132 = vrot.lane.b32.xlu2 %v2260_v60, %s9843_s9  ;;  %v2963_v61 = vsel %vm1091_vm5, %v2961_v5, %v2962_v24  ;;  %v2965_v9 = vsel %vm1091_vm5, %v2962_v24, %v2964_v7  ;;  %v2223_v21 = vmax.f32 %v2191_v25, 0.0  ;;  %v11439_v5 = vpop.f32.mrf.mxu0 }
 0x41a   : > { %4114 = vrot.lane.b32.xlu1 %v2251_v23, %s9843_s9  ;;  %v11430_v26 = vpack.c.bf16 %v2965_v9, %v2963_v61  ;;  %v11432_v52 = vpack.c.bf16 %v2560_v47, %v2558_v14  ;;  %v2246_v25 = vadd.f32 %v10947_v35, %v11080_v20 }
 0x41b   : > { %v2035_v4 = vadd.f32 %v11355_v44, %v1911_v39  ;;  %8827 = vmatmul.msk.bf16.gmra.mxu3 %vm2612_vm6, %v11109_v59  ;;  %8867 = vmatmul.msk.bf16.gmra.mxu1 %vm2612_vm6, %v11160_v27  ;;  %v2358_v18 = vrot.slane %v2223_v21, 7  ;;  %v2254_v44 = vadd.f32 %v10947_v35, %v11278_v32 }
 0x41c   : > { %v3204_v38 = vpop.f32.mrf.mxu2 }
 0x41d   : > { %v2159_v16 = vadd.f32 %v2125_v56, %v2035_v4 }
 0x41e   : > { %v2669_v7 = vpop.f32.mrf.mxu3 }
 0x41f   : > { %v2812_v17 = vadd.f32 %v11073_v50, %v2669_v7  ;;  %v2192_v30 = vadd.f32 %v11267_v22, %v2159_v16  ;;  %v2261_v31 = vadd.f32 %v10947_v35, %v2159_v16  ;;  %v2424_v50 = vsel %vm508_vm3, 0.0, %v2358_v18 }
 0x420   : > { %v3080_v24 = vpop.f32.mrf.mxu1  ;;  %v3318_v20 = vrot.slane %v2424_v50, 1  ;;  %v2255_v16 = vadd.f32 %v10947_v35, %v11308_v10  ;;  %v3456_v7 = vrot.slane %v2424_v50, 2 }
 0x421   : > { %v3153_v60 = vadd.f32 %v11373_v33, %v2812_v17  ;;  %v2224_v56 = vmax.f32 %v2192_v30, 0.0  ;;  %4134 = vrot.lane.b32.xlu0 %v2261_v31, %s9843_s9  ;;  %4120 = vrot.lane.b32.xlu2 %v2254_v44, %s9843_s9  ;;  %v11462_v17 = vpop.f32.mrf.mxu0 }
 0x422   : > { %4104 = vrot.lane.b32.xlu1 %v2246_v25, %s9843_s9 }
 0x423   : > { %v2359_v22 = vrot.slane %v2224_v56, 7  ;;  %v11453_v23 = vadd.f32 %v3204_v38, %v3153_v60 }
 0x424   : > { %v3206_v14 = vpop.f32.mrf.mxu2 }
 0x425   : > { %v2440_v32 = vsel %vm508_vm3, %v2359_v22, 0.0  ;;  %v2360_v47 = vsel %vm508_vm3, %v2358_v18, %v2359_v22  ;;  %v2253_v18 = vadd.f32 %v10947_v35, %v11260_v11  ;;  %v2250_v22 = vadd.f32 %v10947_v35, %v11187_v28 }
 0x426   : > { %v3321_v39 = vrot.slane %v2440_v32, 1  ;;  %v3459_v33 = vrot.slane %v2440_v32, 2  ;;  %v2671_v61 = vpop.f32.mrf.mxu3  ;;  %v11457_v9 = vpack.c.bf16 %v2360_v47, %v2424_v50  ;;  %v3319_v21 = vrot.slane %v2360_v47, 1 }
 0x427   : > { %v2814_v4 = vadd.f32 %v11116_v62, %v2671_v61  ;;  %v3457_v38 = vrot.slane %v2360_v47, 2  ;;  %v2248_v47 = vadd.f32 %v10947_v35, %v11135_v29  ;;  %v2249_v28 = vadd.f32 %v10947_v35, %v11171_v1 }
 0x428   : > { %v3083_v30 = vpop.f32.mrf.mxu1  ;;  %8918 = vmatmul.msk.bf16.vlgmr.msra.gmra.mxu0 %vm2612_vm6, %v10782_v42  ;;  %v3320_v31 = vsel %vm684_vm4, %v3318_v20, %v3319_v21  ;;  %v3322_v44 = vsel %vm684_vm4, %v3319_v21, %v3321_v39 }
 0x429   : > { %v3154_v62 = vadd.f32 %v11399_v12, %v2814_v4  ;;  %8887 = vmatmul.msk.bf16.gmra.mxu2 %vm2612_vm6, %v11192_v8  ;;  %4122 = vrot.lane.b32.xlu0 %v2255_v16, %s9843_s9  ;;  %v3458_v10 = vsel %vm1091_vm5, %v3456_v7, %v3457_v38  ;;  %v3460_v25 = vsel %vm1091_vm5, %v3457_v38, %v3459_v33  ;;  %v11494_v39 = vpop.f32.mrf.mxu0 }
 0x42a   : > { %4118 = vrot.lane.b32.xlu2 %v2253_v18, %s9843_s9  ;;  %v11477_v42 = vpack.c.bf16 %v3460_v25, %v3458_v10  ;;  %v11479_v11 = vpack.c.bf16 %v3322_v44, %v3320_v31  ;;  %v14940_v10 = vld [vmem:[#allocation11_spill] sm:$0xff] }
 0x42b   : > { %8828 = vmatmul.msk.bf16.gmra.mxu3 %vm2612_vm6, %v11164_v6  ;;  %8868 = vmatmul.msk.bf16.gmra.mxu1 %vm2612_vm6, %v11207_v43  ;;  %v11485_v12 = vadd.f32 %v3206_v14, %v3154_v62 }
 0x42c   : > { %14939 = vst [vmem:[#allocation27_spill] sm:$0xff] %v11479_v11  ;;  %v3209_v60 = vpop.f32.mrf.mxu2  ;;  %v14954_v11 = vld [vmem:[#allocation44_spill] sm:$0xff] }
 0x42e   : > { %v2674_v56 = vpop.f32.mrf.mxu3 }
 0x42f   : > { %v2817_v50 = vadd.f32 %v11137_v41, %v2674_v56  ;;  %v14942_v56 = vld [vmem:[#allocation36_spill] sm:$0xff] }
 0x430   : > { %v3085_v32 = vpop.f32.mrf.mxu1 }
 0x431   : > { %v3155_v20 = vadd.f32 %v11417_v2, %v2817_v50  ;;  %4112 = vrot.lane.b32.xlu0 %v2250_v22, %s9843_s9  ;;  %v2247_v2 = vadd.f32 %v10947_v35, %v11118_v63 }
 0x432   : > { %4108 = vrot.lane.b32.xlu2 %v2248_v47, %s9843_s9  ;;  %v14944_v47 = vld [vmem:[#allocation9_spill] sm:$0xff] }
 0x433   : > { %v11497_v14 = vadd.f32 %v3209_v60, %v3155_v20  ;;  %v14941_v60 = vld [vmem:[#allocation20_spill] sm:$0xff] }
 0x434   : > { %v3211_v33 = vpop.f32.mrf.mxu2 }
 0x436   : > { %v2676_v61 = vpop.f32.mrf.mxu3 }
 0x437   : > { %v2819_v41 = vadd.f32 %v11173_v15, %v2676_v61  ;;  %v11516_v15 = vpop.f32.mrf.mxu0 }
 0x438   : > { %v3088_v21 = vpop.f32.mrf.mxu1  ;;  %8919 = vmatmul.msk.bf16.gmra.mxu0 %vm2612_vm6, %v10821_v19 }
 0x439   : > { %v3156_v29 = vadd.f32 %v3080_v24, %v2819_v41  ;;  %8888 = vmatmul.msk.bf16.gmra.mxu2 %vm2612_vm6, %v11235_v51  ;;  %4110 = vrot.lane.b32.xlu0 %v2249_v28, %s9843_s9 }
 0x43a   : > { %4106 = vrot.lane.b32.xlu2 %v2247_v2, %s9843_s9  ;;  %v14945_v2 = vld [vmem:[#allocation19_spill] sm:$0xff] }
 0x43b   : > { %8829 = vmatmul.msk.bf16.gmra.mxu3 %vm2612_vm6, %v11210_v53  ;;  %8869 = vmatmul.msk.bf16.gmra.mxu1 %vm2612_vm6, %v11250_v0  ;;  %v11514_v1 = vadd.f32 %v3211_v33, %v3156_v29 }
 0x43c   : > { %v3214_v4 = vpop.f32.mrf.mxu2 }
 0x43e   : > { %v2679_v35 = vpop.f32.mrf.mxu3 }
 0x43f   : > { %v2822_v63 = vadd.f32 %v11189_v36, %v2679_v35  ;;  %v11521_v18 = vpop.f32.mrf.mxu0  ;;  %v14943_v36 = vld [vmem:[#allocation34_spill] sm:$0xff]  ;;  %v14946_v35 = vld [vmem:[#allocation13_spill] sm:$0xff] }
 0x440   : > { %v3090_v24 = vpop.f32.mrf.mxu1 }
 0x441   : > { %v3157_v16 = vadd.f32 %v3083_v30, %v2822_v63 }
 0x443   : > { %v11519_v7 = vadd.f32 %v3214_v4, %v3157_v16 }
 0x444   : > { %v3216_v38 = vpop.f32.mrf.mxu2 }
 0x446   : > { %v2681_v31 = vpop.f32.mrf.mxu3 }
 0x447   : > { %v2824_v44 = vadd.f32 %v11219_v48, %v2681_v31  ;;  %v11535_v20 = vpop.f32.mrf.mxu0 }
 0x448   : > { %v3093_v62 = vpop.f32.mrf.mxu1  ;;  %8920 = vmatmul.msk.bf16.gmra.mxu0 %vm2612_vm6, %v14940_v10 }
 0x449   : > { %v3158_v25 = vadd.f32 %v3085_v32, %v2824_v44  ;;  %8889 = vmatmul.msk.bf16.gmra.mxu2 %vm2612_vm6, %v14941_v60  ;;  %v9617_v44 = vld [vmem:[%s14626_s1 + $0x54] sm:$0xff] }
 0x44a   : > { %3342 = vmatpush.bf16.msra.mxu3 %v9617_v44  ;;  %v9619_v44 = vld [vmem:[%s14626_s1 + $0x64] sm:$0xff] }
 0x44b   : > { %8830 = vmatmul.msk.bf16.gmra.mxu3 %vm2612_vm6, %v14942_v56  ;;  %8870 = vmatmul.msk.bf16.gmra.mxu1 %vm2612_vm6, %v14943_v36  ;;  %v11532_v30 = vadd.f32 %v3216_v38, %v3158_v25  ;;  %v14947_v38 = vld [vmem:[#allocation25_spill] sm:$0xff] }
 0x44c   : > { %v3219_v50 = vpop.f32.mrf.mxu2  ;;  %3607 = vmatpush.bf16.msra.mxu1 %v9619_v44 }
 0x44e   : > { %v2684_v22 = vpop.f32.mrf.mxu3 }
 0x44f   : > { %v2827_v48 = vadd.f32 %v14944_v47, %v2684_v22  ;;  %v11544_v16 = vpop.f32.mrf.mxu0 }
 0x450   : > { %v3095_v33 = vpop.f32.mrf.mxu1 }
 0x451   : > { %v3159_v61 = vadd.f32 %v3088_v21, %v2827_v48 }
 0x453   : > { %v11537_v32 = vadd.f32 %v3219_v50, %v3159_v61 }
 0x454   : > { %v3221_v41 = vpop.f32.mrf.mxu2 }
 0x456   : > { %v2686_v28 = vpop.f32.mrf.mxu3 }
 0x457   : > { %v2829_v29 = vadd.f32 %v14945_v2, %v2686_v28  ;;  %v11558_v61 = vpop.f32.mrf.mxu0 }
 0x458   : > { %v3098_v4 = vpop.f32.mrf.mxu1  ;;  %8921 = vmatmul.msk.bf16.gmra.mxu0 %vm2612_vm6, %v14946_v35  ;;  %v14950_v35 = vld [vmem:[#allocation15_spill] sm:$0xff] }
 0x459   : > { %v3160_v63 = vadd.f32 %v3090_v24, %v2829_v29  ;;  %8890 = vmatmul.msk.bf16.gmra.mxu2 %vm2612_vm6, %v11324_v3  ;;  %v14948_v24 = vld [vmem:[#allocation38_spill] sm:$0xff]  ;;  %v14949_v29 = vld [vmem:[#allocation40_spill] sm:$0xff] }
 0x45b   : > { %8831 = vmatmul.msk.bf16.gmra.mxu3 %vm2612_vm6, %v14947_v38  ;;  %8871 = vmatmul.msk.bf16.gmra.mxu1 %vm2612_vm6, %v11340_v54  ;;  %v11550_v21 = vadd.f32 %v3221_v41, %v3160_v63 }
 0x45c   : > { %v3224_v31 = vpop.f32.mrf.mxu2 }
 0x45e   : > { %v2689_v25 = vpop.f32.mrf.mxu3 }
 0x45f   : > { %v2832_v50 = vadd.f32 %v14948_v24, %v2689_v25  ;;  %v11574_v25 = vpop.f32.mrf.mxu0 }
 0x460   : > { %v3100_v22 = vpop.f32.mrf.mxu1 }
 0x461   : > { %v3161_v47 = vadd.f32 %v3093_v62, %v2832_v50 }
 0x463   : > { %v11556_v48 = vadd.f32 %v3224_v31, %v3161_v47 }
 0x464   : > { %v3226_v28 = vpop.f32.mrf.mxu2 }
 0x466   : > { %v2691_v2 = vpop.f32.mrf.mxu3 }
 0x467   : > { %v2834_v41 = vadd.f32 %v14949_v29, %v2691_v2 }
 0x468   : > { %v3103_v63 = vpop.f32.mrf.mxu1  ;;  %8922 = vmatmul.msk.bf16.gmra.mxu0 %vm2612_vm6, %v14950_v35  ;;  %v14953_v35 = vld [vmem:[#allocation18_spill] sm:$0xff] }
 0x469   : > { %v3162_v10 = vadd.f32 %v3095_v33, %v2834_v41  ;;  %8891 = vmatmul.msk.bf16.gmra.mxu2 %vm2612_vm6, %v11366_v46  ;;  %v9620_v41 = vld [vmem:[%s14626_s1 + $0x6c] sm:$0xff] }
 0x46a   : > { %3734 = vmatpush.bf16.msra.mxu2 %v9620_v41 }
 0x46b   : > { %8832 = vmatmul.msk.bf16.gmra.mxu3 %vm2612_vm6, %v11343_v49  ;;  %8872 = vmatmul.msk.bf16.gmra.mxu1 %vm2612_vm6, %v11385_v40  ;;  %v11572_v62 = vadd.f32 %v3226_v28, %v3162_v10  ;;  %v11583_v10 = vpop.f32.mrf.mxu0 }
 0x46c   : > { %v3229_v31 = vpop.f32.mrf.mxu2 }
 0x46d   : > { %14951 = vst [vmem:[#allocation12_spill] sm:$0xff] %v11572_v62  ;;  %v14957_v62 = vld [vmem:[#allocation47_spill] sm:$0xff] }
 0x46e   : > { %v2694_v24 = vpop.f32.mrf.mxu3 }
 0x46f   : > { %v2837_v50 = vadd.f32 %v11322_v37, %v2694_v24 }
 0x470   : > { %v3105_v47 = vpop.f32.mrf.mxu1 }
 0x471   : > { %v3163_v33 = vadd.f32 %v3098_v4, %v2837_v50 }
 0x473   : > { %v11577_v2 = vadd.f32 %v3229_v31, %v3163_v33  ;;  %v11596_v41 = vpop.f32.mrf.mxu0 }
 0x474   : > { %v3231_v29 = vpop.f32.mrf.mxu2 }
 0x475   : > { %14952 = vst [vmem:[#allocation29_spill] sm:$0xff] %v11577_v2 }
 0x476   : > { %v2696_v44 = vpop.f32.mrf.mxu3 }
 0x477   : > { %v2839_v19 = vadd.f32 %v14953_v35, %v2696_v44 }
 0x478   : > { %v3108_v28 = vpop.f32.mrf.mxu1  ;;  %8923 = vmatmul.msk.bf16.gmra.mxu0 %vm2612_vm6, %v14954_v11 }
 0x479   : > { %v3164_v37 = vadd.f32 %v3100_v22, %v2839_v19  ;;  %8892 = vmatmul.msk.bf16.gmra.mxu2 %vm2612_vm6, %v11410_v58 }
 0x47b   : > { %8833 = vmatmul.msk.bf16.gmra.mxu3 %vm2612_vm6, %v11387_v13  ;;  %8873 = vmatmul.msk.bf16.gmra.mxu1 %vm2612_vm6, %v11430_v26  ;;  %v11593_v4 = vadd.f32 %v3231_v29, %v3164_v37  ;;  %v11611_v37 = vpop.f32.mrf.mxu0 }
 0x47c   : > { %v3234_v35 = vpop.f32.mrf.mxu2 }
 0x47d   : > { %14955 = vst [vmem:[#allocation10_spill] sm:$0xff] %v11593_v4 }
 0x47e   : > { %v2699_v31 = vpop.f32.mrf.mxu3 }
 0x47f   : > { %v2842_v24 = vadd.f32 %v11383_v55, %v2699_v31  ;;  %v14958_v55 = vld [vmem:[#allocation28_spill] sm:$0xff] }
 0x480   : > { %v3110_v50 = vpop.f32.mrf.mxu1 }
 0x481   : > { %v3165_v33 = vadd.f32 %v3103_v63, %v2842_v24 }
 0x483   : > { %v11598_v19 = vadd.f32 %v3234_v35, %v3165_v33 }
 0x484   : > { %v3236_v22 = vpop.f32.mrf.mxu2 }
 0x485   : > { %14956 = vst [vmem:[#allocation7_spill] sm:$0xff] %v11598_v19 }
 0x486   : > { %v2701_v44 = vpop.f32.mrf.mxu3 }
 0x487   : > { %v2844_v11 = vadd.f32 %v11406_v34, %v2701_v44  ;;  %v11616_v44 = vpop.f32.mrf.mxu0 }
 0x488   : > { %v3113_v2 = vpop.f32.mrf.mxu1  ;;  %8924 = vmatmul.msk.bf16.gmra.mxu0 %vm2612_vm6, %v14957_v62 }
 0x489   : > { %v3166_v29 = vadd.f32 %v3105_v47, %v2844_v11  ;;  %8893 = vmatmul.msk.bf16.gmra.mxu2 %vm2612_vm6, %v11457_v9 }
 0x48b   : > { %8834 = vmatmul.msk.bf16.gmra.mxu3 %vm2612_vm6, %v11432_v52  ;;  %8938 = vmatmul.msk.bf16.vlgmr.msra.gmra.mxu1 %vm2612_vm6, %v14958_v55  ;;  %v11609_v63 = vadd.f32 %v3236_v22, %v3166_v29  ;;  %v14960_v29 = vld [vmem:[#allocation32_spill] sm:$0xff]  ;;  %v14961_v55 = vld [vmem:[#allocation37_spill] sm:$0xff] }
 0x48c   : > { %v3239_v35 = vpop.f32.mrf.mxu2 }
 0x48e   : > { %v2704_v34 = vpop.f32.mrf.mxu3 }
 0x48f   : > { %v2847_v31 = vadd.f32 %v11439_v5, %v2704_v34  ;;  %v14962_v5 = vld [vmem:[#allocation39_spill] sm:$0xff] }
 0x490   : > { %v3115_v24 = vpop.f32.mrf.mxu1 }
 0x491   : > { %v3167_v33 = vadd.f32 %v3108_v28, %v2847_v31 }
 0x493   : > { %v11614_v11 = vadd.f32 %v3239_v35, %v3167_v33 }
 0x494   : > { %v3241_v47 = vpop.f32.mrf.mxu2 }
 0x495   : > { %14959 = vst [vmem:[#allocation42_spill] sm:$0xff] %v11614_v11 }
 0x496   : > { %v2706_v62 = vpop.f32.mrf.mxu3 }
 0x497   : > { %v2849_v19 = vadd.f32 %v11462_v17, %v2706_v62  ;;  %v11630_v62 = vpop.f32.mrf.mxu0 }
 0x498   : > { %v3118_v4 = vpop.f32.mrf.mxu1  ;;  %8925 = vmatmul.msk.bf16.gmra.mxu0 %vm2612_vm6, %v11107_v57 }
 0x499   : > { %v3168_v22 = vadd.f32 %v3110_v50, %v2849_v19  ;;  %8957 = vmatmul.msk.bf16.vlgmr.msra.gmra.mxu2 %vm2612_vm6, %v14960_v29 }
 0x49b   : > { %8898 = vmatmul.msk.bf16.vlgmr.msra.gmra.mxu3 %vm2612_vm6, %v14961_v55  ;;  %8939 = vmatmul.msk.bf16.gmra.mxu1 %vm2612_vm6, %v14962_v5  ;;  %v11627_v28 = vadd.f32 %v3241_v47, %v3168_v22  ;;  %v14964_v22 = vld [vmem:[#allocation14_spill] sm:$0xff] }
 0x49c   : > { %v3244_v35 = vpop.f32.mrf.mxu2 }
 0x49e   : > { %v2709_v34 = vpop.f32.mrf.mxu3 }
 0x49f   : > { %v2852_v17 = vadd.f32 %v11494_v39, %v2709_v34  ;;  %v11639_v5 = vpop.f32.mrf.mxu0  ;;  %v14965_v39 = vld [vmem:[#allocation21_spill] sm:$0xff] }
 0x4a0   : > { %v3120_v31 = vpop.f32.mrf.mxu1 }
 0x4a1   : > { %v3169_v33 = vadd.f32 %v3113_v2, %v2852_v17 }
 0x4a3   : > { %v11632_v50 = vadd.f32 %v3244_v35, %v3169_v33 }
 0x4a4   : > { %v3246_v19 = vpop.f32.mrf.mxu2 }
 0x4a5   : > { %14963 = vst [vmem:[#allocation8_spill] sm:$0xff] %v11632_v50 }
 0x4a6   : > { %v2711_v57 = vpop.f32.mrf.mxu3 }
 0x4a7   : > { %v2854_v11 = vadd.f32 %v11516_v15, %v2711_v57 }
 0x4a8   : > { %v3123_v55 = vpop.f32.mrf.mxu1  ;;  %8926 = vmatmul.msk.bf16.gmra.mxu0 %vm2612_vm6, %v11160_v27 }
 0x4a9   : > { %v3170_v47 = vadd.f32 %v3115_v24, %v2854_v11  ;;  %8958 = vmatmul.msk.bf16.gmra.mxu2 %vm2612_vm6, %v14964_v22  ;;  %v11650_v11 = vpop.f32.mrf.mxu0 }
 0x4ab   : > { %8899 = vmatmul.msk.bf16.gmra.mxu3 %vm2612_vm6, %v14960_v29  ;;  %8940 = vmatmul.msk.bf16.gmra.mxu1 %vm2612_vm6, %v14965_v39  ;;  %v11645_v2 = vadd.f32 %v3246_v19, %v3170_v47  ;;  %v14967_v47 = vld [vmem:[#allocation41_spill] sm:$0xff] }
 0x4ac   : > { %v3249_v35 = vpop.f32.mrf.mxu2 }
 0x4ae   : > { %v2714_v57 = vpop.f32.mrf.mxu3 }
 0x4af   : > { %v2857_v15 = vadd.f32 %v11521_v18, %v2714_v57  ;;  %v14968_v18 = vld [vmem:[#allocation23_spill] sm:$0xff] }
 0x4b0   : > { %v3125_v34 = vpop.f32.mrf.mxu1 }
 0x4b1   : > { %v3171_v17 = vadd.f32 %v3118_v4, %v2857_v15 }
 0x4b3   : > { %v11648_v24 = vadd.f32 %v3249_v35, %v3171_v17  ;;  %v11663_v35 = vpop.f32.mrf.mxu0 }
 0x4b4   : > { %v3251_v33 = vpop.f32.mrf.mxu2 }
 0x4b5   : > { %14966 = vst [vmem:[#allocation31_spill] sm:$0xff] %v11648_v24 }
 0x4b6   : > { %v2716_v27 = vpop.f32.mrf.mxu3 }
 0x4b7   : > { %v2859_v50 = vadd.f32 %v11535_v20, %v2716_v27 }
 0x4b8   : > { %v3128_v29 = vpop.f32.mrf.mxu1  ;;  %8927 = vmatmul.msk.bf16.gmra.mxu0 %vm2612_vm6, %v11207_v43 }
 0x4b9   : > { %v3172_v19 = vadd.f32 %v3120_v31, %v2859_v50  ;;  %8959 = vmatmul.msk.bf16.gmra.mxu2 %vm2612_vm6, %v14967_v47 }
 0x4bb   : > { %8900 = vmatmul.msk.bf16.gmra.mxu3 %vm2612_vm6, %v14964_v22  ;;  %8941 = vmatmul.msk.bf16.gmra.mxu1 %vm2612_vm6, %v14968_v18  ;;  %v11661_v4 = vadd.f32 %v3251_v33, %v3172_v19  ;;  %v11669_v22 = vpop.f32.mrf.mxu0  ;;  %v14969_v19 = vld [vmem:[#allocation16_spill] sm:$0xff] }
 0x4bc   : > { %v3254_v39 = vpop.f32.mrf.mxu2 }
 0x4be   : > { %v2719_v27 = vpop.f32.mrf.mxu3 }
 0x4bf   : > { %v2862_v20 = vadd.f32 %v11544_v16, %v2719_v27  ;;  %v14970_v16 = vld [vmem:[#allocation43_spill] sm:$0xff] }
 0x4c0   : > { %v3130_v57 = vpop.f32.mrf.mxu1 }
 0x4c1   : > { %v3173_v15 = vadd.f32 %v3123_v55, %v2862_v20 }
 0x4c3   : > { %v11666_v31 = vadd.f32 %v3254_v39, %v3173_v15  ;;  %v11682_v15 = vpop.f32.mrf.mxu0 }
 0x4c4   : > { %v3256_v50 = vpop.f32.mrf.mxu2 }
 0x4c6   : > { %v2721_v17 = vpop.f32.mrf.mxu3 }
 0x4c7   : > { %v2864_v43 = vadd.f32 %v11558_v61, %v2721_v17 }
 0x4c8   : > { %v3133_v24 = vpop.f32.mrf.mxu1  ;;  %8928 = vmatmul.msk.bf16.gmra.mxu0 %vm2612_vm6, %v11250_v0 }
 0x4c9   : > { %v3174_v33 = vadd.f32 %v3125_v34, %v2864_v43  ;;  %8960 = vmatmul.msk.bf16.gmra.mxu2 %vm2612_vm6, %v14969_v19 }
 0x4cb   : > { %8901 = vmatmul.msk.bf16.gmra.mxu3 %vm2612_vm6, %v14967_v47  ;;  %8942 = vmatmul.msk.bf16.gmra.mxu1 %vm2612_vm6, %v14970_v16  ;;  %v11679_v55 = vadd.f32 %v3256_v50, %v3174_v33  ;;  %v14972_v33 = vld [vmem:[#allocation45_spill] sm:$0xff]  ;;  %v11697_v16 = vpop.f32.mrf.mxu0 }
 0x4cc   : > { %v3259_v18 = vpop.f32.mrf.mxu2 }
 0x4ce   : > { %v2724_v61 = vpop.f32.mrf.mxu3 }
 0x4cf   : > { %v2867_v39 = vadd.f32 %v11574_v25, %v2724_v61  ;;  %v14973_v25 = vld [vmem:[#allocation46_spill] sm:$0xff] }
 0x4d0   : > { %v3135_v27 = vpop.f32.mrf.mxu1 }
 0x4d1   : > { %v3175_v20 = vadd.f32 %v3128_v29, %v2867_v39 }
 0x4d3   : > { %v11684_v43 = vadd.f32 %v3259_v18, %v3175_v20 }
 0x4d4   : > { %v3261_v34 = vpop.f32.mrf.mxu2 }
 0x4d5   : > { %14971 = vst [vmem:[#allocation33_spill] sm:$0xff] %v11684_v43 }
 0x4d6   : > { %v2726_v17 = vpop.f32.mrf.mxu3 }
 0x4d7   : > { %v2869_v0 = vadd.f32 %v11583_v10, %v2726_v17  ;;  %v11702_v17 = vpop.f32.mrf.mxu0 }
 0x4d8   : > { %v3138_v47 = vpop.f32.mrf.mxu1  ;;  %8929 = vmatmul.msk.bf16.gmra.mxu0 %vm2612_vm6, %v14943_v36 }
 0x4d9   : > { %v3176_v50 = vadd.f32 %v3130_v57, %v2869_v0  ;;  %8961 = vmatmul.msk.bf16.gmra.mxu2 %vm2612_vm6, %v14972_v33 }
 0x4db   : > { %8902 = vmatmul.msk.bf16.gmra.mxu3 %vm2612_vm6, %v14969_v19  ;;  %8943 = vmatmul.msk.bf16.gmra.mxu1 %vm2612_vm6, %v14973_v25  ;;  %v11695_v29 = vadd.f32 %v3261_v34, %v3176_v50  ;;  %v14974_v50 = vld [vmem:[#allocation48_spill] sm:$0xff] }
 0x4dc   : > { %v3264_v18 = vpop.f32.mrf.mxu2 }
 0x4de   : > { %v2729_v10 = vpop.f32.mrf.mxu3 }
 0x4df   : > { %v2872_v61 = vadd.f32 %v11596_v41, %v2729_v10  ;;  %v14975_v41 = vld [vmem:[#allocation49_spill] sm:$0xff] }
 0x4e0   : > { %v3140_v39 = vpop.f32.mrf.mxu1 }
 0x4e1   : > { %v3177_v20 = vadd.f32 %v3133_v24, %v2872_v61 }
 0x4e3   : > { %v11700_v0 = vadd.f32 %v3264_v18, %v3177_v20 }
 0x4e4   : > { %v3266_v57 = vpop.f32.mrf.mxu2 }
 0x4e6   : > { %v2731_v36 = vpop.f32.mrf.mxu3 }
 0x4e7   : > { %v2874_v19 = vadd.f32 %v11611_v37, %v2731_v36  ;;  %v11716_v37 = vpop.f32.mrf.mxu0 }
 0x4e8   : > { %v3143_v43 = vpop.f32.mrf.mxu1  ;;  %8930 = vmatmul.msk.bf16.gmra.mxu0 %vm2612_vm6, %v11340_v54 }
 0x4e9   : > { %v3178_v34 = vadd.f32 %v3135_v27, %v2874_v19  ;;  %8962 = vmatmul.msk.bf16.gmra.mxu2 %vm2612_vm6, %v14974_v50 }
 0x4eb   : > { %8903 = vmatmul.msk.bf16.gmra.mxu3 %vm2612_vm6, %v14972_v33  ;;  %8944 = vmatmul.msk.bf16.gmra.mxu1 %vm2612_vm6, %v14975_v41  ;;  %v11713_v24 = vadd.f32 %v3266_v57, %v3178_v34 }
 0x4ec   : > { %v3269_v25 = vpop.f32.mrf.mxu2 }
 0x4ee   : > { %v2734_v18 = vpop.f32.mrf.mxu3 }
 0x4ef   : > { %v2877_v36 = vadd.f32 %v11616_v44, %v2734_v18  ;;  %v11725_v34 = vpop.f32.mrf.mxu0 }
 0x4f0   : > { %v3145_v10 = vpop.f32.mrf.mxu1 }
 0x4f1   : > { %v3179_v61 = vadd.f32 %v3138_v47, %v2877_v36 }
 0x4f3   : > { %v11718_v27 = vadd.f32 %v3269_v25, %v3179_v61 }
 0x4f4   : > { %v3271_v20 = vpop.f32.mrf.mxu2 }
 0x4f6   : > { %v2736_v19 = vpop.f32.mrf.mxu3 }
 0x4f7   : > { %v2879_v54 = vadd.f32 %v11630_v62, %v2736_v19 }
 0x4f8   : > { %v3148_v33 = vpop.f32.mrf.mxu1  ;;  %8931 = vmatmul.msk.bf16.gmra.mxu0 %vm2612_vm6, %v11385_v40 }
 0x4f9   : > { %v3180_v57 = vadd.f32 %v3140_v39, %v2879_v54  ;;  %8963 = vmatmul.msk.bf16.gmra.mxu2 %vm2612_vm6, %v11109_v59  ;;  %v11736_v39 = vpop.f32.mrf.mxu0 }
 0x4fb   : > { %8904 = vmatmul.msk.bf16.gmra.mxu3 %vm2612_vm6, %v14974_v50  ;;  %8945 = vmatmul.msk.bf16.gmra.mxu1 %vm2612_vm6, %v11140_v45  ;;  %v11731_v44 = vadd.f32 %v3271_v20, %v3180_v57 }
 0x4fc   : > { %v3274_v47 = vpop.f32.mrf.mxu2 }
 0x4fe   : > { %v2739_v62 = vpop.f32.mrf.mxu3 }
 0x4ff   : > { %v2882_v41 = vadd.f32 %v11639_v5, %v2739_v62 }
 0x500   : > { %v3150_v25 = vpop.f32.mrf.mxu1 }
 0x501   : > { %v3181_v18 = vadd.f32 %v3143_v43, %v2882_v41  ;;  %v11749_v20 = vpop.f32.mrf.mxu0 }
 0x503   : > { %v11734_v54 = vadd.f32 %v3274_v47, %v3181_v18 }
 0x504   : > { %v3276_v36 = vpop.f32.mrf.mxu2 }
 0x506   : > { %v2741_v61 = vpop.f32.mrf.mxu3 }
 0x507   : > { %v2884_v19 = vadd.f32 %v11650_v11, %v2741_v61 }
 0x508   : > { %8932 = vmatmul.msk.bf16.gmra.mxu0 %vm2612_vm6, %v11430_v26  ;;  %v3609_v45 = vpop.f32.mrf.mxu1 }
 0x509   : > { %v3182_v50 = vadd.f32 %v3145_v10, %v2884_v19  ;;  %8964 = vmatmul.msk.bf16.gmra.mxu2 %vm2612_vm6, %v11164_v6 }
 0x50b   : > { %8905 = vmatmul.msk.bf16.gmra.mxu3 %vm2612_vm6, %v11109_v59  ;;  %8946 = vmatmul.msk.bf16.gmra.mxu1 %vm2612_vm6, %v11192_v8  ;;  %v11747_v5 = vadd.f32 %v3276_v36, %v3182_v50  ;;  %v11755_v59 = vpop.f32.mrf.mxu0 }
 0x50c   : > { %v3279_v43 = vpop.f32.mrf.mxu2 }
 0x50e   : > { %v2744_v11 = vpop.f32.mrf.mxu3 }
 0x50f   : > { %v2887_v57 = vadd.f32 %v11663_v35, %v2744_v11 }
 0x510   : > { %v3611_v47 = vpop.f32.mrf.mxu1 }
 0x511   : > { %v3183_v62 = vadd.f32 %v3148_v33, %v2887_v57 }
 0x513   : > { %v11752_v10 = vadd.f32 %v3279_v43, %v3183_v62 }
 0x514   : > { %v3281_v41 = vpop.f32.mrf.mxu2 }
 0x516   : > { %v2746_v18 = vpop.f32.mrf.mxu3 }
 0x517   : > { %v2889_v61 = vadd.f32 %v11669_v22, %v2746_v18 }
 0x518   : > { %8933 = vmatmul.msk.bf16.gmra.mxu0 %vm2612_vm6, %v11477_v42  ;;  %v3614_v8 = vpop.f32.mrf.mxu1 }
 0x519   : > { %v3184_v36 = vadd.f32 %v3150_v25, %v2889_v61  ;;  %8965 = vmatmul.msk.bf16.gmra.mxu2 %vm2612_vm6, %v11210_v53 }
 0x51b   : > { %8906 = vmatmul.msk.bf16.gmra.mxu3 %vm2612_vm6, %v11164_v6  ;;  %8947 = vmatmul.msk.bf16.gmra.mxu1 %vm2612_vm6, %v11235_v51  ;;  %v11765_v35 = vadd.f32 %v3281_v41, %v3184_v36 }
 0x51c   : > { %v3736_v33 = vpop.f32.mrf.mxu2 }
 0x51e   : > { %v3344_v22 = vpop.f32.mrf.mxu3 }
 0x51f   : > { %v3424_v19 = vadd.f32 %v3344_v22, %v11453_v23 }
 0x520   : > { %v3616_v50 = vpop.f32.mrf.mxu1 }
 0x521   : > { %v3562_v43 = vadd.f32 %v11682_v15, %v3424_v19 }
 0x523   : > { %v3689_v11 = vadd.f32 %v3609_v45, %v3562_v43 }
 0x524   : > { %v3738_v25 = vpop.f32.mrf.mxu2 }
 0x525   : > { %v11769_v57 = vadd.f32 %v3736_v33, %v3689_v11 }
 0x526   : > { %v3346_v62 = vpop.f32.mrf.mxu3 }
 0x527   : > { %v3425_v18 = vadd.f32 %v3346_v62, %v11485_v12 }
 0x528   : > { %v3619_v6 = vpop.f32.mrf.mxu1 }
 0x529   : > { %v3563_v61 = vadd.f32 %v11697_v16, %v3425_v18  ;;  %8966 = vmatmul.msk.bf16.gmra.mxu2 %vm2612_vm6, %v14942_v56 }
 0x52b   : > { %8907 = vmatmul.msk.bf16.gmra.mxu3 %vm2612_vm6, %v11210_v53  ;;  %8948 = vmatmul.msk.bf16.gmra.mxu1 %vm2612_vm6, %v14941_v60  ;;  %v3690_v51 = vadd.f32 %v3611_v47, %v3563_v61 }
 0x52c   : > { %v3741_v23 = vpop.f32.mrf.mxu2 }
 0x52d   : > { %v11779_v15 = vadd.f32 %v3738_v25, %v3690_v51 }
 0x52e   : > { %v3349_v45 = vpop.f32.mrf.mxu3 }
 0x52f   : > { %v3426_v41 = vadd.f32 %v3349_v45, %v11497_v14 }
 0x530   : > { %v3621_v12 = vpop.f32.mrf.mxu1 }
 0x531   : > { %v3564_v36 = vadd.f32 %v11702_v17, %v3426_v41 }
 0x533   : > { %v3691_v16 = vadd.f32 %v3614_v8, %v3564_v36 }
 0x534   : > { %v3743_v33 = vpop.f32.mrf.mxu2 }
 0x535   : > { %v11783_v22 = vadd.f32 %v3741_v23, %v3691_v16 }
 0x536   : > { %v3351_v19 = vpop.f32.mrf.mxu3 }
 0x537   : > { %v3427_v53 = vadd.f32 %v3351_v19, %v11514_v1  ;;  %v3502_v1 = vpop.f32.mrf.mxu0 }
 0x538   : > { %v3624_v43 = vpop.f32.mrf.mxu1 }
 0x539   : > { %v3565_v60 = vadd.f32 %v11716_v37, %v3427_v53  ;;  %8967 = vmatmul.msk.bf16.gmra.mxu2 %vm2612_vm6, %v14947_v38 }
 0x53b   : > { %8908 = vmatmul.msk.bf16.gmra.mxu3 %vm2612_vm6, %v14942_v56  ;;  %8949 = vmatmul.msk.bf16.gmra.mxu1 %vm2612_vm6, %v11324_v3  ;;  %v3692_v14 = vadd.f32 %v3616_v50, %v3565_v60 }
 0x53c   : > { %v3746_v17 = vpop.f32.mrf.mxu2 }
 0x53d   : > { %v11793_v47 = vadd.f32 %v3743_v33, %v3692_v14 }
 0x53e   : > { %v3354_v8 = vpop.f32.mrf.mxu3 }
 0x53f   : > { %v3428_v11 = vadd.f32 %v3354_v8, %v11519_v7  ;;  %v11803_v50 = vpop.f32.mrf.mxu0 }
 0x540   : > { %v3626_v25 = vpop.f32.mrf.mxu1 }
 0x541   : > { %v3566_v37 = vadd.f32 %v11725_v34, %v3428_v11 }
 0x543   : > { %v3693_v62 = vadd.f32 %v3619_v6, %v3566_v37  ;;  %v14976_v37 = vld [vmem:[#allocation12_spill] sm:$0xff] }
 0x544   : > { %v3748_v18 = vpop.f32.mrf.mxu2 }
 0x545   : > { %v11797_v61 = vadd.f32 %v3746_v17, %v3693_v62 }
 0x546   : > { %v3356_v51 = vpop.f32.mrf.mxu3 }
 0x547   : > { %v3429_v56 = vadd.f32 %v3356_v51, %v11532_v30  ;;  %v11815_v16 = vpop.f32.mrf.mxu0 }
 0x548   : > { %v3629_v23 = vpop.f32.mrf.mxu1 }
 0x549   : > { %v3567_v3 = vadd.f32 %v11736_v39, %v3429_v56  ;;  %8968 = vmatmul.msk.bf16.gmra.mxu2 %vm2612_vm6, %v11343_v49  ;;  %v14977_v56 = vld [vmem:[#allocation29_spill] sm:$0xff] }
 0x54b   : > { %8909 = vmatmul.msk.bf16.gmra.mxu3 %vm2612_vm6, %v14947_v38  ;;  %8950 = vmatmul.msk.bf16.gmra.mxu1 %vm2612_vm6, %v11366_v46  ;;  %v3694_v7 = vadd.f32 %v3621_v12, %v3567_v3 }
 0x54c   : > { %v3751_v34 = vpop.f32.mrf.mxu2 }
 0x54d   : > { %v11809_v6 = vadd.f32 %v3748_v18, %v3694_v7 }
 0x54e   : > { %v3359_v45 = vpop.f32.mrf.mxu3 }
 0x54f   : > { %v3430_v30 = vadd.f32 %v3359_v45, %v11537_v32  ;;  %v11834_v60 = vpop.f32.mrf.mxu0 }
 0x550   : > { %v11812_v41 = vpop.f32.mrf.mxu1 }
 0x551   : > { %v3568_v39 = vadd.f32 %v11749_v20, %v3430_v30  ;;  %v14978_v30 = vld [vmem:[#allocation10_spill] sm:$0xff] }
 0x553   : > { %v3695_v36 = vadd.f32 %v3624_v43, %v3568_v39  ;;  %v9621_v43 = vld [vmem:[%s14626_s1 + $0x74] sm:$0xff] }
 0x554   : > { %v3753_v33 = vpop.f32.mrf.mxu2  ;;  %3861 = vmatpush.bf16.msrb.mxu3 %v9621_v43 }
 0x555   : > { %v11817_v19 = vadd.f32 %v3751_v34, %v3695_v36 }
 0x556   : > { %v3361_v38 = vpop.f32.mrf.mxu3 }
 0x557   : > { %v3431_v46 = vadd.f32 %v3361_v38, %v11550_v21  ;;  %v11846_v18 = vpop.f32.mrf.mxu0 }
 0x558   : > { %v11820_v12 = vpop.f32.mrf.mxu1 }
 0x559   : > { %v3569_v53 = vadd.f32 %v11755_v59, %v3431_v46  ;;  %8969 = vmatmul.msk.bf16.gmra.mxu2 %vm2612_vm6, %v11387_v13 }
 0x55b   : > { %8910 = vmatmul.msk.bf16.gmra.mxu3 %vm2612_vm6, %v11343_v49  ;;  %8951 = vmatmul.msk.bf16.gmra.mxu1 %vm2612_vm6, %v11410_v58  ;;  %v3696_v32 = vadd.f32 %v3626_v25, %v3569_v53  ;;  %v14983_v53 = vld [vmem:[#allocation7_spill] sm:$0xff] }
 0x55c   : > { %v3756_v20 = vpop.f32.mrf.mxu2 }
 0x55d   : > { %v11832_v21 = vadd.f32 %v3753_v33, %v3696_v32 }
 0x55e   : > { %v3364_v59 = vpop.f32.mrf.mxu3 }
 0x55f   : > { %v3432_v14 = vadd.f32 %v3364_v59, %v11556_v48  ;;  %v11861_v3 = vpop.f32.mrf.mxu0 }
 0x560   : > { %v11837_v17 = vpop.f32.mrf.mxu1 }
 0x561   : > { %v3570_v49 = vadd.f32 %v3502_v1, %v3432_v14 }
 0x563   : > { %v3697_v8 = vadd.f32 %v3629_v23, %v3570_v49  ;;  %v14986_v49 = vld [vmem:[#allocation6_spill] sm:$0xff] }
 0x564   : > { %v11839_v11 = vpop.f32.mrf.mxu2 }
 0x565   : > { %v11841_v58 = vadd.f32 %v3756_v20, %v3697_v8 }
 0x566   : > { %v3366_v25 = vpop.f32.mrf.mxu3 }
 0x567   : > { %v11844_v62 = vadd.f32 %v3366_v25, %v14976_v37  ;;  %v11875_v36 = vpop.f32.mrf.mxu0  ;;  %v14988_v37 = vld [vmem:[#allocation42_spill] sm:$0xff] }
 0x568   : > { %v11850_v51 = vpop.f32.mrf.mxu1  ;;  %14981 = vst [vmem:[#allocation20_spill] sm:$0xff] %v11875_v36 }
 0x569   : > { %8970 = vmatmul.msk.bf16.gmra.mxu2 %vm2612_vm6, %v11432_v52 }
 0x56b   : > { %8911 = vmatmul.msk.bf16.gmra.mxu3 %vm2612_vm6, %v11387_v13  ;;  %8952 = vmatmul.msk.bf16.gmra.mxu1 %vm2612_vm6, %v11457_v9  ;;  %v14979_v13 = vld [vmem:[#allocation27_spill] sm:$0xff]  ;;  %v14980_v9 = vmov 0.0|0.0  }
 0x56c   : > { %v11856_v48 = vpop.f32.mrf.mxu2 }
 0x56e   : > { %v3369_v1 = vpop.f32.mrf.mxu3 }
 0x56f   : > { %v11859_v23 = vadd.f32 %v3369_v1, %v14977_v56  ;;  %v11886_v43 = vpop.f32.mrf.mxu0 }
 0x570   : > { %v11863_v7 = vpop.f32.mrf.mxu1  ;;  %14984 = vst [vmem:[#allocation9_spill] sm:$0xff] %v11886_v43 }
 0x574   : > { %v11865_v34 = vpop.f32.mrf.mxu2 }
 0x576   : > { %v3371_v45 = vpop.f32.mrf.mxu3 }
 0x577   : > { %v11868_v39 = vadd.f32 %v3371_v45, %v14978_v30  ;;  %v3522_v56 = vpop.f32.mrf.mxu0 }
 0x578   : > { %v11879_v38 = vpop.f32.mrf.mxu1 }
 0x579   : > { %8971 = vmatmul.msk.bf16.gmra.mxu2 %vm2612_vm6, %v14979_v13  ;;  %14982 = vst [vmem:[#allocation36_spill] sm:$0xff] %v11879_v38 }
 0x57b   : > { %8912 = vmatmul.msk.bf16.gmra.mxu3 %vm2612_vm6, %v11432_v52  ;;  %3683 = vmatmul.bf16.gmra.mxu1 %v14980_v9 }
 0x57c   : > { %v11877_v33 = vpop.f32.mrf.mxu2 }
 0x57e   : > { %v3374_v46 = vpop.f32.mrf.mxu3 }
 0x57f   : > { %v11882_v32 = vadd.f32 %v3374_v46, %v14983_v53  ;;  %v11907_v46 = vpop.f32.mrf.mxu0  ;;  %v14992_v53 = vld [vmem:[#allocation30_spill] sm:$0xff] }
 0x580   : > { %v11891_v52 = vpop.f32.mrf.mxu1  ;;  %14991 = vst [vmem:[#allocation18_spill] sm:$0xff] %v11907_v46 }
 0x581   : > { %14985 = vst [vmem:[#allocation19_spill] sm:$0xff] %v11891_v52  ;;  %v14994_v52 = vld [vmem:[#allocation8_spill] sm:$0xff] }
 0x584   : > { %v11884_v20 = vpop.f32.mrf.mxu2 }
 0x586   : > { %v3376_v59 = vpop.f32.mrf.mxu3 }
 0x587   : > { %v11889_v14 = vadd.f32 %v3376_v59, %v11609_v63  ;;  %v3527_v43 = vpop.f32.mrf.mxu0 }
 0x588   : > { %v3649_v45 = vpop.f32.mrf.mxu1 }
 0x589   : > { %8972 = vmatmul.msk.bf16.gmra.mxu2 %vm2612_vm6, %v14986_v49 }
 0x58b   : > { %8913 = vmatmul.msk.bf16.gmra.mxu3 %vm2612_vm6, %v14979_v13 }
 0x58c   : > { %v11897_v8 = vpop.f32.mrf.mxu2 }
 0x58d   : > { %14987 = vst [vmem:[#allocation25_spill] sm:$0xff] %v11897_v8 }
 0x58e   : > { %v3379_v25 = vpop.f32.mrf.mxu3 }
 0x58f   : > { %v11900_v1 = vadd.f32 %v3379_v25, %v14988_v37 }
 0x590   : > { %v11911_v13 = vpop.f32.mrf.mxu1 }
 0x591   : > { %14993 = vst [vmem:[#allocation28_spill] sm:$0xff] %v11911_v13  ;;  %v11923_v13 = vpop.f32.mrf.mxu0 }
 0x592   : > { %14998 = vst [vmem:[#allocation39_spill] sm:$0xff] %v11923_v13 }
 0x594   : > { %v11902_v30 = vpop.f32.mrf.mxu2 }
 0x595   : > { %14989 = vst [vmem:[#allocation38_spill] sm:$0xff] %v11902_v30 }
 0x596   : > { %v3381_v63 = vpop.f32.mrf.mxu3 }
 0x597   : > { %v11905_v9 = vadd.f32 %v3381_v63, %v11627_v28 }
 0x598   : > { %v3654_v28 = vpop.f32.mrf.mxu1 }
 0x599   : > { %14990 = vst [vmem:[#allocation40_spill] sm:$0xff] %v11905_v9  ;;  %v14997_v9 = vld [vmem:[#allocation11_spill] sm:$0xff] }
 0x59b   : > { %8977 = vmatmul.msk.bf16.vlgmr.msrb.gmra.mxu3 %vm2612_vm6, %v14992_v53 }
 0x59c   : > { %v3776_v59 = vpop.f32.mrf.mxu2 }
 0x59e   : > { %v3384_v49 = vpop.f32.mrf.mxu3 }
 0x59f   : > { %v3440_v25 = vadd.f32 %v3384_v49, %v14994_v52  ;;  %v14999_v52 = vld [vmem:[#allocation31_spill] sm:$0xff] }
 0x5a1   : > { %v3578_v37 = vadd.f32 %v3522_v56, %v3440_v25 }
 0x5a3   : > { %v3705_v8 = vadd.f32 %v3649_v45, %v3578_v37  ;;  %v11926_v45 = vpop.f32.mrf.mxu1 }
 0x5a4   : > { %v11914_v38 = vpop.f32.mrf.mxu2 }
 0x5a5   : > { %14995 = vst [vmem:[#allocation32_spill] sm:$0xff] %v11914_v38  ;;  %v11916_v30 = vadd.f32 %v3776_v59, %v3705_v8  ;;  %v15001_v38 = vld [vmem:[#allocation13_spill] sm:$0xff] }
 0x5a6   : > { %v3386_v63 = vpop.f32.mrf.mxu3 }
 0x5a7   : > { %14996 = vst [vmem:[#allocation37_spill] sm:$0xff] %v11916_v30  ;;  %v11919_v46 = vadd.f32 %v3386_v63, %v11645_v2  ;;  %v3532_v63 = vpop.f32.mrf.mxu0 }
 0x5ab   : > { %8978 = vmatmul.msk.bf16.gmra.mxu3 %vm2612_vm6, %v14997_v9  ;;  %v3659_v9 = vpop.f32.mrf.mxu1 }
 0x5ac   : > { %v3781_v53 = vpop.f32.mrf.mxu2 }
 0x5ae   : > { %v3389_v36 = vpop.f32.mrf.mxu3 }
 0x5af   : > { %v3442_v56 = vadd.f32 %v3389_v36, %v14999_v52 }
 0x5b1   : > { %v3580_v49 = vadd.f32 %v3527_v43, %v3442_v56  ;;  %v11938_v43 = vpop.f32.mrf.mxu0 }
 0x5b2   : > { %15002 = vst [vmem:[#allocation21_spill] sm:$0xff] %v11938_v43 }
 0x5b3   : > { %v3707_v25 = vadd.f32 %v3654_v28, %v3580_v49  ;;  %v11940_v56 = vpop.f32.mrf.mxu1 }
 0x5b4   : > { %v11928_v8 = vpop.f32.mrf.mxu2  ;;  %15003 = vst [vmem:[#allocation41_spill] sm:$0xff] %v11940_v56 }
 0x5b5   : > { %15000 = vst [vmem:[#allocation14_spill] sm:$0xff] %v11928_v8  ;;  %v11930_v59 = vadd.f32 %v3781_v53, %v3707_v25 }
 0x5b6   : > { %v3391_v37 = vpop.f32.mrf.mxu3 }
 0x5b7   : > { %v11933_v2 = vadd.f32 %v3391_v37, %v11661_v4  ;;  %v15007_v37 = vld [vmem:[#allocation15_spill] sm:$0xff] }
 0x5bb   : > { %8979 = vmatmul.msk.bf16.gmra.mxu3 %vm2612_vm6, %v15001_v38  ;;  %v3537_v38 = vpop.f32.mrf.mxu0  ;;  %v3664_v8 = vpop.f32.mrf.mxu1 }
 0x5bc   : > { %v3786_v13 = vpop.f32.mrf.mxu2 }
 0x5be   : > { %v3394_v30 = vpop.f32.mrf.mxu3 }
 0x5bf   : > { %v3444_v36 = vadd.f32 %v3394_v30, %v11666_v31  ;;  %v15008_v30 = vld [vmem:[#allocation33_spill] sm:$0xff] }
 0x5c1   : > { %v3582_v52 = vadd.f32 %v3532_v63, %v3444_v36 }
 0x5c3   : > { %v3709_v28 = vadd.f32 %v3659_v9, %v3582_v52 }
 0x5c4   : > { %v11944_v49 = vpop.f32.mrf.mxu2 }
 0x5c5   : > { %v11942_v53 = vadd.f32 %v3786_v13, %v3709_v28  ;;  %15005 = vst [vmem:[#allocation16_spill] sm:$0xff] %v11944_v49  ;;  %v11954_v13 = vpop.f32.mrf.mxu0 }
 0x5c6   : > { %v3396_v4 = vpop.f32.mrf.mxu3  ;;  %15010 = vst [vmem:[#allocation46_spill] sm:$0xff] %v11954_v13 }
 0x5c7   : > { %15004 = vst [vmem:[#allocation23_spill] sm:$0xff] %v11942_v53  ;;  %v11947_v25 = vadd.f32 %v3396_v4, %v11679_v55  ;;  %v11959_v55 = vpop.f32.mrf.mxu1 }
 0x5c8   : > { %15012 = vst [vmem:[#allocation49_spill] sm:$0xff] %v11959_v55 }
 0x5c9   : > { %15006 = vst [vmem:[#allocation43_spill] sm:$0xff] %v11947_v25 }
 0x5cb   : > { %8980 = vmatmul.msk.bf16.gmra.mxu3 %vm2612_vm6, %v15007_v37  ;;  %v15014_v37 = vld [vmem:[#allocation44_spill] sm:$0xff] }
 0x5cc   : > { %v3791_v36 = vpop.f32.mrf.mxu2 }
 0x5ce   : > { %v3399_v31 = vpop.f32.mrf.mxu3 }
 0x5cf   : > { %v3446_v63 = vadd.f32 %v3399_v31, %v15008_v30  ;;  %v3669_v30 = vpop.f32.mrf.mxu1 }
 0x5d1   : > { %v3584_v9 = vadd.f32 %v3537_v38, %v3446_v63  ;;  %v3542_v38 = vpop.f32.mrf.mxu0 }
 0x5d3   : > { %v3711_v52 = vadd.f32 %v3664_v8, %v3584_v9 }
 0x5d4   : > { %v11961_v4 = vpop.f32.mrf.mxu2 }
 0x5d5   : > { %v11952_v56 = vadd.f32 %v3791_v36, %v3711_v52  ;;  %15013 = vst [vmem:[#allocation12_spill] sm:$0xff] %v11961_v4 }
 0x5d6   : > { %v3401_v28 = vpop.f32.mrf.mxu3 }
 0x5d7   : > { %15009 = vst [vmem:[#allocation45_spill] sm:$0xff] %v11952_v56  ;;  %v11957_v49 = vadd.f32 %v3401_v28, %v11695_v29  ;;  %v15017_v28 = vld [vmem:[#allocation47_spill] sm:$0xff] }
 0x5d9   : > { %15011 = vst [vmem:[#allocation48_spill] sm:$0xff] %v11957_v49 }
 0x5db   : > { %8981 = vmatmul.msk.bf16.gmra.mxu3 %vm2612_vm6, %v15014_v37 }
 0x5dc   : > { %v3796_v36 = vpop.f32.mrf.mxu2 }
 0x5de   : > { %v3404_v53 = vpop.f32.mrf.mxu3 }
 0x5df   : > { %v3448_v31 = vadd.f32 %v3404_v53, %v11700_v0  ;;  %v15020_v53 = vld [vmem:[#allocation50_spill] sm:$0xff] }
 0x5e1   : > { %v3586_v8 = vadd.f32 %v3542_v38, %v3448_v31  ;;  %v11981_v31 = vpop.permute.xlu1 %4096 }
 0x5e3   : > { %v3713_v63 = vadd.f32 %v3669_v30, %v3586_v8  ;;  %v11986_v8 = vpop.permute.xlu0 %4100 }
 0x5e5   : > { %v11966_v9 = vadd.f32 %v3796_v36, %v3713_v63 }
 0x5e6   : > { %v3406_v52 = vpop.f32.mrf.mxu3 }
 0x5e7   : > { %15015 = vst [vmem:[#allocation29_spill] sm:$0xff] %v11966_v9  ;;  %v11969_v29 = vadd.f32 %v3406_v52, %v11713_v24 }
 0x5e9   : > { %15016 = vst [vmem:[#allocation10_spill] sm:$0xff] %v11969_v29  ;;  %v11988_v30 = vpop.permute.xlu1 %4102  ;;  %v15027_v29 = vld [vmem:[#allocation17_spill] sm:$0xff] }
 0x5eb   : > { %8982 = vmatmul.msk.bf16.gmra.mxu3 %vm2612_vm6, %v15017_v28 }
 0x5ee   : > { %v3409_v4 = vpop.f32.mrf.mxu3 }
 0x5ef   : > { %v11974_v37 = vadd.f32 %v3409_v4, %v11718_v27  ;;  %v15023_v4 = vld [vmem:[#allocation51_spill] sm:$0xff] }
 0x5f1   : > { %15018 = vst [vmem:[#allocation27_spill] sm:$0xff] %v11974_v37 }
 0x5f6   : > { %v3411_v55 = vpop.f32.mrf.mxu3 }
 0x5f7   : > { %v11977_v0 = vadd.f32 %v3411_v55, %v11731_v44  ;;  %v11995_v44 = vpop.permute.xlu0 %4094  ;;  %v11997_v55 = vpop.permute.xlu1 %4088 }
 0x5f9   : > { %15019 = vst [vmem:[#allocation7_spill] sm:$0xff] %v11977_v0 }
 0x5fb   : > { %8983 = vmatmul.msk.bf16.gmra.mxu3 %vm2612_vm6, %v15020_v53 }
 0x5fe   : > { %v3414_v38 = vpop.f32.mrf.mxu3 }
 0x5ff   : > { %v11984_v24 = vadd.f32 %v3414_v38, %v11734_v54  ;;  %v12002_v54 = vpop.permute.xlu2 %4092  ;;  %v4085_v38 = vpop.permute.xlu0 %4084 }
 0x601   : > { %15021 = vst [vmem:[#allocation6_spill] sm:$0xff] %v11984_v24 }
 0x606   : > { %v3416_v63 = vpop.f32.mrf.mxu3 }
 0x607   : > { %v11991_v27 = vadd.f32 %v3416_v63, %v11747_v5  ;;  %v4087_v5 = vpop.permute.xlu1 %4086  ;;  %v15026_v63 = vld [vmem:[#allocation35_spill] sm:$0xff] }
 0x609   : > { %15022 = vst [vmem:[#allocation42_spill] sm:$0xff] %v11991_v27 }
 0x60b   : > { %8984 = vmatmul.msk.bf16.gmra.mxu3 %vm2612_vm6, %v15023_v4  ;;  %v12009_v4 = vpop.permute.xlu2 %4098 }
 0x60e   : > { %v3419_v36 = vpop.f32.mrf.mxu3 }
 0x60f   : > { %v12000_v52 = vadd.f32 %v3419_v36, %v11752_v10  ;;  %v12015_v10 = vld [vmem:[%s14627_s2 + $0x3] ss:$0 sm:$0xff]  ;;  %v4083_v36 = vpop.permute.xlu0 %4082 }
 0x611   : > { %15024 = vst [vmem:[#allocation30_spill] sm:$0xff] %v12000_v52  ;;  %v4077_v52 = vpop.permute.xlu1 %4076 }
 0x613   : > { %v12019_v0 = vpop.permute.xlu2 %4090 }
 0x616   : > { %v3421_v28 = vpop.f32.mrf.mxu3 }
 0x617   : > { %v12005_v53 = vadd.f32 %v3421_v28, %v11765_v35 }
 0x619   : > { %15025 = vst [vmem:[#allocation8_spill] sm:$0xff] %v12005_v53 }
 0x61b   : > { %8985 = vmatmul.msk.bf16.gmra.mxu3 %vm2612_vm6, %v15026_v63 }
 0x61e   : > { %v3863_v27 = vpop.f32.mrf.mxu3 }
 0x61f   : > { %v3943_v24 = vadd.f32 %v3863_v27, %v11769_v57  ;;  %v4073_v57 = vpop.permute.xlu0 %4072  ;;  %v4075_v27 = vpop.permute.xlu1 %4074 }
 0x621   : > { %v3976_v35 = vadd.f32 %v12015_v10, %v3943_v24 }
 0x623   : > { %v4008_v63 = vmax.f32 %v3976_v35, 0.0 }
 0x625   : > { %v12024_v56 = vadd.f32 %v4073_v57, %v4008_v63  ;;  %v15028_v63 = vld [vmem:[#allocation34_spill] sm:$0xff] }
 0x626   : > { %v3865_v28 = vpop.f32.mrf.mxu3 }
 0x627   : > { %v3944_v53 = vadd.f32 %v3865_v28, %v11779_v15  ;;  %v4081_v28 = vpop.permute.xlu2 %4080  ;;  %v15029_v15 = vld [vmem:[#allocation26_spill] sm:$0xff] }
 0x629   : > { %v3977_v37 = vadd.f32 %v12015_v10, %v3944_v53 }
 0x62b   : > { %v4009_v9 = vmax.f32 %v3977_v37, 0.0  ;;  %8986 = vmatmul.msk.bf16.gmra.mxu3 %vm2612_vm6, %v15027_v29 }
 0x62d   : > { %v12026_v13 = vadd.f32 %v4075_v27, %v4009_v9 }
 0x62e   : > { %v3868_v49 = vpop.f32.mrf.mxu3 }
 0x62f   : > { %v3945_v24 = vadd.f32 %v3868_v49, %v11783_v22  ;;  %v4079_v9 = vpop.permute.xlu2 %4078 }
 0x631   : > { %v3978_v35 = vadd.f32 %v12015_v10, %v3945_v24 }
 0x633   : > { %v4010_v43 = vmax.f32 %v3978_v35, 0.0 }
 0x635   : > { %v12036_v57 = vadd.f32 %v4077_v52, %v4010_v43 }
 0x636   : > { %v3870_v53 = vpop.f32.mrf.mxu3 }
 0x637   : > { %v3946_v37 = vadd.f32 %v3870_v53, %v11793_v47 }
 0x639   : > { %v3979_v29 = vadd.f32 %v12015_v10, %v3946_v37 }
 0x63b   : > { %v4011_v25 = vmax.f32 %v3979_v29, 0.0  ;;  %8987 = vmatmul.msk.bf16.gmra.mxu3 %vm2612_vm6, %v15028_v63 }
 0x63d   : > { %v12038_v22 = vadd.f32 %v4079_v9, %v4011_v25 }
 0x63e   : > { %v3873_v49 = vpop.f32.mrf.mxu3 }
 0x63f   : > { %v3947_v27 = vadd.f32 %v3873_v49, %v11797_v61  ;;  %v4233_v24 = vpack.c.bf16 %v12038_v22, %v12036_v57  ;;  %v15046_v57 = vpack.c.bf16 %v12026_v13, %v12024_v56  ;;  %v9003_v13 = vld [vmem:[%s14628_s3 + $0x10] sm:$0xf] }
 0x641   : > { %v3980_v47 = vadd.f32 %v12015_v10, %v3947_v27 }
 0x643   : > { %v4012_v37 = vmax.f32 %v3980_v47, 0.0 }
 0x645   : > { %v12048_v43 = vadd.f32 %v4081_v28, %v4012_v37 }
 0x646   : > { %v3875_v35 = vpop.f32.mrf.mxu3 }
 0x647   : > { %v3948_v53 = vadd.f32 %v3875_v35, %v11809_v6 }
 0x649   : > { %v3981_v29 = vadd.f32 %v12015_v10, %v3948_v53 }
 0x64b   : > { %v4013_v63 = vmax.f32 %v3981_v29, 0.0  ;;  %8988 = vmatmul.msk.bf16.gmra.mxu3 %vm2612_vm6, %v15029_v15 }
 0x64d   : > { %v12050_v25 = vadd.f32 %v4083_v36, %v4013_v63  ;;  %v3571_v36 = vadd.f32 %v11803_v50, %v11844_v62  ;;  %v3572_v50 = vadd.f32 %v11815_v16, %v11859_v23 }
 0x64e   : > { %v3878_v61 = vpop.f32.mrf.mxu3 }
 0x64f   : > { %v3949_v52 = vadd.f32 %v3878_v61, %v11817_v19  ;;  %v4234_v9 = vpack.c.bf16 %v12050_v25, %v12048_v43  ;;  %v3698_v29 = vadd.f32 %v11812_v41, %v3571_v36  ;;  %v3573_v41 = vadd.f32 %v11834_v60, %v11868_v39  ;;  %v9623_v43 = vld [vmem:[%s14628_s3 + $0x4] sm:$0xf0] }
 0x650   : > { %v3574_v39 = vadd.f32 %v11846_v18, %v11882_v32  ;;  %v3575_v36 = vadd.f32 %v11861_v3, %v11889_v14  ;;  %v15030_v14 = vld [vmem:[#allocation20_spill] sm:$0xff] }
 0x651   : > { %v3982_v49 = vadd.f32 %v12015_v10, %v3949_v52  ;;  %v3825_v61 = vadd.f32 %v11839_v11, %v3698_v29 }
 0x653   : > { %v4014_v47 = vmax.f32 %v3982_v49, 0.0 }
 0x655   : > { %v12062_v15 = vadd.f32 %v4085_v38, %v4014_v47 }
 0x656   : > { %v3880_v6 = vpop.f32.mrf.mxu3 }
 0x657   : > { %v3950_v27 = vadd.f32 %v3880_v6, %v11832_v21 }
 0x659   : > { %v3983_v35 = vadd.f32 %v12015_v10, %v3950_v27 }
 0x65b   : > { %v4015_v53 = vmax.f32 %v3983_v35, 0.0  ;;  %8989 = vmatmul.msk.bf16.gmra.mxu3 %vm2612_vm6, %v11385_v40 }
 0x65d   : > { %v12064_v19 = vadd.f32 %v4087_v5, %v4015_v53 }
 0x65e   : > { %v3883_v28 = vpop.f32.mrf.mxu3 }
 0x65f   : > { %v3951_v37 = vadd.f32 %v3883_v28, %v11841_v58  ;;  %v4235_v21 = vpack.c.bf16 %v12064_v19, %v12062_v15  ;;  %v3699_v58 = vadd.f32 %v11820_v12, %v3572_v50  ;;  %v15044_v19 = vld [vmem:[#allocation43_spill] sm:$0xff] }
 0x661   : > { %v3984_v63 = vadd.f32 %v12015_v10, %v3951_v37  ;;  %v3826_v23 = vadd.f32 %v11856_v48, %v3699_v58  ;;  %v15033_v58 = vld [vmem:[#allocation40_spill] sm:$0xff] }
 0x663   : > { %v4016_v38 = vmax.f32 %v3984_v63, 0.0  ;;  %v3702_v63 = vadd.f32 %v11863_v7, %v3575_v36  ;;  %v15032_v7 = vld [vmem:[#allocation36_spill] sm:$0xff] }
 0x665   : > { %v12081_v49 = vadd.f32 %v11997_v55, %v4016_v38  ;;  %v15031_v38 = vld [vmem:[#allocation24_spill] sm:$0xff] }
 0x666   : > { %v3885_v40 = vpop.f32.mrf.mxu3 }
 0x667   : > { %v3952_v62 = vadd.f32 %v3885_v40, %v3825_v61  ;;  %v12108_v40 = vpop.permute.xlu1 %4126 }
 0x669   : > { %v3985_v5 = vadd.f32 %v12015_v10, %v3952_v62 }
 0x66b   : > { %v4017_v52 = vmax.f32 %v3985_v5, 0.0  ;;  %8990 = vmatmul.msk.bf16.gmra.mxu3 %vm2612_vm6, %v11430_v26  ;;  %v3700_v26 = vadd.f32 %v11837_v17, %v3573_v41  ;;  %v3701_v17 = vadd.f32 %v11850_v51, %v3574_v39  ;;  %v3829_v51 = vadd.f32 %v11884_v20, %v3702_v63  ;;  %v15034_v41 = vld [vmem:[#allocation9_spill] sm:$0xff]  ;;  %v15036_v39 = vld [vmem:[#allocation19_spill] sm:$0xff] }
 0x66d   : > { %v12084_v11 = vadd.f32 %v12019_v0, %v4017_v52  ;;  %v3827_v47 = vadd.f32 %v11865_v34, %v3700_v26  ;;  %v12094_v0 = vpop.permute.xlu2 %4130  ;;  %v3828_v32 = vadd.f32 %v11877_v33, %v3701_v17  ;;  %v15035_v26 = vld [vmem:[#allocation25_spill] sm:$0xff]  ;;  %v12130_v17 = vpop.permute.xlu0 %4124 }
 0x66e   : > { %v3888_v16 = vpop.f32.mrf.mxu3 }
 0x66f   : > { %v4236_v6 = vpack.c.bf16 %v12084_v11, %v12081_v49  ;;  %v3953_v27 = vadd.f32 %v3888_v16, %v3826_v23  ;;  %v3577_v16 = vadd.f32 %v15034_v41, %v15033_v58  ;;  %v15041_v58 = vld [vmem:[#allocation32_spill] sm:$0xff]  ;;  %v15043_v49 = vld [vmem:[#allocation14_spill] sm:$0xff] }
 0x671   : > { %v3986_v12 = vadd.f32 %v12015_v10, %v3953_v27 }
 0x673   : > { %v4018_v35 = vmax.f32 %v3986_v12, 0.0 }
 0x675   : > { %v4178_v34 = vadd.f32 %v12002_v54, %v4018_v35  ;;  %v12106_v61 = vpop.permute.xlu2 %4132  ;;  %v3576_v54 = vadd.f32 %v15030_v14, %v11900_v1  ;;  %v12124_v1 = vpop.permute.xlu1 %4128 }
 0x676   : > { %v3890_v60 = vpop.f32.mrf.mxu3 }
 0x677   : > { %v3954_v55 = vadd.f32 %v3890_v60, %v3827_v47  ;;  %v3703_v5 = vadd.f32 %v15032_v7, %v3576_v54  ;;  %v15039_v54 = vld [vmem:[#allocation37_spill] sm:$0xff] }
 0x679   : > { %v3987_v48 = vadd.f32 %v12015_v10, %v3954_v55  ;;  %v3830_v12 = vadd.f32 %v15035_v26, %v3703_v5  ;;  %v3704_v55 = vadd.f32 %v15036_v39, %v3577_v16 }
 0x67b   : > { %v4019_v53 = vmax.f32 %v3987_v48, 0.0  ;;  %8991 = vmatmul.msk.bf16.gmra.mxu3 %vm2612_vm6, %v11477_v42  ;;  %v15037_v48 = vld [vmem:[#allocation38_spill] sm:$0xff] }
 0x67d   : > { %v4179_v28 = vadd.f32 %v11995_v44, %v4019_v53  ;;  %v12118_v52 = vpop.permute.xlu2 %4120  ;;  %v3831_v53 = vadd.f32 %v15037_v48, %v3704_v55 }
 0x67e   : > { %v3893_v18 = vpop.f32.mrf.mxu3 }
 0x67f   : > { %v4237_v37 = vpack.c.bf16 %v4179_v28, %v4178_v34  ;;  %v3955_v29 = vadd.f32 %v3893_v18, %v3828_v32 }
 0x681   : > { %v3988_v42 = vadd.f32 %v12015_v10, %v3955_v29  ;;  %v15038_v29 = vld [vmem:[#allocation18_spill] sm:$0xff] }
 0x682   : > { %v3579_v63 = vadd.f32 %v15038_v29, %v11919_v46 }
 0x683   : > { %v4020_v50 = vmax.f32 %v3988_v42, 0.0 }
 0x685   : > { %v4180_v20 = vadd.f32 %v11981_v31, %v4020_v50  ;;  %v12132_v31 = vpop.permute.xlu2 %4118 }
 0x686   : > { %v3895_v3 = vpop.f32.mrf.mxu3 }
 0x687   : > { %v3956_v44 = vadd.f32 %v3895_v3, %v3829_v51  ;;  %v12141_v3 = vpop.permute.xlu0 %4134 }
 0x689   : > { %v3989_v33 = vadd.f32 %v12015_v10, %v3956_v44 }
 0x68b   : > { %v4021_v62 = vmax.f32 %v3989_v33, 0.0  ;;  %8992 = vmatmul.msk.bf16.gmra.mxu3 %vm2612_vm6, %v15031_v38  ;;  %v15040_v33 = vld [vmem:[#allocation28_spill] sm:$0xff] }
 0x68d   : > { %v4181_v23 = vadd.f32 %v12009_v4, %v4021_v62  ;;  %v12134_v4 = vpop.permute.xlu1 %4116  ;;  %v3706_v62 = vadd.f32 %v15040_v33, %v3579_v63  ;;  %v4109_v38 = vpop.permute.xlu2 %4108 }
 0x68e   : > { %v3898_v27 = vpop.f32.mrf.mxu3 }
 0x68f   : > { %v4238_v47 = vpack.c.bf16 %v4181_v23, %v4180_v20  ;;  %v3957_v60 = vadd.f32 %v3898_v27, %v3830_v12  ;;  %v3833_v46 = vadd.f32 %v15041_v58, %v3706_v62  ;;  %v12147_v16 = vpop.permute.xlu0 %4122  ;;  %v15042_v12 = vld [vmem:[#allocation39_spill] sm:$0xff] }
 0x691   : > { %v3990_v35 = vadd.f32 %v12015_v10, %v3957_v60  ;;  %v3581_v60 = vadd.f32 %v15042_v12, %v11933_v2 }
 0x693   : > { %v4022_v28 = vmax.f32 %v3990_v35, 0.0  ;;  %v3708_v2 = vadd.f32 %v11926_v45, %v3581_v60  ;;  %v8995_v45 = vld [vmem:[%s14628_s3] sm:$0xf]  ;;  %v3544_v60 = vpop.f32.mrf.mxu0 }
 0x694   : > { %v8996_v15 = vor.u32 %v9623_v43, %v8995_v45  ;;  %v9627_v45 = vld [vmem:[%s14628_s3 + $0x24] sm:$0xf0] }
 0x695   : > { %v4182_v42 = vadd.f32 %v11986_v8, %v4022_v28  ;;  %v4115_v7 = vpop.permute.xlu1 %4114  ;;  %v4107_v27 = vpop.permute.xlu2 %4106  ;;  %v3835_v11 = vadd.f32 %v15043_v49, %v3708_v2  ;;  %v15054_v49 = vld [vmem:[#allocation12_spill] sm:$0xff] }
 0x696   : > { %v3900_v36 = vpop.f32.mrf.mxu3  ;;  %v3671_v2 = vpop.f32.mrf.mxu1 }
 0x697   : > { %v3958_v34 = vadd.f32 %v3900_v36, %v3831_v53  ;;  %v4113_v48 = vpop.permute.xlu0 %4112 }
 0x699   : > { %v3991_v18 = vadd.f32 %v12015_v10, %v3958_v34 }
 0x69b   : > { %v4023_v32 = vmax.f32 %v3991_v18, 0.0  ;;  %v3547_v43 = vpop.f32.mrf.mxu0 }
 0x69d   : > { %v4183_v51 = vadd.f32 %v11988_v30, %v4023_v32  ;;  %v4105_v26 = vpop.permute.xlu1 %4104  ;;  %v15047_v32 = vld [vmem:[#allocation23_spill] sm:$0xff] }
 0x69e   : > { %v3903_v14 = vpop.f32.mrf.mxu3 }
 0x69f   : > { %v3959_v44 = vadd.f32 %v3903_v14, %v15039_v54  ;;  %v4239_v50 = vpack.c.bf16 %v4183_v51, %v4182_v42  ;;  %v15048_v42 = vld [vmem:[#allocation41_spill] sm:$0xff]  ;;  %v15049_v54 = vld [vmem:[#allocation16_spill] sm:$0xff] }
 0x6a1   : > { %4408 = vmatpush.bf16.msrb.mxu0 %v4239_v50  ;;  %v3992_v5 = vadd.f32 %v12015_v10, %v3959_v44 }
 0x6a3   : > { %v4024_v30 = vmax.f32 %v3992_v5, 0.0 }
 0x6a5   : > { %4409 = vmatpush.bf16.msrb.mxu0 %v4238_v47  ;;  %v12152_v39 = vadd.f32 %v4105_v26, %v4024_v30 }
 0x6a6   : > { %v3905_v41 = vpop.f32.mrf.mxu3 }
 0x6a7   : > { %v3960_v8 = vadd.f32 %v3905_v41, %v3833_v46  ;;  %v15050_v46 = vld [vmem:[#allocation48_spill] sm:$0xff]  ;;  %v15051_v41 = vld [vmem:[#allocation46_spill] sm:$0xff] }
 0x6a9   : > { %v3993_v20 = vadd.f32 %v12015_v10, %v3960_v8  ;;  %4410 = vmatpush.bf16.msrb.mxu0 %v4237_v37  ;;  %v3585_v8 = vadd.f32 %v15051_v41, %v15050_v46 }
 0x6ab   : > { %v4025_v23 = vmax.f32 %v3993_v20, 0.0 }
 0x6ad   : > { %4411 = vmatpush.bf16.msrb.mxu0 %v4236_v6  ;;  %v12157_v47 = vadd.f32 %v4107_v27, %v4025_v23  ;;  %v15052_v27 = vld [vmem:[#allocation45_spill] sm:$0xff] }
 0x6ae   : > { %v3908_v55 = vpop.f32.mrf.mxu3 }
 0x6af   : > { %v3961_v35 = vadd.f32 %v3908_v55, %v11930_v59  ;;  %v4240_v37 = vpack.c.bf16 %v12157_v47, %v12152_v39  ;;  %v15053_v55 = vld [vmem:[#allocation49_spill] sm:$0xff]  ;;  %v9641_v39 = vld [vmem:[%s14628_s3 + $0x94] sm:$0xf0] }
 0x6b1   : > { %4412 = vmatpush.bf16.msrb.mxu0 %v4235_v21  ;;  %v3994_v53 = vadd.f32 %v12015_v10, %v3961_v35  ;;  %v15045_v21 = vld [vmem:[#allocation21_spill] sm:$0xff]  ;;  %v3712_v35 = vadd.f32 %v15053_v55, %v3585_v8 }
 0x6b2   : > { %v3583_v28 = vadd.f32 %v15045_v21, %v15044_v19 }
 0x6b3   : > { %v4026_v36 = vmax.f32 %v3994_v53, 0.0 }
 0x6b4   : > { %v3710_v51 = vadd.f32 %v15048_v42, %v3583_v28 }
 0x6b5   : > { %4413 = vmatpush.bf16.msrb.mxu0 %v4234_v9  ;;  %v4111_v9 = vpop.permute.xlu0 %4110  ;;  %v12183_v18 = vadd.f32 %v4109_v38, %v4026_v36  ;;  %v9625_v38 = vld [vmem:[%s14628_s3 + $0x14] sm:$0xf0] }
 0x6b6   : > { %v3910_v6 = vpop.f32.mrf.mxu3  ;;  %v3837_v44 = vadd.f32 %v15049_v54, %v3710_v51  ;;  %v9004_v58 = vor.u32 %v9625_v38, %v9003_v13  ;;  %v3549_v54 = vpop.f32.mrf.mxu0 }
 0x6b7   : > { %v3962_v59 = vadd.f32 %v3910_v6, %v3835_v11  ;;  %v3839_v11 = vadd.f32 %v15054_v49, %v3712_v35 }
 0x6b9   : > { %v3995_v34 = vadd.f32 %v12015_v10, %v3962_v59  ;;  %4414 = vmatpush.bf16.msrb.mxu0 %v4233_v24  ;;  %v3798_v59 = vpop.f32.mrf.mxu2 }
 0x6bb   : > { %v4027_v25 = vmax.f32 %v3995_v34, 0.0  ;;  %v9011_v34 = vld [vmem:[%s14628_s3 + $0x20] sm:$0xf] }
 0x6bd   : > { %4415 = vmatpush.bf16.msrb.mxu0 %v15046_v57  ;;  %v12188_v22 = vadd.f32 %v4111_v9, %v4027_v25  ;;  %v9012_v9 = vor.u32 %v9627_v45, %v9011_v34  ;;  %v3674_v57 = vpop.f32.mrf.mxu1 }
 0x6be   : > { %v3913_v24 = vpop.f32.mrf.mxu3  ;;  %v3552_v35 = vpop.f32.mrf.mxu0 }
 0x6bf   : > { %v3963_v29 = vadd.f32 %v3913_v24, %v15047_v32  ;;  %v4241_v63 = vpack.c.bf16 %v12188_v22, %v12183_v18  ;;  %v15056_v32 = vld [vmem:[#allocation29_spill] sm:$0xff] }
 0x6c0   : > { %4416 = vmatmul.bf16.vlgmr.msrb.gmra.mxu0 %v8996_v15  ;;  %v15055_v15 = vld [vmem:[#allocation10_spill] sm:$0xff] }
 0x6c1   : > { %v3996_v14 = vadd.f32 %v12015_v10, %v3963_v29  ;;  %v3587_v19 = vadd.f32 %v3544_v60, %v15055_v15  ;;  %v9027_v15 = vld [vmem:[%s14628_s3 + $0x40] sm:$0xf] }
 0x6c3   : > { %v4028_v62 = vmax.f32 %v3996_v14, 0.0  ;;  %v3714_v51 = vadd.f32 %v3671_v2, %v3587_v19  ;;  %v3801_v14 = vpop.f32.mrf.mxu2  ;;  %v9631_v19 = vld [vmem:[%s14628_s3 + $0x44] sm:$0xf0] }
 0x6c5   : > { %v12205_v30 = vadd.f32 %v4113_v48, %v4028_v62 }
 0x6c6   : > { %v3915_v50 = vpop.f32.mrf.mxu3 }
 0x6c7   : > { %v3964_v33 = vadd.f32 %v3915_v50, %v3837_v44  ;;  %v3841_v50 = vadd.f32 %v3798_v59, %v3714_v51  ;;  %v15060_v51 = vld [vmem:[#allocation42_spill] sm:$0xff] }
 0x6c9   : > { %v3997_v56 = vadd.f32 %v12015_v10, %v3964_v33 }
 0x6cb   : > { %v4029_v5 = vmax.f32 %v3997_v56, 0.0  ;;  %v3803_v8 = vpop.f32.mrf.mxu2 }
 0x6cd   : > { %v12207_v20 = vadd.f32 %v4115_v7, %v4029_v5  ;;  %v9019_v5 = vld [vmem:[%s14628_s3 + $0x30] sm:$0xf] }
 0x6ce   : > { %v3918_v23 = vpop.f32.mrf.mxu3 }
 0x6cf   : > { %v3965_v26 = vadd.f32 %v3918_v23, %v15052_v27  ;;  %v4242_v12 = vpack.c.bf16 %v12207_v20, %v12205_v30  ;;  %v15058_v27 = vld [vmem:[#allocation7_spill] sm:$0xff]  ;;  %v9639_v30 = vld [vmem:[%s14628_s3 + $0x84] sm:$0xf0] }
 0x6d0   : > { %4421 = vmatmul.bf16.gmra.mxu0 %v9004_v58  ;;  %v9629_v58 = vld [vmem:[%s14628_s3 + $0x34] sm:$0xf0] }
 0x6d1   : > { %v3998_v53 = vadd.f32 %v12015_v10, %v3965_v26  ;;  %v9020_v23 = vor.u32 %v9629_v58, %v9019_v5  ;;  %v3589_v26 = vadd.f32 %v3549_v54, %v15058_v27 }
 0x6d3   : > { %v4030_v7 = vmax.f32 %v3998_v53, 0.0 }
 0x6d5   : > { %v12224_v21 = vadd.f32 %v12134_v4, %v4030_v7  ;;  %v15057_v4 = vld [vmem:[#allocation27_spill] sm:$0xff] }
 0x6d6   : > { %v3920_v6 = vpop.f32.mrf.mxu3  ;;  %v3588_v62 = vadd.f32 %v3547_v43, %v15057_v4 }
 0x6d7   : > { %v3966_v48 = vadd.f32 %v3920_v6, %v3839_v11 }
 0x6d8   : > { %v3715_v41 = vadd.f32 %v3674_v57, %v3588_v62 }
 0x6d9   : > { %v3999_v36 = vadd.f32 %v12015_v10, %v3966_v48 }
 0x6da   : > { %v3842_v53 = vadd.f32 %v3801_v14, %v3715_v41  ;;  %v15061_v41 = vld [vmem:[#allocation30_spill] sm:$0xff] }
 0x6db   : > { %v4031_v25 = vmax.f32 %v3999_v36, 0.0  ;;  %v3806_v36 = vpop.f32.mrf.mxu2 }
 0x6dd   : > { %v12227_v28 = vadd.f32 %v12132_v31, %v4031_v25  ;;  %v3676_v31 = vpop.f32.mrf.mxu1 }
 0x6de   : > { %v3923_v24 = vpop.f32.mrf.mxu3  ;;  %v3716_v6 = vadd.f32 %v3676_v31, %v3589_v26  ;;  %v9035_v26 = vld [vmem:[%s14628_s3 + $0x50] sm:$0xf] }
 0x6df   : > { %v3967_v29 = vadd.f32 %v3923_v24, %v15056_v32  ;;  %v4243_v42 = vpack.c.bf16 %v12227_v28, %v12224_v21  ;;  %v9059_v21 = vld [vmem:[%s14628_s3 + $0x80] sm:$0xf]  ;;  %v9005_v28 = vld [vmem:[%s14628_s3 + $0x18] sm:$0xf0] }
 0x6e0   : > { %4426 = vmatmul.bf16.gmra.mxu0 %v9012_v9  ;;  %v3843_v7 = vadd.f32 %v3803_v8, %v3716_v6 }
 0x6e1   : > { %v4000_v44 = vadd.f32 %v12015_v10, %v3967_v29  ;;  %v9028_v29 = vor.u32 %v9631_v19, %v9027_v15 }
 0x6e3   : > { %v4032_v13 = vmax.f32 %v4000_v44, 0.0  ;;  %v3808_v62 = vpop.f32.mrf.mxu2 }
 0x6e5   : > { %v12243_v60 = vadd.f32 %v12118_v52, %v4032_v13  ;;  %v3679_v48 = vpop.f32.mrf.mxu1  ;;  %v15059_v52 = vld [vmem:[#allocation6_spill] sm:$0xff] }
 0x6e6   : > { %v3925_v33 = vpop.f32.mrf.mxu3  ;;  %v3590_v45 = vadd.f32 %v3552_v35, %v15059_v52  ;;  %v9633_v35 = vld [vmem:[%s14628_s3 + $0x54] sm:$0xf0] }
 0x6e7   : > { %v3968_v56 = vadd.f32 %v3925_v33, %v3841_v50  ;;  %v9036_v6 = vor.u32 %v9633_v35, %v9035_v26  ;;  %v9630_v35 = vld [vmem:[%s14628_s3 + $0x44] sm:$0xf] }
 0x6e8   : > { %v3717_v24 = vadd.f32 %v3679_v48, %v3590_v45  ;;  %v15062_v48 = vld [vmem:[#allocation8_spill] sm:$0xff] }
 0x6e9   : > { %v4001_v38 = vadd.f32 %v12015_v10, %v3968_v56 }
 0x6ea   : > { %v3844_v33 = vadd.f32 %v3806_v36, %v3717_v24 }
 0x6eb   : > { %v4033_v46 = vmax.f32 %v4001_v38, 0.0  ;;  %v3811_v27 = vpop.f32.mrf.mxu2 }
 0x6ed   : > { %v12246_v55 = vadd.f32 %v12147_v16, %v4033_v46  ;;  %v3554_v16 = vpop.f32.mrf.mxu0  ;;  %v3681_v32 = vpop.f32.mrf.mxu1 }
 0x6ee   : > { %v3928_v2 = vpop.f32.mrf.mxu3  ;;  %v3591_v14 = vadd.f32 %v3554_v16, %v15060_v51 }
 0x6ef   : > { %v4244_v49 = vpack.c.bf16 %v12246_v55, %v12243_v60  ;;  %v3969_v11 = vadd.f32 %v3928_v2, %v3842_v53 }
 0x6f0   : > { %4431 = vmatmul.bf16.gmra.mxu0 %v9020_v23  ;;  %v3718_v31 = vadd.f32 %v3681_v32, %v3591_v14 }
 0x6f1   : > { %v4002_v59 = vadd.f32 %v12015_v10, %v3969_v11 }
 0x6f2   : > { %v3845_v58 = vadd.f32 %v3808_v62, %v3718_v31  ;;  %v9643_v31 = vld [vmem:[%s14628_s3 + $0xa4] sm:$0xf0] }
 0x6f3   : > { %v4034_v25 = vmax.f32 %v4002_v59, 0.0 }
 0x6f5   : > { %v4194_v54 = vadd.f32 %v12130_v17, %v4034_v25  ;;  %v3557_v13 = vpop.f32.mrf.mxu0  ;;  %v3684_v38 = vpop.f32.mrf.mxu1 }
 0x6f6   : > { %v3930_v34 = vpop.f32.mrf.mxu3  ;;  %v3592_v8 = vadd.f32 %v3557_v13, %v15061_v41  ;;  %v9021_v41 = vld [vmem:[%s14628_s3 + $0x38] sm:$0xf0] }
 0x6f7   : > { %v3970_v43 = vadd.f32 %v3930_v34, %v3843_v7 }
 0x6f8   : > { %v3719_v2 = vadd.f32 %v3684_v38, %v3592_v8  ;;  %v9083_v8 = vld [vmem:[%s14628_s3 + $0xb0] sm:$0xf] }
 0x6f9   : > { %v4003_v9 = vadd.f32 %v12015_v10, %v3970_v43 }
 0x6fa   : > { %v3846_v45 = vadd.f32 %v3811_v27, %v3719_v2  ;;  %v9029_v2 = vld [vmem:[%s14628_s3 + $0x48] sm:$0xf0] }
 0x6fb   : > { %v4035_v57 = vmax.f32 %v4003_v9, 0.0  ;;  %v3813_v9 = vpop.f32.mrf.mxu2 }
 0x6fd   : > { %v4195_v44 = vadd.f32 %v12108_v40, %v4035_v57  ;;  %v3559_v11 = vpop.f32.mrf.mxu0  ;;  %v3686_v34 = vpop.f32.mrf.mxu1 }
 0x6fe   : > { %v3933_v50 = vpop.f32.mrf.mxu3  ;;  %v3593_v59 = vadd.f32 %v3559_v11, %v15062_v48  ;;  %v9647_v11 = vld [vmem:[%s14628_s3 + $0xc4] sm:$0xf0] }
 0x6ff   : > { %v4245_v4 = vpack.c.bf16 %v4195_v44, %v4194_v54  ;;  %v3971_v56 = vadd.f32 %v3933_v50, %v3844_v33  ;;  %v9637_v33 = vld [vmem:[%s14628_s3 + $0x74] sm:$0xf0] }
 0x700   : > { %4436 = vmatmul.bf16.gmra.mxu0 %v9028_v29  ;;  %v3720_v16 = vadd.f32 %v3686_v34, %v3593_v59 }
 0x701   : > { %v4004_v5 = vadd.f32 %v12015_v10, %v3971_v56  ;;  %v9075_v56 = vld [vmem:[%s14628_s3 + $0xa0] sm:$0xf] }
 0x702   : > { %v3847_v15 = vadd.f32 %v3813_v9, %v3720_v16  ;;  %v9076_v38 = vor.u32 %v9643_v31, %v9075_v56  ;;  %v9649_v16 = vld [vmem:[%s14628_s3 + $0xd4] sm:$0xf0] }
 0x703   : > { %v4036_v17 = vmax.f32 %v4004_v5, 0.0 }
 0x705   : > { %v4196_v7 = vadd.f32 %v12124_v1, %v4036_v17  ;;  %v9635_v1 = vld [vmem:[%s14628_s3 + $0x64] sm:$0xf0] }
 0x706   : > { %v3935_v46 = vpop.f32.mrf.mxu3 }
 0x707   : > { %v3972_v23 = vadd.f32 %v3935_v46, %v3845_v58  ;;  %v9628_v46 = vld [vmem:[%s14628_s3 + $0x34] sm:$0xf] }
 0x708   : > { %v9024_v27 = vor.u32 %v9628_v46, %v9021_v41 }
 0x709   : > { %v4005_v40 = vadd.f32 %v12015_v10, %v3972_v23  ;;  %v9645_v23 = vld [vmem:[%s14628_s3 + $0xb4] sm:$0xf0] }
 0x70a   : > { %v9084_v17 = vor.u32 %v9645_v23, %v9083_v8  ;;  %v15064_v8 = vld [vmem:[#allocation5_spill] sm:$0xff] }
 0x70b   : > { %v4037_v53 = vmax.f32 %v4005_v40, 0.0 }
 0x70d   : > { %v4197_v36 = vadd.f32 %v12094_v0, %v4037_v53  ;;  %v9043_v0 = vld [vmem:[%s14628_s3 + $0x60] sm:$0xf] }
 0x70e   : > { %v3938_v52 = vpop.f32.mrf.mxu3  ;;  %v9044_v14 = vor.u32 %v9635_v1, %v9043_v0  ;;  %v9091_v53 = vld [vmem:[%s14628_s3 + $0xc0] sm:$0xf]  ;;  %v9651_v0 = vld [vmem:[%s14628_s3 + $0xe4] sm:$0xf0] }
 0x70f   : > { %v4246_v43 = vpack.c.bf16 %v4197_v36, %v4196_v7  ;;  %v3973_v25 = vadd.f32 %v3938_v52, %v3846_v45  ;;  %v9092_v48 = vor.u32 %v9647_v11, %v9091_v53  ;;  %v9658_v7 = vld [vmem:[%s14626_s1 + $0x9c] sm:$0xff]  ;;  %v9632_v52 = vld [vmem:[%s14628_s3 + $0x54] sm:$0xf] }
 0x710   : > { %4441 = vmatmul.bf16.gmra.mxu0 %v9036_v6  ;;  %v9032_v6 = vor.u32 %v9630_v35, %v9029_v2  ;;  %v9654_v36 = vld [vmem:[%s14626_s1 + $0x7c] sm:$0xff]  ;;  %4821 = vmatpush.bf16.msrb.mxu2 %v9658_v7  ;;  %v15065_v35 = vld [vmem:[#allocation22_spill] sm:$0xff]  ;;  %v9640_v53 = vld [vmem:[%s14628_s3 + $0x94] sm:$0xf] }
 0x711   : > { %v4006_v19 = vadd.f32 %v12015_v10, %v3973_v25  ;;  %4862 = vmatpush.bf16.msra.mxu3 %v9654_v36  ;;  %v9037_v45 = vld [vmem:[%s14628_s3 + $0x58] sm:$0xf0] }
 0x712   : > { %v9040_v25 = vor.u32 %v9632_v52, %v9037_v45  ;;  %v9069_v11 = vld [vmem:[%s14628_s3 + $0x98] sm:$0xf0] }
 0x713   : > { %v4038_v32 = vmax.f32 %v4006_v19, 0.0  ;;  %v9662_v19 = vld [vmem:[%s14626_s1 + $0xbc] sm:$0xff] }
 0x714   : > { %4935 = vmatpush.bf16.msra.mxu0 %v9662_v19 }
 0x715   : > { %v4198_v54 = vadd.f32 %v12106_v61, %v4038_v32  ;;  %v9622_v61 = vld [vmem:[%s14628_s3 + $0x4] sm:$0xf]  ;;  %v9045_v32 = vld [vmem:[%s14628_s3 + $0x68] sm:$0xf0] }
 0x716   : > { %v3940_v57 = vpop.f32.mrf.mxu3 }
 0x717   : > { %v3974_v24 = vadd.f32 %v3940_v57, %v3847_v15 }
 0x719   : > { %v4007_v29 = vadd.f32 %v12015_v10, %v3974_v24  ;;  %v9051_v10 = vld [vmem:[%s14628_s3 + $0x70] sm:$0xf]  ;;  %v9634_v24 = vld [vmem:[%s14628_s3 + $0x64] sm:$0xf] }
 0x71a   : > { %v9052_v62 = vor.u32 %v9637_v33, %v9051_v10  ;;  %v9048_v1 = vor.u32 %v9634_v24, %v9045_v32  ;;  %v9115_v10 = vld [vmem:[%s14628_s3 + $0xf0] sm:$0xf]  ;;  %v9653_v33 = vld [vmem:[%s14628_s3 + $0xf4] sm:$0xf0] }
 0x71b   : > { %v4039_v51 = vmax.f32 %v4007_v29, 0.0  ;;  %v9107_v29 = vld [vmem:[%s14628_s3 + $0xe0] sm:$0xf] }
 0x71d   : > { %v4199_v44 = vadd.f32 %v12141_v3, %v4039_v51  ;;  %v8997_v3 = vld [vmem:[%s14628_s3 + $0x8] sm:$0xf0]  ;;  %v9108_v51 = vor.u32 %v9651_v0, %v9107_v29 }
 0x71e   : > { %v9000_v20 = vor.u32 %v9622_v61, %v8997_v3  ;;  %v9116_v61 = vor.u32 %v9653_v33, %v9115_v10 }
 0x71f   : > { %v4247_v50 = vpack.c.bf16 %v4199_v44, %v4198_v54  ;;  %v9636_v44 = vld [vmem:[%s14628_s3 + $0x74] sm:$0xf] }
 0x720   : > { %4446 = vmatmul.bf16.gmra.mxu0 %v9044_v14 }
 0x721   : > { %4497 = vmatpush.bf16.msrb.mxu1 %v4247_v50  ;;  %v9053_v50 = vld [vmem:[%s14628_s3 + $0x78] sm:$0xf0] }
 0x725   : > { %4498 = vmatpush.bf16.msrb.mxu1 %v4246_v43  ;;  %v9099_v43 = vld [vmem:[%s14628_s3 + $0xd0] sm:$0xf] }
 0x726   : > { %v9100_v9 = vor.u32 %v9649_v16, %v9099_v43 }
 0x729   : > { %4499 = vmatpush.bf16.msrb.mxu1 %v4245_v4  ;;  %v9013_v4 = vld [vmem:[%s14628_s3 + $0x28] sm:$0xf0] }
 0x72d   : > { %4500 = vmatpush.bf16.msrb.mxu1 %v4244_v49  ;;  %v9626_v49 = vld [vmem:[%s14628_s3 + $0x24] sm:$0xf] }
 0x72e   : > { %v9016_v13 = vor.u32 %v9626_v49, %v9013_v4  ;;  %v15063_v49 = vmov 0.0  }
 0x730   : > { %4451 = vmatmul.bf16.gmra.mxu0 %v9052_v62  ;;  %v9056_v62 = vor.u32 %v9636_v44, %v9053_v50 }
 0x731   : > { %4501 = vmatpush.bf16.msrb.mxu1 %v4243_v42  ;;  %v9067_v42 = vld [vmem:[%s14628_s3 + $0x90] sm:$0xf] }
 0x735   : > { %4502 = vmatpush.bf16.msrb.mxu1 %v4242_v12  ;;  %v9060_v12 = vor.u32 %v9639_v30, %v9059_v21  ;;  %v9638_v30 = vld [vmem:[%s14628_s3 + $0x84] sm:$0xf] }
 0x739   : > { %4503 = vmatpush.bf16.msrb.mxu1 %v4241_v63  ;;  %v9624_v63 = vld [vmem:[%s14628_s3 + $0x14] sm:$0xf] }
 0x73a   : > { %v9008_v47 = vor.u32 %v9624_v63, %v9005_v28 }
 0x73d   : > { %4504 = vmatpush.bf16.msrb.mxu1 %v4240_v37  ;;  %v12317_v18 = vpop.f32.mrf.mxu0  ;;  %v9068_v37 = vor.u32 %v9641_v39, %v9067_v42 }
 0x740   : > { %4505 = vmatmul.bf16.vlgmr.msrb.gmra.mxu1 %v9000_v20  ;;  %4456 = vmatmul.bf16.gmra.mxu0 %v9060_v12  ;;  %v9061_v20 = vld [vmem:[%s14628_s3 + $0x88] sm:$0xf0] }
 0x741   : > { %v9064_v12 = vor.u32 %v9638_v30, %v9061_v20 }
 0x745   : > { %v12319_v22 = vpop.f32.mrf.mxu0 }
 0x74d   : > { %v12333_v60 = vpop.f32.mrf.mxu0 }
 0x750   : > { %4510 = vmatmul.bf16.gmra.mxu1 %v9008_v47  ;;  %4461 = vmatmul.bf16.gmra.mxu0 %v9068_v37 }
 0x755   : > { %v12335_v55 = vpop.f32.mrf.mxu0 }
 0x75d   : > { %v12349_v5 = vpop.f32.mrf.mxu0 }
 0x760   : > { %4515 = vmatmul.bf16.gmra.mxu1 %v9016_v13  ;;  %4466 = vmatmul.bf16.gmra.mxu0 %v9076_v38 }
 0x765   : > { %v12351_v58 = vpop.f32.mrf.mxu0 }
 0x76d   : > { %v12365_v40 = vpop.f32.mrf.mxu0 }
 0x770   : > { %4520 = vmatmul.bf16.gmra.mxu1 %v9024_v27  ;;  %4471 = vmatmul.bf16.gmra.mxu0 %v9084_v17 }
 0x775   : > { %v12367_v26 = vpop.f32.mrf.mxu0 }
 0x77d   : > { %v12381_v59 = vpop.f32.mrf.mxu0 }
 0x780   : > { %4525 = vmatmul.bf16.gmra.mxu1 %v9032_v6  ;;  %4476 = vmatmul.bf16.gmra.mxu0 %v9092_v48  ;;  %v9072_v48 = vor.u32 %v9640_v53, %v9069_v11 }
 0x785   : > { %v12389_v34 = vpop.f32.mrf.mxu0 }
 0x78d   : > { %v12403_v15 = vpop.f32.mrf.mxu0 }
 0x790   : > { %4530 = vmatmul.bf16.gmra.mxu1 %v9040_v25  ;;  %4481 = vmatmul.bf16.gmra.mxu0 %v9100_v9 }
 0x795   : > { %v12408_v57 = vpop.f32.mrf.mxu0 }
 0x79d   : > { %v12422_v14 = vpop.f32.mrf.mxu0 }
 0x7a0   : > { %4535 = vmatmul.bf16.gmra.mxu1 %v9048_v1  ;;  %4486 = vmatmul.bf16.gmra.mxu0 %v9108_v51 }
 0x7a5   : > { %v12424_v54 = vpop.f32.mrf.mxu0 }
 0x7ad   : > { %v12438_v3 = vpop.f32.mrf.mxu0 }
 0x7b0   : > { %4540 = vmatmul.bf16.gmra.mxu1 %v9056_v62  ;;  %4491 = vmatmul.bf16.gmra.mxu0 %v9116_v61 }
 0x7b5   : > { %v12440_v21 = vpop.f32.mrf.mxu0 }
 0x7bd   : > { %v4506_v63 = vpop.f32.mrf.mxu1  ;;  %v12448_v28 = vpop.f32.mrf.mxu0 }
 0x7be   : > { %v4507_v42 = vadd.f32 %v4506_v63, %v12317_v18  ;;  %v9077_v63 = vld [vmem:[%s14628_s3 + $0xa8] sm:$0xf0] }
 0x7c0   : > { %v4720_v39 = vrot.slane %v4507_v42, 7  ;;  %4545 = vmatmul.bf16.gmra.mxu1 %v9064_v12 }
 0x7c2   : > { %v12452_v47 = vsel %vm508_vm3, 0.0, %v4720_v39  ;;  %v4744_v37 = vsel %vm508_vm3, %v4720_v39, 0.0 }
 0x7c3   : > { %v4752_v4 = vpack.c.bf16 %v12452_v47, %v15063_v49  ;;  %v4770_v56 = vrot.slane %v12452_v47, 1  ;;  %v4771_v31 = vrot.slane %v4744_v37, 1  ;;  %v4884_v13 = vrot.slane %v12452_v47, 2 }
 0x7c4   : > { %v4885_v38 = vrot.slane %v4744_v37, 2 }
 0x7c5   : > { %v12460_v46 = vsel %vm684_vm4, %v4770_v56, %v4771_v31  ;;  %v4508_v18 = vpop.f32.mrf.mxu1  ;;  %9161 = vmatmul.msk.bf16.vlgmr.msra.gmra.mxu3 %vm2612_vm6, %v4752_v4  ;;  %v12463_v41 = vpop.f32.mrf.mxu0 }
 0x7c6   : > { %v4798_v23 = vpack.c.bf16 %v12460_v46, %v15064_v8  ;;  %v12468_v27 = vsel %vm1091_vm5, %v4884_v13, %v4885_v38  ;;  %v4509_v17 = vadd.f32 %v4508_v18, %v12319_v22 }
 0x7c7   : > { %v4912_v2 = vpack.c.bf16 %v12468_v27, %v15065_v35 }
 0x7c8   : > { %9157 = vmatmul.msk.bf16.vlgmr.msrb.gmra.mxu2 %vm2612_vm6, %v4798_v23  ;;  %v4721_v6 = vrot.slane %v4509_v17, 7 }
 0x7c9   : > { %9165 = vmatmul.msk.bf16.vlgmr.msra.gmra.mxu0 %vm2612_vm6, %v4912_v2 }
 0x7ca   : > { %v12484_v22 = vsel %vm508_vm3, 0.0, %v4721_v6  ;;  %v4745_v52 = vsel %vm508_vm3, %v4721_v6, 0.0  ;;  %v9670_v6 = vld [vmem:[%s14626_s1 + $0xfc] sm:$0xff] }
 0x7cb   : > { %v4773_v16 = vrot.slane %v12484_v22, 1  ;;  %v4774_v25 = vrot.slane %v4745_v52, 1  ;;  %v4887_v9 = vrot.slane %v12484_v22, 2  ;;  %v4888_v19 = vrot.slane %v4745_v52, 2  ;;  %5047 = vmatpush.bf16.msrb.mxu3 %v9670_v6 }
 0x7cd   : > { %v4511_v7 = vpop.f32.mrf.mxu1  ;;  %v12481_v36 = vpop.f32.mrf.mxu0  ;;  %v12503_v50 = vsel %vm684_vm4, %v4773_v16, %v4774_v25  ;;  %v12516_v30 = vsel %vm1091_vm5, %v4887_v9, %v4888_v19  ;;  %v9666_v19 = vld [vmem:[%s14626_s1 + $0xdc] sm:$0xff] }
 0x7ce   : > { %v4512_v45 = vadd.f32 %v4511_v7, %v12333_v60  ;;  %4988 = vmatpush.bf16.msra.mxu2 %v9666_v19 }
 0x7d0   : > { %v4722_v43 = vrot.slane %v4512_v45, 7  ;;  %4550 = vmatmul.bf16.gmra.mxu1 %v9072_v48 }
 0x7d2   : > { %v12491_v24 = vsel %vm508_vm3, 0.0, %v4722_v43  ;;  %v4746_v32 = vsel %vm508_vm3, %v4722_v43, 0.0 }
 0x7d3   : > { %v12496_v29 = vpack.c.bf16 %v12491_v24, %v12484_v22  ;;  %v4776_v0 = vrot.slane %v12491_v24, 1  ;;  %v4777_v60 = vrot.slane %v4746_v32, 1  ;;  %v4890_v1 = vrot.slane %v12491_v24, 2 }
 0x7d4   : > { %v4891_v51 = vrot.slane %v4746_v32, 2  ;;  %v9674_v32 = vld [vmem:[%s14626_s1 + $0x11c] sm:$0xff] }
 0x7d5   : > { %v4513_v44 = vpop.f32.mrf.mxu1  ;;  %9162 = vmatmul.msk.bf16.gmra.mxu3 %vm2612_vm6, %v12496_v29  ;;  %v12506_v10 = vsel %vm684_vm4, %v4776_v0, %v4777_v60  ;;  %v12508_v33 = vpop.f32.mrf.mxu0  ;;  %5104 = vmatpush.bf16.msrb.mxu0 %v9674_v32 }
 0x7d6   : > { %v4514_v62 = vadd.f32 %v4513_v44, %v12335_v55  ;;  %v12513_v61 = vpack.c.bf16 %v12506_v10, %v12503_v50  ;;  %v12519_v20 = vsel %vm1091_vm5, %v4890_v1, %v4891_v51  ;;  %v9642_v55 = vld [vmem:[%s14628_s3 + $0xa4] sm:$0xf] }
 0x7d7   : > { %v12523_v12 = vpack.c.bf16 %v12519_v20, %v12516_v30  ;;  %v9080_v39 = vor.u32 %v9642_v55, %v9077_v63 }
 0x7d8   : > { %9158 = vmatmul.msk.bf16.gmra.mxu2 %vm2612_vm6, %v12513_v61  ;;  %v4723_v42 = vrot.slane %v4514_v62, 7  ;;  %v9085_v62 = vld [vmem:[%s14628_s3 + $0xb8] sm:$0xf0] }
 0x7d9   : > { %9166 = vmatmul.msk.bf16.gmra.mxu0 %vm2612_vm6, %v12523_v12 }
 0x7da   : > { %v12538_v56 = vsel %vm508_vm3, 0.0, %v4723_v42  ;;  %v4747_v31 = vsel %vm508_vm3, %v4723_v42, 0.0 }
 0x7db   : > { %v4779_v18 = vrot.slane %v12538_v56, 1  ;;  %v4780_v23 = vrot.slane %v4747_v31, 1  ;;  %v4893_v17 = vrot.slane %v12538_v56, 2  ;;  %v4894_v2 = vrot.slane %v4747_v31, 2 }
 0x7dd   : > { %v4516_v37 = vpop.f32.mrf.mxu1  ;;  %v12535_v4 = vpop.f32.mrf.mxu0  ;;  %v12560_v16 = vsel %vm684_vm4, %v4779_v18, %v4780_v23  ;;  %v12579_v1 = vsel %vm1091_vm5, %v4893_v17, %v4894_v2 }
 0x7de   : > { %v4517_v13 = vadd.f32 %v4516_v37, %v12349_v5 }
 0x7e0   : > { %v4724_v38 = vrot.slane %v4517_v13, 7  ;;  %4555 = vmatmul.bf16.gmra.mxu1 %v9080_v39 }
 0x7e2   : > { %v12545_v53 = vsel %vm508_vm3, 0.0, %v4724_v38  ;;  %v4748_v11 = vsel %vm508_vm3, %v4724_v38, 0.0 }
 0x7e3   : > { %v12553_v5 = vpack.c.bf16 %v12545_v53, %v12538_v56  ;;  %v4782_v48 = vrot.slane %v12545_v53, 1  ;;  %v4783_v7 = vrot.slane %v4748_v11, 1  ;;  %v4896_v52 = vrot.slane %v12545_v53, 2 }
 0x7e4   : > { %v4897_v45 = vrot.slane %v4748_v11, 2 }
 0x7e5   : > { %v4518_v43 = vpop.f32.mrf.mxu1  ;;  %9163 = vmatmul.msk.bf16.gmra.mxu3 %vm2612_vm6, %v12553_v5  ;;  %v12563_v25 = vsel %vm684_vm4, %v4782_v48, %v4783_v7  ;;  %v12565_v9 = vpop.f32.mrf.mxu0 }
 0x7e6   : > { %v4519_v0 = vadd.f32 %v4518_v43, %v12351_v58  ;;  %v12576_v60 = vpack.c.bf16 %v12563_v25, %v12560_v16  ;;  %v12582_v51 = vsel %vm1091_vm5, %v4896_v52, %v4897_v45  ;;  %v9644_v58 = vld [vmem:[%s14628_s3 + $0xb4] sm:$0xf] }
 0x7e7   : > { %v12586_v44 = vpack.c.bf16 %v12582_v51, %v12579_v1  ;;  %v9088_v63 = vor.u32 %v9644_v58, %v9085_v62 }
 0x7e8   : > { %9159 = vmatmul.msk.bf16.gmra.mxu2 %vm2612_vm6, %v12576_v60  ;;  %v4725_v55 = vrot.slane %v4519_v0, 7 }
 0x7e9   : > { %9167 = vmatmul.msk.bf16.gmra.mxu0 %vm2612_vm6, %v12586_v44 }
 0x7ea   : > { %v12601_v37 = vsel %vm508_vm3, 0.0, %v4725_v55  ;;  %v4749_v31 = vsel %vm508_vm3, %v4725_v55, 0.0 }
 0x7eb   : > { %v4785_v18 = vrot.slane %v12601_v37, 1  ;;  %v4786_v23 = vrot.slane %v4749_v31, 1  ;;  %v4899_v17 = vrot.slane %v12601_v37, 2  ;;  %v4900_v2 = vrot.slane %v4749_v31, 2  ;;  %v9093_v31 = vld [vmem:[%s14628_s3 + $0xc8] sm:$0xf0] }
 0x7ed   : > { %v4521_v42 = vpop.f32.mrf.mxu1  ;;  %v12598_v39 = vpop.f32.mrf.mxu0  ;;  %v12622_v19 = vsel %vm684_vm4, %v4785_v18, %v4786_v23  ;;  %v12634_v62 = vsel %vm1091_vm5, %v4899_v17, %v4900_v2 }
 0x7ee   : > { %v4522_v13 = vadd.f32 %v4521_v42, %v12365_v40  ;;  %v9646_v42 = vld [vmem:[%s14628_s3 + $0xc4] sm:$0xf] }
 0x7f0   : > { %v4726_v38 = vrot.slane %v4522_v13, 7  ;;  %4560 = vmatmul.bf16.gmra.mxu1 %v9088_v63  ;;  %v9096_v13 = vor.u32 %v9646_v42, %v9093_v31 }
 0x7f2   : > { %v12608_v11 = vsel %vm508_vm3, 0.0, %v4726_v38  ;;  %v4750_v6 = vsel %vm508_vm3, %v4726_v38, 0.0 }
 0x7f3   : > { %v12613_v48 = vpack.c.bf16 %v12608_v11, %v12601_v37  ;;  %v4788_v7 = vrot.slane %v12608_v11, 1  ;;  %v4789_v40 = vrot.slane %v4750_v6, 1  ;;  %v4902_v52 = vrot.slane %v12608_v11, 2 }
 0x7f4   : > { %v4903_v45 = vrot.slane %v4750_v6, 2 }
 0x7f5   : > { %v12617_v43 = vpop.f32.mrf.mxu1  ;;  %9164 = vmatmul.msk.bf16.gmra.mxu3 %vm2612_vm6, %v12613_v48  ;;  %v12625_v32 = vsel %vm684_vm4, %v4788_v7, %v4789_v40  ;;  %v12627_v0 = vpop.f32.mrf.mxu0  ;;  %v5024_v7 = vpack.c.bf16 %v12503_v50, %v12460_v46  ;;  %v5081_v50 = vpack.c.bf16 %v12516_v30, %v12468_v27 }
 0x7f6   : > { %v12631_v58 = vpack.c.bf16 %v12625_v32, %v12622_v19  ;;  %v12637_v55 = vsel %vm1091_vm5, %v4902_v52, %v4903_v45 }
 0x7f7   : > { %v12641_v63 = vpack.c.bf16 %v12637_v55, %v12634_v62 }
 0x7f8   : > { %9160 = vmatmul.msk.bf16.gmra.mxu2 %vm2612_vm6, %v12631_v58 }
 0x7f9   : > { %9168 = vmatmul.msk.bf16.gmra.mxu0 %vm2612_vm6, %v12641_v63 }
 0x7fd   : > { %v4526_v38 = vpop.f32.mrf.mxu1  ;;  %v12653_v18 = vpop.f32.mrf.mxu0 }
 0x7fe   : > { %v4527_v23 = vadd.f32 %v4526_v38, %v12381_v59  ;;  %v4965_v38 = vpack.c.bf16 %v12484_v22, %v12452_v47  ;;  %v9101_v47 = vld [vmem:[%s14628_s3 + $0xd8] sm:$0xf0] }
 0x800   : > { %v5327_v17 = vrot.slane %v4527_v23, 7  ;;  %4565 = vmatmul.bf16.gmra.mxu1 %v9096_v13 }
 0x802   : > { %v12657_v2 = vsel %vm508_vm3, 0.0, %v5327_v17  ;;  %v5351_v6 = vsel %vm508_vm3, %v5327_v17, 0.0 }
 0x803   : > { %v5377_v40 = vrot.slane %v12657_v2, 1  ;;  %v5378_v52 = vrot.slane %v5351_v6, 1  ;;  %v5491_v45 = vrot.slane %v12657_v2, 2  ;;  %v5492_v42 = vrot.slane %v5351_v6, 2  ;;  %v9648_v6 = vld [vmem:[%s14628_s3 + $0xd4] sm:$0xf] }
 0x805   : > { %v12665_v31 = vsel %vm684_vm4, %v5377_v40, %v5378_v52  ;;  %v4528_v59 = vpop.f32.mrf.mxu1  ;;  %9173 = vmatmul.msk.bf16.vlgmr.msrb.gmra.mxu3 %vm2612_vm6, %v5024_v7  ;;  %v12668_v13 = vpop.f32.mrf.mxu0  ;;  %v12673_v23 = vsel %vm1091_vm5, %v5491_v45, %v5492_v42  ;;  %v9104_v52 = vor.u32 %v9648_v6, %v9101_v47 }
 0x806   : > { %15066 = vst [vmem:[#allocation11_spill] sm:$0xff] %v12668_v13  ;;  %v4529_v46 = vadd.f32 %v4528_v59, %v12389_v34 }
 0x808   : > { %v5328_v17 = vrot.slane %v4529_v46, 7  ;;  %9169 = vmatmul.msk.bf16.vlgmr.msra.gmra.mxu2 %vm2612_vm6, %v4965_v38 }
 0x809   : > { %9177 = vmatmul.msk.bf16.vlgmr.msrb.gmra.mxu0 %vm2612_vm6, %v5081_v50 }
 0x80a   : > { %v12687_v22 = vsel %vm508_vm3, 0.0, %v5328_v17  ;;  %v5352_v34 = vsel %vm508_vm3, %v5328_v17, 0.0 }
 0x80b   : > { %v5380_v27 = vrot.slane %v12687_v22, 1  ;;  %v5381_v30 = vrot.slane %v5352_v34, 1  ;;  %v5494_v7 = vrot.slane %v12687_v22, 2  ;;  %v5495_v40 = vrot.slane %v5352_v34, 2 }
 0x80d   : > { %v12693_v45 = vsel %vm684_vm4, %v5380_v27, %v5381_v30  ;;  %v4531_v42 = vpop.f32.mrf.mxu1  ;;  %v12695_v59 = vpop.f32.mrf.mxu0  ;;  %v12698_v38 = vsel %vm1091_vm5, %v5494_v7, %v5495_v40  ;;  %v5025_v30 = vpack.c.bf16 %v12560_v16, %v12506_v10 }
 0x80e   : > { %15067 = vst [vmem:[#allocation31_spill] sm:$0xff] %v12698_v38  ;;  %v4532_v50 = vadd.f32 %v4531_v42, %v12403_v15 }
 0x810   : > { %v5329_v13 = vrot.slane %v4532_v50, 7  ;;  %4570 = vmatmul.bf16.gmra.mxu1 %v9104_v52  ;;  %v5082_v50 = vpack.c.bf16 %v12579_v1, %v12519_v20 }
 0x812   : > { %v12706_v6 = vsel %vm508_vm3, 0.0, %v5329_v13  ;;  %v5353_v47 = vsel %vm508_vm3, %v5329_v13, 0.0  ;;  %v4966_v13 = vpack.c.bf16 %v12538_v56, %v12491_v24  ;;  %v9109_v24 = vld [vmem:[%s14628_s3 + $0xe8] sm:$0xf0] }
 0x813   : > { %v12711_v34 = vpack.c.bf16 %v12706_v6, %v12687_v22  ;;  %v5497_v27 = vrot.slane %v12706_v6, 2  ;;  %v5498_v15 = vrot.slane %v5353_v47, 2  ;;  %v5384_v46 = vrot.slane %v5353_v47, 1 }
 0x815   : > { %v4533_v7 = vpop.f32.mrf.mxu1  ;;  %9174 = vmatmul.msk.bf16.gmra.mxu3 %vm2612_vm6, %v5025_v30  ;;  %v12717_v40 = vpop.f32.mrf.mxu0  ;;  %v12723_v42 = vsel %vm1091_vm5, %v5497_v27, %v5498_v15  ;;  %v5383_v30 = vrot.slane %v12706_v6, 1 }
 0x816   : > { %v4534_v52 = vadd.f32 %v4533_v7, %v12408_v57  ;;  %15068 = vst [vmem:[#allocation13_spill] sm:$0xff] %v12723_v42  ;;  %v12729_v10 = vpack.c.bf16 %v12723_v42, %v12698_v38  ;;  %v9650_v57 = vld [vmem:[%s14628_s3 + $0xe4] sm:$0xf] }
 0x817   : > { %v9112_v7 = vor.u32 %v9650_v57, %v9109_v24 }
 0x818   : > { %15069 = vst [vmem:[#allocation15_spill] sm:$0xff] %v12729_v10  ;;  %v5330_v16 = vrot.slane %v4534_v52, 7  ;;  %9170 = vmatmul.msk.bf16.gmra.mxu2 %vm2612_vm6, %v4966_v13  ;;  %v12747_v52 = vsel %vm684_vm4, %v5383_v30, %v5384_v46  ;;  %v4524_v30 = vadd.f32 %v12617_v43, %v12367_v26  ;;  %v5026_v26 = vpack.c.bf16 %v12622_v19, %v12563_v25 }
 0x819   : > { %9178 = vmatmul.msk.bf16.gmra.mxu0 %vm2612_vm6, %v5082_v50  ;;  %v9667_v50 = vld [vmem:[%s14626_s1 + $0xe4] sm:$0xff]  ;;  %v5083_v19 = vpack.c.bf16 %v12634_v62, %v12582_v51  ;;  %v9652_v51 = vld [vmem:[%s14628_s3 + $0xf4] sm:$0xf]  ;;  %v9117_v62 = vld [vmem:[%s14628_s3 + $0xf8] sm:$0xf0] }
 0x81a   : > { %v12741_v20 = vsel %vm508_vm3, 0.0, %v5330_v16  ;;  %v5354_v56 = vsel %vm508_vm3, %v5330_v16, 0.0  ;;  %5595 = vmatpush.bf16.msra.mxu1 %v9667_v50  ;;  %v4727_v43 = vrot.slane %v4524_v30, 7 }
 0x81b   : > { %v5386_v1 = vrot.slane %v12741_v20, 1  ;;  %v5387_v27 = vrot.slane %v5354_v56, 1  ;;  %v5500_v47 = vrot.slane %v12741_v20, 2  ;;  %v5501_v15 = vrot.slane %v5354_v56, 2 }
 0x81d   : > { %v4536_v13 = vpop.f32.mrf.mxu1  ;;  %v12753_v17 = vsel %vm684_vm4, %v5386_v1, %v5387_v27  ;;  %v12756_v16 = vsel %vm1091_vm5, %v5500_v47, %v5501_v15  ;;  %v12759_v10 = vpop.f32.mrf.mxu0 }
 0x81e   : > { %15070 = vst [vmem:[#allocation33_spill] sm:$0xff] %v12756_v16  ;;  %v4537_v38 = vadd.f32 %v4536_v13, %v12422_v14  ;;  %v9682_v14 = vld [vmem:[%s14626_s1 + $0x15c] sm:$0xff] }
 0x81f   : > { %5186 = vmatpush.bf16.msra.mxu3 %v9682_v14  ;;  %v9686_v13 = vld [vmem:[%s14626_s1 + $0x17c] sm:$0xff]  ;;  %v12801_v14 = vsel %vm508_vm3, 0.0, %v4727_v43 }
 0x820   : > { %v5331_v24 = vrot.slane %v4537_v38, 7  ;;  %4575 = vmatmul.bf16.gmra.mxu1 %v9112_v7  ;;  %v9678_v7 = vld [vmem:[%s14626_s1 + $0x13c] sm:$0xff]  ;;  %5227 = vmatpush.bf16.msra.mxu0 %v9686_v13 }
 0x821   : > { %5145 = vmatpush.bf16.msrb.mxu2 %v9678_v7 }
 0x822   : > { %v12768_v56 = vsel %vm508_vm3, 0.0, %v5331_v24  ;;  %v5355_v1 = vsel %vm508_vm3, %v5331_v24, 0.0  ;;  %v4967_v24 = vpack.c.bf16 %v12601_v37, %v12545_v53 }
 0x823   : > { %v12776_v27 = vpack.c.bf16 %v12768_v56, %v12741_v20  ;;  %v5503_v47 = vrot.slane %v12768_v56, 2  ;;  %v5504_v38 = vrot.slane %v5355_v1, 2  ;;  %v5389_v37 = vrot.slane %v12768_v56, 1 }
 0x825   : > { %v4538_v15 = vpop.f32.mrf.mxu1  ;;  %9175 = vmatmul.msk.bf16.gmra.mxu3 %vm2612_vm6, %v5026_v26  ;;  %v12792_v25 = vsel %vm1091_vm5, %v5503_v47, %v5504_v38  ;;  %v12805_v53 = vpop.f32.mrf.mxu0  ;;  %v5390_v47 = vrot.slane %v5355_v1, 1 }
 0x826   : > { %v4539_v50 = vadd.f32 %v4538_v15, %v12424_v54  ;;  %15071 = vst [vmem:[#allocation44_spill] sm:$0xff] %v12792_v25  ;;  %v12798_v30 = vpack.c.bf16 %v12792_v25, %v12756_v16  ;;  %v4751_v54 = vsel %vm508_vm3, %v4727_v43, 0.0 }
 0x827   : > { %15073 = vst [vmem:[#allocation50_spill] sm:$0xff] %v12805_v53  ;;  %v12823_v57 = vsel %vm684_vm4, %v5389_v37, %v5390_v47 }
 0x828   : > { %15072 = vst [vmem:[#allocation47_spill] sm:$0xff] %v12798_v30  ;;  %v5332_v26 = vrot.slane %v4539_v50, 7  ;;  %9171 = vmatmul.msk.bf16.gmra.mxu2 %vm2612_vm6, %v4967_v24  ;;  %v5020_v50 = vrot.slane %v12801_v14, 1  ;;  %v5021_v24 = vrot.slane %v4751_v54, 1 }
 0x829   : > { %9179 = vmatmul.msk.bf16.gmra.mxu0 %vm2612_vm6, %v5083_v19  ;;  %v9120_v19 = vor.u32 %v9652_v51, %v9117_v62  ;;  %v5077_v51 = vrot.slane %v12801_v14, 2  ;;  %v5078_v62 = vrot.slane %v4751_v54, 2 }
 0x82a   : > { %v12816_v43 = vsel %vm508_vm3, 0.0, %v5332_v26  ;;  %v5356_v38 = vsel %vm508_vm3, %v5332_v26, 0.0  ;;  %v12838_v37 = vsel %vm684_vm4, %v5020_v50, %v5021_v24  ;;  %v4968_v24 = vpack.c.bf16 %v12801_v14, %v12608_v11 }
 0x82b   : > { %v5392_v15 = vrot.slane %v12816_v43, 1  ;;  %v5393_v7 = vrot.slane %v5356_v38, 1  ;;  %v5506_v1 = vrot.slane %v12816_v43, 2  ;;  %v5507_v13 = vrot.slane %v5356_v38, 2 }
 0x82c   : > { %v5027_v54 = vpack.c.bf16 %v12838_v37, %v12625_v32 }
 0x82d   : > { %v4541_v46 = vpop.f32.mrf.mxu1  ;;  %v12826_v42 = vsel %vm684_vm4, %v5392_v15, %v5393_v7  ;;  %v12829_v16 = vsel %vm1091_vm5, %v5506_v1, %v5507_v13  ;;  %v12854_v13 = vsel %vm1091_vm5, %v5077_v51, %v5078_v62 }
 0x82e   : > { %15074 = vst [vmem:[#allocation51_spill] sm:$0xff] %v12829_v16  ;;  %v4542_v26 = vadd.f32 %v4541_v46, %v12438_v3  ;;  %v12844_v3 = vpop.f32.mrf.mxu0 }
 0x830   : > { %v5333_v53 = vrot.slane %v4542_v26, 7  ;;  %4580 = vmatmul.bf16.gmra.mxu1 %v9120_v19  ;;  %v5084_v26 = vpack.c.bf16 %v12854_v13, %v12637_v55 }
 0x832   : > { %v12841_v47 = vsel %vm508_vm3, 0.0, %v5333_v53  ;;  %v5357_v15 = vsel %vm508_vm3, %v5333_v53, 0.0 }
 0x833   : > { %v12848_v46 = vpack.c.bf16 %v12841_v47, %v12816_v43  ;;  %v5509_v7 = vrot.slane %v12841_v47, 2  ;;  %v5510_v1 = vrot.slane %v5357_v15, 2  ;;  %v5395_v62 = vrot.slane %v12841_v47, 1 }
 0x835   : > { %v4543_v50 = vpop.f32.mrf.mxu1  ;;  %9176 = vmatmul.msk.bf16.gmra.mxu3 %vm2612_vm6, %v5027_v54  ;;  %v12861_v19 = vsel %vm1091_vm5, %v5509_v7, %v5510_v1  ;;  %v5396_v54 = vrot.slane %v5357_v15, 1 }
 0x836   : > { %v4544_v53 = vadd.f32 %v4543_v50, %v12440_v21  ;;  %15075 = vst [vmem:[#allocation35_spill] sm:$0xff] %v12861_v19  ;;  %v12867_v32 = vpack.c.bf16 %v12861_v19, %v12829_v16  ;;  %v12878_v38 = vpop.f32.mrf.mxu0  ;;  %v5573_v19 = vpack.c.bf16 %v12741_v20, %v12706_v6 }
 0x837   : > { %15077 = vst [vmem:[#allocation34_spill] sm:$0xff] %v12878_v38 }
 0x838   : > { %15076 = vst [vmem:[#allocation17_spill] sm:$0xff] %v12867_v32  ;;  %v5334_v51 = vrot.slane %v4544_v53, 7  ;;  %9172 = vmatmul.msk.bf16.gmra.mxu2 %vm2612_vm6, %v4968_v24  ;;  %v12881_v24 = vsel %vm684_vm4, %v5395_v62, %v5396_v54 }
 0x839   : > { %9180 = vmatmul.msk.bf16.gmra.mxu0 %vm2612_vm6, %v5084_v26 }
 0x83a   : > { %v12873_v21 = vsel %vm508_vm3, 0.0, %v5334_v51  ;;  %v5358_v11 = vsel %vm508_vm3, %v5334_v51, 0.0  ;;  %v5572_v51 = vpack.c.bf16 %v12687_v22, %v12657_v2 }
 0x83b   : > { %v5627_v7 = vrot.slane %v12873_v21, 1  ;;  %v5628_v55 = vrot.slane %v5358_v11, 1  ;;  %v5684_v1 = vrot.slane %v12873_v21, 2  ;;  %v5685_v50 = vrot.slane %v5358_v11, 2 }
 0x83d   : > { %v4546_v53 = vpop.f32.mrf.mxu1  ;;  %v12884_v15 = vsel %vm684_vm4, %v5627_v7, %v5628_v55  ;;  %v12887_v26 = vsel %vm1091_vm5, %v5684_v1, %v5685_v50 }
 0x83e   : > { %15078 = vst [vmem:[#allocation26_spill] sm:$0xff] %v12887_v26  ;;  %v4547_v30 = vadd.f32 %v4546_v53, %v12448_v28 }
 0x840   : > { %v5934_v16 = vrot.slane %v4547_v30, 7  ;;  %9241 = vmatmul.msk.bf16.vlgmr.msra.gmra.mxu1 %vm2612_vm6, %v5572_v51 }
 0x842   : > { %v12898_v62 = vsel %vm508_vm3, 0.0, %v5934_v16  ;;  %v5958_v54 = vsel %vm508_vm3, %v5934_v16, 0.0 }
 0x843   : > { %v5984_v7 = vrot.slane %v12898_v62, 1  ;;  %v5985_v55 = vrot.slane %v5958_v54, 1  ;;  %v6098_v16 = vrot.slane %v12898_v62, 2  ;;  %v6099_v51 = vrot.slane %v5958_v54, 2 }
 0x845   : > { %v12903_v22 = vsel %vm684_vm4, %v5984_v7, %v5985_v55  ;;  %v4548_v28 = vpop.f32.mrf.mxu1  ;;  %9185 = vmatmul.msk.bf16.vlgmr.msra.gmra.mxu3 %vm2612_vm6, %v12513_v61  ;;  %v12922_v54 = vsel %vm1091_vm5, %v6098_v16, %v6099_v51 }
 0x846   : > { %v4549_v1 = vadd.f32 %v4548_v28, %v12463_v41  ;;  %v4937_v30 = vpop.f32.mrf.mxu0 }
 0x848   : > { %v5935_v50 = vrot.slane %v4549_v1, 7  ;;  %v4864_v53 = vpop.f32.mrf.mxu3  ;;  %9181 = vmatmul.msk.bf16.vlgmr.msrb.gmra.mxu2 %vm2612_vm6, %v12496_v29  ;;  %v9683_v29 = vld [vmem:[%s14626_s1 + $0x164] sm:$0xff] }
 0x849   : > { %9189 = vmatmul.msk.bf16.vlgmr.msra.gmra.mxu0 %vm2612_vm6, %v12523_v12  ;;  %5793 = vmatpush.bf16.msrb.mxu1 %v9683_v29 }
 0x84a   : > { %v12914_v7 = vsel %vm508_vm3, 0.0, %v5935_v50  ;;  %v5959_v55 = vsel %vm508_vm3, %v5935_v50, 0.0 }
 0x84b   : > { %v5987_v61 = vrot.slane %v12914_v7, 1  ;;  %v5988_v41 = vrot.slane %v5959_v55, 1  ;;  %v6101_v28 = vrot.slane %v12914_v7, 2  ;;  %v6102_v1 = vrot.slane %v5959_v55, 2  ;;  %v4823_v25 = vpop.f32.mrf.mxu2 }
 0x84c   : > { %v4865_v11 = vadd.f32 %v4864_v53, %v4823_v25 }
 0x84d   : > { %v4551_v12 = vpop.f32.mrf.mxu1  ;;  %v12927_v50 = vsel %vm1091_vm5, %v6101_v28, %v6102_v1  ;;  %v12930_v26 = vsel %vm684_vm4, %v5987_v61, %v5988_v41 }
 0x84e   : > { %15079 = vst [vmem:[#allocation20_spill] sm:$0xff] %v12930_v26  ;;  %v4552_v55 = vadd.f32 %v4551_v12, %v12481_v36  ;;  %v4939_v32 = vpop.f32.mrf.mxu0  ;;  %v12933_v38 = vadd.f32 %v4937_v30, %v4865_v11 }
 0x850   : > { %v5936_v16 = vrot.slane %v4552_v55, 7  ;;  %v4866_v51 = vpop.f32.mrf.mxu3  ;;  %9242 = vmatmul.msk.bf16.gmra.mxu1 %vm2612_vm6, %v5573_v19 }
 0x852   : > { %v12941_v6 = vsel %vm508_vm3, 0.0, %v5936_v16  ;;  %v5960_v20 = vsel %vm508_vm3, %v5936_v16, 0.0 }
 0x853   : > { %v5990_v36 = vrot.slane %v12941_v6, 1  ;;  %v5991_v61 = vrot.slane %v5960_v20, 1  ;;  %v4825_v11 = vpop.f32.mrf.mxu2 }
 0x854   : > { %v4867_v30 = vadd.f32 %v4866_v51, %v4825_v11  ;;  %v6104_v51 = vrot.slane %v12941_v6, 2 }
 0x855   : > { %v4553_v41 = vpop.f32.mrf.mxu1  ;;  %9186 = vmatmul.msk.bf16.gmra.mxu3 %vm2612_vm6, %v12576_v60  ;;  %v12948_v28 = vsel %vm684_vm4, %v5990_v36, %v5991_v61  ;;  %v6105_v60 = vrot.slane %v5960_v20, 2 }
 0x856   : > { %15080 = vst [vmem:[#allocation24_spill] sm:$0xff] %v12948_v28  ;;  %v4554_v1 = vadd.f32 %v4553_v41, %v12508_v33  ;;  %v4942_v19 = vpop.f32.mrf.mxu0  ;;  %v12951_v12 = vadd.f32 %v4939_v32, %v4867_v30  ;;  %v12955_v55 = vpack.c.bf16 %v12948_v28, %v12930_v26 }
 0x858   : > { %v5937_v16 = vrot.slane %v4554_v1, 7  ;;  %v4869_v25 = vpop.f32.mrf.mxu3  ;;  %9182 = vmatmul.msk.bf16.gmra.mxu2 %vm2612_vm6, %v12553_v5 }
 0x859   : > { %9190 = vmatmul.msk.bf16.gmra.mxu0 %vm2612_vm6, %v12586_v44  ;;  %v5574_v44 = vpack.c.bf16 %v12816_v43, %v12768_v56 }
 0x85a   : > { %v12963_v33 = vsel %vm508_vm3, 0.0, %v5937_v16  ;;  %v5961_v32 = vsel %vm508_vm3, %v5937_v16, 0.0  ;;  %v12976_v16 = vsel %vm1091_vm5, %v6104_v51, %v6105_v60 }
 0x85b   : > { %v5993_v36 = vrot.slane %v12963_v33, 1  ;;  %v5994_v61 = vrot.slane %v5961_v32, 1  ;;  %v6107_v11 = vrot.slane %v12963_v33, 2  ;;  %v6108_v30 = vrot.slane %v5961_v32, 2  ;;  %v4828_v41 = vpop.f32.mrf.mxu2 }
 0x85c   : > { %v4870_v1 = vadd.f32 %v4869_v25, %v4828_v41 }
 0x85d   : > { %v4556_v20 = vpop.f32.mrf.mxu1  ;;  %v12979_v53 = vsel %vm1091_vm5, %v6107_v11, %v6108_v30  ;;  %v12982_v32 = vsel %vm684_vm4, %v5993_v36, %v5994_v61 }
 0x85e   : > { %15081 = vst [vmem:[#allocation36_spill] sm:$0xff] %v12982_v32  ;;  %v4557_v25 = vadd.f32 %v4556_v20, %v12535_v4  ;;  %v4944_v41 = vpop.f32.mrf.mxu0  ;;  %v12985_v5 = vadd.f32 %v4942_v19, %v4870_v1  ;;  %v9655_v4 = vld [vmem:[%s14626_s1 + $0x84] sm:$0xff] }
 0x85f   : > { %5469 = vmatpush.bf16.msrb.mxu3 %v9655_v4  ;;  %v9659_v20 = vld [vmem:[%s14626_s1 + $0xa4] sm:$0xff] }
 0x860   : > { %v5938_v51 = vrot.slane %v4557_v25, 7  ;;  %v4871_v60 = vpop.f32.mrf.mxu3  ;;  %9243 = vmatmul.msk.bf16.gmra.mxu1 %vm2612_vm6, %v5574_v44  ;;  %v9663_v44 = vld [vmem:[%s14626_s1 + $0xc4] sm:$0xff]  ;;  %5428 = vmatpush.bf16.msra.mxu2 %v9659_v20 }
 0x861   : > { %5542 = vmatpush.bf16.msrb.mxu0 %v9663_v44 }
 0x862   : > { %v12993_v11 = vsel %vm508_vm3, 0.0, %v5938_v51  ;;  %v5962_v36 = vsel %vm508_vm3, %v5938_v51, 0.0 }
 0x863   : > { %v5996_v19 = vrot.slane %v12993_v11, 1  ;;  %v5997_v61 = vrot.slane %v5962_v36, 1  ;;  %v4830_v30 = vpop.f32.mrf.mxu2  ;;  %v6110_v56 = vrot.slane %v12993_v11, 2 }
 0x864   : > { %v4872_v1 = vadd.f32 %v4871_v60, %v4830_v30 }
 0x865   : > { %v4558_v29 = vpop.f32.mrf.mxu1  ;;  %9187 = vmatmul.msk.bf16.gmra.mxu3 %vm2612_vm6, %v12631_v58  ;;  %v13009_v25 = vsel %vm684_vm4, %v5996_v19, %v5997_v61  ;;  %v6111_v19 = vrot.slane %v5962_v36, 2 }
 0x866   : > { %15082 = vst [vmem:[#allocation40_spill] sm:$0xff] %v13009_v25  ;;  %v4559_v51 = vadd.f32 %v4558_v29, %v12565_v9  ;;  %v4947_v43 = vpop.f32.mrf.mxu0  ;;  %v13012_v60 = vadd.f32 %v4944_v41, %v4872_v1  ;;  %v13016_v4 = vpack.c.bf16 %v13009_v25, %v12982_v32 }
 0x867   : > { %v13034_v28 = vsel %vm1091_vm5, %v6110_v56, %v6111_v19 }
 0x868   : > { %15083 = vst [vmem:[#allocation9_spill] sm:$0xff] %v13016_v4  ;;  %v5939_v58 = vrot.slane %v4559_v51, 7  ;;  %v4874_v30 = vpop.f32.mrf.mxu3  ;;  %9183 = vmatmul.msk.bf16.gmra.mxu2 %vm2612_vm6, %v12613_v48 }
 0x869   : > { %9191 = vmatmul.msk.bf16.gmra.mxu0 %vm2612_vm6, %v12641_v63  ;;  %v5575_v63 = vpack.c.bf16 %v12873_v21, %v12841_v47  ;;  %v5134_v47 = vpack.c.bf16 0.0, %v12801_v14 }
 0x86a   : > { %v13024_v9 = vsel %vm508_vm3, 0.0, %v5939_v58  ;;  %v5963_v41 = vsel %vm508_vm3, %v5939_v58, 0.0 }
 0x86b   : > { %v5999_v61 = vrot.slane %v13024_v9, 1  ;;  %v6000_v1 = vrot.slane %v5963_v41, 1  ;;  %v6113_v29 = vrot.slane %v13024_v9, 2  ;;  %v6114_v20 = vrot.slane %v5963_v41, 2  ;;  %v4833_v44 = vpop.f32.mrf.mxu2 }
 0x86c   : > { %v4875_v51 = vadd.f32 %v4874_v30, %v4833_v44 }
 0x86d   : > { %v4561_v36 = vpop.f32.mrf.mxu1  ;;  %v13037_v58 = vsel %vm1091_vm5, %v6113_v29, %v6114_v20  ;;  %v13040_v32 = vsel %vm684_vm4, %v5999_v61, %v6000_v1  ;;  %v5175_v29 = vpack.c.bf16 %v15064_v8, %v12838_v37  ;;  %v5216_v37 = vpack.c.bf16 %v15065_v35, %v12854_v13 }
 0x86e   : > { %15084 = vst [vmem:[#allocation25_spill] sm:$0xff] %v13040_v32  ;;  %v4562_v41 = vadd.f32 %v4561_v36, %v12598_v39  ;;  %v4949_v26 = vpop.f32.mrf.mxu0  ;;  %v13043_v30 = vadd.f32 %v4947_v43, %v4875_v51 }
 0x870   : > { %v5940_v48 = vrot.slane %v4562_v41, 7  ;;  %v4876_v56 = vpop.f32.mrf.mxu3  ;;  %9244 = vmatmul.msk.bf16.gmra.mxu1 %vm2612_vm6, %v5575_v63 }
 0x872   : > { %v13051_v19 = vsel %vm508_vm3, 0.0, %v5940_v48  ;;  %v5964_v61 = vsel %vm508_vm3, %v5940_v48, 0.0 }
 0x873   : > { %15085 = vst [vmem:[#allocation19_spill] sm:$0xff] %v13051_v19  ;;  %v6002_v39 = vrot.slane %v13051_v19, 1  ;;  %v6003_v1 = vrot.slane %v5964_v61, 1  ;;  %v4835_v43 = vpop.f32.mrf.mxu2 }
 0x874   : > { %v4877_v20 = vadd.f32 %v4876_v56, %v4835_v43 }
 0x875   : > { %v4563_v51 = vpop.f32.mrf.mxu1  ;;  %9188 = vmatmul.msk.bf16.gmra.mxu3 %vm2612_vm6, %v5175_v29  ;;  %v13059_v36 = vsel %vm684_vm4, %v6002_v39, %v6003_v1  ;;  %v6116_v39 = vrot.slane %v13051_v19, 2  ;;  %v6117_v1 = vrot.slane %v5964_v61, 2  ;;  %v13084_v61 = vpack.c.bf16 %v12747_v52, %v12693_v45 }
 0x876   : > { %15086 = vst [vmem:[#allocation38_spill] sm:$0xff] %v13059_v36  ;;  %v4564_v63 = vadd.f32 %v4563_v51, %v12627_v0  ;;  %v4952_v41 = vpop.f32.mrf.mxu0  ;;  %v13063_v48 = vadd.f32 %v4949_v26, %v4877_v20  ;;  %v13067_v44 = vpack.c.bf16 %v13059_v36, %v13040_v32 }
 0x877   : > { %v13087_v25 = vsel %vm1091_vm5, %v6116_v39, %v6117_v1 }
 0x878   : > { %15087 = vst [vmem:[#allocation18_spill] sm:$0xff] %v13067_v44  ;;  %v5941_v56 = vrot.slane %v4564_v63, 7  ;;  %v4879_v43 = vpop.f32.mrf.mxu3  ;;  %9184 = vmatmul.msk.bf16.gmra.mxu2 %vm2612_vm6, %v5134_v47  ;;  %v15093_v44 = vld [vmem:[#allocation11_spill] sm:$0xff] }
 0x879   : > { %9192 = vmatmul.msk.bf16.gmra.mxu0 %vm2612_vm6, %v5216_v37 }
 0x87a   : > { %v13075_v0 = vsel %vm508_vm3, 0.0, %v5941_v56  ;;  %v5965_v14 = vsel %vm508_vm3, %v5941_v56, 0.0 }
 0x87b   : > { %15088 = vst [vmem:[#allocation37_spill] sm:$0xff] %v13075_v0  ;;  %v6234_v26 = vrot.slane %v13075_v0, 1  ;;  %v6235_v29 = vrot.slane %v5965_v14, 1  ;;  %v6291_v20 = vrot.slane %v13075_v0, 2  ;;  %v6292_v13 = vrot.slane %v5965_v14, 2  ;;  %v4838_v51 = vpop.f32.mrf.mxu2 }
 0x87c   : > { %v4880_v63 = vadd.f32 %v4879_v43, %v4838_v51 }
 0x87d   : > { %v4566_v37 = vpop.f32.mrf.mxu1  ;;  %v13090_v56 = vsel %vm684_vm4, %v6234_v26, %v6235_v29  ;;  %v13093_v32 = vsel %vm1091_vm5, %v6291_v20, %v6292_v13 }
 0x87e   : > { %15089 = vst [vmem:[#allocation28_spill] sm:$0xff] %v13090_v56  ;;  %v4567_v14 = vadd.f32 %v4566_v37, %v12653_v18  ;;  %v4954_v43 = vpop.f32.mrf.mxu0  ;;  %v13096_v51 = vadd.f32 %v4952_v41, %v4880_v63  ;;  %v5359_v18 = vpack.c.bf16 %v12657_v2, %v15063_v49  ;;  %v5519_v2 = vpack.c.bf16 %v12673_v23, %v15065_v35 }
 0x87f   : > { %15090 = vst [vmem:[#allocation32_spill] sm:$0xff] %v13093_v32 }
 0x880   : > { %v6541_v0 = vrot.slane %v4567_v14, 7  ;;  %v4881_v39 = vpop.f32.mrf.mxu3  ;;  %9257 = vmatmul.msk.bf16.vlgmr.msrb.gmra.mxu1 %vm2612_vm6, %v13084_v61  ;;  %v5405_v14 = vpack.c.bf16 %v12665_v31, %v15064_v8 }
 0x882   : > { %v13105_v1 = vsel %vm508_vm3, 0.0, %v6541_v0  ;;  %v6565_v26 = vsel %vm508_vm3, %v6541_v0, 0.0 }
 0x883   : > { %15091 = vst [vmem:[#allocation39_spill] sm:$0xff] %v13105_v1  ;;  %v6591_v41 = vrot.slane %v13105_v1, 1  ;;  %v6592_v29 = vrot.slane %v6565_v26, 1  ;;  %v4840_v20 = vpop.f32.mrf.mxu2 }
 0x884   : > { %v4882_v13 = vadd.f32 %v4881_v39, %v4840_v20  ;;  %v6705_v39 = vrot.slane %v13105_v1, 2 }
 0x885   : > { %v13112_v63 = vsel %vm684_vm4, %v6591_v41, %v6592_v29  ;;  %v4568_v37 = vpop.f32.mrf.mxu1  ;;  %9233 = vmatmul.msk.bf16.vlgmr.msrb.gmra.mxu3 %vm2612_vm6, %v5359_v18  ;;  %v6706_v41 = vrot.slane %v6565_v26, 2 }
 0x886   : > { %15092 = vst [vmem:[#allocation14_spill] sm:$0xff] %v13112_v63  ;;  %v4569_v47 = vadd.f32 %v4568_v37, %v15093_v44  ;;  %v5106_v0 = vpop.f32.mrf.mxu0  ;;  %v13118_v32 = vadd.f32 %v4954_v43, %v4882_v13 }
 0x887   : > { %v13135_v26 = vsel %vm1091_vm5, %v6705_v39, %v6706_v41 }
 0x888   : > { %v6542_v36 = vrot.slane %v4569_v47, 7  ;;  %v5049_v56 = vpop.f32.mrf.mxu3  ;;  %9229 = vmatmul.msk.bf16.vlgmr.msra.gmra.mxu2 %vm2612_vm6, %v5405_v14  ;;  %15095 = vst [vmem:[#allocation21_spill] sm:$0xff] %v13135_v26 }
 0x889   : > { %9237 = vmatmul.msk.bf16.vlgmr.msrb.gmra.mxu0 %vm2612_vm6, %v5519_v2 }
 0x88a   : > { %v13126_v18 = vsel %vm508_vm3, 0.0, %v6542_v36  ;;  %v6566_v44 = vsel %vm508_vm3, %v6542_v36, 0.0  ;;  %v13142_v36 = vpack.c.bf16 %v12823_v57, %v12753_v17 }
 0x88b   : > { %15094 = vst [vmem:[#allocation43_spill] sm:$0xff] %v13126_v18  ;;  %v6594_v43 = vrot.slane %v13126_v18, 1  ;;  %v6595_v29 = vrot.slane %v6566_v44, 1  ;;  %v6708_v20 = vrot.slane %v13126_v18, 2  ;;  %v6709_v13 = vrot.slane %v6566_v44, 2  ;;  %v4990_v47 = vpop.f32.mrf.mxu2 }
 0x88c   : > { %v5010_v14 = vadd.f32 %v4990_v47, %v12933_v38 }
 0x88d   : > { %v13138_v2 = vsel %vm1091_vm5, %v6708_v20, %v6709_v13  ;;  %v4571_v4 = vpop.f32.mrf.mxu1  ;;  %v13145_v19 = vsel %vm684_vm4, %v6594_v43, %v6595_v29 }
 0x88e   : > { %15096 = vst [vmem:[#allocation23_spill] sm:$0xff] %v13138_v2  ;;  %v5069_v37 = vadd.f32 %v5049_v56, %v5010_v14  ;;  %v4572_v38 = vadd.f32 %v4571_v4, %v12695_v59  ;;  %v5108_v47 = vpop.f32.mrf.mxu0 }
 0x88f   : > { %15097 = vst [vmem:[#allocation41_spill] sm:$0xff] %v13145_v19 }
 0x890   : > { %v6543_v41 = vrot.slane %v4572_v38, 7  ;;  %v5051_v20 = vpop.f32.mrf.mxu3  ;;  %9258 = vmatmul.msk.bf16.gmra.mxu1 %vm2612_vm6, %v13142_v36  ;;  %v13154_v13 = vadd.f32 %v5106_v0, %v5069_v37 }
 0x892   : > { %v13157_v43 = vsel %vm508_vm3, 0.0, %v6543_v41  ;;  %v6567_v29 = vsel %vm508_vm3, %v6543_v41, 0.0 }
 0x893   : > { %15098 = vst [vmem:[#allocation16_spill] sm:$0xff] %v13157_v43  ;;  %v13162_v56 = vpack.c.bf16 %v13157_v43, %v13126_v18  ;;  %v6597_v59 = vrot.slane %v13157_v43, 1  ;;  %v6598_v4 = vrot.slane %v6567_v29, 1  ;;  %v6711_v14 = vrot.slane %v13157_v43, 2  ;;  %v4992_v38 = vpop.f32.mrf.mxu2 }
 0x894   : > { %v6712_v39 = vrot.slane %v6567_v29, 2  ;;  %v5011_v44 = vadd.f32 %v4992_v38, %v12951_v12 }
 0x895   : > { %15099 = vst [vmem:[#allocation48_spill] sm:$0xff] %v13162_v56  ;;  %v4573_v0 = vpop.f32.mrf.mxu1  ;;  %9234 = vmatmul.msk.bf16.gmra.mxu3 %vm2612_vm6, %v12711_v34  ;;  %v13170_v37 = vsel %vm684_vm4, %v6597_v59, %v6598_v4 }
 0x896   : > { %15100 = vst [vmem:[#allocation46_spill] sm:$0xff] %v13170_v37  ;;  %v5070_v41 = vadd.f32 %v5051_v20, %v5011_v44  ;;  %v4574_v18 = vadd.f32 %v4573_v0, %v12717_v40  ;;  %v5111_v63 = vpop.f32.mrf.mxu0  ;;  %v13174_v26 = vsel %vm1091_vm5, %v6711_v14, %v6712_v39  ;;  %v13178_v56 = vpack.c.bf16 %v13170_v37, %v13145_v19  ;;  %v15104_v40 = vld [vmem:[#allocation15_spill] sm:$0xff]  ;;  %v15111_v37 = vld [vmem:[#allocation50_spill] sm:$0xff] }
 0x897   : > { %15101 = vst [vmem:[#allocation45_spill] sm:$0xff] %v13174_v26  ;;  %v13182_v12 = vpack.c.bf16 %v13174_v26, %v13138_v2 }
 0x898   : > { %15102 = vst [vmem:[#allocation49_spill] sm:$0xff] %v13178_v56  ;;  %v6544_v29 = vrot.slane %v4574_v18, 7  ;;  %v5054_v38 = vpop.f32.mrf.mxu3  ;;  %9230 = vmatmul.msk.bf16.gmra.mxu2 %vm2612_vm6, %v13084_v61  ;;  %v13186_v44 = vadd.f32 %v5108_v47, %v5070_v41  ;;  %v13201_v41 = vpack.c.bf16 %v12881_v24, %v12826_v42 }
 0x899   : > { %15103 = vst [vmem:[#allocation12_spill] sm:$0xff] %v13182_v12  ;;  %9238 = vmatmul.msk.bf16.gmra.mxu0 %vm2612_vm6, %v15104_v40 }
 0x89a   : > { %v13191_v39 = vsel %vm508_vm3, 0.0, %v6544_v29  ;;  %v6568_v20 = vsel %vm508_vm3, %v6544_v29, 0.0  ;;  %v9664_v29 = vld [vmem:[%s14626_s1 + $0xcc] sm:$0xff] }
 0x89b   : > { %15105 = vst [vmem:[#allocation10_spill] sm:$0xff] %v13191_v39  ;;  %v6600_v59 = vrot.slane %v13191_v39, 1  ;;  %v6601_v4 = vrot.slane %v6568_v20, 1  ;;  %v6714_v14 = vrot.slane %v13191_v39, 2  ;;  %v6715_v18 = vrot.slane %v6568_v20, 2  ;;  %v4995_v0 = vpop.f32.mrf.mxu2  ;;  %6149 = vmatpush.bf16.msra.mxu1 %v9664_v29 }
 0x89c   : > { %v5012_v12 = vadd.f32 %v4995_v0, %v12985_v5 }
 0x89d   : > { %v4576_v47 = vpop.f32.mrf.mxu1  ;;  %v13207_v19 = vsel %vm1091_vm5, %v6714_v14, %v6715_v18  ;;  %v13210_v20 = vsel %vm684_vm4, %v6600_v59, %v6601_v4  ;;  %v9675_v59 = vld [vmem:[%s14626_s1 + $0x124] sm:$0xff] }
 0x89e   : > { %15106 = vst [vmem:[#allocation29_spill] sm:$0xff] %v13207_v19  ;;  %v5071_v56 = vadd.f32 %v5054_v38, %v5012_v12  ;;  %v4577_v5 = vadd.f32 %v4576_v47, %v12759_v10  ;;  %v5113_v0 = vpop.f32.mrf.mxu0  ;;  %5711 = vmatpush.bf16.msra.mxu3 %v9675_v59  ;;  %v9679_v59 = vld [vmem:[%s14626_s1 + $0x144] sm:$0xff] }
 0x89f   : > { %15107 = vst [vmem:[#allocation27_spill] sm:$0xff] %v13210_v20  ;;  %5752 = vmatpush.bf16.msra.mxu0 %v9679_v59 }
 0x8a0   : > { %v6545_v2 = vrot.slane %v4577_v5, 7  ;;  %v5056_v1 = vpop.f32.mrf.mxu3  ;;  %9259 = vmatmul.msk.bf16.gmra.mxu1 %vm2612_vm6, %v13201_v41  ;;  %v13222_v12 = vadd.f32 %v5111_v63, %v5071_v56 }
 0x8a2   : > { %v13225_v10 = vsel %vm508_vm3, 0.0, %v6545_v2  ;;  %v6569_v38 = vsel %vm508_vm3, %v6545_v2, 0.0  ;;  %v9671_v2 = vld [vmem:[%s14626_s1 + $0x104] sm:$0xff] }
 0x8a3   : > { %15108 = vst [vmem:[#allocation7_spill] sm:$0xff] %v13225_v10  ;;  %v13230_v4 = vpack.c.bf16 %v13225_v10, %v13191_v39  ;;  %v6603_v14 = vrot.slane %v13225_v10, 1  ;;  %v6604_v18 = vrot.slane %v6569_v38, 1  ;;  %v6717_v47 = vrot.slane %v13225_v10, 2  ;;  %v4997_v29 = vpop.f32.mrf.mxu2  ;;  %5654 = vmatpush.bf16.msrb.mxu2 %v9671_v2 }
 0x8a4   : > { %v6718_v5 = vrot.slane %v6569_v38, 2  ;;  %v5013_v63 = vadd.f32 %v4997_v29, %v13012_v60 }
 0x8a5   : > { %15109 = vst [vmem:[#allocation6_spill] sm:$0xff] %v13230_v4  ;;  %v4578_v56 = vpop.f32.mrf.mxu1  ;;  %9235 = vmatmul.msk.bf16.gmra.mxu3 %vm2612_vm6, %v12776_v27  ;;  %v13244_v43 = vsel %vm684_vm4, %v6603_v14, %v6604_v18 }
 0x8a6   : > { %15110 = vst [vmem:[#allocation42_spill] sm:$0xff] %v13244_v43  ;;  %v5072_v61 = vadd.f32 %v5056_v1, %v5013_v63  ;;  %v4579_v38 = vadd.f32 %v4578_v56, %v15111_v37  ;;  %v5116_v39 = vpop.f32.mrf.mxu0  ;;  %v13248_v60 = vsel %vm1091_vm5, %v6717_v47, %v6718_v5  ;;  %v13252_v29 = vpack.c.bf16 %v13244_v43, %v13210_v20  ;;  %v15114_v37 = vld [vmem:[#allocation47_spill] sm:$0xff] }
 0x8a7   : > { %v13256_v26 = vpack.c.bf16 %v13248_v60, %v13207_v19 }
 0x8a8   : > { %15112 = vst [vmem:[#allocation30_spill] sm:$0xff] %v13252_v29  ;;  %v6546_v4 = vrot.slane %v4579_v38, 7  ;;  %v5059_v14 = vpop.f32.mrf.mxu3  ;;  %9231 = vmatmul.msk.bf16.gmra.mxu2 %vm2612_vm6, %v13142_v36  ;;  %v13260_v1 = vadd.f32 %v5113_v0, %v5072_v61  ;;  %v5782_v0 = vpack.c.bf16 %v15064_v8, %v12884_v15 }
 0x8a9   : > { %15113 = vst [vmem:[#allocation8_spill] sm:$0xff] %v13256_v26  ;;  %9239 = vmatmul.msk.bf16.gmra.mxu0 %vm2612_vm6, %v15114_v37 }
 0x8aa   : > { %v13265_v18 = vsel %vm508_vm3, 0.0, %v6546_v4  ;;  %v6570_v47 = vsel %vm508_vm3, %v6546_v4, 0.0 }
 0x8ab   : > { %15115 = vst [vmem:[#allocation5_spill] sm:$0xff] %v13265_v18  ;;  %v6606_v5 = vrot.slane %v13265_v18, 1  ;;  %v6607_v63 = vrot.slane %v6570_v47, 1  ;;  %v6720_v56 = vrot.slane %v13265_v18, 2  ;;  %v6721_v2 = vrot.slane %v6570_v47, 2  ;;  %v5000_v59 = vpop.f32.mrf.mxu2 }
 0x8ac   : > { %v5014_v38 = vadd.f32 %v5000_v59, %v13043_v30 }
 0x8ad   : > { %v4581_v61 = vpop.f32.mrf.mxu1  ;;  %v13276_v26 = vsel %vm1091_vm5, %v6720_v56, %v6721_v2  ;;  %v13279_v4 = vsel %vm684_vm4, %v6606_v5, %v6607_v63 }
 0x8ae   : > { %15116 = vst [vmem:[#allocation11_spill] sm:$0xff] %v13279_v4  ;;  %v5073_v20 = vadd.f32 %v5059_v14, %v5014_v38  ;;  %v4582_v29 = vadd.f32 %v4581_v61, %v12844_v3  ;;  %v5118_v47 = vpop.f32.mrf.mxu0 }
 0x8b0   : > { %v6547_v36 = vrot.slane %v4582_v29, 7  ;;  %v5061_v10 = vpop.f32.mrf.mxu3  ;;  %9260 = vmatmul.msk.bf16.gmra.mxu1 %vm2612_vm6, %v5782_v0  ;;  %v13287_v19 = vadd.f32 %v5116_v39, %v5073_v20  ;;  %v15119_v0 = vld [vmem:[#allocation34_spill] sm:$0xff] }
 0x8b2   : > { %v13290_v56 = vsel %vm508_vm3, 0.0, %v6547_v36  ;;  %v6571_v14 = vsel %vm508_vm3, %v6547_v36, 0.0 }
 0x8b3   : > { %15117 = vst [vmem:[#allocation15_spill] sm:$0xff] %v13290_v56  ;;  %v13295_v3 = vpack.c.bf16 %v13290_v56, %v13265_v18  ;;  %v6609_v5 = vrot.slane %v13290_v56, 1  ;;  %v6610_v63 = vrot.slane %v6571_v14, 1  ;;  %v6723_v2 = vrot.slane %v13290_v56, 2  ;;  %v5002_v29 = vpop.f32.mrf.mxu2 }
 0x8b4   : > { %v6724_v38 = vrot.slane %v6571_v14, 2  ;;  %v5015_v61 = vadd.f32 %v5002_v29, %v13063_v48 }
 0x8b5   : > { %v4583_v39 = vpop.f32.mrf.mxu1  ;;  %9236 = vmatmul.msk.bf16.gmra.mxu3 %vm2612_vm6, %v12848_v46  ;;  %v13303_v20 = vsel %vm684_vm4, %v6609_v5, %v6610_v63  ;;  %v15123_v5 = vld [vmem:[#allocation17_spill] sm:$0xff] }
 0x8b6   : > { %15118 = vst [vmem:[#allocation50_spill] sm:$0xff] %v13303_v20  ;;  %v5074_v36 = vadd.f32 %v5061_v10, %v5015_v61  ;;  %v4584_v59 = vadd.f32 %v4583_v39, %v15119_v0  ;;  %v5121_v30 = vpop.f32.mrf.mxu0  ;;  %v13307_v43 = vsel %vm1091_vm5, %v6723_v2, %v6724_v38  ;;  %v13311_v18 = vpack.c.bf16 %v13303_v20, %v13279_v4 }
 0x8b7   : > { %15120 = vst [vmem:[#allocation47_spill] sm:$0xff] %v13307_v43  ;;  %v13315_v48 = vpack.c.bf16 %v13307_v43, %v13276_v26 }
 0x8b8   : > { %15121 = vst [vmem:[#allocation34_spill] sm:$0xff] %v13311_v18  ;;  %v6548_v14 = vrot.slane %v4584_v59, 7  ;;  %v5064_v29 = vpop.f32.mrf.mxu3  ;;  %9232 = vmatmul.msk.bf16.gmra.mxu2 %vm2612_vm6, %v13201_v41  ;;  %v13319_v10 = vadd.f32 %v5118_v47, %v5074_v36 }
 0x8b9   : > { %15122 = vst [vmem:[#allocation52_spill] sm:$0xff] %v13315_v48  ;;  %9240 = vmatmul.msk.bf16.gmra.mxu0 %vm2612_vm6, %v15123_v5 }
 0x8ba   : > { %v13324_v63 = vsel %vm508_vm3, 0.0, %v6548_v14  ;;  %v6572_v2 = vsel %vm508_vm3, %v6548_v14, 0.0  ;;  %v6126_v14 = vpack.c.bf16 %v12922_v54, %v15065_v35 }
 0x8bb   : > { %15124 = vst [vmem:[#allocation17_spill] sm:$0xff] %v13324_v63  ;;  %v6841_v38 = vrot.slane %v13324_v63, 1  ;;  %v6842_v61 = vrot.slane %v6572_v2, 1  ;;  %v6898_v39 = vrot.slane %v13324_v63, 2  ;;  %v6899_v59 = vrot.slane %v6572_v2, 2  ;;  %v5005_v0 = vpop.f32.mrf.mxu2 }
 0x8bc   : > { %v5016_v48 = vadd.f32 %v5005_v0, %v13096_v51  ;;  %v15129_v2 = vpack.c.bf16 %v12693_v45, %v12665_v31 }
 0x8bd   : > { %v13333_v47 = vsel %vm1091_vm5, %v6898_v39, %v6899_v59  ;;  %v13336_v36 = vsel %vm684_vm4, %v6841_v38, %v6842_v61  ;;  %v15127_v61 = vld [vmem:[#allocation31_spill] sm:$0xff] }
 0x8be   : > { %15125 = vst [vmem:[#allocation53_spill] sm:$0xff] %v13333_v47  ;;  %v5075_v4 = vadd.f32 %v5064_v29, %v5016_v48  ;;  %v5123_v18 = vpop.f32.mrf.mxu0  ;;  %v15128_v59 = vpack.c.bf16 %v15127_v61, %v12673_v23 }
 0x8bf   : > { %15126 = vst [vmem:[#allocation54_spill] sm:$0xff] %v13336_v36 }
 0x8c0   : > { %v5066_v0 = vpop.f32.mrf.mxu3  ;;  %9309 = vmatmul.msk.bf16.vlgmr.msra.gmra.mxu1 %vm2612_vm6, %v6126_v14  ;;  %v13345_v41 = vadd.f32 %v5121_v30, %v5075_v4  ;;  %v13360_v4 = vpop.f32.mrf.mxu1 }
 0x8c3   : > { %v5007_v39 = vpop.f32.mrf.mxu2 }
 0x8c4   : > { %v5017_v38 = vadd.f32 %v5007_v39, %v13118_v32 }
 0x8c5   : > { %9249 = vmatmul.msk.bf16.vlgmr.msra.gmra.mxu3 %vm2612_vm6, %v15128_v59 }
 0x8c6   : > { %v5076_v48 = vadd.f32 %v5066_v0, %v5017_v38  ;;  %v5229_v29 = vpop.f32.mrf.mxu0  ;;  %v13365_v0 = vpack.c.bf16 %v12976_v16, %v12927_v50  ;;  %v15131_v38 = vld [vmem:[#allocation13_spill] sm:$0xff] }
 0x8c8   : > { %v5188_v56 = vpop.f32.mrf.mxu3  ;;  %9245 = vmatmul.msk.bf16.vlgmr.msrb.gmra.mxu2 %vm2612_vm6, %v15129_v2  ;;  %v13356_v51 = vadd.f32 %v5123_v18, %v5076_v48  ;;  %v13371_v18 = vpop.f32.mrf.mxu1  ;;  %v15130_v2 = vld [vmem:[#allocation33_spill] sm:$0xff]  ;;  %v15133_v48 = vpack.c.bf16 %v12753_v17, %v12747_v52  ;;  %v13394_v17 = vpack.c.bf16 %v13034_v28, %v12979_v53 }
 0x8c9   : > { %9253 = vmatmul.msk.bf16.vlgmr.msra.gmra.mxu0 %vm2612_vm6, %v12711_v34 }
 0x8cb   : > { %v5147_v32 = vpop.f32.mrf.mxu2 }
 0x8cc   : > { %v5167_v23 = vadd.f32 %v5147_v32, %v13154_v13  ;;  %v15132_v13 = vpack.c.bf16 %v15130_v2, %v15131_v38  ;;  %v15134_v2 = vld [vmem:[#allocation51_spill] sm:$0xff]  ;;  %v15135_v38 = vld [vmem:[#allocation44_spill] sm:$0xff] }
 0x8ce   : > { %v5208_v30 = vadd.f32 %v5188_v56, %v5167_v23  ;;  %v5231_v14 = vpop.f32.mrf.mxu0  ;;  %v9680_v23 = vld [vmem:[%s14626_s1 + $0x14c] sm:$0xff] }
 0x8cf   : > { %6359 = vmatpush.bf16.msrb.mxu1 %v9680_v23 }
 0x8d0   : > { %v5190_v39 = vpop.f32.mrf.mxu3  ;;  %9310 = vmatmul.msk.bf16.gmra.mxu1 %vm2612_vm6, %v13365_v0  ;;  %v13369_v31 = vadd.f32 %v5229_v29, %v5208_v30  ;;  %v13390_v30 = vpop.f32.mrf.mxu1 }
 0x8d3   : > { %v5149_v45 = vpop.f32.mrf.mxu2 }
 0x8d4   : > { %v5168_v34 = vadd.f32 %v5149_v45, %v13186_v44 }
 0x8d5   : > { %9250 = vmatmul.msk.bf16.gmra.mxu3 %vm2612_vm6, %v15132_v13  ;;  %v15136_v13 = vpack.c.bf16 %v15134_v2, %v15135_v38  ;;  %v15139_v38 = vld [vmem:[#allocation26_spill] sm:$0xff] }
 0x8d6   : > { %v5209_v56 = vadd.f32 %v5190_v39, %v5168_v34  ;;  %v5234_v61 = vpop.f32.mrf.mxu0 }
 0x8d8   : > { %v5193_v59 = vpop.f32.mrf.mxu3  ;;  %9246 = vmatmul.msk.bf16.gmra.mxu2 %vm2612_vm6, %v15133_v48  ;;  %v13382_v29 = vadd.f32 %v5231_v14, %v5209_v56  ;;  %v9687_v56 = vld [vmem:[%s14626_s1 + $0x184] sm:$0xff] }
 0x8d9   : > { %9254 = vmatmul.msk.bf16.gmra.mxu0 %vm2612_vm6, %v12776_v27  ;;  %v9660_v27 = vld [vmem:[%s14626_s1 + $0xac] sm:$0xff]  ;;  %5834 = vmatpush.bf16.msra.mxu2 %v9687_v56 }
 0x8da   : > { %6035 = vmatpush.bf16.msrb.mxu3 %v9660_v27 }
 0x8db   : > { %v5152_v32 = vpop.f32.mrf.mxu2 }
 0x8dc   : > { %v5169_v44 = vadd.f32 %v5152_v32, %v13222_v12  ;;  %v13414_v32 = vpop.f32.mrf.mxu1 }
 0x8de   : > { %v5210_v39 = vadd.f32 %v5193_v59, %v5169_v44  ;;  %v5236_v45 = vpop.f32.mrf.mxu0  ;;  %v9656_v59 = vld [vmem:[%s14626_s1 + $0x8c] sm:$0xff]  ;;  %v15137_v44 = vpack.c.bf16 %v12826_v42, %v12823_v57 }
 0x8df   : > { %6076 = vmatpush.bf16.msrb.mxu0 %v9656_v59 }
 0x8e0   : > { %v5195_v52 = vpop.f32.mrf.mxu3  ;;  %9311 = vmatmul.msk.bf16.gmra.mxu1 %vm2612_vm6, %v13394_v17  ;;  %v13401_v12 = vadd.f32 %v5234_v61, %v5210_v39 }
 0x8e3   : > { %v5154_v14 = vpop.f32.mrf.mxu2 }
 0x8e4   : > { %v5170_v34 = vadd.f32 %v5154_v14, %v13260_v1  ;;  %v13433_v57 = vpop.f32.mrf.mxu1 }
 0x8e5   : > { %9251 = vmatmul.msk.bf16.gmra.mxu3 %vm2612_vm6, %v15136_v13  ;;  %v15140_v13 = vld [vmem:[#allocation35_spill] sm:$0xff] }
 0x8e6   : > { %v5211_v48 = vadd.f32 %v5195_v52, %v5170_v34  ;;  %v5239_v61 = vpop.f32.mrf.mxu0  ;;  %v13427_v34 = vpack.c.bf16 %v13087_v25, %v13037_v58 }
 0x8e8   : > { %v5198_v1 = vpop.f32.mrf.mxu3  ;;  %9247 = vmatmul.msk.bf16.gmra.mxu2 %vm2612_vm6, %v15137_v44  ;;  %v13420_v23 = vadd.f32 %v5236_v45, %v5211_v48  ;;  %v5741_v48 = vpack.c.bf16 0.0, %v12873_v21  ;;  %v15142_v44 = vpack.c.bf16 %v12884_v15, %v12881_v24  ;;  %v6012_v15 = vpack.c.bf16 %v12903_v22, %v15064_v8 }
 0x8e9   : > { %9255 = vmatmul.msk.bf16.gmra.mxu0 %vm2612_vm6, %v12848_v46 }
 0x8eb   : > { %v5157_v39 = vpop.f32.mrf.mxu2 }
 0x8ec   : > { %v5171_v27 = vadd.f32 %v5157_v39, %v13287_v19  ;;  %v15141_v19 = vpack.c.bf16 %v15139_v38, %v15140_v13  ;;  %v13448_v39 = vpop.f32.mrf.mxu1 }
 0x8ee   : > { %v5212_v52 = vadd.f32 %v5198_v1, %v5171_v27  ;;  %v5241_v14 = vpop.f32.mrf.mxu0 }
 0x8f0   : > { %v5200_v2 = vpop.f32.mrf.mxu3  ;;  %9312 = vmatmul.msk.bf16.gmra.mxu1 %vm2612_vm6, %v13427_v34  ;;  %v13431_v42 = vadd.f32 %v5239_v61, %v5212_v52  ;;  %v5967_v52 = vpack.c.bf16 %v12941_v6, %v12914_v7 }
 0x8f2   : > { %15138 = vst [vmem:[#allocation31_spill] sm:$0xff] %v13431_v42  ;;  %v15151_v42 = vld [vmem:[#allocation20_spill] sm:$0xff] }
 0x8f3   : > { %v5159_v45 = vpop.f32.mrf.mxu2 }
 0x8f4   : > { %v5172_v46 = vadd.f32 %v5159_v45, %v13319_v10  ;;  %v13460_v13 = vpop.f32.mrf.mxu1 }
 0x8f5   : > { %9252 = vmatmul.msk.bf16.gmra.mxu3 %vm2612_vm6, %v15141_v19 }
 0x8f6   : > { %v5213_v56 = vadd.f32 %v5200_v2, %v5172_v46  ;;  %v5244_v59 = vpop.f32.mrf.mxu0 }
 0x8f8   : > { %v5203_v1 = vpop.f32.mrf.mxu3  ;;  %9248 = vmatmul.msk.bf16.gmra.mxu2 %vm2612_vm6, %v15142_v44  ;;  %v13445_v61 = vadd.f32 %v5241_v14, %v5213_v56  ;;  %v5966_v56 = vpack.c.bf16 %v12898_v62, %v15063_v49 }
 0x8f9   : > { %9256 = vmatmul.msk.bf16.gmra.mxu0 %vm2612_vm6, %v5741_v48 }
 0x8fa   : > { %15143 = vst [vmem:[#allocation33_spill] sm:$0xff] %v13445_v61 }
 0x8fb   : > { %v5162_v10 = vpop.f32.mrf.mxu2 }
 0x8fc   : > { %v5173_v27 = vadd.f32 %v5162_v10, %v13345_v41 }
 0x8fe   : > { %v5214_v2 = vadd.f32 %v5203_v1, %v5173_v27  ;;  %v5246_v21 = vpop.f32.mrf.mxu0 }
 0x900   : > { %v5205_v45 = vpop.f32.mrf.mxu3  ;;  %9325 = vmatmul.msk.bf16.vlgmr.msrb.gmra.mxu1 %vm2612_vm6, %v5967_v52  ;;  %v13454_v24 = vadd.f32 %v5244_v59, %v5214_v2  ;;  %v13473_v2 = vpop.f32.mrf.mxu1 }
 0x902   : > { %15144 = vst [vmem:[#allocation13_spill] sm:$0xff] %v13454_v24  ;;  %v15148_v24 = vld [vmem:[#allocation37_spill] sm:$0xff] }
 0x903   : > { %v5164_v14 = vpop.f32.mrf.mxu2  ;;  %v6348_v61 = vpack.c.bf16 0.0, %v15148_v24 }
 0x904   : > { %v5174_v46 = vadd.f32 %v5164_v14, %v13356_v51  ;;  %v5968_v51 = vpack.c.bf16 %v12993_v11, %v12963_v33 }
 0x905   : > { %9301 = vmatmul.msk.bf16.vlgmr.msrb.gmra.mxu3 %vm2612_vm6, %v6012_v15 }
 0x906   : > { %v5215_v41 = vadd.f32 %v5205_v45, %v5174_v46  ;;  %v5544_v19 = vpop.f32.mrf.mxu0 }
 0x908   : > { %v5471_v48 = vpop.f32.mrf.mxu3  ;;  %9261 = vmatmul.msk.bf16.vlgmr.msra.gmra.mxu2 %vm2612_vm6, %v15104_v40  ;;  %v13466_v59 = vadd.f32 %v5246_v21, %v5215_v41  ;;  %v13483_v41 = vpop.f32.mrf.mxu1 }
 0x909   : > { %9305 = vmatmul.msk.bf16.vlgmr.msrb.gmra.mxu0 %vm2612_vm6, %v5966_v56 }
 0x90a   : > { %15145 = vst [vmem:[#allocation51_spill] sm:$0xff] %v13466_v59 }
 0x90b   : > { %v5430_v1 = vpop.f32.mrf.mxu2 }
 0x90c   : > { %v5472_v44 = vadd.f32 %v5471_v48, %v5430_v1  ;;  %v9657_v48 = vld [vmem:[%s14626_s1 + $0x94] sm:$0xff] }
 0x90d   : > { %v15146_v1 = vld [vmem:[#allocation19_spill] sm:$0xff]  ;;  %6683 = vmatpush.bf16.msra.mxu1 %v9657_v48 }
 0x90e   : > { %v13471_v10 = vadd.f32 %v5544_v19, %v5472_v44  ;;  %v5546_v27 = vpop.f32.mrf.mxu0  ;;  %v5969_v44 = vpack.c.bf16 %v15146_v1, %v13024_v9 }
 0x910   : > { %v5473_v45 = vpop.f32.mrf.mxu3  ;;  %9326 = vmatmul.msk.bf16.gmra.mxu1 %vm2612_vm6, %v5968_v51 }
 0x913   : > { %v5432_v15 = vpop.f32.mrf.mxu2 }
 0x914   : > { %v5474_v14 = vadd.f32 %v5473_v45, %v5432_v15 }
 0x915   : > { %9302 = vmatmul.msk.bf16.gmra.mxu3 %vm2612_vm6, %v12955_v55 }
 0x916   : > { %v13478_v40 = vadd.f32 %v5546_v27, %v5474_v14  ;;  %v5549_v21 = vpop.f32.mrf.mxu0  ;;  %v13496_v14 = vpop.f32.mrf.mxu1 }
 0x918   : > { %v5476_v46 = vpop.f32.mrf.mxu3  ;;  %9262 = vmatmul.msk.bf16.gmra.mxu2 %vm2612_vm6, %v15114_v37  ;;  %v9672_v37 = vld [vmem:[%s14626_s1 + $0x10c] sm:$0xff] }
 0x919   : > { %9306 = vmatmul.msk.bf16.gmra.mxu0 %vm2612_vm6, %v5967_v52  ;;  %6261 = vmatpush.bf16.msra.mxu3 %v9672_v37 }
 0x91b   : > { %v5435_v19 = vpop.f32.mrf.mxu2 }
 0x91c   : > { %v5477_v56 = vadd.f32 %v5476_v46, %v5435_v19  ;;  %v15147_v19 = vld [vmem:[#allocation9_spill] sm:$0xff] }
 0x91e   : > { %v13490_v27 = vadd.f32 %v5549_v21, %v5477_v56  ;;  %v5551_v45 = vpop.f32.mrf.mxu0  ;;  %v9668_v21 = vld [vmem:[%s14626_s1 + $0xec] sm:$0xff]  ;;  %v13511_v36 = vpop.f32.mrf.mxu1 }
 0x91f   : > { %v9676_v56 = vld [vmem:[%s14626_s1 + $0x12c] sm:$0xff]  ;;  %6202 = vmatpush.bf16.msrb.mxu2 %v9668_v21 }
 0x920   : > { %v5478_v15 = vpop.f32.mrf.mxu3  ;;  %9327 = vmatmul.msk.bf16.gmra.mxu1 %vm2612_vm6, %v5969_v44  ;;  %6318 = vmatpush.bf16.msra.mxu0 %v9676_v56  ;;  %v15149_v56 = vld [vmem:[#allocation18_spill] sm:$0xff] }
 0x923   : > { %v5437_v52 = vpop.f32.mrf.mxu2 }
 0x924   : > { %v5479_v46 = vadd.f32 %v5478_v15, %v5437_v52 }
 0x925   : > { %9303 = vmatmul.msk.bf16.gmra.mxu3 %vm2612_vm6, %v15147_v19 }
 0x926   : > { %v13506_v48 = vadd.f32 %v5551_v45, %v5479_v46  ;;  %v5554_v20 = vpop.f32.mrf.mxu0 }
 0x928   : > { %v5481_v37 = vpop.f32.mrf.mxu3  ;;  %9263 = vmatmul.msk.bf16.gmra.mxu2 %vm2612_vm6, %v15123_v5 }
 0x929   : > { %9307 = vmatmul.msk.bf16.gmra.mxu0 %vm2612_vm6, %v5968_v51 }
 0x92b   : > { %v5440_v15 = vpop.f32.mrf.mxu2 }
 0x92c   : > { %v5482_v52 = vadd.f32 %v5481_v37, %v5440_v15  ;;  %v5823_v37 = vpack.c.bf16 %v15065_v35, %v15139_v38  ;;  %v13523_v15 = vpop.f32.mrf.mxu1 }
 0x92e   : > { %v13513_v63 = vadd.f32 %v5554_v20, %v5482_v52  ;;  %v5556_v59 = vpop.f32.mrf.mxu0 }
 0x930   : > { %v5483_v45 = vpop.f32.mrf.mxu3  ;;  %9328 = vmatmul.msk.bf16.gmra.mxu1 %vm2612_vm6, %v6348_v61 }
 0x933   : > { %v5442_v46 = vpop.f32.mrf.mxu2 }
 0x934   : > { %v5484_v21 = vadd.f32 %v5483_v45, %v5442_v46  ;;  %v15150_v45 = vld [vmem:[#allocation39_spill] sm:$0xff]  ;;  %v13532_v47 = vpop.f32.mrf.mxu1 }
 0x935   : > { %9304 = vmatmul.msk.bf16.gmra.mxu3 %vm2612_vm6, %v15149_v56  ;;  %v6573_v46 = vpack.c.bf16 %v15150_v45, %v15063_v49 }
 0x936   : > { %v13519_v5 = vadd.f32 %v5556_v59, %v5484_v21  ;;  %v5559_v51 = vpop.f32.mrf.mxu0 }
 0x938   : > { %v5486_v20 = vpop.f32.mrf.mxu3  ;;  %9264 = vmatmul.msk.bf16.gmra.mxu2 %vm2612_vm6, %v5823_v37  ;;  %v15152_v37 = vpack.c.bf16 %v15151_v42, %v12903_v22 }
 0x939   : > { %9308 = vmatmul.msk.bf16.gmra.mxu0 %vm2612_vm6, %v5969_v44 }
 0x93b   : > { %v5445_v52 = vpop.f32.mrf.mxu2 }
 0x93c   : > { %v5487_v61 = vadd.f32 %v5486_v20, %v5445_v52  ;;  %v13550_v42 = vpop.f32.mrf.mxu1 }
 0x93e   : > { %v13529_v43 = vadd.f32 %v5559_v51, %v5487_v61  ;;  %v5561_v59 = vpop.f32.mrf.mxu0  ;;  %v15153_v51 = vpack.c.bf16 %v12914_v7, %v12898_v62  ;;  %v15154_v61 = vpack.c.bf16 %v12927_v50, %v12922_v54  ;;  %v5618_v7 = vadd.f32 %v13371_v18, %v13478_v40 }
 0x93f   : > { %v15160_v18 = vpack.c.bf16 %v12979_v53, %v12976_v16  ;;  %v5619_v40 = vadd.f32 %v13390_v30, %v13490_v27  ;;  %v9688_v53 = vld [vmem:[%s14626_s1 + $0x18c] sm:$0xff]  ;;  %v5620_v30 = vadd.f32 %v13414_v32, %v13506_v48  ;;  %v15165_v48 = vpack.c.bf16 %v13024_v9, %v12993_v11 }
 0x940   : > { %v5488_v21 = vpop.f32.mrf.mxu3  ;;  %9377 = vmatmul.msk.bf16.vlgmr.msra.gmra.mxu1 %vm2612_vm6, %v6573_v46  ;;  %v5617_v46 = vadd.f32 %v13360_v4, %v13471_v10  ;;  %6441 = vmatpush.bf16.msrb.mxu3 %v9688_v53 }
 0x943   : > { %v5447_v38 = vpop.f32.mrf.mxu2 }
 0x944   : > { %v5489_v35 = vadd.f32 %v5488_v21, %v5447_v38  ;;  %v13562_v10 = vpop.f32.mrf.mxu1 }
 0x945   : > { %9317 = vmatmul.msk.bf16.vlgmr.msra.gmra.mxu3 %vm2612_vm6, %v15152_v37  ;;  %v15155_v37 = vld [vmem:[#allocation48_spill] sm:$0xff] }
 0x946   : > { %v13538_v44 = vadd.f32 %v5561_v59, %v5489_v35  ;;  %v5754_v20 = vpop.f32.mrf.mxu0 }
 0x948   : > { %v5713_v52 = vpop.f32.mrf.mxu3  ;;  %9313 = vmatmul.msk.bf16.vlgmr.msrb.gmra.mxu2 %vm2612_vm6, %v15153_v51  ;;  %v15156_v51 = vld [vmem:[#allocation36_spill] sm:$0xff] }
 0x949   : > { %9321 = vmatmul.msk.bf16.vlgmr.msra.gmra.mxu0 %vm2612_vm6, %v15154_v61  ;;  %v15157_v61 = vld [vmem:[#allocation24_spill] sm:$0xff] }
 0x94a   : > { %v15158_v4 = vpack.c.bf16 %v15156_v51, %v15157_v61  ;;  %v15162_v61 = vld [vmem:[#allocation25_spill] sm:$0xff] }
 0x94b   : > { %v5656_v22 = vpop.f32.mrf.mxu2 }
 0x94c   : > { %v5676_v35 = vadd.f32 %v5656_v22, %v5617_v46 }
 0x94e   : > { %v5733_v59 = vadd.f32 %v5713_v52, %v5676_v35  ;;  %v5756_v21 = vpop.f32.mrf.mxu0  ;;  %v15159_v35 = vpack.c.bf16 %v12963_v33, %v12941_v6  ;;  %v13579_v33 = vpop.f32.mrf.mxu1 }
 0x950   : > { %v5715_v38 = vpop.f32.mrf.mxu3  ;;  %9378 = vmatmul.msk.bf16.gmra.mxu1 %vm2612_vm6, %v15155_v37  ;;  %v13554_v62 = vadd.f32 %v5754_v20, %v5733_v59 }
 0x953   : > { %v5658_v54 = vpop.f32.mrf.mxu2 }
 0x954   : > { %v5677_v50 = vadd.f32 %v5658_v54, %v5618_v7 }
 0x955   : > { %9318 = vmatmul.msk.bf16.gmra.mxu3 %vm2612_vm6, %v15158_v4  ;;  %v15163_v4 = vld [vmem:[#allocation40_spill] sm:$0xff] }
 0x956   : > { %v5734_v52 = vadd.f32 %v5715_v38, %v5677_v50  ;;  %v5759_v46 = vpop.f32.mrf.mxu0  ;;  %v9677_v38 = vld [vmem:[%s14626_s1 + $0x134] sm:$0xff]  ;;  %v15161_v50 = vld [vmem:[#allocation6_spill] sm:$0xff] }
 0x957   : > { %6925 = vmatpush.bf16.msrb.mxu1 %v9677_v38  ;;  %v5621_v38 = vadd.f32 %v13433_v57, %v13513_v63 }
 0x958   : > { %v5718_v22 = vpop.f32.mrf.mxu3  ;;  %9314 = vmatmul.msk.bf16.gmra.mxu2 %vm2612_vm6, %v15159_v35  ;;  %v13568_v20 = vadd.f32 %v5756_v21, %v5734_v52  ;;  %v15164_v52 = vpack.c.bf16 %v15162_v61, %v15163_v4  ;;  %v15168_v61 = vld [vmem:[#allocation38_spill] sm:$0xff] }
 0x959   : > { %9322 = vmatmul.msk.bf16.gmra.mxu0 %vm2612_vm6, %v15160_v18 }
 0x95b   : > { %v5661_v59 = vpop.f32.mrf.mxu2 }
 0x95c   : > { %v5678_v7 = vadd.f32 %v5661_v59, %v5619_v40  ;;  %v15166_v59 = vpack.c.bf16 %v13037_v58, %v13034_v28  ;;  %v5622_v28 = vadd.f32 %v13448_v39, %v13519_v5  ;;  %v15171_v39 = vld [vmem:[#allocation32_spill] sm:$0xff] }
 0x95d   : > { %v15172_v5 = vpack.c.bf16 %v15171_v39, %v13087_v25  ;;  %v5624_v25 = vadd.f32 %v13473_v2, %v13538_v44 }
 0x95e   : > { %v5735_v54 = vadd.f32 %v5718_v22, %v5678_v7  ;;  %v5761_v6 = vpop.f32.mrf.mxu0  ;;  %v9684_v22 = vld [vmem:[%s14626_s1 + $0x16c] sm:$0xff]  ;;  %v13610_v7 = vpop.f32.mrf.mxu1 }
 0x95f   : > { %6400 = vmatpush.bf16.msra.mxu2 %v9684_v22  ;;  %v15170_v22 = vpack.c.bf16 %v15148_v24, %v15146_v1  ;;  %v15173_v24 = vld [vmem:[#allocation23_spill] sm:$0xff]  ;;  %v15174_v1 = vld [vmem:[#allocation21_spill] sm:$0xff] }
 0x960   : > { %v5720_v21 = vpop.f32.mrf.mxu3  ;;  %9379 = vmatmul.msk.bf16.gmra.mxu1 %vm2612_vm6, %v15161_v50  ;;  %v13586_v16 = vadd.f32 %v5759_v46, %v5735_v54  ;;  %v9661_v46 = vld [vmem:[%s14626_s1 + $0xb4] sm:$0xff] }
 0x961   : > { %6642 = vmatpush.bf16.msrb.mxu0 %v9661_v46 }
 0x963   : > { %v5663_v27 = vpop.f32.mrf.mxu2 }
 0x964   : > { %v5679_v51 = vadd.f32 %v5663_v27, %v5620_v30 }
 0x965   : > { %9319 = vmatmul.msk.bf16.gmra.mxu3 %vm2612_vm6, %v15164_v52 }
 0x966   : > { %v5736_v35 = vadd.f32 %v5720_v21, %v5679_v51  ;;  %v5764_v18 = vpop.f32.mrf.mxu0  ;;  %v13620_v58 = vpop.f32.mrf.mxu1  ;;  %v15167_v51 = vld [vmem:[#allocation28_spill] sm:$0xff] }
 0x967   : > { %v15169_v63 = vpack.c.bf16 %v15167_v51, %v15168_v61 }
 0x968   : > { %v5723_v32 = vpop.f32.mrf.mxu3  ;;  %9315 = vmatmul.msk.bf16.gmra.mxu2 %vm2612_vm6, %v15165_v48  ;;  %v13604_v40 = vadd.f32 %v5761_v6, %v5736_v35  ;;  %v5623_v35 = vadd.f32 %v13460_v13, %v13529_v43 }
 0x969   : > { %9323 = vmatmul.msk.bf16.gmra.mxu0 %vm2612_vm6, %v15166_v59 }
 0x96b   : > { %v5666_v54 = vpop.f32.mrf.mxu2 }
 0x96c   : > { %v5680_v21 = vadd.f32 %v5666_v54, %v5621_v38 }
 0x96e   : > { %v5737_v53 = vadd.f32 %v5723_v32, %v5680_v21  ;;  %v5766_v30 = vpop.f32.mrf.mxu0  ;;  %v13638_v48 = vpop.f32.mrf.mxu1  ;;  %v15175_v21 = vpack.c.bf16 %v15173_v24, %v15174_v1 }
 0x970   : > { %v5725_v27 = vpop.f32.mrf.mxu3  ;;  %9380 = vmatmul.msk.bf16.gmra.mxu1 %vm2612_vm6, %v13295_v3  ;;  %v13616_v11 = vadd.f32 %v5764_v18, %v5737_v53 }
 0x973   : > { %v5668_v9 = vpop.f32.mrf.mxu2 }
 0x974   : > { %v5681_v6 = vadd.f32 %v5668_v9, %v5622_v28  ;;  %v15176_v28 = vld [vmem:[#allocation14_spill] sm:$0xff] }
 0x975   : > { %9320 = vmatmul.msk.bf16.gmra.mxu3 %vm2612_vm6, %v15169_v63  ;;  %v6619_v9 = vpack.c.bf16 %v15176_v28, %v15064_v8 }
 0x976   : > { %v5738_v57 = vadd.f32 %v5725_v27, %v5681_v6  ;;  %v5769_v4 = vpop.f32.mrf.mxu0  ;;  %v13652_v6 = vpop.f32.mrf.mxu1 }
 0x978   : > { %v5728_v52 = vpop.f32.mrf.mxu3  ;;  %9316 = vmatmul.msk.bf16.gmra.mxu2 %vm2612_vm6, %v15170_v22  ;;  %v13630_v46 = vadd.f32 %v5766_v30, %v5738_v57 }
 0x979   : > { %9324 = vmatmul.msk.bf16.gmra.mxu0 %vm2612_vm6, %v15172_v5  ;;  %v15177_v5 = vld [vmem:[#allocation29_spill] sm:$0xff] }
 0x97b   : > { %v5671_v18 = vpop.f32.mrf.mxu2 }
 0x97c   : > { %v5682_v32 = vadd.f32 %v5671_v18, %v5623_v35  ;;  %v15178_v35 = vld [vmem:[#allocation45_spill] sm:$0xff] }
 0x97d   : > { %v15179_v18 = vpack.c.bf16 %v15177_v5, %v15178_v35 }
 0x97e   : > { %v5739_v59 = vadd.f32 %v5728_v52, %v5682_v32  ;;  %v5771_v38 = vpop.f32.mrf.mxu0  ;;  %v13672_v32 = vpop.f32.mrf.mxu1 }
 0x980   : > { %v5730_v54 = vpop.f32.mrf.mxu3  ;;  %9393 = vmatmul.msk.bf16.vlgmr.msrb.gmra.mxu1 %vm2612_vm6, %v15175_v21  ;;  %v13644_v53 = vadd.f32 %v5769_v4, %v5739_v59  ;;  %v5816_v59 = vadd.f32 %v13496_v14, %v13568_v20  ;;  %v15180_v21 = vld [vmem:[#allocation49_spill] sm:$0xff]  ;;  %v5817_v14 = vadd.f32 %v13511_v36, %v13586_v16  ;;  %v9669_v36 = vld [vmem:[%s14626_s1 + $0xf4] sm:$0xff]  ;;  %v5818_v16 = vadd.f32 %v13523_v15, %v13604_v40 }
 0x981   : > { %6809 = vmatpush.bf16.msra.mxu3 %v9669_v36 }
 0x983   : > { %v5673_v30 = vpop.f32.mrf.mxu2 }
 0x984   : > { %v5683_v27 = vadd.f32 %v5673_v30, %v5624_v25 }
 0x985   : > { %9333 = vmatmul.msk.bf16.vlgmr.msrb.gmra.mxu3 %vm2612_vm6, %v13365_v0  ;;  %v5815_v0 = vadd.f32 %v13483_v41, %v13554_v62 }
 0x986   : > { %v5740_v43 = vadd.f32 %v5730_v54, %v5683_v27  ;;  %v6078_v13 = vpop.f32.mrf.mxu0  ;;  %v13689_v25 = vpop.f32.mrf.mxu1 }
 0x988   : > { %v6037_v61 = vpop.f32.mrf.mxu3  ;;  %9329 = vmatmul.msk.bf16.vlgmr.msra.gmra.mxu2 %vm2612_vm6, %v12955_v55  ;;  %v13656_v63 = vadd.f32 %v5771_v38, %v5740_v43 }
 0x989   : > { %v13658_v57 = vadd.f32 %v6078_v13, %v6037_v61  ;;  %9373 = vmatmul.msk.bf16.vlgmr.msrb.gmra.mxu0 %vm2612_vm6, %v6619_v9 }
 0x98b   : > { %v5836_v2 = vpop.f32.mrf.mxu2 }
 0x98c   : > { %v5856_v44 = vadd.f32 %v5836_v2, %v5815_v0  ;;  %v15182_v0 = vld [vmem:[#allocation30_spill] sm:$0xff]  ;;  %v5819_v2 = vadd.f32 %v13532_v47, %v13616_v11 }
 0x98d   : > { %v15187_v11 = vld [vmem:[#allocation22_spill] sm:$0xff] }
 0x98e   : > { %v13664_v4 = vadd.f32 %v5856_v44, %v13369_v31  ;;  %v6080_v52 = vpop.f32.mrf.mxu0  ;;  %v13713_v9 = vpop.f32.mrf.mxu1 }
 0x990   : > { %v6039_v22 = vpop.f32.mrf.mxu3  ;;  %9394 = vmatmul.msk.bf16.gmra.mxu1 %vm2612_vm6, %v15179_v18 }
 0x991   : > { %v13670_v55 = vadd.f32 %v6080_v52, %v6039_v22  ;;  %v15183_v22 = vld [vmem:[#allocation31_spill] sm:$0xff] }
 0x993   : > { %v5838_v41 = vpop.f32.mrf.mxu2 }
 0x994   : > { %v5857_v62 = vadd.f32 %v5838_v41, %v5816_v59  ;;  %v15184_v59 = vld [vmem:[#allocation53_spill] sm:$0xff]  ;;  %v15185_v41 = vld [vmem:[#allocation47_spill] sm:$0xff] }
 0x995   : > { %9334 = vmatmul.msk.bf16.gmra.mxu3 %vm2612_vm6, %v13394_v17 }
 0x996   : > { %v13679_v31 = vadd.f32 %v5857_v62, %v13382_v29  ;;  %v6083_v38 = vpop.f32.mrf.mxu0  ;;  %v13729_v35 = vpop.f32.mrf.mxu1 }
 0x998   : > { %v6042_v54 = vpop.f32.mrf.mxu3  ;;  %9330 = vmatmul.msk.bf16.gmra.mxu2 %vm2612_vm6, %v15147_v19  ;;  %v15181_v19 = vpack.c.bf16 %v13276_v26, %v13248_v60  ;;  %v9665_v26 = vld [vmem:[%s14626_s1 + $0xd4] sm:$0xff] }
 0x999   : > { %v13683_v24 = vadd.f32 %v6083_v38, %v6042_v54  ;;  %9374 = vmatmul.msk.bf16.gmra.mxu0 %vm2612_vm6, %v15180_v21  ;;  %v9673_v60 = vld [vmem:[%s14626_s1 + $0x114] sm:$0xff]  ;;  %6756 = vmatpush.bf16.msrb.mxu2 %v9665_v26  ;;  %v5820_v38 = vadd.f32 %v13550_v42, %v13630_v46  ;;  %v6430_v54 = vpack.c.bf16 %v15187_v11, %v15171_v39  ;;  %v15189_v42 = vld [vmem:[#allocation34_spill] sm:$0xff] }
 0x99a   : > { %6868 = vmatpush.bf16.msra.mxu0 %v9673_v60  ;;  %v5821_v46 = vadd.f32 %v13562_v10, %v13644_v53  ;;  %v6733_v10 = vpack.c.bf16 %v15174_v1, %v15187_v11  ;;  %v15193_v53 = vld [vmem:[#allocation51_spill] sm:$0xff] }
 0x99b   : > { %v5841_v20 = vpop.f32.mrf.mxu2 }
 0x99c   : > { %v5858_v17 = vadd.f32 %v5841_v20, %v5817_v14  ;;  %v15188_v20 = vld [vmem:[#allocation33_spill] sm:$0xff] }
 0x99e   : > { %v13692_v29 = vadd.f32 %v5858_v17, %v13401_v12  ;;  %v6085_v30 = vpop.f32.mrf.mxu0 }
 0x9a0   : > { %v6044_v27 = vpop.f32.mrf.mxu3  ;;  %9395 = vmatmul.msk.bf16.gmra.mxu1 %vm2612_vm6, %v15181_v19 }
 0x9a1   : > { %v13698_v43 = vadd.f32 %v6085_v30, %v6044_v27  ;;  %v6389_v27 = vpack.c.bf16 %v15064_v8, %v15167_v51  ;;  %v5822_v51 = vadd.f32 %v13579_v33, %v13656_v63 }
 0x9a3   : > { %v5843_v13 = vpop.f32.mrf.mxu2 }
 0x9a4   : > { %v5859_v12 = vadd.f32 %v5843_v13, %v5818_v16  ;;  %v15190_v13 = vld [vmem:[#allocation13_spill] sm:$0xff] }
 0x9a5   : > { %9335 = vmatmul.msk.bf16.gmra.mxu3 %vm2612_vm6, %v13427_v34 }
 0x9a6   : > { %v13716_v61 = vadd.f32 %v5859_v12, %v13420_v23  ;;  %v6088_v15 = vpop.f32.mrf.mxu0 }
 0x9a8   : > { %v6047_v40 = vpop.f32.mrf.mxu3  ;;  %9331 = vmatmul.msk.bf16.gmra.mxu2 %vm2612_vm6, %v15149_v56  ;;  %v15186_v56 = vpack.c.bf16 %v15184_v59, %v15185_v41  ;;  %v15194_v41 = vld [vmem:[#allocation41_spill] sm:$0xff] }
 0x9a9   : > { %v13720_v34 = vadd.f32 %v6088_v15, %v6047_v40  ;;  %9375 = vmatmul.msk.bf16.gmra.mxu0 %vm2612_vm6, %v15182_v0  ;;  %v15195_v33 = vpack.c.bf16 %v15194_v41, %v15176_v28 }
 0x9ab   : > { %v5846_v44 = vpop.f32.mrf.mxu2 }
 0x9ac   : > { %v5860_v52 = vadd.f32 %v5846_v44, %v5819_v2  ;;  %v15191_v44 = vld [vmem:[#allocation43_spill] sm:$0xff] }
 0x9ae   : > { %v13727_v23 = vadd.f32 %v5860_v52, %v15183_v22  ;;  %v6090_v5 = vpop.f32.mrf.mxu0  ;;  %v15192_v52 = vpack.c.bf16 %v15191_v44, %v15150_v45  ;;  %v6171_v45 = vadd.f32 %v13610_v7, %v13658_v57  ;;  %v15199_v57 = vld [vmem:[#allocation12_spill] sm:$0xff] }
 0x9b0   : > { %v6049_v18 = vpop.f32.mrf.mxu3  ;;  %9396 = vmatmul.msk.bf16.gmra.mxu1 %vm2612_vm6, %v15186_v56 }
 0x9b1   : > { %v13735_v62 = vadd.f32 %v6090_v5, %v6049_v18 }
 0x9b3   : > { %v5848_v47 = vpop.f32.mrf.mxu2 }
 0x9b4   : > { %v5861_v14 = vadd.f32 %v5848_v47, %v5820_v38 }
 0x9b5   : > { %9336 = vmatmul.msk.bf16.gmra.mxu3 %vm2612_vm6, %v6430_v54 }
 0x9b6   : > { %v13743_v17 = vadd.f32 %v5861_v14, %v15188_v20  ;;  %v6093_v30 = vpop.f32.mrf.mxu0  ;;  %v6172_v14 = vadd.f32 %v13620_v58, %v13670_v55  ;;  %v6173_v58 = vadd.f32 %v13638_v48, %v13683_v24  ;;  %v6361_v55 = vpop.f32.mrf.mxu1  ;;  %v15203_v48 = vld [vmem:[#allocation5_spill] sm:$0xff]  ;;  %v15204_v24 = vld [vmem:[#allocation7_spill] sm:$0xff] }
 0x9b8   : > { %v6052_v19 = vpop.f32.mrf.mxu3  ;;  %9332 = vmatmul.msk.bf16.gmra.mxu2 %vm2612_vm6, %v6389_v27  ;;  %v15196_v27 = vld [vmem:[#allocation10_spill] sm:$0xff] }
 0x9b9   : > { %v13748_v36 = vadd.f32 %v6093_v30, %v6052_v19  ;;  %9376 = vmatmul.msk.bf16.gmra.mxu0 %vm2612_vm6, %v15189_v42  ;;  %v15197_v19 = vld [vmem:[#allocation16_spill] sm:$0xff] }
 0x9ba   : > { %v15198_v28 = vpack.c.bf16 %v15196_v27, %v15197_v19  ;;  %v6175_v27 = vadd.f32 %v13672_v32, %v13720_v34 }
 0x9bb   : > { %v5851_v39 = vpop.f32.mrf.mxu2 }
 0x9bc   : > { %v5862_v16 = vadd.f32 %v5851_v39, %v5821_v46 }
 0x9be   : > { %v13755_v12 = vadd.f32 %v5862_v16, %v15190_v13  ;;  %v6095_v26 = vpop.f32.mrf.mxu0  ;;  %v15200_v13 = vld [vmem:[#allocation27_spill] sm:$0xff] }
 0x9c0   : > { %v6054_v60 = vpop.f32.mrf.mxu3 }
 0x9c1   : > { %v13757_v15 = vadd.f32 %v6095_v26, %v6054_v60  ;;  %v15201_v26 = vld [vmem:[#allocation46_spill] sm:$0xff] }
 0x9c2   : > { %v15202_v60 = vpack.c.bf16 %v15200_v13, %v15201_v26 }
 0x9c3   : > { %v5853_v40 = vpop.f32.mrf.mxu2 }
 0x9c4   : > { %v5863_v2 = vadd.f32 %v5853_v40, %v5822_v51 }
 0x9c5   : > { %9385 = vmatmul.msk.bf16.vlgmr.msra.gmra.mxu3 %vm2612_vm6, %v15192_v52 }
 0x9c6   : > { %v13768_v22 = vadd.f32 %v5863_v2, %v15193_v53  ;;  %v6320_v5 = vpop.f32.mrf.mxu0 }
 0x9c8   : > { %v6263_v18 = vpop.f32.mrf.mxu3  ;;  %9381 = vmatmul.msk.bf16.vlgmr.msrb.gmra.mxu2 %vm2612_vm6, %v6733_v10  ;;  %v9685_v10 = vld [vmem:[%s14626_s1 + $0x174] sm:$0xff] }
 0x9c9   : > { %9389 = vmatmul.msk.bf16.vlgmr.msra.gmra.mxu0 %vm2612_vm6, %v15195_v33  ;;  %7007 = vmatpush.bf16.msrb.mxu3 %v9685_v10  ;;  %v6363_v33 = vpop.f32.mrf.mxu1  ;;  %v15213_v10 = vld [vmem:[#allocation52_spill] sm:$0xff] }
 0x9cb   : > { %v6204_v63 = vpop.f32.mrf.mxu2 }
 0x9cc   : > { %v6224_v56 = vadd.f32 %v6204_v63, %v6171_v45  ;;  %v15205_v45 = vpack.c.bf16 %v15203_v48, %v15204_v24  ;;  %v9681_v63 = vld [vmem:[%s14626_s1 + $0x154] sm:$0xff]  ;;  %v15215_v48 = vld [vmem:[#allocation50_spill] sm:$0xff] }
 0x9cd   : > { %6966 = vmatpush.bf16.msra.mxu2 %v9681_v63 }
 0x9ce   : > { %v6283_v38 = vadd.f32 %v6263_v18, %v6224_v56  ;;  %v6322_v47 = vpop.f32.mrf.mxu0  ;;  %v9689_v56 = vld [vmem:[%s14626_s1 + $0x194] sm:$0xff] }
 0x9cf   : > { %7048 = vmatpush.bf16.msrb.mxu0 %v9689_v56 }
 0x9d0   : > { %v6265_v1 = vpop.f32.mrf.mxu3  ;;  %v13777_v54 = vadd.f32 %v6320_v5, %v6283_v38  ;;  %v6174_v5 = vadd.f32 %v13652_v6, %v13698_v43  ;;  %v15206_v43 = vld [vmem:[#allocation8_spill] sm:$0xff] }
 0x9d3   : > { %v6206_v20 = vpop.f32.mrf.mxu2 }
 0x9d4   : > { %v6225_v30 = vadd.f32 %v6206_v20, %v6172_v14  ;;  %v15207_v14 = vld [vmem:[#allocation11_spill] sm:$0xff]  ;;  %v15208_v20 = vld [vmem:[#allocation42_spill] sm:$0xff] }
 0x9d5   : > { %9386 = vmatmul.msk.bf16.gmra.mxu3 %vm2612_vm6, %v15198_v28 }
 0x9d6   : > { %v6284_v46 = vadd.f32 %v6265_v1, %v6225_v30  ;;  %v6325_v39 = vpop.f32.mrf.mxu0  ;;  %v15209_v30 = vpack.c.bf16 %v15207_v14, %v15208_v20 }
 0x9d8   : > { %v6268_v7 = vpop.f32.mrf.mxu3  ;;  %9382 = vmatmul.msk.bf16.gmra.mxu2 %vm2612_vm6, %v15199_v57  ;;  %v13787_v16 = vadd.f32 %v6322_v47, %v6284_v46 }
 0x9d9   : > { %9390 = vmatmul.msk.bf16.gmra.mxu0 %vm2612_vm6, %v15202_v60  ;;  %v6176_v60 = vadd.f32 %v13689_v25, %v13735_v62  ;;  %v6177_v25 = vadd.f32 %v13713_v9, %v13748_v36 }
 0x9db   : > { %v6209_v51 = vpop.f32.mrf.mxu2 }
 0x9dc   : > { %v6226_v40 = vadd.f32 %v6209_v51, %v6173_v58 }
 0x9de   : > { %v6285_v2 = vadd.f32 %v6268_v7, %v6226_v40  ;;  %v6327_v44 = vpop.f32.mrf.mxu0  ;;  %v6366_v7 = vpop.f32.mrf.mxu1  ;;  %v15210_v40 = vld [vmem:[#allocation17_spill] sm:$0xff] }
 0x9e0   : > { %v6270_v52 = vpop.f32.mrf.mxu3  ;;  %v13798_v53 = vadd.f32 %v6325_v39, %v6285_v2  ;;  %v15211_v2 = vld [vmem:[#allocation15_spill] sm:$0xff] }
 0x9e3   : > { %v6211_v18 = vpop.f32.mrf.mxu2 }
 0x9e4   : > { %v6227_v41 = vadd.f32 %v6211_v18, %v6174_v5 }
 0x9e5   : > { %9387 = vmatmul.msk.bf16.gmra.mxu3 %vm2612_vm6, %v15205_v45 }
 0x9e6   : > { %v6286_v38 = vadd.f32 %v6270_v52, %v6227_v41  ;;  %v6330_v47 = vpop.f32.mrf.mxu0  ;;  %v6368_v18 = vpop.f32.mrf.mxu1  ;;  %v15214_v41 = vld [vmem:[#allocation54_spill] sm:$0xff] }
 0x9e7   : > { %v15216_v24 = vpack.c.bf16 %v15214_v41, %v15215_v48 }
 0x9e8   : > { %v6273_v6 = vpop.f32.mrf.mxu3  ;;  %9383 = vmatmul.msk.bf16.gmra.mxu2 %vm2612_vm6, %v15206_v43  ;;  %v13814_v1 = vadd.f32 %v6327_v44, %v6286_v38  ;;  %v15212_v44 = vpack.c.bf16 %v15210_v40, %v15211_v2 }
 0x9e9   : > { %9391 = vmatmul.msk.bf16.gmra.mxu0 %vm2612_vm6, %v15209_v30 }
 0x9ea   : > { %v6384_v48 = vadd.f32 %v6368_v18, %v13814_v1 }
 0x9eb   : > { %v6214_v19 = vpop.f32.mrf.mxu2 }
 0x9ec   : > { %v6228_v28 = vadd.f32 %v6214_v19, %v6175_v27 }
 0x9ee   : > { %v6287_v46 = vadd.f32 %v6273_v6, %v6228_v28  ;;  %v6332_v39 = vpop.f32.mrf.mxu0  ;;  %v6178_v6 = vadd.f32 %v13729_v35, %v13757_v15  ;;  %v6371_v14 = vpop.f32.mrf.mxu1  ;;  %v6381_v35 = vadd.f32 %v6361_v55, %v13777_v54 }
 0x9f0   : > { %v6275_v13 = vpop.f32.mrf.mxu3  ;;  %v13822_v26 = vadd.f32 %v6330_v47, %v6287_v46 }
 0x9f3   : > { %v6216_v58 = vpop.f32.mrf.mxu2 }
 0x9f4   : > { %v6229_v51 = vadd.f32 %v6216_v58, %v6176_v60  ;;  %v6382_v58 = vadd.f32 %v6363_v33, %v13787_v16 }
 0x9f5   : > { %9388 = vmatmul.msk.bf16.gmra.mxu3 %vm2612_vm6, %v15212_v44 }
 0x9f6   : > { %v6288_v52 = vadd.f32 %v6275_v13, %v6229_v51  ;;  %v6335_v32 = vpop.f32.mrf.mxu0  ;;  %v6373_v46 = vpop.f32.mrf.mxu1 }
 0x9f8   : > { %v6278_v34 = vpop.f32.mrf.mxu3  ;;  %9384 = vmatmul.msk.bf16.gmra.mxu2 %vm2612_vm6, %v15213_v10  ;;  %v13832_v5 = vadd.f32 %v6332_v39, %v6288_v52 }
 0x9f9   : > { %9392 = vmatmul.msk.bf16.gmra.mxu0 %vm2612_vm6, %v15216_v24 }
 0x9fb   : > { %v6219_v62 = vpop.f32.mrf.mxu2 }
 0x9fc   : > { %v6230_v45 = vadd.f32 %v6219_v62, %v6177_v25 }
 0x9fe   : > { %v6289_v63 = vadd.f32 %v6278_v34, %v6230_v45  ;;  %v6337_v56 = vpop.f32.mrf.mxu0  ;;  %v6376_v54 = vpop.f32.mrf.mxu1 }
 0xa00   : > { %v6280_v38 = vpop.f32.mrf.mxu3  ;;  %v13840_v47 = vadd.f32 %v6335_v32, %v6289_v63 }
 0xa03   : > { %v6221_v20 = vpop.f32.mrf.mxu2 }
 0xa04   : > { %v6231_v30 = vadd.f32 %v6221_v20, %v6178_v6  ;;  %v6955_v20 = vpack.c.bf16 0.0, %v15210_v40 }
 0xa05   : > { %9401 = vmatmul.msk.bf16.vlgmr.msrb.gmra.mxu3 %vm2612_vm6, %v15180_v21 }
 0xa06   : > { %v6290_v27 = vadd.f32 %v6280_v38, %v6231_v30  ;;  %v13846_v19 = vpop.f32.mrf.mxu0 }
 0xa08   : > { %v6443_v9 = vpop.f32.mrf.mxu3  ;;  %9397 = vmatmul.msk.bf16.vlgmr.msra.gmra.mxu2 %vm2612_vm6, %v15155_v37  ;;  %v13850_v36 = vadd.f32 %v6337_v56, %v6290_v27  ;;  %v6386_v56 = vadd.f32 %v6373_v46, %v13832_v5 }
 0xa09   : > { %9405 = vmatmul.msk.bf16.vlgmr.msrb.gmra.mxu0 %vm2612_vm6, %v15199_v57 }
 0xa0b   : > { %v6402_v15 = vpop.f32.mrf.mxu2 }
 0xa0c   : > { %v6422_v28 = vadd.f32 %v6402_v15, %v6381_v35 }
 0xa0e   : > { %v6463_v39 = vadd.f32 %v6443_v9, %v6422_v28  ;;  %v13855_v13 = vpop.f32.mrf.mxu0 }
 0xa10   : > { %v13858_v21 = vadd.f32 %v6463_v39, %v13664_v4  ;;  %v6445_v60 = vpop.f32.mrf.mxu3  ;;  %v6383_v4 = vadd.f32 %v6366_v7, %v13798_v53 }
 0xa13   : > { %v6404_v37 = vpop.f32.mrf.mxu2 }
 0xa14   : > { %v6423_v51 = vadd.f32 %v6404_v37, %v6382_v58 }
 0xa15   : > { %9402 = vmatmul.msk.bf16.gmra.mxu3 %vm2612_vm6, %v15182_v0 }
 0xa16   : > { %v6464_v57 = vadd.f32 %v6445_v60, %v6423_v51  ;;  %v13863_v2 = vpop.f32.mrf.mxu0 }
 0xa18   : > { %v13866_v55 = vadd.f32 %v6464_v57, %v13679_v31  ;;  %v6448_v44 = vpop.f32.mrf.mxu3  ;;  %9398 = vmatmul.msk.bf16.gmra.mxu2 %vm2612_vm6, %v15161_v50  ;;  %v6378_v31 = vpop.f32.mrf.mxu1 }
 0xa19   : > { %9406 = vmatmul.msk.bf16.gmra.mxu0 %vm2612_vm6, %v15206_v43 }
 0xa1b   : > { %v6407_v16 = vpop.f32.mrf.mxu2 }
 0xa1c   : > { %v6424_v33 = vadd.f32 %v6407_v16, %v6383_v4 }
 0xa1e   : > { %v6465_v52 = vadd.f32 %v6448_v44, %v6424_v33  ;;  %v13873_v0 = vpop.f32.mrf.mxu0 }
 0xa20   : > { %v13876_v32 = vadd.f32 %v6465_v52, %v13692_v29  ;;  %v6450_v34 = vpop.f32.mrf.mxu3  ;;  %v6385_v29 = vadd.f32 %v6371_v14, %v13822_v26  ;;  %v13891_v1 = vpop.f32.mrf.mxu1 }
 0xa23   : > { %v6409_v24 = vpop.f32.mrf.mxu2 }
 0xa24   : > { %v6425_v25 = vadd.f32 %v6409_v24, %v6384_v48 }
 0xa25   : > { %9403 = vmatmul.msk.bf16.gmra.mxu3 %vm2612_vm6, %v15189_v42 }
 0xa26   : > { %v6466_v50 = vadd.f32 %v6450_v34, %v6425_v25  ;;  %v13881_v43 = vpop.f32.mrf.mxu0 }
 0xa28   : > { %v13884_v53 = vadd.f32 %v6466_v50, %v13716_v61  ;;  %v6453_v7 = vpop.f32.mrf.mxu3  ;;  %9399 = vmatmul.msk.bf16.gmra.mxu2 %vm2612_vm6, %v13295_v3  ;;  %v6996_v3 = vpack.c.bf16 %v15064_v8, %v15214_v41  ;;  %v13901_v6 = vpop.f32.mrf.mxu1  ;;  %v6387_v41 = vadd.f32 %v6376_v54, %v13840_v47 }
 0xa29   : > { %9407 = vmatmul.msk.bf16.gmra.mxu0 %vm2612_vm6, %v15213_v10 }
 0xa2b   : > { %v6412_v18 = vpop.f32.mrf.mxu2 }
 0xa2c   : > { %v6426_v62 = vadd.f32 %v6412_v18, %v6385_v29 }
 0xa2e   : > { %v6467_v42 = vadd.f32 %v6453_v7, %v6426_v62  ;;  %v13893_v45 = vpop.f32.mrf.mxu0 }
 0xa30   : > { %v13896_v63 = vadd.f32 %v6467_v42, %v13727_v23  ;;  %v6455_v61 = vpop.f32.mrf.mxu3  ;;  %v7037_v23 = vpack.c.bf16 %v15187_v11, %v15184_v59  ;;  %v6690_v28 = vpop.f32.mrf.mxu1 }
 0xa33   : > { %v6414_v38 = vpop.f32.mrf.mxu2 }
 0xa34   : > { %v6427_v10 = vadd.f32 %v6414_v38, %v6386_v56  ;;  %v9690_v56 = vld [vmem:[%s14626_s1 + $0x19c] sm:$0xff] }
 0xa35   : > { %9404 = vmatmul.msk.bf16.gmra.mxu3 %vm2612_vm6, %v6996_v3  ;;  %7278 = vmatpush.bf16.msrb.mxu2 %v9690_v56 }
 0xa36   : > { %v6468_v26 = vadd.f32 %v6455_v61, %v6427_v10  ;;  %v13904_v14 = vpop.f32.mrf.mxu0  ;;  %v9691_v10 = vld [vmem:[%s14626_s1 + $0x1a4] sm:$0xff] }
 0xa37   : > { %7231 = vmatpush.bf16.msra.mxu1 %v9691_v10  ;;  %v6691_v10 = vadd.f32 %v6690_v28, %v13863_v2 }
 0xa38   : > { %v13910_v30 = vadd.f32 %v6468_v26, %v13743_v17  ;;  %v6458_v5 = vpop.f32.mrf.mxu3  ;;  %9400 = vmatmul.msk.bf16.gmra.mxu2 %vm2612_vm6, %v6955_v20  ;;  %v6388_v17 = vadd.f32 %v6378_v31, %v13850_v36  ;;  %v6692_v51 = vpop.f32.mrf.mxu1  ;;  %v9692_v26 = vld [vmem:[%s14626_s1 + $0x1ac] sm:$0xff]  ;;  %v6686_v20 = vadd.f32 %v13891_v1, %v13846_v19 }
 0xa39   : > { %9408 = vmatmul.msk.bf16.gmra.mxu0 %vm2612_vm6, %v7037_v23  ;;  %7357 = vmatpush.bf16.msra.mxu3 %v9692_v26  ;;  %v6693_v2 = vadd.f32 %v6692_v51, %v13873_v0 }
 0xa3b   : > { %v6417_v27 = vpop.f32.mrf.mxu2 }
 0xa3c   : > { %v6428_v9 = vadd.f32 %v6417_v27, %v6387_v41  ;;  %v9693_v27 = vld [vmem:[%s14626_s1 + $0x1b4] sm:$0xff] }
 0xa3d   : > { %7416 = vmatpush.bf16.msra.mxu0 %v9693_v27 }
 0xa3e   : > { %v6469_v35 = vadd.f32 %v6458_v5, %v6428_v9  ;;  %v13915_v15 = vpop.f32.mrf.mxu0 }
 0xa40   : > { %v13918_v40 = vadd.f32 %v6469_v35, %v13755_v12  ;;  %v6460_v59 = vpop.f32.mrf.mxu3  ;;  %v13924_v4 = vpop.f32.mrf.mxu1 }
 0xa42   : > { %15217 = vst [vmem:[#allocation44_spill] sm:$0xff] %v13918_v40 }
 0xa43   : > { %v6419_v46 = vpop.f32.mrf.mxu2 }
 0xa44   : > { %v6429_v39 = vadd.f32 %v6419_v46, %v6388_v17 }
 0xa46   : > { %v6470_v60 = vadd.f32 %v6460_v59, %v6429_v39  ;;  %v6870_v58 = vpop.f32.mrf.mxu0  ;;  %v6688_v59 = vadd.f32 %v13901_v6, %v13855_v13  ;;  %v13982_v13 = vld [vmem:[%s14627_s2 + $0x4] ss:$0 sm:$0xff] }
 0xa48   : > { %v13922_v37 = vadd.f32 %v6470_v60, %v13768_v22  ;;  %v6811_v47 = vpop.f32.mrf.mxu3  ;;  %v13928_v36 = vpop.f32.mrf.mxu1 }
 0xa4a   : > { %15218 = vst [vmem:[#allocation26_spill] sm:$0xff] %v13922_v37 }
 0xa4b   : > { %v6758_v57 = vpop.f32.mrf.mxu2 }
 0xa4c   : > { %v6778_v23 = vadd.f32 %v6758_v57, %v6686_v20 }
 0xa4e   : > { %v6872_v54 = vpop.f32.mrf.mxu0  ;;  %v6831_v9 = vadd.f32 %v6811_v47, %v6778_v23 }
 0xa50   : > { %v6813_v44 = vpop.f32.mrf.mxu3  ;;  %v13936_v24 = vpop.f32.mrf.mxu1  ;;  %v6890_v46 = vadd.f32 %v6870_v58, %v6831_v9 }
 0xa53   : > { %v6760_v16 = vpop.f32.mrf.mxu2 }
 0xa54   : > { %v6779_v19 = vadd.f32 %v6760_v16, %v6688_v59 }
 0xa56   : > { %v13926_v12 = vpop.f32.mrf.mxu0  ;;  %v6832_v60 = vadd.f32 %v6813_v44, %v6779_v19 }
 0xa58   : > { %v6816_v33 = vpop.f32.mrf.mxu3  ;;  %v13946_v18 = vpop.f32.mrf.mxu1  ;;  %v6891_v23 = vadd.f32 %v6872_v54, %v6832_v60 }
 0xa5b   : > { %v6763_v52 = vpop.f32.mrf.mxu2 }
 0xa5c   : > { %v6780_v20 = vadd.f32 %v6763_v52, %v6691_v10 }
 0xa5e   : > { %v13930_v34 = vpop.f32.mrf.mxu0  ;;  %v6833_v58 = vadd.f32 %v6816_v33, %v6780_v20 }
 0xa60   : > { %v13932_v31 = vpop.f32.mrf.mxu3  ;;  %v6927_v38 = vpop.f32.mrf.mxu1  ;;  %v6892_v19 = vadd.f32 %v13926_v12, %v6833_v58  ;;  %v6696_v12 = vadd.f32 %v13924_v4, %v13881_v43 }
 0xa61   : > { %v6947_v57 = vadd.f32 %v6927_v38, %v6890_v46 }
 0xa63   : > { %v6765_v22 = vpop.f32.mrf.mxu2 }
 0xa64   : > { %v6781_v9 = vadd.f32 %v6765_v22, %v6693_v2 }
 0xa66   : > { %v13934_v48 = vpop.f32.mrf.mxu0  ;;  %v6834_v60 = vadd.f32 %v13932_v31, %v6781_v9 }
 0xa68   : > { %v13938_v25 = vpop.f32.mrf.mxu3  ;;  %v6929_v17 = vpop.f32.mrf.mxu1 }
 0xa69   : > { %v6948_v16 = vadd.f32 %v6929_v17, %v6891_v23 }
 0xa6b   : > { %v13940_v50 = vpop.f32.mrf.mxu2 }
 0xa6c   : > { %v6782_v43 = vadd.f32 %v13940_v50, %v6696_v12 }
 0xa6e   : > { %v13942_v7 = vpop.f32.mrf.mxu0  ;;  %v6835_v50 = vadd.f32 %v13938_v25, %v6782_v43 }
 0xa70   : > { %v13944_v29 = vpop.f32.mrf.mxu3  ;;  %v6932_v27 = vpop.f32.mrf.mxu1 }
 0xa73   : > { %v13948_v62 = vpop.f32.mrf.mxu2 }
 0xa76   : > { %v13950_v42 = vpop.f32.mrf.mxu0 }
 0xa78   : > { %v13952_v61 = vpop.f32.mrf.mxu3 }
 0xa7b   : > { %v13957_v3 = vpop.f32.mrf.mxu2 }
 0xa7e   : > { %v13967_v5 = vpop.f32.mrf.mxu0 }
 0xa80   : > { %v13969_v41 = vpop.f32.mrf.mxu3 }
 0xa83   : > { %v13974_v35 = vpop.f32.mrf.mxu2 }
 0xa86   : > { %v7050_v1 = vpop.f32.mrf.mxu0 }
 0xa88   : > { %v7009_v39 = vpop.f32.mrf.mxu3 }
 0xa8b   : > { %v6968_v56 = vpop.f32.mrf.mxu2 }
 0xa8c   : > { %v6988_v26 = vadd.f32 %v6968_v56, %v6947_v57  ;;  %v6949_v56 = vadd.f32 %v6932_v27, %v6892_v19 }
 0xa8e   : > { %v7029_v37 = vadd.f32 %v7009_v39, %v6988_v26  ;;  %v7052_v47 = vpop.f32.mrf.mxu0 }
 0xa90   : > { %v7070_v40 = vadd.f32 %v7050_v1, %v7029_v37  ;;  %v7011_v6 = vpop.f32.mrf.mxu3 }
 0xa92   : > { %v7078_v44 = vadd.f32 %v7070_v40, %v13858_v21  ;;  %v6934_v21 = vpop.f32.mrf.mxu1 }
 0xa93   : > { %v6970_v38 = vpop.f32.mrf.mxu2 }
 0xa94   : > { %v7088_v28 = vadd.f32 %v13982_v13, %v7078_v44  ;;  %v6989_v52 = vadd.f32 %v6970_v38, %v6948_v16 }
 0xa96   : > { %v7124_v54 = vrot.slane %v7088_v28, 7  ;;  %v7030_v59 = vadd.f32 %v7011_v6, %v6989_v52  ;;  %v7055_v37 = vpop.f32.mrf.mxu0  ;;  %v6893_v6 = vadd.f32 %v13930_v34, %v6834_v60 }
 0xa98   : > { %v7140_v1 = vsel %vm508_vm3, 0.0, %v7124_v54  ;;  %v7148_v46 = vsel %vm508_vm3, %v7124_v54, 0.0  ;;  %v7071_v33 = vadd.f32 %v7052_v47, %v7030_v59  ;;  %v7014_v39 = vpop.f32.mrf.mxu3  ;;  %v6950_v19 = vadd.f32 %v6934_v21, %v6893_v6 }
 0xa99   : > { %v7156_v40 = vpack.c.bf16 %v7140_v1, %v15063_v49  ;;  %v7174_v17 = vrot.slane %v7140_v1, 1  ;;  %v7175_v0 = vrot.slane %v7148_v46, 1  ;;  %v7300_v51 = vrot.slane %v7140_v1, 2 }
 0xa9a   : > { %v7301_v22 = vrot.slane %v7148_v46, 2  ;;  %v7079_v57 = vadd.f32 %v7071_v33, %v13866_v55  ;;  %v6937_v34 = vpop.f32.mrf.mxu1  ;;  %v6698_v33 = vadd.f32 %v13928_v36, %v13893_v45 }
 0xa9b   : > { %v13996_v10 = vsel %vm684_vm4, %v7174_v17, %v7175_v0  ;;  %v6973_v26 = vpop.f32.mrf.mxu2  ;;  %9421 = vmatmul.msk.bf16.vlgmr.msrb.gmra.mxu2 %vm2612_vm6, %v7156_v40  ;;  %v6894_v0 = vadd.f32 %v13934_v48, %v6835_v50  ;;  %v6701_v48 = vadd.f32 %v13936_v24, %v13904_v14 }
 0xa9c   : > { %v14000_v20 = vsel %vm1091_vm5, %v7300_v51, %v7301_v22  ;;  %v7089_v47 = vadd.f32 %v13982_v13, %v7079_v57  ;;  %v6990_v23 = vadd.f32 %v6973_v26, %v6949_v56  ;;  %v7202_v31 = vpack.c.bf16 %v13996_v10, %v15064_v8 }
 0xa9d   : > { %v7328_v55 = vpack.c.bf16 %v14000_v20, %v15187_v11  ;;  %v6783_v45 = vadd.f32 %v13948_v62, %v6698_v33  ;;  %v6784_v24 = vadd.f32 %v13957_v3, %v6701_v48 }
 0xa9e   : > { %v7125_v4 = vrot.slane %v7089_v47, 7  ;;  %v7031_v27 = vadd.f32 %v7014_v39, %v6990_v23  ;;  %9413 = vmatmul.msk.bf16.vlgmr.msra.gmra.mxu1 %vm2612_vm6, %v7202_v31  ;;  %v7057_v58 = vpop.f32.mrf.mxu0 }
 0xa9f   : > { %9429 = vmatmul.msk.bf16.vlgmr.msra.gmra.mxu3 %vm2612_vm6, %v7328_v55  ;;  %v6836_v31 = vadd.f32 %v13944_v29, %v6783_v45  ;;  %v6951_v55 = vadd.f32 %v6937_v34, %v6894_v0 }
 0xaa0   : > { %v7141_v44 = vsel %vm508_vm3, 0.0, %v7125_v4  ;;  %v7149_v16 = vsel %vm508_vm3, %v7125_v4, 0.0  ;;  %v7072_v38 = vadd.f32 %v7055_v37, %v7031_v27  ;;  %v7016_v2 = vpop.f32.mrf.mxu3 }
 0xaa1   : > { %v7387_v28 = vpack.c.bf16 %v7141_v44, %v7140_v1  ;;  %v7177_v52 = vrot.slane %v7141_v44, 1  ;;  %v7178_v9 = vrot.slane %v7149_v16, 1  ;;  %v7303_v54 = vrot.slane %v7141_v44, 2 }
 0xaa2   : > { %v7080_v59 = vadd.f32 %v7072_v38, %v13876_v32  ;;  %v7304_v46 = vrot.slane %v7149_v16, 2 }
 0xaa3   : > { %v6975_v39 = vpop.f32.mrf.mxu2  ;;  %9437 = vmatmul.msk.bf16.vlgmr.msra.gmra.mxu0 %vm2612_vm6, %v7387_v28  ;;  %v14019_v37 = vsel %vm684_vm4, %v7177_v52, %v7178_v9 }
 0xaa4   : > { %v7090_v1 = vadd.f32 %v13982_v13, %v7080_v59  ;;  %v6991_v40 = vadd.f32 %v6975_v39, %v6950_v19  ;;  %v7452_v25 = vpack.c.bf16 %v14019_v37, %v13996_v10  ;;  %v14025_v32 = vsel %vm1091_vm5, %v7303_v54, %v7304_v46  ;;  %v9698_v10 = vld [vmem:[%s14626_s1 + $0x1dc] sm:$0xff] }
 0xaa5   : > { %v7515_v21 = vpack.c.bf16 %v14025_v32, %v14000_v20  ;;  %v6837_v46 = vadd.f32 %v13952_v61, %v6784_v24  ;;  %v9696_v24 = vld [vmem:[%s14626_s1 + $0x1cc] sm:$0xff]  ;;  %v9772_v20 = vld [vmem:[%s14627_s2 + $0x6] ss:$0 sm:$0xff] }
 0xaa6   : > { %v7126_v36 = vrot.slane %v7090_v1, 7  ;;  %v7032_v17 = vadd.f32 %v7016_v2, %v6991_v40  ;;  %v7060_v26 = vpop.f32.mrf.mxu0  ;;  %v6895_v2 = vadd.f32 %v13942_v7, %v6836_v31  ;;  %v6703_v7 = vadd.f32 %v13946_v18, %v13915_v15  ;;  %7591 = vmatpush.bf16.msrb.mxu3 %v9696_v24  ;;  %7734 = vrot.lane.b32.xlu0 %v9772_v20, %s9844_s8  ;;  %s9790_s8 = sshra.s32 %s8516_s7, 4  ;;  %s9791_s8 = int_to_ptr.hbm [resolvable:$true] %s9790_s8 }
 0xaa7   : > { %s9792_s9 = scalar_lea.hbm %s9791_s8, 64  ;;  %p9797_p0 = scmp.lt.s32.totalorder %s9791_s8, %s14629_s4 }
 0xaa8   : > { %v7142_v51 = vsel %vm508_vm3, 0.0, %v7126_v36  ;;  %v7150_v60 = vsel %vm508_vm3, %v7126_v36, 0.0  ;;  %v7073_v22 = vadd.f32 %v7057_v58, %v7032_v17  ;;  %v7019_v57 = vpop.f32.mrf.mxu3  ;;  %v9695_v36 = vld [vmem:[%s14626_s1 + $0x1c4] sm:$0xff]  ;;  %p9793_p11 = scmp.ne.s32.totalorder %s9791_s8, %s9792_s9  ;;  %p9798_p1 = scmp.lt.s32.totalorder %s9796_s12, %s9792_s9 }
 0xaa9   : > { %v7181_v56 = vrot.slane %v7150_v60, 1  ;;  %v7307_v12 = vrot.slane %v7150_v60, 2  ;;  %v14033_v47 = vpack.c.bf16 %v7142_v51, %v7141_v44  ;;  %v7180_v23 = vrot.slane %v7142_v51, 1  ;;  %v6939_v44 = vpop.f32.mrf.mxu1  ;;  %7544 = vmatpush.bf16.msra.mxu2 %v9695_v36 }
 0xaaa   : > { %v7081_v62 = vadd.f32 %v7073_v22, %v13884_v53  ;;  %v7306_v43 = vrot.slane %v7142_v51, 2  ;;  %v6952_v33 = vadd.f32 %v6939_v44, %v6895_v2  ;;  %p9794_p12 = pnand %p9793_p11, %p9911_p5  ;;  %p9799_p2 = por %p9798_p1, %p9797_p0 }
 0xaab   : > { %v6978_v4 = vpop.f32.mrf.mxu2  ;;  %9422 = vmatmul.msk.bf16.gmra.mxu2 %vm2612_vm6, %v14033_v47  ;;  %v14042_v27 = vsel %vm684_vm4, %v7180_v23, %v7181_v56 }
 0xaac   : > { %v7091_v6 = vadd.f32 %v13982_v13, %v7081_v62  ;;  %v6992_v58 = vadd.f32 %v6978_v4, %v6951_v55  ;;  %v14047_v29 = vpack.c.bf16 %v14042_v27, %v14019_v37  ;;  %v14050_v53 = vsel %vm1091_vm5, %v7306_v43, %v7307_v12  ;;  %p9795_p13 = pneg %p9794_p12 }
 0xaad   : > { %v14054_v14 = vpack.c.bf16 %v14050_v53, %v14025_v32 }
 0xaae   : > { %v7127_v16 = vrot.slane %v7091_v6, 7  ;;  %v7033_v38 = vadd.f32 %v7019_v57, %v6992_v58  ;;  %9414 = vmatmul.msk.bf16.gmra.mxu1 %vm2612_vm6, %v14047_v29  ;;  %v7062_v1 = vpop.f32.mrf.mxu0  ;;  %v6896_v57 = vadd.f32 %v13950_v42, %v6837_v46  ;;  %p9800_p3 = pnand %p9799_p2, %p9795_p13 }
 0xaaf   : > { %9430 = vmatmul.msk.bf16.gmra.mxu3 %vm2612_vm6, %v14054_v14 }
 0xab0   : > { %v7151_v28 = vsel %vm508_vm3, %v7127_v16, 0.0  ;;  %v7074_v52 = vadd.f32 %v7060_v26, %v7033_v38  ;;  %v7143_v9 = vsel %vm508_vm3, 0.0, %v7127_v16  ;;  %v7021_v54 = vpop.f32.mrf.mxu3 }
 0xab1   : > { %v7388_v50 = vpack.c.bf16 %v7143_v9, %v7142_v51  ;;  %v7183_v59 = vrot.slane %v7143_v9, 1  ;;  %v7184_v19 = vrot.slane %v7151_v28, 1  ;;  %v7309_v3 = vrot.slane %v7143_v9, 2  ;;  %v6942_v56 = vpop.f32.mrf.mxu1 }
 0xab2   : > { %v7082_v34 = vadd.f32 %v7074_v52, %v13896_v63  ;;  %v7310_v39 = vrot.slane %v7151_v28, 2  ;;  %v9694_v63 = vld [vmem:[%s14626_s1 + $0x1bc] sm:$0xff]  ;;  %v6785_v51 = vadd.f32 %v13974_v35, %v6703_v7  ;;  %v6953_v35 = vadd.f32 %v6942_v56, %v6896_v57 }
 0xab3   : > { %v6980_v40 = vpop.f32.mrf.mxu2  ;;  %9438 = vmatmul.msk.bf16.gmra.mxu0 %vm2612_vm6, %v7388_v50  ;;  %v14070_v45 = vsel %vm684_vm4, %v7183_v59, %v7184_v19  ;;  %7481 = vmatpush.bf16.msrb.mxu1 %v9694_v63  ;;  %v9697_v50 = vld [vmem:[%s14626_s1 + $0x1d4] sm:$0xff] }
 0xab4   : > { %v7092_v61 = vadd.f32 %v13982_v13, %v7082_v34  ;;  %v6993_v17 = vadd.f32 %v6980_v40, %v6952_v33  ;;  %v14080_v15 = vsel %vm1091_vm5, %v7309_v3, %v7310_v39  ;;  %v7453_v18 = vpack.c.bf16 %v14070_v45, %v14042_v27  ;;  %7638 = vmatpush.bf16.msrb.mxu0 %v9697_v50 }
 0xab5   : > { %v7516_v0 = vpack.c.bf16 %v14080_v15, %v14050_v53  ;;  %v6838_v48 = vadd.f32 %v13969_v41, %v6785_v51 }
 0xab6   : > { %v7128_v60 = vrot.slane %v7092_v61, 7  ;;  %v7034_v22 = vadd.f32 %v7021_v54, %v6993_v17  ;;  %v7065_v2 = vpop.f32.mrf.mxu0 }
 0xab7   : > { %v6897_v54 = vadd.f32 %v13967_v5, %v6838_v48  ;;  %7685 = vmatpush.bf16.msra.mxu1 %v9698_v10 }
 0xab8   : > { %v7144_v12 = vsel %vm508_vm3, 0.0, %v7128_v60  ;;  %v7152_v26 = vsel %vm508_vm3, %v7128_v60, 0.0  ;;  %v7075_v23 = vadd.f32 %v7062_v1, %v7034_v22  ;;  %v7024_v58 = vpop.f32.mrf.mxu3  ;;  %v15219_v1 = vld [vmem:[#allocation44_spill] sm:$0xff] }
 0xab9   : > { %v7187_v31 = vrot.slane %v7152_v26, 1  ;;  %v7313_v62 = vrot.slane %v7152_v26, 2  ;;  %v14090_v55 = vpack.c.bf16 %v7144_v12, %v7143_v9  ;;  %v7186_v43 = vrot.slane %v7144_v12, 1  ;;  %v6944_v46 = vpop.f32.mrf.mxu1 }
 0xaba   : > { %v7083_v4 = vadd.f32 %v7075_v23, %v13910_v30  ;;  %v7312_v6 = vrot.slane %v7144_v12, 2  ;;  %v6954_v40 = vadd.f32 %v6944_v46, %v6897_v54 }
 0xabb   : > { %v6983_v44 = vpop.f32.mrf.mxu2  ;;  %9423 = vmatmul.msk.bf16.gmra.mxu2 %vm2612_vm6, %v14090_v55  ;;  %v14097_v42 = vsel %vm684_vm4, %v7186_v43, %v7187_v31 }
 0xabc   : > { %v7093_v16 = vadd.f32 %v13982_v13, %v7083_v4  ;;  %v6994_v38 = vadd.f32 %v6983_v44, %v6953_v35  ;;  %v14105_v30 = vpack.c.bf16 %v14097_v42, %v14070_v45  ;;  %v14108_v41 = vsel %vm1091_vm5, %v7312_v6, %v7313_v62 }
 0xabd   : > { %v14112_v28 = vpack.c.bf16 %v14108_v41, %v14080_v15 }
 0xabe   : > { %v7129_v52 = vrot.slane %v7093_v16, 7  ;;  %v7035_v9 = vadd.f32 %v7024_v58, %v6994_v38  ;;  %9415 = vmatmul.msk.bf16.gmra.mxu1 %vm2612_vm6, %v14105_v30  ;;  %v7067_v23 = vpop.f32.mrf.mxu0  ;;  %v15220_v58 = vld [vmem:[#allocation26_spill] sm:$0xff] }
 0xabf   : > { %9431 = vmatmul.msk.bf16.gmra.mxu3 %vm2612_vm6, %v14112_v28 }
 0xac0   : > { %v7153_v59 = vsel %vm508_vm3, %v7129_v52, 0.0  ;;  %v7076_v19 = vadd.f32 %v7065_v2, %v7035_v9  ;;  %v7145_v3 = vsel %vm508_vm3, 0.0, %v7129_v52  ;;  %v7026_v57 = vpop.f32.mrf.mxu3 }
 0xac1   : > { %v7389_v34 = vpack.c.bf16 %v7145_v3, %v7144_v12  ;;  %v7189_v33 = vrot.slane %v7145_v3, 1  ;;  %v7190_v39 = vrot.slane %v7153_v59, 1  ;;  %v7315_v7 = vrot.slane %v7145_v3, 2 }
 0xac2   : > { %v7084_v5 = vadd.f32 %v7076_v19, %v15219_v1  ;;  %v7316_v36 = vrot.slane %v7153_v59, 2 }
 0xac3   : > { %v6985_v63 = vpop.f32.mrf.mxu2  ;;  %9439 = vmatmul.msk.bf16.gmra.mxu0 %vm2612_vm6, %v7389_v34  ;;  %v7191_v61 = vsel %vm684_vm4, %v7189_v33, %v7190_v39 }
 0xac4   : > { %v7094_v17 = vadd.f32 %v13982_v13, %v7084_v5  ;;  %v6995_v51 = vadd.f32 %v6985_v63, %v6954_v40  ;;  %v7317_v60 = vsel %vm1091_vm5, %v7315_v7, %v7316_v36  ;;  %v7454_v22 = vpack.c.bf16 %v7191_v61, %v14097_v42 }
 0xac5   : > { %v7517_v56 = vpack.c.bf16 %v7317_v60, %v14108_v41 }
 0xac6   : > { %v7130_v12 = vrot.slane %v7094_v17, 7  ;;  %v7036_v26 = vadd.f32 %v7026_v57, %v6995_v51 }
 0xac8   : > { %v7146_v31 = vsel %vm508_vm3, 0.0, %v7130_v12  ;;  %v7154_v62 = vsel %vm508_vm3, %v7130_v12, 0.0  ;;  %v7077_v43 = vadd.f32 %v7067_v23, %v7036_v26 }
 0xac9   : > { %v7193_v48 = vrot.slane %v7154_v62, 1  ;;  %v7319_v4 = vrot.slane %v7154_v62, 2  ;;  %v7159_v35 = vpack.c.bf16 %v7146_v31, %v7145_v3  ;;  %v7192_v6 = vrot.slane %v7146_v31, 1 }
 0xaca   : > { %v7085_v44 = vadd.f32 %v7077_v43, %v15220_v58  ;;  %v7318_v24 = vrot.slane %v7146_v31, 2 }
 0xacb   : > { %9424 = vmatmul.msk.bf16.gmra.mxu2 %vm2612_vm6, %v7159_v35  ;;  %v7194_v42 = vsel %vm684_vm4, %v7192_v6, %v7193_v48 }
 0xacc   : > { %v7095_v16 = vadd.f32 %v13982_v13, %v7085_v44  ;;  %v7205_v38 = vpack.c.bf16 %v7194_v42, %v7191_v61  ;;  %v7320_v41 = vsel %vm1091_vm5, %v7318_v24, %v7319_v4  ;;  %v9700_v44 = vld [vmem:[%s14626_s1 + $0x1ec] sm:$0xff] }
 0xacd   : > { %v7331_v2 = vpack.c.bf16 %v7320_v41, %v7317_v60  ;;  %7955 = vmatpush.bf16.msra.mxu3 %v9700_v44 }
 0xace   : > { %v7131_v52 = vrot.slane %v7095_v16, 7  ;;  %9416 = vmatmul.msk.bf16.gmra.mxu1 %vm2612_vm6, %v7205_v38 }
 0xacf   : > { %9432 = vmatmul.msk.bf16.gmra.mxu3 %vm2612_vm6, %v7331_v2 }
 0xad0   : > { %v7155_v9 = vsel %vm508_vm3, %v7131_v52, 0.0  ;;  %v7147_v54 = vsel %vm508_vm3, 0.0, %v7131_v52  ;;  %v9699_v52 = vld [vmem:[%s14626_s1 + $0x1e4] sm:$0xff] }
 0xad1   : > { %v7390_v50 = vpack.c.bf16 %v7147_v54, %v7146_v31  ;;  %v7511_v59 = vrot.slane %v7147_v54, 2  ;;  %v7512_v19 = vrot.slane %v7155_v9, 2  ;;  %v7448_v3 = vrot.slane %v7147_v54, 1  ;;  %7956 = vmatpush.bf16.msra.mxu3 %v9699_v52 }
 0xad2   : > { %v7449_v46 = vrot.slane %v7155_v9, 1  ;;  %v7574_v37 = vpack.c.bf16 0.0, %v7147_v54  ;;  %v9701_v9 = vld [vmem:[%s14626_s1 + $0x1f4] sm:$0xff]  ;;  %v9703_v54 = vld [vmem:[%s14626_s1 + $0x204] sm:$0xff] }
 0xad3   : > { %9440 = vmatmul.msk.bf16.gmra.mxu0 %vm2612_vm6, %v7390_v50  ;;  %v7513_v13 = vsel %vm1091_vm5, %v7511_v59, %v7512_v19  ;;  %v9706_v59 = vld [vmem:[%s14626_s1 + $0x21c] sm:$0xff] }
 0xad4   : > { %v7518_v34 = vpack.c.bf16 %v7513_v13, %v7320_v41  ;;  %v7450_v33 = vsel %vm684_vm4, %v7448_v3, %v7449_v46  ;;  %v9704_v41 = vld [vmem:[%s14626_s1 + $0x20c] sm:$0xff] }
 0xad5   : > { %v7455_v39 = vpack.c.bf16 %v7450_v33, %v7194_v42  ;;  %8040 = vmatpush.bf16.msra.mxu0 %v9704_v41 }
 0xad9   : > { %8041 = vmatpush.bf16.msra.mxu0 %v9703_v54 }
 0xadb   : > { %9453 = vmatmul.msk.bf16.vlgmr.msra.gmra.mxu2 %vm2612_vm6, %v7515_v21 }
 0xade   : > { %9445 = vmatmul.msk.bf16.vlgmr.msrb.gmra.mxu1 %vm2612_vm6, %v7452_v25  ;;  %v7621_v25 = vpack.c.bf16 %v15064_v8, %v7450_v33  ;;  %v9705_v33 = vld [vmem:[%s14626_s1 + $0x214] sm:$0xff] }
 0xadf   : > { %9461 = vmatmul.msk.bf16.vlgmr.msrb.gmra.mxu3 %vm2612_vm6, %v14033_v47  ;;  %8105 = vmatpush.bf16.msrb.mxu1 %v9706_v59 }
 0xae3   : > { %9469 = vmatmul.msk.bf16.vlgmr.msrb.gmra.mxu0 %vm2612_vm6, %v14047_v29  ;;  %8106 = vmatpush.bf16.msrb.mxu1 %v9705_v33 }
 0xaeb   : > { %9454 = vmatmul.msk.bf16.gmra.mxu2 %vm2612_vm6, %v7516_v0 }
 0xaee   : > { %9446 = vmatmul.msk.bf16.gmra.mxu1 %vm2612_vm6, %v7453_v18 }
 0xaef   : > { %9462 = vmatmul.msk.bf16.gmra.mxu3 %vm2612_vm6, %v14090_v55 }
 0xaf3   : > { %9470 = vmatmul.msk.bf16.gmra.mxu0 %vm2612_vm6, %v14105_v30 }
 0xafb   : > { %9455 = vmatmul.msk.bf16.gmra.mxu2 %vm2612_vm6, %v7517_v56 }
 0xafe   : > { %9447 = vmatmul.msk.bf16.gmra.mxu1 %vm2612_vm6, %v7454_v22 }
 0xaff   : > { %9463 = vmatmul.msk.bf16.gmra.mxu3 %vm2612_vm6, %v7159_v35 }
 0xb03   : > { %9471 = vmatmul.msk.bf16.gmra.mxu0 %vm2612_vm6, %v7205_v38  ;;  %v9702_v38 = vld [vmem:[%s14626_s1 + $0x1fc] sm:$0xff] }
 0xb04   : > { %7902 = vmatpush.bf16.msrb.mxu2 %v9702_v38 }
 0xb08   : > { %7903 = vmatpush.bf16.msrb.mxu2 %v9701_v9 }
 0xb0b   : > { %9456 = vmatmul.msk.bf16.gmra.mxu2 %vm2612_vm6, %v7518_v34 }
 0xb0e   : > { %9448 = vmatmul.msk.bf16.gmra.mxu1 %vm2612_vm6, %v7455_v39 }
 0xb0f   : > { %9464 = vmatmul.msk.bf16.gmra.mxu3 %vm2612_vm6, %v7574_v37 }
 0xb13   : > { %9472 = vmatmul.msk.bf16.gmra.mxu0 %vm2612_vm6, %v7621_v25 }
 0xb1b   : > { %v7233_v32 = vpop.f32.mrf.mxu1 }
 0xb1e   : > { %9477 = vmatmul.msk.bf16.vlgmr.msra.gmra.mxu1 %vm2612_vm6, %v14054_v14  ;;  %v7280_v27 = vpop.f32.mrf.mxu2 }
 0xb20   : > { %v7418_v15 = vpop.f32.mrf.mxu0 }
 0xb22   : > { %v7359_v29 = vpop.f32.mrf.mxu3 }
 0xb23   : > { %v7235_v21 = vpop.f32.mrf.mxu1 }
 0xb26   : > { %v7282_v45 = vpop.f32.mrf.mxu2 }
 0xb28   : > { %v7420_v14 = vpop.f32.mrf.mxu0 }
 0xb2a   : > { %v7361_v0 = vpop.f32.mrf.mxu3 }
 0xb2b   : > { %v14186_v47 = vpop.f32.mrf.mxu1 }
 0xb2e   : > { %9478 = vmatmul.msk.bf16.gmra.mxu1 %vm2612_vm6, %v14112_v28  ;;  %v7285_v55 = vpop.f32.mrf.mxu2  ;;  %v7668_v28 = vpack.c.bf16 %v15187_v11, %v7513_v13  ;;  %v7283_v13 = vadd.f32 %v7282_v45, %v7235_v21 }
 0xb30   : > { %v14203_v40 = vpop.f32.mrf.mxu0  ;;  %v7380_v20 = vadd.f32 %v7361_v0, %v7283_v13  ;;  %v14275_v0 = vld [vmem:[%s14627_s2 + $0x5] ss:$0 sm:$0xff] }
 0xb32   : > { %v14197_v7 = vpop.f32.mrf.mxu3 }
 0xb33   : > { %v14190_v53 = vpop.f32.mrf.mxu1 }
 0xb36   : > { %v7287_v5 = vpop.f32.mrf.mxu2 }
 0xb38   : > { %v14211_v17 = vpop.f32.mrf.mxu0 }
 0xb3a   : > { %v14205_v36 = vpop.f32.mrf.mxu3 }
 0xb3b   : > { %v14192_v18 = vpop.f32.mrf.mxu1 }
 0xb3e   : > { %9479 = vmatmul.msk.bf16.gmra.mxu1 %vm2612_vm6, %v7331_v2  ;;  %v14209_v61 = vpop.f32.mrf.mxu2  ;;  %v7281_v2 = vadd.f32 %v7280_v27, %v7233_v32  ;;  %v7286_v27 = vadd.f32 %v7285_v55, %v14186_v47 }
 0xb40   : > { %v14217_v57 = vpop.f32.mrf.mxu0  ;;  %v7379_v50 = vadd.f32 %v7359_v29, %v7281_v2  ;;  %v7439_v29 = vadd.f32 %v7420_v14, %v7380_v20  ;;  %v7381_v45 = vadd.f32 %v14197_v7, %v7286_v27 }
 0xb42   : > { %v14213_v51 = vpop.f32.mrf.mxu3  ;;  %v7438_v34 = vadd.f32 %v7418_v15, %v7379_v50  ;;  %v7288_v15 = vadd.f32 %v7287_v5, %v14190_v53  ;;  %v7440_v47 = vadd.f32 %v14203_v40, %v7381_v45 }
 0xb43   : > { %v14195_v30 = vpop.f32.mrf.mxu1 }
 0xb44   : > { %v7382_v14 = vadd.f32 %v14205_v36, %v7288_v15  ;;  %v7291_v36 = vadd.f32 %v14209_v61, %v14192_v18 }
 0xb46   : > { %v14215_v22 = vpop.f32.mrf.mxu2  ;;  %v7441_v59 = vadd.f32 %v14211_v17, %v7382_v14 }
 0xb48   : > { %v14223_v31 = vpop.f32.mrf.mxu0 }
 0xb4a   : > { %v14219_v12 = vpop.f32.mrf.mxu3 }
 0xb4b   : > { %v14199_v1 = vpop.f32.mrf.mxu1 }
 0xb4e   : > { %9480 = vmatmul.msk.bf16.gmra.mxu1 %vm2612_vm6, %v7668_v28  ;;  %v14221_v26 = vpop.f32.mrf.mxu2 }
 0xb50   : > { %v14231_v4 = vpop.f32.mrf.mxu0 }
 0xb52   : > { %v14225_v62 = vpop.f32.mrf.mxu3 }
 0xb53   : > { %v14207_v63 = vpop.f32.mrf.mxu1 }
 0xb56   : > { %v14229_v48 = vpop.f32.mrf.mxu2 }
 0xb58   : > { %v14240_v24 = vpop.f32.mrf.mxu0 }
 0xb5a   : > { %v14233_v35 = vpop.f32.mrf.mxu3 }
 0xb5b   : > { %v7483_v60 = vpop.f32.mrf.mxu1 }
 0xb5c   : > { %v7503_v10 = vadd.f32 %v7483_v60, %v7438_v34 }
 0xb5e   : > { %v7546_v58 = vpop.f32.mrf.mxu2 }
 0xb5f   : > { %v7566_v37 = vadd.f32 %v7546_v58, %v7503_v10  ;;  %v14277_v58 = vpop.permute.xlu0 %7734 }
 0xb60   : > { %v7640_v3 = vpop.f32.mrf.mxu0 }
 0xb62   : > { %v7593_v42 = vpop.f32.mrf.mxu3 }
 0xb63   : > { %v7485_v56 = vpop.f32.mrf.mxu1  ;;  %v7613_v44 = vadd.f32 %v7593_v42, %v7566_v37 }
 0xb64   : > { %v7504_v38 = vadd.f32 %v7485_v56, %v7439_v29 }
 0xb65   : > { %v7660_v2 = vadd.f32 %v7640_v3, %v7613_v44 }
 0xb66   : > { %v7548_v19 = vpop.f32.mrf.mxu2 }
 0xb67   : > { %v7567_v41 = vadd.f32 %v7548_v19, %v7504_v38  ;;  %v7293_v38 = vadd.f32 %v14215_v22, %v14195_v30  ;;  %v7296_v22 = vadd.f32 %v14221_v26, %v14199_v1 }
 0xb68   : > { %v7642_v28 = vpop.f32.mrf.mxu0 }
 0xb69   : > { %v7384_v30 = vadd.f32 %v14219_v12, %v7293_v38  ;;  %v7385_v1 = vadd.f32 %v14225_v62, %v7296_v22 }
 0xb6a   : > { %v7595_v39 = vpop.f32.mrf.mxu3 }
 0xb6b   : > { %v7488_v23 = vpop.f32.mrf.mxu1  ;;  %v7614_v42 = vadd.f32 %v7595_v39, %v7567_v41 }
 0xb6c   : > { %v7505_v7 = vadd.f32 %v7488_v23, %v7440_v47 }
 0xb6d   : > { %v7661_v19 = vadd.f32 %v7642_v28, %v7614_v42 }
 0xb6e   : > { %v7551_v25 = vpop.f32.mrf.mxu2 }
 0xb6f   : > { %v7568_v50 = vadd.f32 %v7551_v25, %v7505_v7 }
 0xb70   : > { %v7645_v52 = vpop.f32.mrf.mxu0 }
 0xb72   : > { %v7598_v21 = vpop.f32.mrf.mxu3 }
 0xb73   : > { %v14227_v43 = vpop.f32.mrf.mxu1  ;;  %v7615_v25 = vadd.f32 %v7598_v21, %v7568_v50 }
 0xb74   : > { %v7506_v23 = vadd.f32 %v14227_v43, %v7441_v59  ;;  %v7383_v43 = vadd.f32 %v14213_v51, %v7291_v36 }
 0xb75   : > { %v7662_v51 = vadd.f32 %v7645_v52, %v7615_v25 }
 0xb76   : > { %v7553_v56 = vpop.f32.mrf.mxu2  ;;  %v7442_v47 = vadd.f32 %v14217_v57, %v7383_v43  ;;  %v7443_v57 = vadd.f32 %v14223_v31, %v7384_v30 }
 0xb77   : > { %v7569_v21 = vadd.f32 %v7553_v56, %v7506_v23 }
 0xb78   : > { %v7647_v45 = vpop.f32.mrf.mxu0 }
 0xb7a   : > { %v7600_v54 = vpop.f32.mrf.mxu3 }
 0xb7b   : > { %v14235_v6 = vpop.f32.mrf.mxu1  ;;  %v7616_v56 = vadd.f32 %v7600_v54, %v7569_v21 }
 0xb7c   : > { %v7507_v42 = vadd.f32 %v14235_v6, %v7442_v47 }
 0xb7d   : > { %v7663_v6 = vadd.f32 %v7647_v45, %v7616_v56  ;;  %v7298_v45 = vadd.f32 %v14229_v48, %v14207_v63 }
 0xb7e   : > { %v7556_v18 = vpop.f32.mrf.mxu2 }
 0xb7f   : > { %v7570_v26 = vadd.f32 %v7556_v18, %v7507_v42 }
 0xb80   : > { %v7650_v50 = vpop.f32.mrf.mxu0 }
 0xb83   : > { %v14242_v16 = vpop.f32.mrf.mxu1 }
 0xb84   : > { %v7508_v23 = vadd.f32 %v14242_v16, %v7443_v57 }
 0xb86   : > { %v7558_v12 = vpop.f32.mrf.mxu2 }
 0xb88   : > { %v7652_v30 = vpop.f32.mrf.mxu0 }
 0xb8b   : > { %v14262_v46 = vpop.f32.mrf.mxu1 }
 0xb93   : > { %v14267_v32 = vpop.f32.mrf.mxu1 }
 0xb9b   : > { %v7687_v60 = vpop.f32.mrf.mxu1 }
 0xb9c   : > { %v7707_v55 = vadd.f32 %v7687_v60, %v7660_v2  ;;  %v7603_v2 = vpop.f32.mrf.mxu3 }
 0xb9e   : > { %v7716_v53 = vadd.f32 %v14275_v0, %v7707_v55  ;;  %v7737_v5 = vadd.f32 %v14277_v58, %v7707_v55 }
 0xba0   : > { %v7724_v9 = vmax.f32 %v7716_v53, 0.0  ;;  %8460 = vrot.lane.b32.xlu1 %v7737_v5, %s9845_s10 }
 0xba2   : > { %v7790_v40 = vrot.slane %v7724_v9, 7 }
 0xba3   : > { %v7689_v3 = vpop.f32.mrf.mxu1 }
 0xba4   : > { %v7806_v13 = vsel %vm508_vm3, 0.0, %v7790_v40  ;;  %v7814_v34 = vsel %vm508_vm3, %v7790_v40, 0.0  ;;  %v7708_v33 = vadd.f32 %v7689_v3, %v7661_v19  ;;  %v7605_v31 = vpop.f32.mrf.mxu3 }
 0xba5   : > { %v7822_v39 = vpack.c.bf16 %v7806_v13, %v15063_v49  ;;  %v7840_v10 = vrot.slane %v7806_v13, 1  ;;  %v7841_v20 = vrot.slane %v7814_v34, 1  ;;  %v7978_v37 = vrot.slane %v7806_v13, 2 }
 0xba6   : > { %v7979_v17 = vrot.slane %v7814_v34, 2  ;;  %v7717_v27 = vadd.f32 %v14275_v0, %v7708_v33  ;;  %v7738_v29 = vadd.f32 %v14277_v58, %v7708_v33 }
 0xba7   : > { %v14294_v61 = vsel %vm684_vm4, %v7840_v10, %v7841_v20  ;;  %9501 = vmatmul.msk.bf16.vlgmr.msra.gmra.mxu3 %vm327_vm0, %v7822_v39 }
 0xba8   : > { %v7868_v49 = vpack.c.bf16 %v14294_v61, %v15064_v8  ;;  %v14301_v28 = vsel %vm1091_vm5, %v7978_v37, %v7979_v17  ;;  %v7725_v44 = vmax.f32 %v7717_v27, 0.0  ;;  %8462 = vrot.lane.b32.xlu2 %v7738_v29, %s9845_s10  ;;  %v7617_v37 = vadd.f32 %v7603_v2, %v7570_v26  ;;  %v7561_v2 = vpop.f32.mrf.mxu2  ;;  %v9709_v26 = vld [vmem:[%s14626_s1 + $0x234] sm:$0xff] }
 0xba9   : > { %v8006_v15 = vpack.c.bf16 %v14301_v28, %v15187_v11 }
 0xbaa   : > { %v7791_v41 = vrot.slane %v7725_v44, 7  ;;  %9489 = vmatmul.msk.bf16.vlgmr.msrb.gmra.mxu2 %vm327_vm0, %v7868_v49  ;;  %v7444_v49 = vadd.f32 %v14231_v4, %v7385_v1 }
 0xbab   : > { %9513 = vmatmul.msk.bf16.vlgmr.msra.gmra.mxu0 %vm327_vm0, %v8006_v15  ;;  %v7692_v60 = vpop.f32.mrf.mxu1  ;;  %v7571_v15 = vadd.f32 %v7558_v12, %v7508_v23 }
 0xbac   : > { %v7807_v55 = vsel %vm508_vm3, 0.0, %v7791_v41  ;;  %v7709_v14 = vadd.f32 %v7692_v60, %v7662_v51  ;;  %v7815_v52 = vsel %vm508_vm3, %v7791_v41, 0.0  ;;  %v7509_v4 = vadd.f32 %v14262_v46, %v7444_v49  ;;  %v7608_v42 = vpop.f32.mrf.mxu3 }
 0xbad   : > { %v8071_v7 = vpack.c.bf16 %v7807_v55, %v7806_v13  ;;  %v7843_v59 = vrot.slane %v7807_v55, 1  ;;  %v7844_v40 = vrot.slane %v7815_v52, 1  ;;  %v7981_v19 = vrot.slane %v7807_v55, 2 }
 0xbae   : > { %v7718_v53 = vadd.f32 %v14275_v0, %v7709_v14  ;;  %v7739_v5 = vadd.f32 %v14277_v58, %v7709_v14  ;;  %v7982_v36 = vrot.slane %v7815_v52, 2  ;;  %v7664_v51 = vadd.f32 %v7650_v50, %v7617_v37  ;;  %v9712_v52 = vld [vmem:[%s14626_s1 + $0x24c] sm:$0xff] }
 0xbaf   : > { %9525 = vmatmul.msk.bf16.vlgmr.msrb.gmra.mxu1 %vm327_vm0, %v8071_v7  ;;  %v14331_v29 = vsel %vm684_vm4, %v7843_v59, %v7844_v40  ;;  %v7386_v14 = vadd.f32 %v14233_v35, %v7298_v45  ;;  %v7618_v63 = vadd.f32 %v7605_v31, %v7571_v15  ;;  %v7572_v48 = vadd.f32 %v7561_v2, %v7509_v4  ;;  %v9710_v35 = vld [vmem:[%s14626_s1 + $0x23c] sm:$0xff] }
 0xbb0   : > { %v7726_v9 = vmax.f32 %v7718_v53, 0.0  ;;  %8464 = vrot.lane.b32.xlu0 %v7739_v5, %s9845_s10  ;;  %v14337_v18 = vsel %vm1091_vm5, %v7981_v19, %v7982_v36  ;;  %v9708_v5 = vld [vmem:[%s14626_s1 + $0x22c] sm:$0xff]  ;;  %8245 = vmatpush.bf16.msrb.mxu3 %v9710_v35  ;;  %v7563_v37 = vpop.f32.mrf.mxu2 }
 0xbb1   : > { %v7445_v57 = vadd.f32 %v14240_v24, %v7386_v14  ;;  %v7665_v1 = vadd.f32 %v7652_v30, %v7618_v63  ;;  %8176 = vmatpush.bf16.msra.mxu2 %v9708_v5  ;;  %8298 = vmatpush.bf16.msrb.mxu0 %v9712_v52  ;;  %v9713_v14 = vld [vmem:[%s14626_s1 + $0x254] sm:$0xff] }
 0xbb2   : > { %v7792_v54 = vrot.slane %v7726_v9, 7  ;;  %v7619_v9 = vadd.f32 %v7608_v42, %v7572_v48 }
 0xbb3   : > { %v7694_v3 = vpop.f32.mrf.mxu1  ;;  %v7510_v24 = vadd.f32 %v14267_v32, %v7445_v57 }
 0xbb4   : > { %v7808_v13 = vsel %vm508_vm3, 0.0, %v7792_v54  ;;  %v7816_v34 = vsel %vm508_vm3, %v7792_v54, 0.0  ;;  %v7710_v33 = vadd.f32 %v7694_v3, %v7663_v6  ;;  %v9707_v54 = vld [vmem:[%s14626_s1 + $0x224] sm:$0xff]  ;;  %8246 = vmatpush.bf16.msrb.mxu3 %v9709_v26 }
 0xbb5   : > { %v7846_v39 = vrot.slane %v7808_v13, 1  ;;  %v7847_v10 = vrot.slane %v7816_v34, 1  ;;  %v7984_v62 = vrot.slane %v7808_v13, 2  ;;  %v7985_v20 = vrot.slane %v7816_v34, 2  ;;  %8177 = vmatpush.bf16.msra.mxu2 %v9707_v54 }
 0xbb6   : > { %v7719_v25 = vadd.f32 %v14275_v0, %v7710_v33  ;;  %v7740_v17 = vadd.f32 %v14277_v58, %v7710_v33  ;;  %v14328_v27 = vpack.c.bf16 %v7808_v13, %v7807_v55 }
 0xbb7   : > { %v14334_v16 = vsel %vm684_vm4, %v7846_v39, %v7847_v10  ;;  %v14340_v43 = vsel %vm1091_vm5, %v7984_v62, %v7985_v20  ;;  %v7655_v20 = vpop.f32.mrf.mxu0 }
 0xbb8   : > { %v7727_v44 = vmax.f32 %v7719_v25, 0.0  ;;  %9502 = vmatmul.msk.bf16.gmra.mxu3 %vm327_vm0, %v14328_v27  ;;  %8466 = vrot.lane.b32.xlu1 %v7740_v17, %s9845_s10  ;;  %v14348_v38 = vpack.c.bf16 %v14334_v16, %v14331_v29  ;;  %v14352_v21 = vpack.c.bf16 %v14340_v43, %v14337_v18 }
 0xbba   : > { %v7793_v41 = vrot.slane %v7727_v44, 7  ;;  %9490 = vmatmul.msk.bf16.gmra.mxu2 %vm327_vm0, %v14348_v38  ;;  %v9711_v44 = vld [vmem:[%s14626_s1 + $0x244] sm:$0xff] }
 0xbbb   : > { %9514 = vmatmul.msk.bf16.gmra.mxu0 %vm327_vm0, %v14352_v21  ;;  %v7697_v60 = vpop.f32.mrf.mxu1 }
 0xbbc   : > { %v7809_v47 = vsel %vm508_vm3, 0.0, %v7793_v41  ;;  %v7711_v55 = vadd.f32 %v7697_v60, %v7664_v51  ;;  %v7817_v7 = vsel %vm508_vm3, %v7793_v41, 0.0  ;;  %v9714_v41 = vld [vmem:[%s14626_s1 + $0x25c] sm:$0xff]  ;;  %8299 = vmatpush.bf16.msrb.mxu0 %v9711_v44  ;;  %v7573_v51 = vadd.f32 %v7563_v37, %v7510_v24 }
 0xbbd   : > { %v8072_v56 = vpack.c.bf16 %v7809_v47, %v7808_v13  ;;  %v7849_v6 = vrot.slane %v7809_v47, 1  ;;  %v7850_v50 = vrot.slane %v7817_v7, 1  ;;  %v7987_v59 = vrot.slane %v7809_v47, 2  ;;  %8351 = vmatpush.bf16.msra.mxu1 %v9714_v41 }
 0xbbe   : > { %v7720_v46 = vadd.f32 %v14275_v0, %v7711_v55  ;;  %v7741_v22 = vadd.f32 %v14277_v58, %v7711_v55  ;;  %v7988_v40 = vrot.slane %v7817_v7, 2  ;;  %v7666_v60 = vadd.f32 %v7655_v20, %v7619_v9 }
 0xbbf   : > { %9526 = vmatmul.msk.bf16.gmra.mxu1 %vm327_vm0, %v8072_v56  ;;  %v14392_v32 = vsel %vm684_vm4, %v7849_v6, %v7850_v50  ;;  %v8211_v37 = vpack.c.bf16 %v14337_v18, %v14301_v28  ;;  %v8142_v44 = vpack.c.bf16 %v14331_v29, %v14294_v61  ;;  %v9716_v61 = vld [vmem:[%s14626_s1 + $0x26c] sm:$0xff]  ;;  %v9715_v29 = vld [vmem:[%s14626_s1 + $0x264] sm:$0xff] }
 0xbc0   : > { %v7728_v53 = vmax.f32 %v7720_v46, 0.0  ;;  %8468 = vrot.lane.b32.xlu2 %v7741_v22, %s9845_s10  ;;  %v14398_v17 = vsel %vm1091_vm5, %v7987_v59, %v7988_v40  ;;  %v8143_v28 = vpack.c.bf16 %v14392_v32, %v14334_v16  ;;  %8404 = vmatpush.bf16.msrb.mxu2 %v9716_v61 }
 0xbc1   : > { %8352 = vmatpush.bf16.msra.mxu1 %v9713_v14 }
 0xbc2   : > { %v7794_v12 = vrot.slane %v7728_v53, 7  ;;  %v7657_v53 = vpop.f32.mrf.mxu0 }
 0xbc3   : > { %v7699_v19 = vpop.f32.mrf.mxu1 }
 0xbc4   : > { %v7810_v36 = vsel %vm508_vm3, 0.0, %v7794_v12  ;;  %v7818_v3 = vsel %vm508_vm3, %v7794_v12, 0.0  ;;  %v7712_v23 = vadd.f32 %v7699_v19, %v7665_v1  ;;  %8405 = vmatpush.bf16.msrb.mxu2 %v9715_v29 }
 0xbc5   : > { %v7852_v13 = vrot.slane %v7810_v36, 1  ;;  %v7853_v34 = vrot.slane %v7818_v3, 1  ;;  %v7990_v33 = vrot.slane %v7810_v36, 2  ;;  %v7991_v31 = vrot.slane %v7818_v3, 2 }
 0xbc6   : > { %v7721_v39 = vadd.f32 %v14275_v0, %v7712_v23  ;;  %v7742_v10 = vadd.f32 %v14277_v58, %v7712_v23  ;;  %v14389_v62 = vpack.c.bf16 %v7810_v36, %v7809_v47  ;;  %v7610_v47 = vpop.f32.mrf.mxu3 }
 0xbc7   : > { %v14395_v25 = vsel %vm684_vm4, %v7852_v13, %v7853_v34  ;;  %v14401_v49 = vsel %vm1091_vm5, %v7990_v33, %v7991_v31  ;;  %v7620_v48 = vadd.f32 %v7610_v47, %v7573_v51 }
 0xbc8   : > { %v7729_v45 = vmax.f32 %v7721_v39, 0.0  ;;  %9503 = vmatmul.msk.bf16.gmra.mxu3 %vm327_vm0, %v14389_v62  ;;  %8470 = vrot.lane.b32.xlu0 %v7742_v10, %s9845_s10  ;;  %v14411_v15 = vpack.c.bf16 %v14395_v25, %v14392_v32  ;;  %v14415_v4 = vpack.c.bf16 %v14401_v49, %v14398_v17 }
 0xbc9   : > { %v7667_v5 = vadd.f32 %v7657_v53, %v7620_v48 }
 0xbca   : > { %v7795_v2 = vrot.slane %v7729_v45, 7  ;;  %9491 = vmatmul.msk.bf16.gmra.mxu2 %vm327_vm0, %v14411_v15  ;;  %v8212_v45 = vpack.c.bf16 %v14398_v17, %v14340_v43 }
 0xbcb   : > { %9515 = vmatmul.msk.bf16.gmra.mxu0 %vm327_vm0, %v14415_v4  ;;  %v7702_v55 = vpop.f32.mrf.mxu1 }
 0xbcc   : > { %v7811_v30 = vsel %vm508_vm3, 0.0, %v7795_v2  ;;  %v7713_v63 = vadd.f32 %v7702_v55, %v7666_v60  ;;  %v7819_v42 = vsel %vm508_vm3, %v7795_v2, 0.0 }
 0xbcd   : > { %v8073_v56 = vpack.c.bf16 %v7811_v30, %v7810_v36  ;;  %v7855_v52 = vrot.slane %v7811_v30, 1  ;;  %v7856_v9 = vrot.slane %v7819_v42, 1  ;;  %v7993_v57 = vrot.slane %v7811_v30, 2 }
 0xbce   : > { %v7722_v46 = vadd.f32 %v14275_v0, %v7713_v63  ;;  %v7743_v22 = vadd.f32 %v14277_v58, %v7713_v63  ;;  %v7994_v12 = vrot.slane %v7819_v42, 2 }
 0xbcf   : > { %9527 = vmatmul.msk.bf16.gmra.mxu1 %vm327_vm0, %v8073_v56  ;;  %v7857_v23 = vsel %vm684_vm4, %v7855_v52, %v7856_v9 }
 0xbd0   : > { %v7730_v7 = vmax.f32 %v7722_v46, 0.0  ;;  %8472 = vrot.lane.b32.xlu1 %v7743_v22, %s9845_s10  ;;  %v7995_v34 = vsel %vm1091_vm5, %v7993_v57, %v7994_v12  ;;  %v8144_v16 = vpack.c.bf16 %v7857_v23, %v14395_v25 }
 0xbd2   : > { %v7796_v35 = vrot.slane %v7730_v7, 7 }
 0xbd3   : > { %v7704_v1 = vpop.f32.mrf.mxu1 }
 0xbd4   : > { %v7812_v26 = vsel %vm508_vm3, 0.0, %v7796_v35  ;;  %v7820_v54 = vsel %vm508_vm3, %v7796_v35, 0.0  ;;  %v7714_v6 = vadd.f32 %v7704_v1, %v7667_v5 }
 0xbd5   : > { %v7858_v50 = vrot.slane %v7812_v26, 1  ;;  %v7859_v59 = vrot.slane %v7820_v54, 1  ;;  %v7996_v40 = vrot.slane %v7812_v26, 2  ;;  %v7997_v19 = vrot.slane %v7820_v54, 2 }
 0xbd6   : > { %v7723_v24 = vadd.f32 %v14275_v0, %v7714_v6  ;;  %v7744_v36 = vadd.f32 %v14277_v58, %v7714_v6  ;;  %v7825_v3 = vpack.c.bf16 %v7812_v26, %v7811_v30 }
 0xbd7   : > { %v7860_v13 = vsel %vm684_vm4, %v7858_v50, %v7859_v59  ;;  %v7998_v33 = vsel %vm1091_vm5, %v7996_v40, %v7997_v19 }
 0xbd8   : > { %v7731_v31 = vmax.f32 %v7723_v24, 0.0  ;;  %9504 = vmatmul.msk.bf16.gmra.mxu3 %vm327_vm0, %v7825_v3  ;;  %8474 = vrot.lane.b32.xlu2 %v7744_v36, %s9845_s10  ;;  %v7871_v39 = vpack.c.bf16 %v7860_v13, %v7857_v23  ;;  %v8009_v10 = vpack.c.bf16 %v7998_v33, %v7995_v34 }
 0xbda   : > { %v7797_v20 = vrot.slane %v7731_v31, 7  ;;  %9492 = vmatmul.msk.bf16.gmra.mxu2 %vm327_vm0, %v7871_v39 }
 0xbdb   : > { %9516 = vmatmul.msk.bf16.gmra.mxu0 %vm327_vm0, %v8009_v10 }
 0xbdc   : > { %v7813_v0 = vsel %vm508_vm3, 0.0, %v7797_v20  ;;  %v7821_v18 = vsel %vm508_vm3, %v7797_v20, 0.0 }
 0xbdd   : > { %v8074_v58 = vpack.c.bf16 %v7813_v0, %v7812_v26  ;;  %v8207_v43 = vrot.slane %v7813_v0, 2  ;;  %v8139_v32 = vrot.slane %v7821_v18, 1  ;;  %v8276_v41 = vpack.c.bf16 0.0, %v7813_v0 }
 0xbdf   : > { %9528 = vmatmul.msk.bf16.gmra.mxu1 %vm327_vm0, %v8074_v58 }
 0xbe8   : > { %9549 = vmatmul.msk.bf16.vlgmr.msrb.gmra.mxu3 %vm327_vm0, %v8211_v37 }
 0xbea   : > { %9537 = vmatmul.msk.bf16.vlgmr.msra.gmra.mxu2 %vm327_vm0, %v8142_v44 }
 0xbeb   : > { %9561 = vmatmul.msk.bf16.vlgmr.msrb.gmra.mxu0 %vm327_vm0, %v14328_v27  ;;  %v8213_v27 = vpack.c.bf16 %v7995_v34, %v14401_v49 }
 0xbef   : > { %9573 = vmatmul.msk.bf16.vlgmr.msra.gmra.mxu1 %vm327_vm0, %v14348_v38  ;;  %v8208_v38 = vrot.slane %v7821_v18, 2 }
 0xbf1   : > { %v8209_v17 = vsel %vm1091_vm5, %v8207_v43, %v8208_v38 }
 0xbf2   : > { %v8382_v56 = vpack.c.bf16 %v15187_v11, %v8209_v17 }
 0xbf8   : > { %9550 = vmatmul.msk.bf16.gmra.mxu3 %vm327_vm0, %v8212_v45 }
 0xbfa   : > { %9538 = vmatmul.msk.bf16.gmra.mxu2 %vm327_vm0, %v8143_v28 }
 0xbfb   : > { %9562 = vmatmul.msk.bf16.gmra.mxu0 %vm327_vm0, %v14389_v62  ;;  %v8138_v62 = vrot.slane %v7813_v0, 1 }
 0xbfd   : > { %v8140_v49 = vsel %vm684_vm4, %v8138_v62, %v8139_v32 }
 0xbfe   : > { %v8145_v25 = vpack.c.bf16 %v8140_v49, %v7860_v13  ;;  %v8329_v51 = vpack.c.bf16 %v15064_v8, %v8140_v49 }
 0xbff   : > { %9574 = vmatmul.msk.bf16.gmra.mxu1 %vm327_vm0, %v14411_v15  ;;  %v8214_v15 = vpack.c.bf16 %v8209_v17, %v7998_v33 }
 0xc08   : > { %9551 = vmatmul.msk.bf16.gmra.mxu3 %vm327_vm0, %v8213_v27 }
 0xc0a   : > { %9539 = vmatmul.msk.bf16.gmra.mxu2 %vm327_vm0, %v8144_v16 }
 0xc0b   : > { %9563 = vmatmul.msk.bf16.gmra.mxu0 %vm327_vm0, %v7825_v3 }
 0xc0f   : > { %9575 = vmatmul.msk.bf16.gmra.mxu1 %vm327_vm0, %v7871_v39 }
 0xc18   : > { %9552 = vmatmul.msk.bf16.gmra.mxu3 %vm327_vm0, %v8214_v15 }
 0xc1a   : > { %9540 = vmatmul.msk.bf16.gmra.mxu2 %vm327_vm0, %v8145_v25 }
 0xc1b   : > { %9564 = vmatmul.msk.bf16.gmra.mxu0 %vm327_vm0, %v8276_v41  ;;  %v14539_v41 = vld [vmem:[%s14627_s2 + $0x7] ss:$0 sm:$0xff] }
 0xc1f   : > { %9576 = vmatmul.msk.bf16.gmra.mxu1 %vm327_vm0, %v8329_v51 }
 0xc28   : > { %v8043_v30 = vpop.f32.mrf.mxu0 }
 0xc2a   : > { %9585 = vmatmul.msk.bf16.vlgmr.msrb.gmra.mxu2 %vm327_vm0, %v14352_v21  ;;  %v7958_v55 = vpop.f32.mrf.mxu3 }
 0xc2c   : > { %v8108_v63 = vpop.f32.mrf.mxu1 }
 0xc2d   : > { %v7905_v2 = vpop.f32.mrf.mxu2 }
 0xc2e   : > { %v7959_v39 = vadd.f32 %v7958_v55, %v7905_v2 }
 0xc30   : > { %v8045_v46 = vpop.f32.mrf.mxu0  ;;  %v8063_v20 = vadd.f32 %v8043_v30, %v7959_v39 }
 0xc32   : > { %v7960_v8 = vpop.f32.mrf.mxu3  ;;  %v8128_v44 = vadd.f32 %v8108_v63, %v8063_v20 }
 0xc34   : > { %v8110_v21 = vpop.f32.mrf.mxu1 }
 0xc35   : > { %v7907_v60 = vpop.f32.mrf.mxu2 }
 0xc36   : > { %v7961_v37 = vadd.f32 %v7960_v8, %v7907_v60 }
 0xc38   : > { %v8064_v61 = vadd.f32 %v8045_v46, %v7961_v37 }
 0xc3a   : > { %9586 = vmatmul.msk.bf16.gmra.mxu2 %vm327_vm0, %v14415_v4  ;;  %v8048_v4 = vpop.f32.mrf.mxu0  ;;  %v8129_v43 = vadd.f32 %v8110_v21, %v8064_v61 }
 0xc3b   : > { %v7963_v42 = vpop.f32.mrf.mxu3 }
 0xc3c   : > { %v8113_v53 = vpop.f32.mrf.mxu1 }
 0xc3d   : > { %v7910_v47 = vpop.f32.mrf.mxu2 }
 0xc3e   : > { %v7964_v18 = vadd.f32 %v7963_v42, %v7910_v47  ;;  %v8461_v42 = vpop.permute.xlu1 %8460 }
 0xc40   : > { %v8065_v49 = vadd.f32 %v8048_v4, %v7964_v18 }
 0xc42   : > { %v8050_v52 = vpop.f32.mrf.mxu0  ;;  %v8130_v47 = vadd.f32 %v8113_v53, %v8065_v49 }
 0xc43   : > { %v7965_v35 = vpop.f32.mrf.mxu3 }
 0xc44   : > { %v14504_v9 = vpop.f32.mrf.mxu1 }
 0xc45   : > { %v14491_v14 = vpop.f32.mrf.mxu2 }
 0xc46   : > { %v7966_v60 = vadd.f32 %v7965_v35, %v14491_v14 }
 0xc48   : > { %v8066_v21 = vadd.f32 %v8050_v52, %v7966_v60 }
 0xc4a   : > { %9587 = vmatmul.msk.bf16.gmra.mxu2 %vm327_vm0, %v8009_v10  ;;  %v14506_v1 = vpop.f32.mrf.mxu0  ;;  %v8131_v14 = vadd.f32 %v14504_v9, %v8066_v21 }
 0xc4b   : > { %v7968_v57 = vpop.f32.mrf.mxu3 }
 0xc4c   : > { %v14508_v26 = vpop.f32.mrf.mxu1 }
 0xc4d   : > { %v14494_v48 = vpop.f32.mrf.mxu2 }
 0xc52   : > { %v14512_v6 = vpop.f32.mrf.mxu0 }
 0xc53   : > { %v14510_v54 = vpop.f32.mrf.mxu3 }
 0xc54   : > { %v14514_v59 = vpop.f32.mrf.mxu1 }
 0xc55   : > { %v14496_v22 = vpop.f32.mrf.mxu2 }
 0xc5a   : > { %9588 = vmatmul.msk.bf16.gmra.mxu2 %vm327_vm0, %v8382_v56  ;;  %v14518_v19 = vpop.f32.mrf.mxu0 }
 0xc5b   : > { %v14516_v40 = vpop.f32.mrf.mxu3 }
 0xc5c   : > { %v14520_v36 = vpop.f32.mrf.mxu1 }
 0xc5d   : > { %v14500_v7 = vpop.f32.mrf.mxu2 }
 0xc62   : > { %v14526_v13 = vpop.f32.mrf.mxu0 }
 0xc63   : > { %v14522_v3 = vpop.f32.mrf.mxu3 }
 0xc64   : > { %v14528_v34 = vpop.f32.mrf.mxu1 }
 0xc65   : > { %v14502_v5 = vpop.f32.mrf.mxu2 }
 0xc6a   : > { %v8301_v10 = vpop.f32.mrf.mxu0 }
 0xc6b   : > { %v8248_v33 = vpop.f32.mrf.mxu3 }
 0xc6c   : > { %v8354_v0 = vpop.f32.mrf.mxu1 }
 0xc6d   : > { %v8179_v12 = vpop.f32.mrf.mxu2 }
 0xc6e   : > { %v8199_v28 = vadd.f32 %v8179_v12, %v8128_v44  ;;  %v8463_v44 = vpop.permute.xlu2 %8462 }
 0xc70   : > { %v8268_v29 = vadd.f32 %v8248_v33, %v8199_v28 }
 0xc72   : > { %v8303_v27 = vpop.f32.mrf.mxu0  ;;  %v8321_v32 = vadd.f32 %v8301_v10, %v8268_v29  ;;  %v7969_v10 = vadd.f32 %v7968_v57, %v14494_v48 }
 0xc73   : > { %v8250_v45 = vpop.f32.mrf.mxu3 }
 0xc74   : > { %v8356_v38 = vpop.f32.mrf.mxu1  ;;  %v8374_v25 = vadd.f32 %v8354_v0, %v8321_v32  ;;  %v8067_v0 = vadd.f32 %v14506_v1, %v7969_v10 }
 0xc75   : > { %v8181_v11 = vpop.f32.mrf.mxu2 }
 0xc76   : > { %v8200_v62 = vadd.f32 %v8181_v11, %v8129_v43  ;;  %v8132_v29 = vadd.f32 %v14508_v26, %v8067_v0  ;;  %v7974_v26 = vadd.f32 %v14516_v40, %v14500_v7  ;;  %v8469_v10 = vpop.permute.xlu2 %8468 }
 0xc78   : > { %v8269_v15 = vadd.f32 %v8250_v45, %v8200_v62 }
 0xc7a   : > { %v8306_v51 = vpop.f32.mrf.mxu0  ;;  %v8322_v8 = vadd.f32 %v8303_v27, %v8269_v15  ;;  %v7971_v27 = vadd.f32 %v14510_v54, %v14496_v22 }
 0xc7b   : > { %v8253_v17 = vpop.f32.mrf.mxu3 }
 0xc7c   : > { %v8359_v46 = vpop.f32.mrf.mxu1  ;;  %v8375_v33 = vadd.f32 %v8356_v38, %v8322_v8  ;;  %v8068_v62 = vadd.f32 %v14512_v6, %v7971_v27 }
 0xc7d   : > { %v8184_v50 = vpop.f32.mrf.mxu2 }
 0xc7e   : > { %v8201_v30 = vadd.f32 %v8184_v50, %v8130_v47 }
 0xc80   : > { %v8270_v12 = vadd.f32 %v8253_v17, %v8201_v30  ;;  %v8465_v17 = vpop.permute.xlu0 %8464 }
 0xc82   : > { %v8308_v35 = vpop.f32.mrf.mxu0  ;;  %v8323_v20 = vadd.f32 %v8306_v51, %v8270_v12  ;;  %v8133_v51 = vadd.f32 %v14514_v59, %v8068_v62  ;;  %v7976_v59 = vadd.f32 %v14522_v3, %v14502_v5 }
 0xc83   : > { %v8255_v4 = vpop.f32.mrf.mxu3 }
 0xc84   : > { %v8361_v45 = vpop.f32.mrf.mxu1  ;;  %v8376_v9 = vadd.f32 %v8359_v46, %v8323_v20 }
 0xc85   : > { %v8186_v24 = vpop.f32.mrf.mxu2 }
 0xc86   : > { %v8202_v52 = vadd.f32 %v8186_v24, %v8131_v14 }
 0xc88   : > { %v8271_v48 = vadd.f32 %v8255_v4, %v8202_v52 }
 0xc8a   : > { %v8324_v43 = vadd.f32 %v8308_v35, %v8271_v48  ;;  %v8311_v38 = vpop.f32.mrf.mxu0 }
 0xc8b   : > { %v8258_v28 = vpop.f32.mrf.mxu3 }
 0xc8c   : > { %v8364_v22 = vpop.f32.mrf.mxu1 }
 0xc8d   : > { %v14524_v23 = vpop.f32.mrf.mxu2 }
 0xc8e   : > { %v8203_v18 = vadd.f32 %v14524_v23, %v8132_v29 }
 0xc90   : > { %v8272_v49 = vadd.f32 %v8258_v28, %v8203_v18 }
 0xc92   : > { %v8325_v47 = vadd.f32 %v8311_v38, %v8272_v49  ;;  %v8313_v8 = vpop.f32.mrf.mxu0 }
 0xc94   : > { %v8378_v7 = vadd.f32 %v8364_v22, %v8325_v47 }
 0xc95   : > { %v14530_v31 = vpop.f32.mrf.mxu2 }
 0xc96   : > { %v8204_v60 = vadd.f32 %v14530_v31, %v8133_v51 }
 0xc9a   : > { %v8316_v3 = vpop.f32.mrf.mxu0 }
 0xc9d   : > { %v14532_v58 = vpop.f32.mrf.mxu2 }
 0xca2   : > { %v8318_v28 = vpop.f32.mrf.mxu0 }
 0xca5   : > { %v14534_v16 = vpop.f32.mrf.mxu2 }
 0xcad   : > { %v8407_v2 = vpop.f32.mrf.mxu2 }
 0xcae   : > { %v8427_v55 = vadd.f32 %v8407_v2, %v8374_v25  ;;  %v8377_v25 = vadd.f32 %v8361_v45, %v8324_v43  ;;  %v8260_v2 = vpop.f32.mrf.mxu3 }
 0xcaf   : > { %v8273_v46 = vadd.f32 %v8260_v2, %v8204_v60 }
 0xcb0   : > { %v8436_v63 = vadd.f32 %v14539_v41, %v8427_v55  ;;  %v8069_v55 = vadd.f32 %v14518_v19, %v7974_v26 }
 0xcb1   : > { %v8326_v12 = vadd.f32 %v8313_v8, %v8273_v46 }
 0xcb2   : > { %v8444_v56 = vmax.f32 %v8436_v63, 0.0  ;;  %v8467_v63 = vpop.permute.xlu1 %8466 }
 0xcb4   : > { %v8484_v11 = vadd.f32 %v8461_v42, %v8444_v56  ;;  %v8134_v56 = vadd.f32 %v14520_v36, %v8069_v55  ;;  %v8366_v42 = vpop.f32.mrf.mxu1 }
 0xcb5   : > { %v8409_v39 = vpop.f32.mrf.mxu2  ;;  %v8379_v5 = vadd.f32 %v8366_v42, %v8326_v12 }
 0xcb6   : > { %8492 = vst.msk [vmem:[%s14548_s27] sm:$0xff] %vm327_vm0, %v8484_v11  ;;  %v8428_v53 = vadd.f32 %v8409_v39, %v8375_v33  ;;  %v8205_v4 = vadd.f32 %v14532_v58, %v8134_v56  ;;  %v8263_v11 = vpop.f32.mrf.mxu3  ;;  %v8070_v33 = vadd.f32 %v14526_v13, %v7976_v59 }
 0xcb8   : > { %v8437_v50 = vadd.f32 %v14539_v41, %v8428_v53  ;;  %v8274_v14 = vadd.f32 %v8263_v11, %v8205_v4  ;;  %v8135_v35 = vadd.f32 %v14528_v34, %v8070_v33 }
 0xcba   : > { %v8445_v37 = vmax.f32 %v8437_v50, 0.0  ;;  %v8206_v58 = vadd.f32 %v14534_v16, %v8135_v35  ;;  %v8327_v20 = vadd.f32 %v8316_v3, %v8274_v14  ;;  %v8473_v29 = vpop.permute.xlu1 %8472 }
 0xcbc   : > { %v8485_v57 = vadd.f32 %v8463_v44, %v8445_v37  ;;  %v8369_v13 = vpop.f32.mrf.mxu1  ;;  %v8471_v37 = vpop.permute.xlu0 %8470 }
 0xcbd   : > { %v8412_v61 = vpop.f32.mrf.mxu2 }
 0xcbe   : > { %8493 = vst.msk [vmem:[%s14548_s27 + $0x8] sm:$0xff] %vm327_vm0, %v8485_v57  ;;  %v8429_v24 = vadd.f32 %v8412_v61, %v8376_v9  ;;  %v8265_v44 = vpop.f32.mrf.mxu3  ;;  %v8380_v57 = vadd.f32 %v8369_v13, %v8327_v20 }
 0xcbf   : > { %v8275_v45 = vadd.f32 %v8265_v44, %v8206_v58 }
 0xcc0   : > { %v8438_v1 = vadd.f32 %v14539_v41, %v8429_v24 }
 0xcc1   : > { %v8328_v61 = vadd.f32 %v8318_v28, %v8275_v45 }
 0xcc2   : > { %v8446_v32 = vmax.f32 %v8438_v1, 0.0 }
 0xcc4   : > { %v8486_v15 = vadd.f32 %v8465_v17, %v8446_v32  ;;  %v8371_v24 = vpop.f32.mrf.mxu1  ;;  %v8475_v17 = vpop.permute.xlu2 %8474 }
 0xcc5   : > { %v8414_v54 = vpop.f32.mrf.mxu2  ;;  %v8381_v1 = vadd.f32 %v8371_v24, %v8328_v61 }
 0xcc6   : > { %8494 = vst.msk [vmem:[%s14548_s27 + $0x10] sm:$0xff] %vm327_vm0, %v8486_v15  ;;  %v8430_v23 = vadd.f32 %v8414_v54, %v8377_v25 }
 0xcc8   : > { %v8439_v6 = vadd.f32 %v14539_v41, %v8430_v23 }
 0xcca   : > { %v8447_v30 = vmax.f32 %v8439_v6, 0.0 }
 0xccc   : > { %v8487_v21 = vadd.f32 %v8467_v63, %v8447_v30 }
 0xccd   : > { %v8417_v40 = vpop.f32.mrf.mxu2 }
 0xcce   : > { %8495 = vst.msk [vmem:[%s14548_s27 + $0x18] sm:$0xff] %vm327_vm0, %v8487_v21  ;;  %v8431_v31 = vadd.f32 %v8417_v40, %v8378_v7 }
 0xcd0   : > { %v8440_v19 = vadd.f32 %v14539_v41, %v8431_v31 }
 0xcd2   : > { %v8448_v39 = vmax.f32 %v8440_v19, 0.0 }
 0xcd4   : > { %v8488_v53 = vadd.f32 %v8469_v10, %v8448_v39 }
 0xcd5   : > { %v8419_v36 = vpop.f32.mrf.mxu2 }
 0xcd6   : > { %8496 = vst.msk [vmem:[%s14548_s27 + $0x20] sm:$0xff] %vm327_vm0, %v8488_v53  ;;  %v8432_v52 = vadd.f32 %v8419_v36, %v8379_v5 }
 0xcd8   : > { %v8441_v50 = vadd.f32 %v14539_v41, %v8432_v52 }
 0xcda   : > { %v8449_v0 = vmax.f32 %v8441_v50, 0.0 }
 0xcdc   : > { %v8489_v48 = vadd.f32 %v8471_v37, %v8449_v0 }
 0xcdd   : > { %v8422_v9 = vpop.f32.mrf.mxu2 }
 0xcde   : > { %8497 = vst.msk [vmem:[%s14548_s27 + $0x28] sm:$0xff] %vm327_vm0, %v8489_v48  ;;  %v8433_v34 = vadd.f32 %v8422_v9, %v8380_v57 }
 0xce0   : > { %v8442_v16 = vadd.f32 %v14539_v41, %v8433_v34 }
 0xce2   : > { %v8450_v27 = vmax.f32 %v8442_v16, 0.0 }
 0xce4   : > { %v8490_v18 = vadd.f32 %v8473_v29, %v8450_v27 }
 0xce5   : > { %v8424_v43 = vpop.f32.mrf.mxu2 }
 0xce6   : > { %8498 = vst.msk [vmem:[%s14548_s27 + $0x30] sm:$0xff] %vm327_vm0, %v8490_v18  ;;  %v8434_v38 = vadd.f32 %v8424_v43, %v8381_v1 }
 0xce8   : > { %v8443_v62 = vadd.f32 %v14539_v41, %v8434_v38 }
 0xcea   : > { %v8451_v32 = vmax.f32 %v8443_v62, 0.0 }
 0xcec   : > { %v8491_v49 = vadd.f32 %v8475_v17, %v8451_v32 }
 0xcee   : > { %8499 = vst.msk [vmem:[%s14548_s27 + $0x38] sm:$0xff] %vm327_vm0, %v8491_v49 }
 0xcef   : > { %9803 = shalt.err (!%p9800_p3)
}
 0xcf0   : > { %s9846_s20 = smov 128   ;;  %s9847_s22 = smov 8  }
 0xcf1   : > { %9720 = dma.vmem_to_hbm [thread:$0]  (%p9911_p5), %s8514_s6, 1024, %s8516_s7, %s8501_s19, %s9846_s20, %s9846_s20, %s9847_s22  }
 0xcf2 PF: > { %p9726_p4 = scmp.ge.s32.totalorder %s9838_s18, 2  ;;  %s8530_s23 = sand.u32 1, %s9826_s15  }
 0xcf3   : > { %s8531_s27 = scalar_lea.sflag [#allocation3], %s8530_s23 }
 0xcf4   : > { %p9723_p7 = pnand %p9726_p4, %p9915_p6 }
 0xcf6   : > { %p9724_p8 = pneg %p9723_p7 }
 0xcf8   : > { %9821 = dma.done.wait (%p9724_p8), %s8531_s27, 1024  }
 0xcf9   : > { %9823 = vsyncadd (%p9724_p8), %s8531_s27, 4294966272  ;;  %p14_p9 = scmp.ge.s32.totalorder %s9898_s21, 4   ;;  %s15221_s15 = smov %s9830_s16 }
 0xcfa   : > { %s15222_s16 = smov %s9834_s17  ;;  %s15223_s17 = smov %s9909_s24 }
 0xcfb   : > { %s15224_s18 = smov %s9898_s21  ;;  %16 = sbr.rel (!%p14_p9) target bundleno = 3 (0x3), region = 71 }
 0xd00   :  { %8537 = vsyncpa [#allocation3], 1 }
 0xd01   :  { %8539 = vsyncpa [#allocation3 + $0x1], 1 }

</bundles_post_ra>
